<compile_context>
chip_gen: v7x
topology: tpu7x:2x2x1
jax: 0.10.0
libtpu: 0.0.40
codegen_flags: <defaults>
</compile_context>

<pallas_src>
import functools

import jax
import jax.numpy as jnp
from jax import lax
from jax.experimental import pallas as pl
from jax.experimental.pallas import tpu as pltpu

HIDDEN = 1024   # fixed by GCN.__init__ (conv1: dim_sim -> 1024)
LANE = 128


def _round_up(x, m):
    return (x + m - 1) // m * m


def _vmem_budget_bytes():
    """Generation-aware usable VMEM: ~3/4 of physical (96 MiB v5e/v6e, 48 MiB v7x)."""
    cap = 64 << 20
    try:
        info = pltpu.get_tpu_info()
        cap = int(getattr(info, "vmem_capacity_bytes", cap) or cap)
    except Exception:
        pass
    return max(32 << 20, min((cap * 3) // 4, 112 << 20))


def _choose_tiles(n):
    """Decoupled (tile_m, tile_k). Big tiles amortize per-step overhead (measured:
    512-tiles ~85% of HBM roofline vs ~63% for 256-tiles)."""
    if n <= 256:
        return 128, 128
    if n <= 1024:
        return 256, 256
    return 512, 512


# --------- kernel 1: HW2 = relu(A @ XW1 + b1) @ W2 (fused conv2 projection) ----------
def conv1_proj_kernel(a_ref, xw1_ref, w2_ref, b1_ref, hw2_ref, acc_ref,
                      *, tile_k, xw1_resident):
    k = pl.program_id(1)

    @pl.when(k == 0)
    def _():
        acc_ref[...] = jnp.zeros_like(acc_ref)

    if xw1_resident:
        # XW1 is VMEM-resident (fetched once); slice the k-th reduction chunk.
        start = pl.multiple_of(k * tile_k, tile_k)
        xw1 = xw1_ref[pl.ds(start, tile_k), :]
    else:
        xw1 = xw1_ref[...]

    # MXU accumulate: bf16 inputs, f32 accumulation.
    acc_ref[...] += jnp.dot(a_ref[...], xw1, preferred_element_type=jnp.float32)

    @pl.when(k == pl.num_programs(1) - 1)
    def _():
        # bias + relu in f32 once per row tile, then fused conv2 projection so the
        # stored tile is lane-dense (out_pad columns).
        h1 = jnp.maximum(acc_ref[...] + b1_ref[...], 0.0)
        hw2 = jnp.dot(h1.astype(jnp.bfloat16), w2_ref[...],
                      preferred_element_type=jnp.float32)
        hw2_ref[...] = hw2.astype(hw2_ref.dtype)


# --------- kernel 2: OUT = A @ HW2 + b2 -----------------------------------------------
def conv2_agg_kernel(a_ref, hw2_ref, b2_ref, out_ref, acc_ref,
                     *, tile_k, hw2_resident):
    k = pl.program_id(1)

    @pl.when(k == 0)
    def _():
        acc_ref[...] = jnp.zeros_like(acc_ref)

    if hw2_resident:
        start = pl.multiple_of(k * tile_k, tile_k)
        hw2 = hw2_ref[pl.ds(start, tile_k), :]
    else:
        hw2 = hw2_ref[...]

    acc_ref[...] += jnp.dot(a_ref[...], hw2, preferred_element_type=jnp.float32)

    @pl.when(k == pl.num_programs(1) - 1)
    def _():
        out_ref[...] = acc_ref[...] + b2_ref[...]


def normalized_adjacency_padded(edge_index, num_nodes, n_pad, dtype):
    """Dense gcn_norm adjacency (self-loops, symmetric norm), built already padded to
    n_pad and cast to the kernel dtype (no separate pad/cast HBM pass)."""
    src, dst = edge_index[0], edge_index[1]
    a = jnp.zeros((n_pad, n_pad), jnp.float32)
    a = a.at[dst, src].add(1.0)                       # message j (src) -> i (dst)
    valid = (jnp.arange(n_pad) < num_nodes).astype(jnp.float32)
    a = a + jnp.diag(valid)                           # self-loops on real nodes only
    deg = a.sum(axis=1)
    d_inv_sqrt = jnp.where(deg > 0, lax.rsqrt(deg), 0.0)
    return (d_inv_sqrt[:, None] * a * d_inv_sqrt[None, :]).astype(dtype)


@functools.partial(
    jax.jit,
    static_argnames=("tile_m", "tile_k", "n_pad", "out_pad",
                     "xw1_res", "hw2_res", "vmem_limit"))
def _gcn_forward_impl(x, edge_index, w1, b1, w2, b2, *, tile_m, tile_k, n_pad,
                      out_pad, xw1_res, hw2_res, vmem_limit):
    n = x.shape[0]
    hidden = w1.shape[1]
    out_dim = w2.shape[1]

    # ---- JAX-side prep (fused by XLA inside this jit) --------------------------------
    a_p = normalized_adjacency_padded(edge_index, n, n_pad, jnp.bfloat16)
    xw1 = x.astype(jnp.float32) @ w1.astype(jnp.float32)              # tiny K matmul
    xw1 = jnp.pad(xw1, ((0, n_pad - n), (0, 0))).astype(jnp.bfloat16)
    w2_p = jnp.pad(w2, ((0, 0), (0, out_pad - out_dim))).astype(jnp.bfloat16)
    b1_p = b1.reshape(1, hidden).astype(jnp.float32)
    b2_p = jnp.pad(b2, (0, out_pad - out_dim)).reshape(1, out_pad).astype(jnp.float32)

    grid = (n_pad // tile_m, n_pad // tile_k)
    cparams = pltpu.CompilerParams(
        dimension_semantics=("parallel", "arbitrary"),
        vmem_limit_bytes=vmem_limit,
    )

    xw1_spec = (pl.BlockSpec((n_pad, hidden), lambda i, k: (0, 0)) if xw1_res
                else pl.BlockSpec((tile_k, hidden), lambda i, k: (k, 0)))
    hw2_spec = (pl.BlockSpec((n_pad, out_pad), lambda i, k: (0, 0)) if hw2_res
                else pl.BlockSpec((tile_k, out_pad), lambda i, k: (k, 0)))

    # ---- stage 1: HW2[i] = relu(sum_k A[i,k] @ XW1[k] + b1) @ W2 ---------------------
    hw2 = pl.pallas_call(
        functools.partial(conv1_proj_kernel, tile_k=tile_k, xw1_resident=xw1_res),
        out_shape=jax.ShapeDtypeStruct((n_pad, out_pad), jnp.bfloat16),
        grid_spec=pltpu.PrefetchScalarGridSpec(
            num_scalar_prefetch=0,
            grid=grid,
            in_specs=[
                pl.BlockSpec((tile_m, tile_k), lambda i, k: (i, k)),      # A tile
                xw1_spec,                                                 # XW1
                pl.BlockSpec((hidden, out_pad), lambda i, k: (0, 0)),     # W2 (resident)
                pl.BlockSpec((1, hidden), lambda i, k: (0, 0)),           # b1 (resident)
            ],
            out_specs=pl.BlockSpec((tile_m, out_pad), lambda i, k: (i, 0)),
            scratch_shapes=[pltpu.VMEM((tile_m, hidden), jnp.float32)],
        ),
        compiler_params=cparams,
        cost_estimate=pl.CostEstimate(
            flops=2 * n_pad * n_pad * hidden + 2 * n_pad * hidden * out_pad,
            transcendentals=0,
            bytes_accessed=(a_p.size * 2
                            + xw1.size * 2 * (1 if xw1_res else grid[0])
                            + w2_p.size * 2 + n_pad * out_pad * 2),
        ),
    )(a_p, xw1, w2_p, b1_p)

    # ---- stage 2: OUT[i] = sum_k A[i,k] @ HW2[k] + b2 --------------------------------
    out = pl.pallas_call(
        functools.partial(conv2_agg_kernel, tile_k=tile_k, hw2_resident=hw2_res),
        out_shape=jax.ShapeDtypeStruct((n_pad, out_pad), jnp.float32),
        grid_spec=pltpu.PrefetchScalarGridSpec(
            num_scalar_prefetch=0,
            grid=grid,
            in_specs=[
                pl.BlockSpec((tile_m, tile_k), lambda i, k: (i, k)),      # A tile
                hw2_spec,                                                 # HW2
                pl.BlockSpec((1, out_pad), lambda i, k: (0, 0)),          # b2 (resident)
            ],
            out_specs=pl.BlockSpec((tile_m, out_pad), lambda i, k: (i, 0)),
            scratch_shapes=[pltpu.VMEM((tile_m, out_pad), jnp.float32)],
        ),
        compiler_params=cparams,
        cost_estimate=pl.CostEstimate(
            flops=2 * n_pad * n_pad * out_pad,
            transcendentals=0,
            bytes_accessed=(a_p.size * 2
                            + n_pad * out_pad * 2 * (1 if hw2_res else grid[0])
                            + n_pad * out_pad * 4),
        ),
    )(a_p, hw2, b2_p)

    return out[:n, :out_dim]


def gcn_forward(x, edge_index, w1, b1, w2, b2):
    n = x.shape[0]
    hidden = w1.shape[1]
    out_dim = w2.shape[1]

    budget = _vmem_budget_bytes()
    tile_m, tile_k = _choose_tiles(n)
    t = max(tile_m, tile_k)
    n_pad = _round_up(max(n, t), t)
    out_pad = _round_up(out_dim, LANE)

    bf16 = 2
    # Conservative VMEM estimates (resident operands counted double-buffered).
    fixed1 = (2 * tile_m * tile_k * bf16            # A double buffer
              + 2 * hidden * out_pad * bf16         # W2
              + 2 * tile_m * out_pad * bf16         # HW2 output tile
              + tile_m * hidden * 4                 # f32 accumulator
              + 2 * hidden * 4)                     # b1
    xw1_res = (fixed1 + 2 * n_pad * hidden * bf16) <= budget

    fixed2 = (2 * tile_m * tile_k * bf16            # A double buffer
              + 2 * tile_m * out_pad * 4            # output tile (f32)
              + tile_m * out_pad * 4                # f32 accumulator
              + 2 * out_pad * 4)                    # b2
    hw2_res = (fixed2 + 2 * n_pad * out_pad * bf16) <= budget

    return _gcn_forward_impl(
        x, edge_index, w1, b1, w2, b2,
        tile_m=tile_m, tile_k=tile_k, n_pad=n_pad, out_pad=out_pad,
        xw1_res=xw1_res, hw2_res=hw2_res, vmem_limit=budget)


def glorot(key, shape):
    fan_in, fan_out = shape
    limit = jnp.sqrt(6.0 / (fan_in + fan_out))
    return jax.random.uniform(key, shape, jnp.float32, -limit, limit)


if __name__ == "__main__":
    # Small but module-consistent shapes (hidden dim fixed at 1024 by GCN.__init__).
    # N=512 gives a real (2, 2) grid (parallel rows, k-accumulation) with 256-tiles,
    # and exercises the VMEM-resident XW1 / HW2 fast path.
    N = 512         # number of graph nodes
    DIM_SIM = 32    # input feature dim
    OUT_DIM = 64    # conv2 output dim

    key = jax.random.PRNGKey(0)
    kx, kw1, kw2 = jax.random.split(key, 3)

    # Node features.
    x = jax.random.normal(kx, (N, DIM_SIM), jnp.float32)

    # Deterministic edge_index [2, E]: edges i -> (i+off) % N, no self-loops, no dups.
    offsets = jnp.array([1, 2, 5], dtype=jnp.int32)
    src = jnp.tile(jnp.arange(N, dtype=jnp.int32), offsets.shape[0])
    dst = (src + jnp.repeat(offsets, N)) % N
    edge_index = jnp.stack([src, dst], axis=0)           # [2, 3N]

    # Parameters (glorot-uniform weights, zero biases, as in GCNConv defaults).
    w1 = glorot(kw1, (DIM_SIM, HIDDEN))
    b1 = jnp.zeros((HIDDEN,), jnp.float32)
    w2 = glorot(kw2, (HIDDEN, OUT_DIM))
    b2 = jnp.zeros((OUT_DIM,), jnp.float32)

    out = jax.block_until_ready(gcn_forward(x, edge_index, w1, b1, w2, b2))

    # Pure-JAX f32 reference (kernel uses bf16 MXU inputs -> looser tolerance).
    a_ref = jnp.zeros((N, N), jnp.float32).at[dst, src].add(1.0) + jnp.eye(N)
    deg = a_ref.sum(axis=1)
    dis = jnp.where(deg > 0, 1.0 / jnp.sqrt(deg), 0.0)
    a_hat = dis[:, None] * a_ref * dis[None, :]
    ref_h1 = jnp.maximum(a_hat @ (x @ w1) + b1[None, :], 0.0)
    ref = a_hat @ (ref_h1 @ w2) + b2[None, :]

    assert out.shape == (N, OUT_DIM)
    max_err = jnp.max(jnp.abs(out - ref))
    assert jnp.allclose(out, ref, atol=3e-2, rtol=3e-2), f"max abs err {max_err}"

    print("KERNEL_OK")
</pallas_src>

<mosaic_0001>
module attributes {stable_mosaic.version = 11 : i64} {
  func.func private @main(%arg0: i32) attributes {dimension_semantics = [#tpu.dimension_semantics<core_parallel>], iteration_bounds = array<i64: 2>, tpu.core_type = #tpu.core_type<sc_scalar_subcore>, window_params = []} {
    return
  }
}

module attributes {stable_mosaic.version = 11 : i64} {
  func.func private @main(%arg0: i32) attributes {dimension_semantics = [#tpu.dimension_semantics<core_parallel>], iteration_bounds = array<i64: 2>, tpu.core_type = #tpu.core_type<sc_scalar_subcore>, window_params = []} {
    return
  }
}

module attributes {stable_mosaic.version = 11 : i64} {
  func.func @conv1_proj_kernel(%arg0: i32, %arg1: i32, %arg2: memref<256x256xbf16, #tpu.memory_space<vmem>>, %arg3: memref<512x1024xbf16, #tpu.memory_space<vmem>>, %arg4: memref<1024x128xbf16, #tpu.memory_space<vmem>>, %arg5: memref<1x1024xf32, #tpu.memory_space<vmem>>, %arg6: memref<256x128xbf16, #tpu.memory_space<vmem>>, %arg7: memref<256x1024xf32, #tpu.memory_space<vmem>>) attributes {dimension_semantics = [#tpu.dimension_semantics<parallel>, #tpu.dimension_semantics<arbitrary>], iteration_bounds = array<i64: 2, 2>, scalar_prefetch = 0 : i64, scratch_operands = 1 : i64, tpu.core_type = #tpu.core_type<tc>, window_params = [{transform_indices = @transform_0, window_bounds = array<i64: 256, 256>}, {pipeline_mode = #tpu.pipeline_mode<synchronous>, transform_indices = @transform_1, window_bounds = array<i64: 512, 1024>}, {pipeline_mode = #tpu.pipeline_mode<synchronous>, transform_indices = @transform_2, window_bounds = array<i64: 1024, 128>}, {pipeline_mode = #tpu.pipeline_mode<synchronous>, transform_indices = @transform_3, window_bounds = array<i64: 1, 1024>}, {transform_indices = @transform_4, window_bounds = array<i64: 256, 128>}]} {
    %c0_i32 = arith.constant 0 : i32
    %0 = arith.cmpi eq, %arg1, %c0_i32 : i32
    %1 = arith.extui %0 : i1 to i32
    %c0_i32_0 = arith.constant 0 : i32
    %2 = arith.cmpi ne, %1, %c0_i32_0 : i32
    scf.if %2 {
      %cst_8 = arith.constant 0.000000e+00 : f32
      %15 = vector.broadcast %cst_8 : f32 to vector<256x1024xf32>
      %c0_9 = arith.constant 0 : index
      %c0_10 = arith.constant 0 : index
      %16 = vector.load %arg7[%c0_9, %c0_10] : memref<256x1024xf32, #tpu.memory_space<vmem>>, vector<256x1024xf32>
      tpu.vector_store %arg7[%c0_9, %c0_10], %15 {strides = array<i32>} : memref<256x1024xf32, #tpu.memory_space<vmem>>, vector<256x1024xf32>,
    } else {
    }
    %c256_i32 = arith.constant 256 : i32
    %3 = arith.muli %arg1, %c256_i32 : i32
    %4 = tpu.assume_multiple %3, 256 : i32
    %5 = arith.index_cast %4 : i32 to index
    %c0 = arith.constant 0 : index
    %6 = vector.load %arg3[%5, %c0] : memref<512x1024xbf16, #tpu.memory_space<vmem>>, vector<256x1024xbf16>
    %c0_1 = arith.constant 0 : index
    %c0_2 = arith.constant 0 : index
    %7 = vector.load %arg7[%c0_1, %c0_2] : memref<256x1024xf32, #tpu.memory_space<vmem>>, vector<256x1024xf32>
    %c0_3 = arith.constant 0 : index
    %c0_4 = arith.constant 0 : index
    %8 = vector.load %arg2[%c0_3, %c0_4] : memref<256x256xbf16, #tpu.memory_space<vmem>>, vector<256x256xbf16>
    %cst = arith.constant dense<0.000000e+00> : vector<256x1024xf32>
    %9 = tpu.matmul %8, %6, %cst {dimension_numbers = #tpu.dot_dimension_numbers<[1], [0], [0], [1], [0, 0, 1, 1], [], []>} : vector<256x256xbf16>, vector<256x1024xbf16>, vector<256x1024xf32> -> vector<256x1024xf32>
    %10 = arith.addf %7, %9 : vector<256x1024xf32>
    %c0_5 = arith.constant 0 : index
    %c0_6 = arith.constant 0 : index
    %11 = vector.load %arg7[%c0_5, %c0_6] : memref<256x1024xf32, #tpu.memory_space<vmem>>, vector<256x1024xf32>
    tpu.vector_store %arg7[%c0_5, %c0_6], %10 {strides = array<i32>} : memref<256x1024xf32, #tpu.memory_space<vmem>>, vector<256x1024xf32>,
    %c1_i32 = arith.constant 1 : i32
    %12 = arith.cmpi eq, %arg1, %c1_i32 : i32
    %13 = arith.extui %12 : i1 to i32
    %c0_i32_7 = arith.constant 0 : i32
    %14 = arith.cmpi ne, %13, %c0_i32_7 : i32
    scf.if %14 {
      %c0_8 = arith.constant 0 : index
      %c0_9 = arith.constant 0 : index
      %15 = vector.load %arg7[%c0_8, %c0_9] : memref<256x1024xf32, #tpu.memory_space<vmem>>, vector<256x1024xf32>
      %c0_10 = arith.constant 0 : index
      %c0_11 = arith.constant 0 : index
      %16 = vector.load %arg5[%c0_10, %c0_11] : memref<1x1024xf32, #tpu.memory_space<vmem>>, vector<1x1024xf32>
      %17 = vector.broadcast %16 : vector<1x1024xf32> to vector<256x1024xf32>
      %18 = arith.addf %15, %17 : vector<256x1024xf32>
      %cst_12 = arith.constant 0.000000e+00 : f32
      %19 = vector.broadcast %cst_12 : f32 to vector<256x1024xf32>
      %20 = arith.maximumf %18, %19 : vector<256x1024xf32>
      %21 = arith.truncf %20 : vector<256x1024xf32> to vector<256x1024xbf16>
      %c0_13 = arith.constant 0 : index
      %c0_14 = arith.constant 0 : index
      %22 = vector.load %arg4[%c0_13, %c0_14] : memref<1024x128xbf16, #tpu.memory_space<vmem>>, vector<1024x128xbf16>
      %cst_15 = arith.constant dense<0.000000e+00> : vector<256x128xf32>
      %23 = tpu.matmul %21, %22, %cst_15 {dimension_numbers = #tpu.dot_dimension_numbers<[1], [0], [0], [1], [0, 0, 1, 1], [], []>} : vector<256x1024xbf16>, vector<1024x128xbf16>, vector<256x128xf32> -> vector<256x128xf32>
      %24 = arith.truncf %23 : vector<256x128xf32> to vector<256x128xbf16>
      %c0_16 = arith.constant 0 : index
      %c0_17 = arith.constant 0 : index
      %25 = vector.load %arg6[%c0_16, %c0_17] : memref<256x128xbf16, #tpu.memory_space<vmem>>, vector<256x128xbf16>
      tpu.vector_store %arg6[%c0_16, %c0_17], %24 {strides = array<i32>} : memref<256x128xbf16, #tpu.memory_space<vmem>>, vector<256x128xbf16>,
    } else {
    }
    return
  }
  func.func @transform_0(%arg0: i32, %arg1: i32) -> (i32, i32) {
    %c0_i32 = arith.constant 0 : i32
    return %arg0, %arg1 : i32, i32
  }
  func.func @transform_1(%arg0: i32, %arg1: i32) -> (i32, i32) {
    %c0_i32 = arith.constant 0 : i32
    %c0_i32_0 = arith.constant 0 : i32
    %c0_i32_1 = arith.constant 0 : i32
    return %c0_i32, %c0_i32_0 : i32, i32
  }
  func.func @transform_2(%arg0: i32, %arg1: i32) -> (i32, i32) {
    %c0_i32 = arith.constant 0 : i32
    %c0_i32_0 = arith.constant 0 : i32
    %c0_i32_1 = arith.constant 0 : i32
    return %c0_i32, %c0_i32_0 : i32, i32
  }
  func.func @transform_3(%arg0: i32, %arg1: i32) -> (i32, i32) {
    %c0_i32 = arith.constant 0 : i32
    %c0_i32_0 = arith.constant 0 : i32
    %c0_i32_1 = arith.constant 0 : i32
    return %c0_i32, %c0_i32_0 : i32, i32
  }
  func.func @transform_4(%arg0: i32, %arg1: i32) -> (i32, i32) {
    %c0_i32 = arith.constant 0 : i32
    %c0_i32_0 = arith.constant 0 : i32
    return %arg0, %c0_i32 : i32, i32
  }
}

module attributes {stable_mosaic.version = 11 : i64} {
  func.func @conv2_agg_kernel(%arg0: i32, %arg1: i32, %arg2: memref<256x256xbf16, #tpu.memory_space<vmem>>, %arg3: memref<512x128xbf16, #tpu.memory_space<vmem>>, %arg4: memref<1x128xf32, #tpu.memory_space<vmem>>, %arg5: memref<256x128xf32, #tpu.memory_space<vmem>>, %arg6: memref<256x128xf32, #tpu.memory_space<vmem>>) attributes {dimension_semantics = [#tpu.dimension_semantics<parallel>, #tpu.dimension_semantics<arbitrary>], iteration_bounds = array<i64: 2, 2>, scalar_prefetch = 0 : i64, scratch_operands = 1 : i64, tpu.core_type = #tpu.core_type<tc>, window_params = [{transform_indices = @transform_0, window_bounds = array<i64: 256, 256>}, {pipeline_mode = #tpu.pipeline_mode<synchronous>, transform_indices = @transform_1, window_bounds = array<i64: 512, 128>}, {pipeline_mode = #tpu.pipeline_mode<synchronous>, transform_indices = @transform_2, window_bounds = array<i64: 1, 128>}, {transform_indices = @transform_3, window_bounds = array<i64: 256, 128>}]} {
    %c0_i32 = arith.constant 0 : i32
    %0 = arith.cmpi eq, %arg1, %c0_i32 : i32
    %1 = arith.extui %0 : i1 to i32
    %c0_i32_0 = arith.constant 0 : i32
    %2 = arith.cmpi ne, %1, %c0_i32_0 : i32
    scf.if %2 {
      %cst_8 = arith.constant 0.000000e+00 : f32
      %15 = vector.broadcast %cst_8 : f32 to vector<256x128xf32>
      %c0_9 = arith.constant 0 : index
      %c0_10 = arith.constant 0 : index
      %16 = vector.load %arg6[%c0_9, %c0_10] : memref<256x128xf32, #tpu.memory_space<vmem>>, vector<256x128xf32>
      tpu.vector_store %arg6[%c0_9, %c0_10], %15 {strides = array<i32>} : memref<256x128xf32, #tpu.memory_space<vmem>>, vector<256x128xf32>,
    } else {
    }
    %c256_i32 = arith.constant 256 : i32
    %3 = arith.muli %arg1, %c256_i32 : i32
    %4 = tpu.assume_multiple %3, 256 : i32
    %5 = arith.index_cast %4 : i32 to index
    %c0 = arith.constant 0 : index
    %6 = vector.load %arg3[%5, %c0] : memref<512x128xbf16, #tpu.memory_space<vmem>>, vector<256x128xbf16>
    %c0_1 = arith.constant 0 : index
    %c0_2 = arith.constant 0 : index
    %7 = vector.load %arg6[%c0_1, %c0_2] : memref<256x128xf32, #tpu.memory_space<vmem>>, vector<256x128xf32>
    %c0_3 = arith.constant 0 : index
    %c0_4 = arith.constant 0 : index
    %8 = vector.load %arg2[%c0_3, %c0_4] : memref<256x256xbf16, #tpu.memory_space<vmem>>, vector<256x256xbf16>
    %cst = arith.constant dense<0.000000e+00> : vector<256x128xf32>
    %9 = tpu.matmul %8, %6, %cst {dimension_numbers = #tpu.dot_dimension_numbers<[1], [0], [0], [1], [0, 0, 1, 1], [], []>} : vector<256x256xbf16>, vector<256x128xbf16>, vector<256x128xf32> -> vector<256x128xf32>
    %10 = arith.addf %7, %9 : vector<256x128xf32>
    %c0_5 = arith.constant 0 : index
    %c0_6 = arith.constant 0 : index
    %11 = vector.load %arg6[%c0_5, %c0_6] : memref<256x128xf32, #tpu.memory_space<vmem>>, vector<256x128xf32>
    tpu.vector_store %arg6[%c0_5, %c0_6], %10 {strides = array<i32>} : memref<256x128xf32, #tpu.memory_space<vmem>>, vector<256x128xf32>,
    %c1_i32 = arith.constant 1 : i32
    %12 = arith.cmpi eq, %arg1, %c1_i32 : i32
    %13 = arith.extui %12 : i1 to i32
    %c0_i32_7 = arith.constant 0 : i32
    %14 = arith.cmpi ne, %13, %c0_i32_7 : i32
    scf.if %14 {
      %c0_8 = arith.constant 0 : index
      %c0_9 = arith.constant 0 : index
      %15 = vector.load %arg6[%c0_8, %c0_9] : memref<256x128xf32, #tpu.memory_space<vmem>>, vector<256x128xf32>
      %c0_10 = arith.constant 0 : index
      %c0_11 = arith.constant 0 : index
      %16 = vector.load %arg4[%c0_10, %c0_11] : memref<1x128xf32, #tpu.memory_space<vmem>>, vector<1x128xf32>
      %17 = vector.broadcast %16 : vector<1x128xf32> to vector<256x128xf32>
      %18 = arith.addf %15, %17 : vector<256x128xf32>
      %c0_12 = arith.constant 0 : index
      %c0_13 = arith.constant 0 : index
      %19 = vector.load %arg5[%c0_12, %c0_13] : memref<256x128xf32, #tpu.memory_space<vmem>>, vector<256x128xf32>
      tpu.vector_store %arg5[%c0_12, %c0_13], %18 {strides = array<i32>} : memref<256x128xf32, #tpu.memory_space<vmem>>, vector<256x128xf32>,
    } else {
    }
    return
  }
  func.func @transform_0(%arg0: i32, %arg1: i32) -> (i32, i32) {
    %c0_i32 = arith.constant 0 : i32
    return %arg0, %arg1 : i32, i32
  }
  func.func @transform_1(%arg0: i32, %arg1: i32) -> (i32, i32) {
    %c0_i32 = arith.constant 0 : i32
    %c0_i32_0 = arith.constant 0 : i32
    %c0_i32_1 = arith.constant 0 : i32
    return %c0_i32, %c0_i32_0 : i32, i32
  }
  func.func @transform_2(%arg0: i32, %arg1: i32) -> (i32, i32) {
    %c0_i32 = arith.constant 0 : i32
    %c0_i32_0 = arith.constant 0 : i32
    %c0_i32_1 = arith.constant 0 : i32
    return %c0_i32, %c0_i32_0 : i32, i32
  }
  func.func @transform_3(%arg0: i32, %arg1: i32) -> (i32, i32) {
    %c0_i32 = arith.constant 0 : i32
    %c0_i32_0 = arith.constant 0 : i32
    return %arg0, %c0_i32 : i32, i32
  }
}

</mosaic_0001>

<bundles_post_ra>
// kernel: _gcn_forward_impl.3
= control target key start
LH: loop header
LB: loop body
LE: loop exit
PB: predicated region body
PF: predicated region fallthrough
CT: control target
= control target key end

     0   :  { %s1550_s12 = smov 0   ;;  %s1552_s13 = smov 0   ;;  %s1835_s0 = inlined_call_operand.vmem [shape: bf16[512,512], index: 0, kind: input, shape index: {}]   ;;  %s1836_s1 = inlined_call_operand.vmem [shape: bf16[512,128], index: 1, kind: input, shape index: {}]   ;;  %s1837_s2 = inlined_call_operand.vmem [shape: f32[1,128], index: 2, kind: input, shape index: {}]   ;;  %s1838_s3 = inlined_call_operand.vmem [shape: f32[512,128], index: 3, kind: output, shape index: {}]  }
   0x1   :  { %s1554_s14 = smov 0   ;;  %s1556_s15 = smov 0  }
   0x2   :  { %s1558_s16 = smov 0   ;;  %s1560_s17 = smov 0  }
   0x3   :  { %s1562_s18 = smov 0  }
   0x4 LB: > { %s22_s19 = sadd.s32 1, %s1519_s16  ;;  %s25_s20 = sadd.s32 1, %s1523_s17  ;;  %s1527_s18 = sphi %s1562_s18, %s13_s18   ;;  %s1523_s17 = sphi %s1560_s17, %s1844_s17   ;;  %s1519_s16 = sphi %s1558_s16, %s1843_s16   ;;  %s1515_s15 = sphi %s1556_s15, %s1842_s15   ;;  %s1511_s14 = sphi %s1554_s14, %s1841_s14   ;;  %s1507_s13 = sphi %s1552_s13, %s1840_s13   ;;  %s1503_s12 = sphi %s1550_s12, %s1839_s12  }
   0x5   : > { %p23_p0 = scmp.ge.s32.totalorder %s22_s19, 2  ;;  %p41_p1 = scmp.ne.s32.totalorder %s1507_s13, %s1503_s12 }
   0x6   : > { %p42_p2 = scmp.eq.s32.totalorder %s1527_s18, 0  ;;  %s34_s24 = sadd.s32 1, %s1507_s13 }
   0x7   : > { %s1846_s19 = smov (%p23_p0, %s22_s19), 0  ;;  %s1848_s20 = smov (!%p23_p0, %s25_s20), %s1523_s17 }
   0x8   : > { %p43_p3 = por %p42_p2, %p41_p1  ;;  %p27_p4 = scmp.ge.s32.totalorder %s1848_s20, 2 }
   0x9   : > { %s30_s21 = ssub.s32 %s1519_s16, %s1846_s19  ;;  %p1158_p6 = scmp.ge.s32.totalorder %s1527_s18, 4 }
   0xa   : > { %s1850_s20 = smov (%p27_p4, %s1848_s20), 0 }
   0xb   : > { %s29_s22 = ssub.s32 %s1523_s17, %s1850_s20  ;;  %141 = sbr.rel (%p1158_p6) target bundleno = 41 (0x29), region = 24 }
   0xc   : > { %s31_s23 = sor.u32 %s30_s21, %s29_s22 }
   0xd   : > { %p32_p5 = scmp.eq.s32.totalorder %s31_s23, 0 }
   0xf   : > { %s1601_s25 = scalar_select %p32_p5, %s1507_s13, %s34_s24  }
  0x12   : > { %144 = sbr.rel (!%p43_p3) target bundleno = 41 (0x29), region = 28  ;;  %s146_s26 = sand.u32 (%p43_p3), 1, %s1507_s13  }
  0x13   : > { %s1161_s27 = sshll.u32 (%p43_p3), %s1519_s16, 1  ;;  %s1159_s28 = sshll.u32 (%p43_p3), %s146_s26, 8 }
  0x14   : > { %s1223_s29 = sshll.u32 (%p43_p3), %s1523_s17, 7  ;;  %s1615_s8 = scalar_lea.vmem (%p43_p3), [#allocation3], %s1159_s28 }
  0x15   : > { %s152_s30 = sadd.s32 (%p43_p3), %s1223_s29, %s1161_s27 }
  0x16   : > { %s1163_s4 = sshll.u32 (%p43_p3), %s152_s30, 2 }
  0x17   : > { %s1610_s7 = scalar_lea.vmem (%p43_p3), %s1835_s0, %s1163_s4 }
  0x18   : > { %v244_v0 = vld [vmem:[%s1610_s7] sm:$0xff] (%p43_p3)  ;;  %v246_v1 = vld [vmem:[%s1610_s7 + $0x10] sm:$0xff] (%p43_p3) }
  0x19   : > { %v248_v2 = vld [vmem:[%s1610_s7 + $0x20] sm:$0xff]  ;;  %245 = vst [vmem:[%s1615_s8] sm:$0xff] %v244_v0  ;;  %247 = vst [vmem:[%s1615_s8 + $0x8] sm:$0xff] %v246_v1  ;;  %v250_v3 = vld [vmem:[%s1610_s7 + $0x30] sm:$0xff] }
  0x1a   : > { %249 = vst [vmem:[%s1615_s8 + $0x10] sm:$0xff] %v248_v2  ;;  %v252_v4 = vld [vmem:[%s1610_s7 + $0x40] sm:$0xff]  ;;  %v254_v5 = vld [vmem:[%s1610_s7 + $0x50] sm:$0xff]  ;;  %251 = vst [vmem:[%s1615_s8 + $0x18] sm:$0xff] %v250_v3 }
  0x1b   : > { %253 = vst [vmem:[%s1615_s8 + $0x20] sm:$0xff] %v252_v4  ;;  %255 = vst [vmem:[%s1615_s8 + $0x28] sm:$0xff] %v254_v5  ;;  %v256_v6 = vld [vmem:[%s1610_s7 + $0x60] sm:$0xff]  ;;  %v258_v7 = vld [vmem:[%s1610_s7 + $0x70] sm:$0xff] }
  0x1c   : > { %v260_v8 = vld [vmem:[%s1610_s7 + $0x80] sm:$0xff]  ;;  %257 = vst [vmem:[%s1615_s8 + $0x30] sm:$0xff] %v256_v6  ;;  %259 = vst [vmem:[%s1615_s8 + $0x38] sm:$0xff] %v258_v7  ;;  %v262_v9 = vld [vmem:[%s1610_s7 + $0x90] sm:$0xff] }
  0x1d   : > { %261 = vst [vmem:[%s1615_s8 + $0x40] sm:$0xff] %v260_v8  ;;  %v264_v10 = vld [vmem:[%s1610_s7 + $0xa0] sm:$0xff]  ;;  %v266_v11 = vld [vmem:[%s1610_s7 + $0xb0] sm:$0xff]  ;;  %263 = vst [vmem:[%s1615_s8 + $0x48] sm:$0xff] %v262_v9 }
  0x1e   : > { %265 = vst [vmem:[%s1615_s8 + $0x50] sm:$0xff] %v264_v10  ;;  %267 = vst [vmem:[%s1615_s8 + $0x58] sm:$0xff] %v266_v11  ;;  %v268_v12 = vld [vmem:[%s1610_s7 + $0xc0] sm:$0xff]  ;;  %v270_v13 = vld [vmem:[%s1610_s7 + $0xd0] sm:$0xff] }
  0x1f   : > { %v272_v14 = vld [vmem:[%s1610_s7 + $0xe0] sm:$0xff]  ;;  %269 = vst [vmem:[%s1615_s8 + $0x60] sm:$0xff] %v268_v12  ;;  %271 = vst [vmem:[%s1615_s8 + $0x68] sm:$0xff] %v270_v13  ;;  %v274_v15 = vld [vmem:[%s1610_s7 + $0xf0] sm:$0xff] }
  0x20   : > { %273 = vst [vmem:[%s1615_s8 + $0x70] sm:$0xff] %v272_v14  ;;  %v276_v16 = vld [vmem:[%s1610_s7 + $0x100] sm:$0xff]  ;;  %v278_v17 = vld [vmem:[%s1610_s7 + $0x110] sm:$0xff]  ;;  %275 = vst [vmem:[%s1615_s8 + $0x78] sm:$0xff] %v274_v15 }
  0x21   : > { %277 = vst [vmem:[%s1615_s8 + $0x80] sm:$0xff] %v276_v16  ;;  %279 = vst [vmem:[%s1615_s8 + $0x88] sm:$0xff] %v278_v17  ;;  %v280_v18 = vld [vmem:[%s1610_s7 + $0x120] sm:$0xff]  ;;  %v282_v19 = vld [vmem:[%s1610_s7 + $0x130] sm:$0xff] }
  0x22   : > { %v284_v20 = vld [vmem:[%s1610_s7 + $0x140] sm:$0xff]  ;;  %281 = vst [vmem:[%s1615_s8 + $0x90] sm:$0xff] %v280_v18  ;;  %283 = vst [vmem:[%s1615_s8 + $0x98] sm:$0xff] %v282_v19  ;;  %v286_v21 = vld [vmem:[%s1610_s7 + $0x150] sm:$0xff] }
  0x23   : > { %285 = vst [vmem:[%s1615_s8 + $0xa0] sm:$0xff] %v284_v20  ;;  %v288_v22 = vld [vmem:[%s1610_s7 + $0x160] sm:$0xff]  ;;  %v290_v23 = vld [vmem:[%s1610_s7 + $0x170] sm:$0xff]  ;;  %287 = vst [vmem:[%s1615_s8 + $0xa8] sm:$0xff] %v286_v21 }
  0x24   : > { %289 = vst [vmem:[%s1615_s8 + $0xb0] sm:$0xff] %v288_v22  ;;  %291 = vst [vmem:[%s1615_s8 + $0xb8] sm:$0xff] %v290_v23  ;;  %v292_v24 = vld [vmem:[%s1610_s7 + $0x180] sm:$0xff]  ;;  %v294_v25 = vld [vmem:[%s1610_s7 + $0x190] sm:$0xff] }
  0x25   : > { %v296_v26 = vld [vmem:[%s1610_s7 + $0x1a0] sm:$0xff]  ;;  %293 = vst [vmem:[%s1615_s8 + $0xc0] sm:$0xff] %v292_v24  ;;  %295 = vst [vmem:[%s1615_s8 + $0xc8] sm:$0xff] %v294_v25  ;;  %v298_v27 = vld [vmem:[%s1610_s7 + $0x1b0] sm:$0xff] }
  0x26   : > { %297 = vst [vmem:[%s1615_s8 + $0xd0] sm:$0xff] %v296_v26  ;;  %v300_v28 = vld [vmem:[%s1610_s7 + $0x1c0] sm:$0xff]  ;;  %v302_v29 = vld [vmem:[%s1610_s7 + $0x1d0] sm:$0xff]  ;;  %299 = vst [vmem:[%s1615_s8 + $0xd8] sm:$0xff] %v298_v27 }
  0x27   : > { %301 = vst [vmem:[%s1615_s8 + $0xe0] sm:$0xff] %v300_v28  ;;  %303 = vst [vmem:[%s1615_s8 + $0xe8] sm:$0xff] %v302_v29  ;;  %v304_v30 = vld [vmem:[%s1610_s7 + $0x1e0] sm:$0xff]  ;;  %v306_v31 = vld [vmem:[%s1610_s7 + $0x1f0] sm:$0xff] }
  0x28   : > { %305 = vst [vmem:[%s1615_s8 + $0xf0] sm:$0xff] %v304_v30  ;;  %307 = vst [vmem:[%s1615_s8 + $0xf8] sm:$0xff] %v306_v31 }
  0x29 PF: > { %p1164_p7 = scmp.ge.s32.totalorder %s1527_s18, 1  ;;  %p312_p8 = scmp.lt.s32.totalorder %s1527_s18, 5 }
  0x2b   : > { %p313_p9 = pnand %p1164_p7, %p312_p8 }
  0x2c   : > { %s319_s9 = sand.u32 (!%p313_p9), 1, %s1503_s12   ;;  %s1166_s10 = sshll.u32 (!%p313_p9), %s1515_s15, 5 }
  0x2d   : > { %316 = sbr.rel (%p313_p9) target bundleno = 394 (0x18a), region = 66  ;;  %s1165_s11 = sshll.u32 (!%p313_p9), %s319_s9, 8 }
  0x2e   : > { %p345_p10 = scmp.lt.s32.totalorder (!%p313_p9), %s1166_s10, 63  ;;  %s1687_s26 = scalar_lea.vmem (!%p313_p9), [#allocation3], %s1165_s11 }
  0x2f   : > { %p1168_p11 = scmp.ne.s32.totalorder (!%p313_p9), %s1511_s14, 0 }
  0x34   : > { %s1852_s10 = smov (!%p345_p10, %s1166_s10), 63  ;;  %354 = sbr.rel (%p1168_p11) target bundleno = 70 (0x46), region = 74 }
  0x35   : > { %s1167_s21 = sshll.u32 %s1852_s10, 3  ;;  %v1529_v32 = vmov (!%p1168_p11), 0.0  }
  0x36   : > { %s1685_s24 = scalar_lea.vmem %s1838_s3, %s1167_s21  ;;  %355 = vst [vmem:[#allocation2] sm:$0xff] (!%p1168_p11), %v1529_v32  ;;  %356 = vst [vmem:[#allocation2 + $0x8] sm:$0xff] (!%p1168_p11), %v1529_v32 }
  0x37   : > { %357 = vst [vmem:[#allocation2 + $0x10] sm:$0xff] (!%p1168_p11), %v1529_v32  ;;  %358 = vst [vmem:[#allocation2 + $0x18] sm:$0xff] (!%p1168_p11), %v1529_v32 }
  0x38   : > { %359 = vst [vmem:[#allocation2 + $0x20] sm:$0xff] (!%p1168_p11), %v1529_v32  ;;  %360 = vst [vmem:[#allocation2 + $0x28] sm:$0xff] (!%p1168_p11), %v1529_v32 }
  0x39   : > { %361 = vst [vmem:[#allocation2 + $0x30] sm:$0xff] (!%p1168_p11), %v1529_v32  ;;  %362 = vst [vmem:[#allocation2 + $0x38] sm:$0xff] (!%p1168_p11), %v1529_v32 }
  0x3a   : > { %363 = vst [vmem:[#allocation2 + $0x40] sm:$0xff] (!%p1168_p11), %v1529_v32  ;;  %364 = vst [vmem:[#allocation2 + $0x48] sm:$0xff] (!%p1168_p11), %v1529_v32 }
  0x3b   : > { %365 = vst [vmem:[#allocation2 + $0x50] sm:$0xff] %v1529_v32  ;;  %366 = vst [vmem:[#allocation2 + $0x58] sm:$0xff] %v1529_v32 }
  0x3c   : > { %367 = vst [vmem:[#allocation2 + $0x60] sm:$0xff] %v1529_v32  ;;  %368 = vst [vmem:[#allocation2 + $0x68] sm:$0xff] %v1529_v32 }
  0x3d   : > { %369 = vst [vmem:[#allocation2 + $0x70] sm:$0xff] %v1529_v32  ;;  %370 = vst [vmem:[#allocation2 + $0x78] sm:$0xff] %v1529_v32 }
  0x3e   : > { %371 = vst [vmem:[#allocation2 + $0x80] sm:$0xff] %v1529_v32  ;;  %372 = vst [vmem:[#allocation2 + $0x88] sm:$0xff] %v1529_v32 }
  0x3f   : > { %373 = vst [vmem:[#allocation2 + $0x90] sm:$0xff] %v1529_v32  ;;  %374 = vst [vmem:[#allocation2 + $0x98] sm:$0xff] %v1529_v32 }
  0x40   : > { %375 = vst [vmem:[#allocation2 + $0xa0] sm:$0xff] %v1529_v32  ;;  %376 = vst [vmem:[#allocation2 + $0xa8] sm:$0xff] %v1529_v32 }
  0x41   : > { %377 = vst [vmem:[#allocation2 + $0xb0] sm:$0xff] %v1529_v32  ;;  %378 = vst [vmem:[#allocation2 + $0xb8] sm:$0xff] %v1529_v32 }
  0x42   : > { %379 = vst [vmem:[#allocation2 + $0xc0] sm:$0xff] %v1529_v32  ;;  %380 = vst [vmem:[#allocation2 + $0xc8] sm:$0xff] %v1529_v32 }
  0x43   : > { %381 = vst [vmem:[#allocation2 + $0xd0] sm:$0xff] %v1529_v32  ;;  %382 = vst [vmem:[#allocation2 + $0xd8] sm:$0xff] %v1529_v32 }
  0x44   : > { %383 = vst [vmem:[#allocation2 + $0xe0] sm:$0xff] %v1529_v32  ;;  %384 = vst [vmem:[#allocation2 + $0xe8] sm:$0xff] %v1529_v32 }
  0x45   : > { %385 = vst [vmem:[#allocation2 + $0xf0] sm:$0xff] %v1529_v32  ;;  %386 = vst [vmem:[#allocation2 + $0xf8] sm:$0xff] %v1529_v32 }
  0x46 PF: > { %s1169_s12 = sshll.u32 %s1511_s14, 8  ;;  %v1427_v33 = vld [vmem:[%s1687_s26 + $0x4] ss:$8 sps:$4 sm:$0xff]   ;;  %v1425_v51 = vld [vmem:[%s1687_s26] ss:$8 sps:$4 sm:$0xff]   ;;  %p1219_p12 = scmp.ne.s32.totalorder %s1511_s14, 1 }
  0x47   : > { %s388_s15 = sshra.s32 %s1169_s12, 3  ;;  %v1430_v34 = vld [vmem:[%s1687_s26 + $0x84] ss:$8 sps:$4 sm:$0xff]   ;;  %776 = vmatprep.mubr.bf16.mxu0 %v1427_v33  ;;  %v1428_v52 = vld [vmem:[%s1687_s26 + $0x80] ss:$8 sps:$4 sm:$0xff]  }
  0x48   : > { %s1170_s27 = sshll.u32 %s388_s15, 2  ;;  %840 = vmatprep.mubr.bf16.mxu1 %v1430_v34  ;;  %v1431_v53 = vld [vmem:[%s1687_s26 + $0x14] ss:$8 sps:$4 sm:$0xff]   ;;  %v1435_v55 = vld [vmem:[%s1687_s26 + $0x10] ss:$8 sps:$4 sm:$0xff]   ;;  %v424_v19 = vld [vmem:[#allocation2] sm:$0xff] }
  0x49   : > { %s1696_s30 = scalar_lea.vmem %s1836_s1, %s1170_s27  ;;  %v1433_v54 = vld [vmem:[%s1687_s26 + $0x94] ss:$8 sps:$4 sm:$0xff]   ;;  %v1436_v56 = vld [vmem:[%s1687_s26 + $0x90] ss:$8 sps:$4 sm:$0xff]   ;;  %v1437_v57 = vld [vmem:[%s1687_s26 + $0x24] ss:$8 sps:$4 sm:$0xff]  }
  0x4a   : > { %v1409_v35 = vld [vmem:[%s1696_s30 + $0x40] sm:$0xff]   ;;  %v1411_v37 = vld [vmem:[%s1696_s30 + $0x48] sm:$0xff]   ;;  %v1413_v39 = vld [vmem:[%s1696_s30 + $0x50] sm:$0xff]  }
  0x4b   : > { %v1410_v36 = vld [vmem:[%s1696_s30] sm:$0xff]   ;;  %1224 = vmatprep.subr.bf16.mxu0 %v1409_v35  ;;  %1336 = vmatprep.subr.bf16.mxu1 %v1409_v35  ;;  %v1412_v38 = vld [vmem:[%s1696_s30 + $0x8] sm:$0xff]   ;;  %v1414_v40 = vld [vmem:[%s1696_s30 + $0x10] sm:$0xff]  }
  0x4c   : > { %1225 = vmatpush3.bf16.msra.mxu0 %v1410_v36  ;;  %1344 = vmatpush3.bf16.msra.mxu1 %v1410_v36  ;;  %v1415_v41 = vld [vmem:[%s1696_s30 + $0x58] sm:$0xff]   ;;  %v1417_v43 = vld [vmem:[%s1696_s30 + $0x60] sm:$0xff]   ;;  %v1419_v45 = vld [vmem:[%s1696_s30 + $0x68] sm:$0xff]  }
  0x4d   : > { %1226 = vmatprep.subr.bf16.mxu0 %v1411_v37  ;;  %1337 = vmatprep.subr.bf16.mxu1 %v1411_v37  ;;  %v1416_v42 = vld [vmem:[%s1696_s30 + $0x18] sm:$0xff]   ;;  %v1418_v44 = vld [vmem:[%s1696_s30 + $0x20] sm:$0xff]   ;;  %v1420_v46 = vld [vmem:[%s1696_s30 + $0x28] sm:$0xff]  }
  0x4e   : > { %v1421_v47 = vld [vmem:[%s1696_s30 + $0x70] sm:$0xff]   ;;  %v1423_v49 = vld [vmem:[%s1696_s30 + $0x78] sm:$0xff]   ;;  %v1439_v58 = vld [vmem:[%s1687_s26 + $0xa4] ss:$8 sps:$4 sm:$0xff]  }
  0x4f   : > { %v1422_v48 = vld [vmem:[%s1696_s30 + $0x30] sm:$0xff]   ;;  %v1424_v50 = vld [vmem:[%s1696_s30 + $0x38] sm:$0xff]   ;;  %v1441_v59 = vld [vmem:[%s1687_s26 + $0x20] ss:$8 sps:$4 sm:$0xff]  }
  0x50   : > { %1227 = vmatpush3.bf16.msra.mxu0 %v1412_v38  ;;  %1345 = vmatpush3.bf16.msra.mxu1 %v1412_v38  ;;  %v1442_v60 = vld [vmem:[%s1687_s26 + $0xa0] ss:$8 sps:$4 sm:$0xff]   ;;  %v1443_v61 = vld [vmem:[%s1687_s26 + $0x34] ss:$8 sps:$4 sm:$0xff]   ;;  %v1447_v63 = vld [vmem:[%s1687_s26 + $0x30] ss:$8 sps:$4 sm:$0xff]  }
  0x51   : > { %1228 = vmatprep.subr.bf16.mxu0 %v1413_v39  ;;  %1338 = vmatprep.subr.bf16.mxu1 %v1413_v39  ;;  %v1445_v62 = vld [vmem:[%s1687_s26 + $0xb4] ss:$8 sps:$4 sm:$0xff]   ;;  %v1448_v0 = vld [vmem:[%s1687_s26 + $0xb0] ss:$8 sps:$4 sm:$0xff]   ;;  %v1449_v1 = vld [vmem:[%s1687_s26 + $0x44] ss:$8 sps:$4 sm:$0xff]  }
  0x52   : > { %v1451_v2 = vld [vmem:[%s1687_s26 + $0xc4] ss:$8 sps:$4 sm:$0xff]   ;;  %v1453_v3 = vld [vmem:[%s1687_s26 + $0x40] ss:$8 sps:$4 sm:$0xff]   ;;  %v1455_v5 = vld [vmem:[%s1687_s26 + $0x54] ss:$8 sps:$4 sm:$0xff]  }
  0x53   : > { %v1454_v4 = vld [vmem:[%s1687_s26 + $0xc0] ss:$8 sps:$4 sm:$0xff]   ;;  %v1457_v6 = vld [vmem:[%s1687_s26 + $0xd4] ss:$8 sps:$4 sm:$0xff]   ;;  %v1459_v7 = vld [vmem:[%s1687_s26 + $0x50] ss:$8 sps:$4 sm:$0xff]  }
  0x54   : > { %1229 = vmatpush3.bf16.msra.mxu0 %v1414_v40  ;;  %1346 = vmatpush3.bf16.msra.mxu1 %v1414_v40  ;;  %v1460_v8 = vld [vmem:[%s1687_s26 + $0xd0] ss:$8 sps:$4 sm:$0xff]   ;;  %v1461_v9 = vld [vmem:[%s1687_s26 + $0x64] ss:$8 sps:$4 sm:$0xff]   ;;  %v1465_v11 = vld [vmem:[%s1687_s26 + $0x60] ss:$8 sps:$4 sm:$0xff]  }
  0x55   : > { %1230 = vmatprep.subr.bf16.mxu0 %v1415_v41  ;;  %1339 = vmatprep.subr.bf16.mxu1 %v1415_v41  ;;  %v1463_v10 = vld [vmem:[%s1687_s26 + $0xe4] ss:$8 sps:$4 sm:$0xff]   ;;  %v1466_v12 = vld [vmem:[%s1687_s26 + $0xe0] ss:$8 sps:$4 sm:$0xff]   ;;  %v1467_v13 = vld [vmem:[%s1687_s26 + $0x74] ss:$8 sps:$4 sm:$0xff]  }
  0x56   : > { %v1469_v14 = vld [vmem:[%s1687_s26 + $0xf4] ss:$8 sps:$4 sm:$0xff]   ;;  %v1471_v15 = vld [vmem:[%s1687_s26 + $0x70] ss:$8 sps:$4 sm:$0xff]   ;;  %v440_v21 = vld [vmem:[#allocation2 + $0x80] sm:$0xff] }
  0x57   : > { %v1472_v16 = vld [vmem:[%s1687_s26 + $0xf0] ss:$8 sps:$4 sm:$0xff]   ;;  %v425_v27 = vld [vmem:[#allocation2 + $0x8] sm:$0xff] }
  0x58   : > { %1231 = vmatpush3.bf16.msra.mxu0 %v1416_v42  ;;  %1347 = vmatpush3.bf16.msra.mxu1 %v1416_v42  ;;  %v441_v29 = vld [vmem:[#allocation2 + $0x88] sm:$0xff]  ;;  %v426_v39 = vld [vmem:[#allocation2 + $0x10] sm:$0xff] }
  0x59   : > { %1232 = vmatprep.subr.bf16.mxu0 %v1417_v43  ;;  %1340 = vmatprep.subr.bf16.mxu1 %v1417_v43  ;;  %v442_v41 = vld [vmem:[#allocation2 + $0x90] sm:$0xff] }
  0x5c   : > { %1233 = vmatpush3.bf16.msra.mxu0 %v1418_v44  ;;  %1348 = vmatpush3.bf16.msra.mxu1 %v1418_v44 }
  0x5d   : > { %1234 = vmatprep.subr.bf16.mxu0 %v1419_v45  ;;  %1341 = vmatprep.subr.bf16.mxu1 %v1419_v45 }
  0x60   : > { %1235 = vmatpush3.bf16.msra.mxu0 %v1420_v46  ;;  %1349 = vmatpush3.bf16.msra.mxu1 %v1420_v46 }
  0x61   : > { %1236 = vmatprep.subr.bf16.mxu0 %v1421_v47  ;;  %1342 = vmatprep.subr.bf16.mxu1 %v1421_v47  ;;  %v427_v47 = vld [vmem:[#allocation2 + $0x18] sm:$0xff] }
  0x64   : > { %1237 = vmatpush3.bf16.msra.mxu0 %v1422_v48  ;;  %1350 = vmatpush3.bf16.msra.mxu1 %v1422_v48 }
  0x65   : > { %1238 = vmatprep.subr.bf16.mxu0 %v1423_v49  ;;  %1343 = vmatprep.subr.bf16.mxu1 %v1423_v49  ;;  %v443_v49 = vld [vmem:[#allocation2 + $0x98] sm:$0xff] }
  0x68   : > { %1239 = vmatpush3.bf16.msra.mxu0 %v1424_v50  ;;  %1351 = vmatpush3.bf16.msra.mxu1 %v1424_v50 }
  0x6b   : > { %777 = vmatmul.mubr.bf16.vlgmr.msra.gmra.mrb[0].mxu0 %v1425_v51  ;;  %841 = vmatmul.mubr.bf16.vlgmr.msra.gmra.mrb[0].mxu1 %v1428_v52 }
  0x6c   : > { %784 = vmatprep.mubr.bf16.mxu0 %v1431_v53  ;;  %848 = vmatprep.mubr.bf16.mxu1 %v1433_v54 }
  0x73   : > { %785 = vmatmul.mubr.bf16.gmra.mrb[4].mxu0 %v1435_v55  ;;  %849 = vmatmul.mubr.bf16.gmra.mrb[4].mxu1 %v1436_v56 }
  0x74   : > { %792 = vmatprep.mubr.bf16.mxu0 %v1437_v57  ;;  %856 = vmatprep.mubr.bf16.mxu1 %v1439_v58 }
  0x7b   : > { %793 = vmatmul.mubr.bf16.gmra.mrb[8].mxu0 %v1441_v59  ;;  %857 = vmatmul.mubr.bf16.gmra.mrb[8].mxu1 %v1442_v60  ;;  %v428_v59 = vld [vmem:[#allocation2 + $0x20] sm:$0xff] }
  0x7c   : > { %800 = vmatprep.mubr.bf16.mxu0 %v1443_v61  ;;  %864 = vmatprep.mubr.bf16.mxu1 %v1445_v62  ;;  %v444_v61 = vld [vmem:[#allocation2 + $0xa0] sm:$0xff] }
  0x83   : > { %801 = vmatmul.mubr.bf16.gmra.mrb[12].mxu0 %v1447_v63  ;;  %865 = vmatmul.mubr.bf16.gmra.mrb[12].mxu1 %v1448_v0 }
  0x84   : > { %808 = vmatprep.mubr.bf16.mxu0 %v1449_v1  ;;  %872 = vmatprep.mubr.bf16.mxu1 %v1451_v2 }
  0x8b   : > { %809 = vmatmul.mubr.bf16.gmra.mrb[16].mxu0 %v1453_v3  ;;  %873 = vmatmul.mubr.bf16.gmra.mrb[16].mxu1 %v1454_v4  ;;  %v429_v3 = vld [vmem:[#allocation2 + $0x28] sm:$0xff] }
  0x8c   : > { %816 = vmatprep.mubr.bf16.mxu0 %v1455_v5  ;;  %880 = vmatprep.mubr.bf16.mxu1 %v1457_v6  ;;  %v445_v5 = vld [vmem:[#allocation2 + $0xa8] sm:$0xff] }
  0x93   : > { %817 = vmatmul.mubr.bf16.gmra.mrb[20].mxu0 %v1459_v7  ;;  %881 = vmatmul.mubr.bf16.gmra.mrb[20].mxu1 %v1460_v8 }
  0x94   : > { %824 = vmatprep.mubr.bf16.mxu0 %v1461_v9  ;;  %888 = vmatprep.mubr.bf16.mxu1 %v1463_v10 }
  0x9b   : > { %825 = vmatmul.mubr.bf16.gmra.mrb[24].mxu0 %v1465_v11  ;;  %889 = vmatmul.mubr.bf16.gmra.mrb[24].mxu1 %v1466_v12 }
  0x9c   : > { %832 = vmatprep.mubr.bf16.mxu0 %v1467_v13  ;;  %896 = vmatprep.mubr.bf16.mxu1 %v1469_v14 }
  0xa3   : > { %833 = vmatmul.mubr.bf16.gmra.mrb[28].mxu0 %v1471_v15  ;;  %897 = vmatmul.mubr.bf16.gmra.mrb[28].mxu1 %v1472_v16  ;;  %v430_v15 = vld [vmem:[#allocation2 + $0x30] sm:$0xff] }
 0x13e   : > { %v1240_v17 = vpop.f32.mrb[0].mxu0  ;;  %v1288_v18 = vpop.f32.mrb[0].mxu1 }
 0x13f   : > { %v1241_v20 = vpop.f32.mrb[1].mxu0  ;;  %v1289_v22 = vpop.f32.mrb[1].mxu1 }
 0x140   : > { %v1242_v23 = vadd.f32 %v1241_v20, %v1240_v17  ;;  %v1290_v24 = vadd.f32 %v1289_v22, %v1288_v18  ;;  %v1243_v25 = vpop.f32.mrb[2].mxu0  ;;  %v1291_v26 = vpop.f32.mrb[2].mxu1  ;;  %v446_v17 = vld [vmem:[#allocation2 + $0xb0] sm:$0xff] }
 0x141   : > { %v1244_v28 = vpop.f32.mrb[3].mxu0  ;;  %v1292_v30 = vpop.f32.mrb[3].mxu1 }
 0x142   : > { %v905_v31 = vadd.f32 %v1242_v23, %v424_v19  ;;  %v921_v32 = vadd.f32 %v1290_v24, %v440_v21  ;;  %v1245_v33 = vadd.f32 %v1244_v28, %v1243_v25  ;;  %v1293_v34 = vadd.f32 %v1292_v30, %v1291_v26  ;;  %v431_v23 = vld [vmem:[#allocation2 + $0x38] sm:$0xff] }
 0x143   : > { %v447_v25 = vld [vmem:[#allocation2 + $0xb8] sm:$0xff] }
 0x144   : > { %937 = vst [vmem:[#allocation2] sm:$0xff] %v905_v31  ;;  %953 = vst [vmem:[#allocation2 + $0x80] sm:$0xff] %v921_v32  ;;  %v906_v35 = vadd.f32 %v1245_v33, %v425_v27  ;;  %v922_v36 = vadd.f32 %v1293_v34, %v441_v29 }
 0x146   : > { %938 = vst [vmem:[#allocation2 + $0x8] sm:$0xff] %v906_v35  ;;  %954 = vst [vmem:[#allocation2 + $0x88] sm:$0xff] %v922_v36  ;;  %v1246_v37 = vpop.f32.mrb[4].mxu0  ;;  %v1294_v38 = vpop.f32.mrb[4].mxu1  ;;  %v432_v35 = vld [vmem:[#allocation2 + $0x40] sm:$0xff] }
 0x147   : > { %v1247_v40 = vpop.f32.mrb[5].mxu0  ;;  %v1295_v42 = vpop.f32.mrb[5].mxu1 }
 0x148   : > { %v1248_v43 = vadd.f32 %v1247_v40, %v1246_v37  ;;  %v1296_v44 = vadd.f32 %v1295_v42, %v1294_v38  ;;  %v1249_v45 = vpop.f32.mrb[6].mxu0  ;;  %v1297_v46 = vpop.f32.mrb[6].mxu1  ;;  %v448_v37 = vld [vmem:[#allocation2 + $0xc0] sm:$0xff] }
 0x149   : > { %v1250_v48 = vpop.f32.mrb[7].mxu0  ;;  %v1298_v50 = vpop.f32.mrb[7].mxu1 }
 0x14a   : > { %v907_v51 = vadd.f32 %v1248_v43, %v426_v39  ;;  %v923_v52 = vadd.f32 %v1296_v44, %v442_v41  ;;  %v1251_v53 = vadd.f32 %v1250_v48, %v1249_v45  ;;  %v1299_v54 = vadd.f32 %v1298_v50, %v1297_v46  ;;  %v433_v43 = vld [vmem:[#allocation2 + $0x48] sm:$0xff] }
 0x14b   : > { %v449_v45 = vld [vmem:[#allocation2 + $0xc8] sm:$0xff] }
 0x14c   : > { %939 = vst [vmem:[#allocation2 + $0x10] sm:$0xff] %v907_v51  ;;  %955 = vst [vmem:[#allocation2 + $0x90] sm:$0xff] %v923_v52  ;;  %v908_v55 = vadd.f32 %v1251_v53, %v427_v47  ;;  %v924_v56 = vadd.f32 %v1299_v54, %v443_v49 }
 0x14e   : > { %940 = vst [vmem:[#allocation2 + $0x18] sm:$0xff] %v908_v55  ;;  %956 = vst [vmem:[#allocation2 + $0x98] sm:$0xff] %v924_v56  ;;  %v1252_v57 = vpop.f32.mrb[8].mxu0  ;;  %v1300_v58 = vpop.f32.mrb[8].mxu1  ;;  %v434_v55 = vld [vmem:[#allocation2 + $0x50] sm:$0xff] }
 0x14f   : > { %v1253_v60 = vpop.f32.mrb[9].mxu0  ;;  %v1301_v62 = vpop.f32.mrb[9].mxu1 }
 0x150   : > { %v1254_v63 = vadd.f32 %v1253_v60, %v1252_v57  ;;  %v1302_v0 = vadd.f32 %v1301_v62, %v1300_v58  ;;  %v1255_v1 = vpop.f32.mrb[10].mxu0  ;;  %v1303_v2 = vpop.f32.mrb[10].mxu1  ;;  %v450_v57 = vld [vmem:[#allocation2 + $0xd0] sm:$0xff] }
 0x151   : > { %v1256_v4 = vpop.f32.mrb[11].mxu0  ;;  %v1304_v6 = vpop.f32.mrb[11].mxu1 }
 0x152   : > { %v909_v7 = vadd.f32 %v1254_v63, %v428_v59  ;;  %v925_v8 = vadd.f32 %v1302_v0, %v444_v61  ;;  %v1257_v9 = vadd.f32 %v1256_v4, %v1255_v1  ;;  %v1305_v10 = vadd.f32 %v1304_v6, %v1303_v2  ;;  %v435_v63 = vld [vmem:[#allocation2 + $0x58] sm:$0xff] }
 0x153   : > { %v451_v1 = vld [vmem:[#allocation2 + $0xd8] sm:$0xff] }
 0x154   : > { %941 = vst [vmem:[#allocation2 + $0x20] sm:$0xff] %v909_v7  ;;  %957 = vst [vmem:[#allocation2 + $0xa0] sm:$0xff] %v925_v8  ;;  %v910_v11 = vadd.f32 %v1257_v9, %v429_v3  ;;  %v926_v12 = vadd.f32 %v1305_v10, %v445_v5 }
 0x156   : > { %942 = vst [vmem:[#allocation2 + $0x28] sm:$0xff] %v910_v11  ;;  %958 = vst [vmem:[#allocation2 + $0xa8] sm:$0xff] %v926_v12  ;;  %v1258_v13 = vpop.f32.mrb[12].mxu0  ;;  %v1306_v14 = vpop.f32.mrb[12].mxu1  ;;  %v436_v11 = vld [vmem:[#allocation2 + $0x60] sm:$0xff] }
 0x157   : > { %v1259_v16 = vpop.f32.mrb[13].mxu0  ;;  %v1307_v18 = vpop.f32.mrb[13].mxu1 }
 0x158   : > { %v1260_v19 = vadd.f32 %v1259_v16, %v1258_v13  ;;  %v1308_v20 = vadd.f32 %v1307_v18, %v1306_v14  ;;  %v1261_v21 = vpop.f32.mrb[14].mxu0  ;;  %v1309_v22 = vpop.f32.mrb[14].mxu1  ;;  %v452_v13 = vld [vmem:[#allocation2 + $0xe0] sm:$0xff] }
 0x159   : > { %v1262_v24 = vpop.f32.mrb[15].mxu0  ;;  %v1310_v26 = vpop.f32.mrb[15].mxu1 }
 0x15a   : > { %v911_v27 = vadd.f32 %v1260_v19, %v430_v15  ;;  %v927_v28 = vadd.f32 %v1308_v20, %v446_v17  ;;  %v1263_v29 = vadd.f32 %v1262_v24, %v1261_v21  ;;  %v1311_v30 = vadd.f32 %v1310_v26, %v1309_v22  ;;  %v437_v19 = vld [vmem:[#allocation2 + $0x68] sm:$0xff] }
 0x15b   : > { %v453_v21 = vld [vmem:[#allocation2 + $0xe8] sm:$0xff] }
 0x15c   : > { %943 = vst [vmem:[#allocation2 + $0x30] sm:$0xff] %v911_v27  ;;  %959 = vst [vmem:[#allocation2 + $0xb0] sm:$0xff] %v927_v28  ;;  %v912_v31 = vadd.f32 %v1263_v29, %v431_v23  ;;  %v928_v32 = vadd.f32 %v1311_v30, %v447_v25 }
 0x15e   : > { %944 = vst [vmem:[#allocation2 + $0x38] sm:$0xff] %v912_v31  ;;  %960 = vst [vmem:[#allocation2 + $0xb8] sm:$0xff] %v928_v32  ;;  %v1264_v33 = vpop.f32.mrb[16].mxu0  ;;  %v1312_v34 = vpop.f32.mrb[16].mxu1  ;;  %v438_v31 = vld [vmem:[#allocation2 + $0x70] sm:$0xff] }
 0x15f   : > { %v1265_v36 = vpop.f32.mrb[17].mxu0  ;;  %v1313_v38 = vpop.f32.mrb[17].mxu1 }
 0x160   : > { %v1266_v39 = vadd.f32 %v1265_v36, %v1264_v33  ;;  %v1314_v40 = vadd.f32 %v1313_v38, %v1312_v34  ;;  %v1267_v41 = vpop.f32.mrb[18].mxu0  ;;  %v1315_v42 = vpop.f32.mrb[18].mxu1  ;;  %v454_v33 = vld [vmem:[#allocation2 + $0xf0] sm:$0xff] }
 0x161   : > { %v1268_v44 = vpop.f32.mrb[19].mxu0  ;;  %v1316_v46 = vpop.f32.mrb[19].mxu1 }
 0x162   : > { %v913_v47 = vadd.f32 %v1266_v39, %v432_v35  ;;  %v929_v48 = vadd.f32 %v1314_v40, %v448_v37  ;;  %v1269_v49 = vadd.f32 %v1268_v44, %v1267_v41  ;;  %v1317_v50 = vadd.f32 %v1316_v46, %v1315_v42  ;;  %v439_v39 = vld [vmem:[#allocation2 + $0x78] sm:$0xff] }
 0x163   : > { %v455_v41 = vld [vmem:[#allocation2 + $0xf8] sm:$0xff] }
 0x164   : > { %945 = vst [vmem:[#allocation2 + $0x40] sm:$0xff] %v913_v47  ;;  %961 = vst [vmem:[#allocation2 + $0xc0] sm:$0xff] %v929_v48  ;;  %v914_v51 = vadd.f32 %v1269_v49, %v433_v43  ;;  %v930_v52 = vadd.f32 %v1317_v50, %v449_v45  ;;  %v973_v49 = vld [vmem:[#allocation2] sm:$0xff] (!%p1219_p12) }
 0x165   : > { %v1748_v50 = vld [vmem:[%s1837_s2] ss:$0 sm:$0xff] (!%p1219_p12) }
 0x166   : > { %946 = vst [vmem:[#allocation2 + $0x48] sm:$0xff] %v914_v51  ;;  %962 = vst [vmem:[#allocation2 + $0xc8] sm:$0xff] %v930_v52  ;;  %v1270_v53 = vpop.f32.mrb[20].mxu0  ;;  %v1318_v54 = vpop.f32.mrb[20].mxu1  ;;  %v974_v51 = vld [vmem:[#allocation2 + $0x8] sm:$0xff] (!%p1219_p12)  ;;  %v1012_v52 = vadd.f32 (!%p1219_p12), %v1748_v50, %v973_v49 }
 0x167   : > { %v1271_v56 = vpop.f32.mrb[21].mxu0  ;;  %v1319_v58 = vpop.f32.mrb[21].mxu1 }
 0x168   : > { %v1272_v59 = vadd.f32 %v1271_v56, %v1270_v53  ;;  %v1320_v60 = vadd.f32 %v1319_v58, %v1318_v54  ;;  %v1273_v61 = vpop.f32.mrb[22].mxu0  ;;  %v1321_v62 = vpop.f32.mrb[22].mxu1  ;;  %v1013_v53 = vadd.f32 (!%p1219_p12), %v1748_v50, %v974_v51  ;;  %v975_v54 = vld [vmem:[#allocation2 + $0x10] sm:$0xff] (!%p1219_p12)  ;;  %v977_v56 = vld [vmem:[#allocation2 + $0x20] sm:$0xff] (!%p1219_p12)  ;;  %1044 = vst [vmem:[%s1685_s24] sm:$0xff] (!%p1219_p12), %v1012_v52 }
 0x169   : > { %v1274_v0 = vpop.f32.mrb[23].mxu0  ;;  %v1322_v2 = vpop.f32.mrb[23].mxu1 }
 0x16a   : > { %v915_v3 = vadd.f32 %v1272_v59, %v434_v55  ;;  %v931_v4 = vadd.f32 %v1320_v60, %v450_v57  ;;  %v1275_v5 = vadd.f32 %v1274_v0, %v1273_v61  ;;  %v1323_v6 = vadd.f32 %v1322_v2, %v1321_v62  ;;  %v976_v55 = vld [vmem:[#allocation2 + $0x18] sm:$0xff] (!%p1219_p12)  ;;  %v978_v60 = vld [vmem:[#allocation2 + $0x28] sm:$0xff] (!%p1219_p12)  ;;  %v979_v61 = vld [vmem:[#allocation2 + $0x30] sm:$0xff] (!%p1219_p12)  ;;  %1045 = vst [vmem:[%s1685_s24 + $0x8] sm:$0xff] (!%p1219_p12), %v1013_v53 }
 0x16b   : > { %v1014_v57 = vadd.f32 (!%p1219_p12), %v1748_v50, %v975_v54  ;;  %v1015_v58 = vadd.f32 (!%p1219_p12), %v1748_v50, %v976_v55  ;;  %v1016_v59 = vadd.f32 (!%p1219_p12), %v1748_v50, %v977_v56  ;;  %v980_v62 = vld [vmem:[#allocation2 + $0x38] sm:$0xff] (!%p1219_p12)  ;;  %v1018_v0 = vadd.f32 (!%p1219_p12), %v1748_v50, %v979_v61  ;;  %v981_v2 = vld [vmem:[#allocation2 + $0x40] sm:$0xff] (!%p1219_p12) }
 0x16c   : > { %947 = vst [vmem:[#allocation2 + $0x50] sm:$0xff] %v915_v3  ;;  %963 = vst [vmem:[#allocation2 + $0xd0] sm:$0xff] %v931_v4  ;;  %v916_v7 = vadd.f32 %v1275_v5, %v435_v63  ;;  %v932_v8 = vadd.f32 %v1323_v6, %v451_v1  ;;  %v1017_v63 = vadd.f32 (!%p1219_p12), %v1748_v50, %v978_v60 }
 0x16d   : > { %v1019_v1 = vadd.f32 (!%p1219_p12), %v1748_v50, %v980_v62  ;;  %v982_v3 = vld [vmem:[#allocation2 + $0x48] sm:$0xff] (!%p1219_p12)  ;;  %1046 = vst [vmem:[%s1685_s24 + $0x10] sm:$0xff] (!%p1219_p12), %v1014_v57  ;;  %1047 = vst [vmem:[%s1685_s24 + $0x18] sm:$0xff] (!%p1219_p12), %v1015_v58  ;;  %v1020_v5 = vadd.f32 (!%p1219_p12), %v1748_v50, %v981_v2 }
 0x16e   : > { %948 = vst [vmem:[#allocation2 + $0x58] sm:$0xff] %v916_v7  ;;  %964 = vst [vmem:[#allocation2 + $0xd8] sm:$0xff] %v932_v8  ;;  %v1276_v9 = vpop.f32.mrb[24].mxu0  ;;  %v1324_v10 = vpop.f32.mrb[24].mxu1  ;;  %v1021_v6 = vadd.f32 (!%p1219_p12), %v1748_v50, %v982_v3 }
 0x16f   : > { %v1277_v12 = vpop.f32.mrb[25].mxu0  ;;  %v1325_v14 = vpop.f32.mrb[25].mxu1  ;;  %1048 = vst [vmem:[%s1685_s24 + $0x20] sm:$0xff] (!%p1219_p12), %v1016_v59  ;;  %1049 = vst [vmem:[%s1685_s24 + $0x28] sm:$0xff] (!%p1219_p12), %v1017_v63 }
 0x170   : > { %v1278_v15 = vadd.f32 %v1277_v12, %v1276_v9  ;;  %v1326_v16 = vadd.f32 %v1325_v14, %v1324_v10  ;;  %v1279_v17 = vpop.f32.mrb[26].mxu0  ;;  %v1327_v18 = vpop.f32.mrb[26].mxu1  ;;  %1050 = vst [vmem:[%s1685_s24 + $0x30] sm:$0xff] (!%p1219_p12), %v1018_v0  ;;  %1051 = vst [vmem:[%s1685_s24 + $0x38] sm:$0xff] (!%p1219_p12), %v1019_v1 }
 0x171   : > { %v1280_v20 = vpop.f32.mrb[27].mxu0  ;;  %v1328_v22 = vpop.f32.mrb[27].mxu1  ;;  %1052 = vst [vmem:[%s1685_s24 + $0x40] sm:$0xff] (!%p1219_p12), %v1020_v5  ;;  %1053 = vst [vmem:[%s1685_s24 + $0x48] sm:$0xff] (!%p1219_p12), %v1021_v6 }
 0x172   : > { %v917_v23 = vadd.f32 %v1278_v15, %v436_v11  ;;  %v933_v24 = vadd.f32 %v1326_v16, %v452_v13  ;;  %v1281_v25 = vadd.f32 %v1280_v20, %v1279_v17  ;;  %v1329_v26 = vadd.f32 %v1328_v22, %v1327_v18  ;;  %v989_v16 = vld [vmem:[#allocation2 + $0x80] sm:$0xff] (!%p1219_p12)  ;;  %v990_v20 = vld [vmem:[#allocation2 + $0x88] sm:$0xff] (!%p1219_p12)  ;;  %v992_v22 = vld [vmem:[#allocation2 + $0x98] sm:$0xff] (!%p1219_p12) }
 0x173   : > { %v983_v4 = vld [vmem:[#allocation2 + $0x50] sm:$0xff] (!%p1219_p12) }
 0x174   : > { %949 = vst [vmem:[#allocation2 + $0x60] sm:$0xff] %v917_v23  ;;  %965 = vst [vmem:[#allocation2 + $0xe0] sm:$0xff] %v933_v24  ;;  %v918_v27 = vadd.f32 %v1281_v25, %v437_v19  ;;  %v934_v28 = vadd.f32 %v1329_v26, %v453_v21  ;;  %v1022_v7 = vadd.f32 (!%p1219_p12), %v1748_v50, %v983_v4  ;;  %v991_v21 = vld [vmem:[#allocation2 + $0x90] sm:$0xff] (!%p1219_p12)  ;;  %v993_v26 = vld [vmem:[#allocation2 + $0xa0] sm:$0xff] (!%p1219_p12) }
 0x175   : > { %v984_v8 = vld [vmem:[#allocation2 + $0x58] sm:$0xff] (!%p1219_p12)  ;;  %v1028_v19 = vadd.f32 (!%p1219_p12), %v1748_v50, %v989_v16  ;;  %v1029_v23 = vadd.f32 (!%p1219_p12), %v1748_v50, %v990_v20  ;;  %v1030_v24 = vadd.f32 (!%p1219_p12), %v1748_v50, %v991_v21  ;;  %v1031_v25 = vadd.f32 (!%p1219_p12), %v1748_v50, %v992_v22 }
 0x176   : > { %950 = vst [vmem:[#allocation2 + $0x68] sm:$0xff] %v918_v27  ;;  %966 = vst [vmem:[#allocation2 + $0xe8] sm:$0xff] %v934_v28  ;;  %v1282_v29 = vpop.f32.mrb[28].mxu0  ;;  %v1330_v30 = vpop.f32.mrb[28].mxu1  ;;  %v1023_v11 = vadd.f32 (!%p1219_p12), %v1748_v50, %v984_v8  ;;  %v994_v27 = vld [vmem:[#allocation2 + $0xa8] sm:$0xff] (!%p1219_p12)  ;;  %v995_v28 = vld [vmem:[#allocation2 + $0xb0] sm:$0xff] (!%p1219_p12) }
 0x177   : > { %v1283_v32 = vpop.f32.mrb[29].mxu0  ;;  %v1331_v34 = vpop.f32.mrb[29].mxu1  ;;  %1054 = vst [vmem:[%s1685_s24 + $0x50] sm:$0xff] (!%p1219_p12), %v1022_v7  ;;  %1060 = vst [vmem:[%s1685_s24 + $0x80] sm:$0xff] (!%p1219_p12), %v1028_v19 }
 0x178   : > { %v1284_v35 = vadd.f32 %v1283_v32, %v1282_v29  ;;  %v1332_v36 = vadd.f32 %v1331_v34, %v1330_v30  ;;  %v1285_v37 = vpop.f32.mrb[30].mxu0  ;;  %v1333_v38 = vpop.f32.mrb[30].mxu1  ;;  %972 = sbr.rel (%p1219_p12) target bundleno = 394 (0x18a), region = 78  ;;  %1055 = vst [vmem:[%s1685_s24 + $0x58] sm:$0xff] (!%p1219_p12), %v1023_v11  ;;  %v1032_v29 = vadd.f32 (!%p1219_p12), %v1748_v50, %v993_v26  ;;  %v1033_v30 = vadd.f32 (!%p1219_p12), %v1748_v50, %v994_v27  ;;  %v996_v32 = vld [vmem:[#allocation2 + $0xb8] sm:$0xff] (!%p1219_p12)  ;;  %v998_v34 = vld [vmem:[#allocation2 + $0xc8] sm:$0xff] (!%p1219_p12) }
 0x179   : > { %v1286_v40 = vpop.f32.mrb[31].mxu0  ;;  %v1334_v42 = vpop.f32.mrb[31].mxu1  ;;  %1061 = vst [vmem:[%s1685_s24 + $0x88] sm:$0xff] (!%p1219_p12), %v1029_v23  ;;  %1062 = vst [vmem:[%s1685_s24 + $0x90] sm:$0xff] (!%p1219_p12), %v1030_v24 }
 0x17a   : > { %v919_v43 = vadd.f32 %v1284_v35, %v438_v31  ;;  %v935_v44 = vadd.f32 %v1332_v36, %v454_v33  ;;  %v1287_v45 = vadd.f32 %v1286_v40, %v1285_v37  ;;  %v1335_v46 = vadd.f32 %v1334_v42, %v1333_v38  ;;  %v997_v33 = vld [vmem:[#allocation2 + $0xc0] sm:$0xff] (!%p1219_p12)  ;;  %1063 = vst [vmem:[%s1685_s24 + $0x98] sm:$0xff] (!%p1219_p12), %v1031_v25  ;;  %v999_v38 = vld [vmem:[#allocation2 + $0xd0] sm:$0xff] (!%p1219_p12) }
 0x17b   : > { %v985_v9 = vld [vmem:[#allocation2 + $0x60] sm:$0xff] (!%p1219_p12)  ;;  %v1034_v31 = vadd.f32 (!%p1219_p12), %v1748_v50, %v995_v28  ;;  %v1035_v35 = vadd.f32 (!%p1219_p12), %v1748_v50, %v996_v32  ;;  %v1036_v36 = vadd.f32 (!%p1219_p12), %v1748_v50, %v997_v33  ;;  %v1037_v37 = vadd.f32 (!%p1219_p12), %v1748_v50, %v998_v34  ;;  %1064 = vst [vmem:[%s1685_s24 + $0xa0] sm:$0xff] (!%p1219_p12), %v1032_v29 }
 0x17c   : > { %951 = vst [vmem:[#allocation2 + $0x70] sm:$0xff] %v919_v43  ;;  %967 = vst [vmem:[#allocation2 + $0xf0] sm:$0xff] %v935_v44  ;;  %v920_v47 = vadd.f32 %v1287_v45, %v439_v39  ;;  %v936_v48 = vadd.f32 %v1335_v46, %v455_v41  ;;  %v1024_v12 = vadd.f32 (!%p1219_p12), %v1748_v50, %v985_v9  ;;  %v1000_v39 = vld [vmem:[#allocation2 + $0xd8] sm:$0xff] (!%p1219_p12)  ;;  %v1001_v40 = vld [vmem:[#allocation2 + $0xe0] sm:$0xff] (!%p1219_p12) }
 0x17d   : > { %v986_v10 = vld [vmem:[#allocation2 + $0x68] sm:$0xff] (!%p1219_p12)  ;;  %1065 = vst [vmem:[%s1685_s24 + $0xa8] sm:$0xff] (!%p1219_p12), %v1033_v30  ;;  %1066 = vst [vmem:[%s1685_s24 + $0xb0] sm:$0xff] (!%p1219_p12), %v1034_v31  ;;  %v1038_v41 = vadd.f32 (!%p1219_p12), %v1748_v50, %v999_v38  ;;  %v1039_v42 = vadd.f32 (!%p1219_p12), %v1748_v50, %v1000_v39  ;;  %v1040_v43 = vadd.f32 (!%p1219_p12), %v1748_v50, %v1001_v40 }
 0x17e   : > { %952 = vst [vmem:[#allocation2 + $0x78] sm:$0xff] %v920_v47  ;;  %968 = vst [vmem:[#allocation2 + $0xf8] sm:$0xff] %v936_v48  ;;  %v1025_v13 = vadd.f32 (!%p1219_p12), %v1748_v50, %v986_v10  ;;  %v1002_v44 = vld [vmem:[#allocation2 + $0xe8] sm:$0xff] (!%p1219_p12) }
 0x17f   : > { %1056 = vst [vmem:[%s1685_s24 + $0x60] sm:$0xff] %v1024_v12  ;;  %1067 = vst [vmem:[%s1685_s24 + $0xb8] sm:$0xff] %v1035_v35  ;;  %v1041_v47 = vadd.f32 %v1748_v50, %v1002_v44 }
 0x180   : > { %1057 = vst [vmem:[%s1685_s24 + $0x68] sm:$0xff] %v1025_v13  ;;  %1068 = vst [vmem:[%s1685_s24 + $0xc0] sm:$0xff] %v1036_v36 }
 0x181   : > { %1069 = vst [vmem:[%s1685_s24 + $0xc8] sm:$0xff] %v1037_v37  ;;  %1070 = vst [vmem:[%s1685_s24 + $0xd0] sm:$0xff] %v1038_v41 }
 0x182   : > { %1071 = vst [vmem:[%s1685_s24 + $0xd8] sm:$0xff] %v1039_v42  ;;  %1072 = vst [vmem:[%s1685_s24 + $0xe0] sm:$0xff] %v1040_v43 }
 0x183   : > { %v987_v14 = vld [vmem:[#allocation2 + $0x70] sm:$0xff]  ;;  %1073 = vst [vmem:[%s1685_s24 + $0xe8] sm:$0xff] %v1041_v47 }
 0x184   : > { %v1026_v17 = vadd.f32 %v1748_v50, %v987_v14  ;;  %v1003_v45 = vld [vmem:[#allocation2 + $0xf0] sm:$0xff] }
 0x185   : > { %v988_v15 = vld [vmem:[#allocation2 + $0x78] sm:$0xff]  ;;  %v1042_v48 = vadd.f32 %v1748_v50, %v1003_v45 }
 0x186   : > { %v1027_v18 = vadd.f32 %v1748_v50, %v988_v15  ;;  %1058 = vst [vmem:[%s1685_s24 + $0x70] sm:$0xff] %v1026_v17  ;;  %v1004_v46 = vld [vmem:[#allocation2 + $0xf8] sm:$0xff] }
 0x187   : > { %v1043_v49 = vadd.f32 %v1748_v50, %v1004_v46  ;;  %1074 = vst [vmem:[%s1685_s24 + $0xf0] sm:$0xff] %v1042_v48 }
 0x188   : > { %1059 = vst [vmem:[%s1685_s24 + $0x78] sm:$0xff] %v1027_v18 }
 0x189   : > { %1075 = vst [vmem:[%s1685_s24 + $0xf8] sm:$0xff] %v1043_v49 }
 0x18a PF: > { %s13_s18 = sadd.s32 1, %s1527_s18   ;;  %s1839_s12 = smov %s1507_s13 }
 0x18b   : > { %p10_p13 = scmp.ge.s32.totalorder %s13_s18, 6   ;;  %s1840_s13 = smov %s1601_s25 }
 0x18c   : > { %s1841_s14 = smov %s1519_s16  ;;  %s1842_s15 = smov %s1523_s17 }
 0x18d   : > { %s1843_s16 = smov %s1846_s19  ;;  %s1844_s17 = smov %s1850_s20 }
 0x18e   :  { %12 = sbr.rel (!%p10_p13) target bundleno = 4 (0x4), region = 114 }

// kernel: _gcn_forward_impl.2
= control target key start
LH: loop header
LB: loop body
LE: loop exit
PB: predicated region body
PF: predicated region fallthrough
CT: control target
= control target key end

     0   :  { %s6586_s15 = smov 0   ;;  %s6588_s16 = smov 0   ;;  %s7936_s0 = inlined_call_operand.vmem [shape: bf16[512,512], index: 0, kind: input, shape index: {}]   ;;  %s7937_s1 = inlined_call_operand.vmem [shape: bf16[512,1024], index: 1, kind: input, shape index: {}]   ;;  %s7938_s2 = inlined_call_operand.vmem [shape: bf16[1024,128], index: 2, kind: input, shape index: {}]   ;;  %s7939_s3 = inlined_call_operand.vmem [shape: f32[1,1024], index: 3, kind: input, shape index: {}]   ;;  %s7940_s4 = inlined_call_operand.vmem [shape: bf16[512,128], index: 4, kind: output, shape index: {}]  }
   0x1   :  { %s6590_s17 = smov 0   ;;  %s6592_s18 = smov 0  }
   0x2   :  { %s6594_s19 = smov 0   ;;  %s6596_s20 = smov 0  }
   0x3   :  { %s6598_s21 = smov 0  }
   0x4 LB: > { %s23_s22 = sadd.s32 1, %s6550_s19  ;;  %s26_s23 = sadd.s32 1, %s6554_s20  ;;  %s6558_s21 = sphi %s6598_s21, %s14_s21   ;;  %s6554_s20 = sphi %s6596_s20, %s7946_s20   ;;  %s6550_s19 = sphi %s6594_s19, %s7945_s19   ;;  %s6546_s18 = sphi %s6592_s18, %s7944_s18   ;;  %s6542_s17 = sphi %s6590_s17, %s7943_s17   ;;  %s6538_s16 = sphi %s6588_s16, %s7942_s16   ;;  %s6534_s15 = sphi %s6586_s15, %s7941_s15  }
   0x5   : > { %p24_p0 = scmp.ge.s32.totalorder %s23_s22, 2  ;;  %p42_p1 = scmp.ne.s32.totalorder %s6538_s16, %s6534_s15 }
   0x6   : > { %p43_p2 = scmp.eq.s32.totalorder %s6558_s21, 0  ;;  %s35_s27 = sadd.s32 1, %s6538_s16 }
   0x7   : > { %s7948_s22 = smov (%p24_p0, %s23_s22), 0  ;;  %s7950_s23 = smov (!%p24_p0, %s26_s23), %s6554_s20 }
   0x8   : > { %p44_p3 = por %p43_p2, %p42_p1  ;;  %p28_p4 = scmp.ge.s32.totalorder %s7950_s23, 2 }
   0x9   : > { %s31_s24 = ssub.s32 %s6550_s19, %s7948_s22  ;;  %p5484_p6 = scmp.ge.s32.totalorder %s6558_s21, 4 }
   0xa   : > { %s7952_s23 = smov (%p28_p4, %s7950_s23), 0 }
   0xb   : > { %s30_s25 = ssub.s32 %s6554_s20, %s7952_s23  ;;  %166 = sbr.rel (%p5484_p6) target bundleno = 41 (0x29), region = 28 }
   0xc   : > { %s32_s26 = sor.u32 %s31_s24, %s30_s25 }
   0xd   : > { %p33_p5 = scmp.eq.s32.totalorder %s32_s26, 0 }
   0xf   : > { %s6637_s28 = scalar_select %p33_p5, %s6538_s16, %s35_s27  }
  0x12   : > { %169 = sbr.rel (!%p44_p3) target bundleno = 41 (0x29), region = 32  ;;  %s171_s29 = sand.u32 (%p44_p3), 1, %s6538_s16  }
  0x13   : > { %s5487_s30 = sshll.u32 (%p44_p3), %s6550_s19, 1  ;;  %s5485_s5 = sshll.u32 (%p44_p3), %s171_s29, 8 }
  0x14   : > { %s5757_s6 = sshll.u32 (%p44_p3), %s6554_s20, 7  ;;  %s6651_s12 = scalar_lea.vmem (%p44_p3), [#allocation3], %s5485_s5 }
  0x15   : > { %s177_s7 = sadd.s32 (%p44_p3), %s5757_s6, %s5487_s30 }
  0x16   : > { %s5489_s8 = sshll.u32 (%p44_p3), %s177_s7, 2 }
  0x17   : > { %s6646_s11 = scalar_lea.vmem (%p44_p3), %s7936_s0, %s5489_s8 }
  0x18   : > { %v269_v0 = vld [vmem:[%s6646_s11] sm:$0xff] (%p44_p3)  ;;  %v271_v1 = vld [vmem:[%s6646_s11 + $0x10] sm:$0xff] (%p44_p3) }
  0x19   : > { %v273_v2 = vld [vmem:[%s6646_s11 + $0x20] sm:$0xff]  ;;  %270 = vst [vmem:[%s6651_s12] sm:$0xff] %v269_v0  ;;  %272 = vst [vmem:[%s6651_s12 + $0x8] sm:$0xff] %v271_v1  ;;  %v275_v3 = vld [vmem:[%s6646_s11 + $0x30] sm:$0xff] }
  0x1a   : > { %274 = vst [vmem:[%s6651_s12 + $0x10] sm:$0xff] %v273_v2  ;;  %v277_v4 = vld [vmem:[%s6646_s11 + $0x40] sm:$0xff]  ;;  %v279_v5 = vld [vmem:[%s6646_s11 + $0x50] sm:$0xff]  ;;  %276 = vst [vmem:[%s6651_s12 + $0x18] sm:$0xff] %v275_v3 }
  0x1b   : > { %278 = vst [vmem:[%s6651_s12 + $0x20] sm:$0xff] %v277_v4  ;;  %280 = vst [vmem:[%s6651_s12 + $0x28] sm:$0xff] %v279_v5  ;;  %v281_v6 = vld [vmem:[%s6646_s11 + $0x60] sm:$0xff]  ;;  %v283_v7 = vld [vmem:[%s6646_s11 + $0x70] sm:$0xff] }
  0x1c   : > { %v285_v8 = vld [vmem:[%s6646_s11 + $0x80] sm:$0xff]  ;;  %282 = vst [vmem:[%s6651_s12 + $0x30] sm:$0xff] %v281_v6  ;;  %284 = vst [vmem:[%s6651_s12 + $0x38] sm:$0xff] %v283_v7  ;;  %v287_v9 = vld [vmem:[%s6646_s11 + $0x90] sm:$0xff] }
  0x1d   : > { %286 = vst [vmem:[%s6651_s12 + $0x40] sm:$0xff] %v285_v8  ;;  %v289_v10 = vld [vmem:[%s6646_s11 + $0xa0] sm:$0xff]  ;;  %v291_v11 = vld [vmem:[%s6646_s11 + $0xb0] sm:$0xff]  ;;  %288 = vst [vmem:[%s6651_s12 + $0x48] sm:$0xff] %v287_v9 }
  0x1e   : > { %290 = vst [vmem:[%s6651_s12 + $0x50] sm:$0xff] %v289_v10  ;;  %292 = vst [vmem:[%s6651_s12 + $0x58] sm:$0xff] %v291_v11  ;;  %v293_v12 = vld [vmem:[%s6646_s11 + $0xc0] sm:$0xff]  ;;  %v295_v13 = vld [vmem:[%s6646_s11 + $0xd0] sm:$0xff] }
  0x1f   : > { %v297_v14 = vld [vmem:[%s6646_s11 + $0xe0] sm:$0xff]  ;;  %294 = vst [vmem:[%s6651_s12 + $0x60] sm:$0xff] %v293_v12  ;;  %296 = vst [vmem:[%s6651_s12 + $0x68] sm:$0xff] %v295_v13  ;;  %v299_v15 = vld [vmem:[%s6646_s11 + $0xf0] sm:$0xff] }
  0x20   : > { %298 = vst [vmem:[%s6651_s12 + $0x70] sm:$0xff] %v297_v14  ;;  %v301_v16 = vld [vmem:[%s6646_s11 + $0x100] sm:$0xff]  ;;  %v303_v17 = vld [vmem:[%s6646_s11 + $0x110] sm:$0xff]  ;;  %300 = vst [vmem:[%s6651_s12 + $0x78] sm:$0xff] %v299_v15 }
  0x21   : > { %302 = vst [vmem:[%s6651_s12 + $0x80] sm:$0xff] %v301_v16  ;;  %304 = vst [vmem:[%s6651_s12 + $0x88] sm:$0xff] %v303_v17  ;;  %v305_v18 = vld [vmem:[%s6646_s11 + $0x120] sm:$0xff]  ;;  %v307_v19 = vld [vmem:[%s6646_s11 + $0x130] sm:$0xff] }
  0x22   : > { %v309_v20 = vld [vmem:[%s6646_s11 + $0x140] sm:$0xff]  ;;  %306 = vst [vmem:[%s6651_s12 + $0x90] sm:$0xff] %v305_v18  ;;  %308 = vst [vmem:[%s6651_s12 + $0x98] sm:$0xff] %v307_v19  ;;  %v311_v21 = vld [vmem:[%s6646_s11 + $0x150] sm:$0xff] }
  0x23   : > { %310 = vst [vmem:[%s6651_s12 + $0xa0] sm:$0xff] %v309_v20  ;;  %v313_v22 = vld [vmem:[%s6646_s11 + $0x160] sm:$0xff]  ;;  %v315_v23 = vld [vmem:[%s6646_s11 + $0x170] sm:$0xff]  ;;  %312 = vst [vmem:[%s6651_s12 + $0xa8] sm:$0xff] %v311_v21 }
  0x24   : > { %314 = vst [vmem:[%s6651_s12 + $0xb0] sm:$0xff] %v313_v22  ;;  %316 = vst [vmem:[%s6651_s12 + $0xb8] sm:$0xff] %v315_v23  ;;  %v317_v24 = vld [vmem:[%s6646_s11 + $0x180] sm:$0xff]  ;;  %v319_v25 = vld [vmem:[%s6646_s11 + $0x190] sm:$0xff] }
  0x25   : > { %v321_v26 = vld [vmem:[%s6646_s11 + $0x1a0] sm:$0xff]  ;;  %318 = vst [vmem:[%s6651_s12 + $0xc0] sm:$0xff] %v317_v24  ;;  %320 = vst [vmem:[%s6651_s12 + $0xc8] sm:$0xff] %v319_v25  ;;  %v323_v27 = vld [vmem:[%s6646_s11 + $0x1b0] sm:$0xff] }
  0x26   : > { %322 = vst [vmem:[%s6651_s12 + $0xd0] sm:$0xff] %v321_v26  ;;  %v325_v28 = vld [vmem:[%s6646_s11 + $0x1c0] sm:$0xff]  ;;  %v327_v29 = vld [vmem:[%s6646_s11 + $0x1d0] sm:$0xff]  ;;  %324 = vst [vmem:[%s6651_s12 + $0xd8] sm:$0xff] %v323_v27 }
  0x27   : > { %326 = vst [vmem:[%s6651_s12 + $0xe0] sm:$0xff] %v325_v28  ;;  %328 = vst [vmem:[%s6651_s12 + $0xe8] sm:$0xff] %v327_v29  ;;  %v329_v30 = vld [vmem:[%s6646_s11 + $0x1e0] sm:$0xff]  ;;  %v331_v31 = vld [vmem:[%s6646_s11 + $0x1f0] sm:$0xff] }
  0x28   : > { %330 = vst [vmem:[%s6651_s12 + $0xf0] sm:$0xff] %v329_v30  ;;  %332 = vst [vmem:[%s6651_s12 + $0xf8] sm:$0xff] %v331_v31 }
  0x29 PF: > { %p5490_p7 = scmp.ge.s32.totalorder %s6558_s21, 1  ;;  %p337_p8 = scmp.lt.s32.totalorder %s6558_s21, 5 }
  0x2b   : > { %p338_p9 = pnand %p5490_p7, %p337_p8 }
  0x2c   : > { %s344_s13 = sand.u32 (!%p338_p9), 1, %s6534_s15   ;;  %s5492_s14 = sshll.u32 (!%p338_p9), %s6546_s18, 5 }
  0x2d   : > { %341 = sbr.rel (%p338_p9) target bundleno = 1205 (0x4b5), region = 70  ;;  %s5491_s24 = sshll.u32 (!%p338_p9), %s344_s13, 8 }
  0x2e   : > { %p372_p10 = scmp.lt.s32.totalorder (!%p338_p9), %s5492_s14, 63  ;;  %s6723_s30 = scalar_lea.vmem (!%p338_p9), [#allocation3], %s5491_s24 }
  0x2f   : > { %p5494_p11 = scmp.ne.s32.totalorder (!%p338_p9), %s6542_s17, 0 }
  0x34   : > { %s7954_s14 = smov (!%p372_p10, %s5492_s14), 63  ;;  %381 = sbr.rel (%p5494_p11) target bundleno = 182 (0xb6), region = 78 }
  0x35   : > { %s5493_s25 = sshll.u32 %s7954_s14, 2  ;;  %v6560_v32 = vmov (!%p5494_p11), 0.0  }
  0x36   : > { %s6721_s29 = scalar_lea.vmem %s7940_s4, %s5493_s25  ;;  %382 = vst [vmem:[#allocation2] sm:$0xff] (!%p5494_p11), %v6560_v32  ;;  %383 = vst [vmem:[#allocation2 + $0x8] sm:$0xff] (!%p5494_p11), %v6560_v32 }
  0x37   : > { %384 = vst [vmem:[#allocation2 + $0x10] sm:$0xff] (!%p5494_p11), %v6560_v32  ;;  %385 = vst [vmem:[#allocation2 + $0x18] sm:$0xff] (!%p5494_p11), %v6560_v32 }
  0x38   : > { %386 = vst [vmem:[#allocation2 + $0x20] sm:$0xff] (!%p5494_p11), %v6560_v32  ;;  %387 = vst [vmem:[#allocation2 + $0x28] sm:$0xff] (!%p5494_p11), %v6560_v32 }
  0x39   : > { %388 = vst [vmem:[#allocation2 + $0x30] sm:$0xff] (!%p5494_p11), %v6560_v32  ;;  %389 = vst [vmem:[#allocation2 + $0x38] sm:$0xff] (!%p5494_p11), %v6560_v32 }
  0x3a   : > { %390 = vst [vmem:[#allocation2 + $0x40] sm:$0xff] (!%p5494_p11), %v6560_v32  ;;  %391 = vst [vmem:[#allocation2 + $0x48] sm:$0xff] (!%p5494_p11), %v6560_v32 }
  0x3b   : > { %392 = vst [vmem:[#allocation2 + $0x50] sm:$0xff] %v6560_v32  ;;  %393 = vst [vmem:[#allocation2 + $0x58] sm:$0xff] %v6560_v32 }
  0x3c   : > { %394 = vst [vmem:[#allocation2 + $0x60] sm:$0xff] %v6560_v32  ;;  %395 = vst [vmem:[#allocation2 + $0x68] sm:$0xff] %v6560_v32 }
  0x3d   : > { %396 = vst [vmem:[#allocation2 + $0x70] sm:$0xff] %v6560_v32  ;;  %397 = vst [vmem:[#allocation2 + $0x78] sm:$0xff] %v6560_v32 }
  0x3e   : > { %398 = vst [vmem:[#allocation2 + $0x80] sm:$0xff] %v6560_v32  ;;  %399 = vst [vmem:[#allocation2 + $0x88] sm:$0xff] %v6560_v32 }
  0x3f   : > { %400 = vst [vmem:[#allocation2 + $0x90] sm:$0xff] %v6560_v32  ;;  %401 = vst [vmem:[#allocation2 + $0x98] sm:$0xff] %v6560_v32 }
  0x40   : > { %402 = vst [vmem:[#allocation2 + $0xa0] sm:$0xff] %v6560_v32  ;;  %403 = vst [vmem:[#allocation2 + $0xa8] sm:$0xff] %v6560_v32 }
  0x41   : > { %404 = vst [vmem:[#allocation2 + $0xb0] sm:$0xff] %v6560_v32  ;;  %405 = vst [vmem:[#allocation2 + $0xb8] sm:$0xff] %v6560_v32 }
  0x42   : > { %406 = vst [vmem:[#allocation2 + $0xc0] sm:$0xff] %v6560_v32  ;;  %407 = vst [vmem:[#allocation2 + $0xc8] sm:$0xff] %v6560_v32 }
  0x43   : > { %408 = vst [vmem:[#allocation2 + $0xd0] sm:$0xff] %v6560_v32  ;;  %409 = vst [vmem:[#allocation2 + $0xd8] sm:$0xff] %v6560_v32 }
  0x44   : > { %410 = vst [vmem:[#allocation2 + $0xe0] sm:$0xff] %v6560_v32  ;;  %411 = vst [vmem:[#allocation2 + $0xe8] sm:$0xff] %v6560_v32 }
  0x45   : > { %412 = vst [vmem:[#allocation2 + $0xf0] sm:$0xff] %v6560_v32  ;;  %413 = vst [vmem:[#allocation2 + $0xf8] sm:$0xff] %v6560_v32 }
  0x46   : > { %414 = vst [vmem:[#allocation2 + $0x100] sm:$0xff] %v6560_v32  ;;  %415 = vst [vmem:[#allocation2 + $0x108] sm:$0xff] %v6560_v32 }
  0x47   : > { %416 = vst [vmem:[#allocation2 + $0x110] sm:$0xff] %v6560_v32  ;;  %417 = vst [vmem:[#allocation2 + $0x118] sm:$0xff] %v6560_v32 }
  0x48   : > { %418 = vst [vmem:[#allocation2 + $0x120] sm:$0xff] %v6560_v32  ;;  %419 = vst [vmem:[#allocation2 + $0x128] sm:$0xff] %v6560_v32 }
  0x49   : > { %420 = vst [vmem:[#allocation2 + $0x130] sm:$0xff] %v6560_v32  ;;  %421 = vst [vmem:[#allocation2 + $0x138] sm:$0xff] %v6560_v32 }
  0x4a   : > { %422 = vst [vmem:[#allocation2 + $0x140] sm:$0xff] %v6560_v32  ;;  %423 = vst [vmem:[#allocation2 + $0x148] sm:$0xff] %v6560_v32 }
  0x4b   : > { %424 = vst [vmem:[#allocation2 + $0x150] sm:$0xff] %v6560_v32  ;;  %425 = vst [vmem:[#allocation2 + $0x158] sm:$0xff] %v6560_v32 }
  0x4c   : > { %426 = vst [vmem:[#allocation2 + $0x160] sm:$0xff] %v6560_v32  ;;  %427 = vst [vmem:[#allocation2 + $0x168] sm:$0xff] %v6560_v32 }
  0x4d   : > { %428 = vst [vmem:[#allocation2 + $0x170] sm:$0xff] %v6560_v32  ;;  %429 = vst [vmem:[#allocation2 + $0x178] sm:$0xff] %v6560_v32 }
  0x4e   : > { %430 = vst [vmem:[#allocation2 + $0x180] sm:$0xff] %v6560_v32  ;;  %431 = vst [vmem:[#allocation2 + $0x188] sm:$0xff] %v6560_v32 }
  0x4f   : > { %432 = vst [vmem:[#allocation2 + $0x190] sm:$0xff] %v6560_v32  ;;  %433 = vst [vmem:[#allocation2 + $0x198] sm:$0xff] %v6560_v32 }
  0x50   : > { %434 = vst [vmem:[#allocation2 + $0x1a0] sm:$0xff] %v6560_v32  ;;  %435 = vst [vmem:[#allocation2 + $0x1a8] sm:$0xff] %v6560_v32 }
  0x51   : > { %436 = vst [vmem:[#allocation2 + $0x1b0] sm:$0xff] %v6560_v32  ;;  %437 = vst [vmem:[#allocation2 + $0x1b8] sm:$0xff] %v6560_v32 }
  0x52   : > { %438 = vst [vmem:[#allocation2 + $0x1c0] sm:$0xff] %v6560_v32  ;;  %439 = vst [vmem:[#allocation2 + $0x1c8] sm:$0xff] %v6560_v32 }
  0x53   : > { %440 = vst [vmem:[#allocation2 + $0x1d0] sm:$0xff] %v6560_v32  ;;  %441 = vst [vmem:[#allocation2 + $0x1d8] sm:$0xff] %v6560_v32 }
  0x54   : > { %442 = vst [vmem:[#allocation2 + $0x1e0] sm:$0xff] %v6560_v32  ;;  %443 = vst [vmem:[#allocation2 + $0x1e8] sm:$0xff] %v6560_v32 }
  0x55   : > { %444 = vst [vmem:[#allocation2 + $0x1f0] sm:$0xff] %v6560_v32  ;;  %445 = vst [vmem:[#allocation2 + $0x1f8] sm:$0xff] %v6560_v32 }
  0x56   : > { %446 = vst [vmem:[#allocation2 + $0x200] sm:$0xff] %v6560_v32  ;;  %447 = vst [vmem:[#allocation2 + $0x208] sm:$0xff] %v6560_v32 }
  0x57   : > { %448 = vst [vmem:[#allocation2 + $0x210] sm:$0xff] %v6560_v32  ;;  %449 = vst [vmem:[#allocation2 + $0x218] sm:$0xff] %v6560_v32 }
  0x58   : > { %450 = vst [vmem:[#allocation2 + $0x220] sm:$0xff] %v6560_v32  ;;  %451 = vst [vmem:[#allocation2 + $0x228] sm:$0xff] %v6560_v32 }
  0x59   : > { %452 = vst [vmem:[#allocation2 + $0x230] sm:$0xff] %v6560_v32  ;;  %453 = vst [vmem:[#allocation2 + $0x238] sm:$0xff] %v6560_v32 }
  0x5a   : > { %454 = vst [vmem:[#allocation2 + $0x240] sm:$0xff] %v6560_v32  ;;  %455 = vst [vmem:[#allocation2 + $0x248] sm:$0xff] %v6560_v32 }
  0x5b   : > { %456 = vst [vmem:[#allocation2 + $0x250] sm:$0xff] %v6560_v32  ;;  %457 = vst [vmem:[#allocation2 + $0x258] sm:$0xff] %v6560_v32 }
  0x5c   : > { %458 = vst [vmem:[#allocation2 + $0x260] sm:$0xff] %v6560_v32  ;;  %459 = vst [vmem:[#allocation2 + $0x268] sm:$0xff] %v6560_v32 }
  0x5d   : > { %460 = vst [vmem:[#allocation2 + $0x270] sm:$0xff] %v6560_v32  ;;  %461 = vst [vmem:[#allocation2 + $0x278] sm:$0xff] %v6560_v32 }
  0x5e   : > { %462 = vst [vmem:[#allocation2 + $0x280] sm:$0xff] %v6560_v32  ;;  %463 = vst [vmem:[#allocation2 + $0x288] sm:$0xff] %v6560_v32 }
  0x5f   : > { %464 = vst [vmem:[#allocation2 + $0x290] sm:$0xff] %v6560_v32  ;;  %465 = vst [vmem:[#allocation2 + $0x298] sm:$0xff] %v6560_v32 }
  0x60   : > { %466 = vst [vmem:[#allocation2 + $0x2a0] sm:$0xff] %v6560_v32  ;;  %467 = vst [vmem:[#allocation2 + $0x2a8] sm:$0xff] %v6560_v32 }
  0x61   : > { %468 = vst [vmem:[#allocation2 + $0x2b0] sm:$0xff] %v6560_v32  ;;  %469 = vst [vmem:[#allocation2 + $0x2b8] sm:$0xff] %v6560_v32 }
  0x62   : > { %470 = vst [vmem:[#allocation2 + $0x2c0] sm:$0xff] %v6560_v32  ;;  %471 = vst [vmem:[#allocation2 + $0x2c8] sm:$0xff] %v6560_v32 }
  0x63   : > { %472 = vst [vmem:[#allocation2 + $0x2d0] sm:$0xff] %v6560_v32  ;;  %473 = vst [vmem:[#allocation2 + $0x2d8] sm:$0xff] %v6560_v32 }
  0x64   : > { %474 = vst [vmem:[#allocation2 + $0x2e0] sm:$0xff] %v6560_v32  ;;  %475 = vst [vmem:[#allocation2 + $0x2e8] sm:$0xff] %v6560_v32 }
  0x65   : > { %476 = vst [vmem:[#allocation2 + $0x2f0] sm:$0xff] %v6560_v32  ;;  %477 = vst [vmem:[#allocation2 + $0x2f8] sm:$0xff] %v6560_v32 }
  0x66   : > { %478 = vst [vmem:[#allocation2 + $0x300] sm:$0xff] %v6560_v32  ;;  %479 = vst [vmem:[#allocation2 + $0x308] sm:$0xff] %v6560_v32 }
  0x67   : > { %480 = vst [vmem:[#allocation2 + $0x310] sm:$0xff] %v6560_v32  ;;  %481 = vst [vmem:[#allocation2 + $0x318] sm:$0xff] %v6560_v32 }
  0x68   : > { %482 = vst [vmem:[#allocation2 + $0x320] sm:$0xff] %v6560_v32  ;;  %483 = vst [vmem:[#allocation2 + $0x328] sm:$0xff] %v6560_v32 }
  0x69   : > { %484 = vst [vmem:[#allocation2 + $0x330] sm:$0xff] %v6560_v32  ;;  %485 = vst [vmem:[#allocation2 + $0x338] sm:$0xff] %v6560_v32 }
  0x6a   : > { %486 = vst [vmem:[#allocation2 + $0x340] sm:$0xff] %v6560_v32  ;;  %487 = vst [vmem:[#allocation2 + $0x348] sm:$0xff] %v6560_v32 }
  0x6b   : > { %488 = vst [vmem:[#allocation2 + $0x350] sm:$0xff] %v6560_v32  ;;  %489 = vst [vmem:[#allocation2 + $0x358] sm:$0xff] %v6560_v32 }
  0x6c   : > { %490 = vst [vmem:[#allocation2 + $0x360] sm:$0xff] %v6560_v32  ;;  %491 = vst [vmem:[#allocation2 + $0x368] sm:$0xff] %v6560_v32 }
  0x6d   : > { %492 = vst [vmem:[#allocation2 + $0x370] sm:$0xff] %v6560_v32  ;;  %493 = vst [vmem:[#allocation2 + $0x378] sm:$0xff] %v6560_v32 }
  0x6e   : > { %494 = vst [vmem:[#allocation2 + $0x380] sm:$0xff] %v6560_v32  ;;  %495 = vst [vmem:[#allocation2 + $0x388] sm:$0xff] %v6560_v32 }
  0x6f   : > { %496 = vst [vmem:[#allocation2 + $0x390] sm:$0xff] %v6560_v32  ;;  %497 = vst [vmem:[#allocation2 + $0x398] sm:$0xff] %v6560_v32 }
  0x70   : > { %498 = vst [vmem:[#allocation2 + $0x3a0] sm:$0xff] %v6560_v32  ;;  %499 = vst [vmem:[#allocation2 + $0x3a8] sm:$0xff] %v6560_v32 }
  0x71   : > { %500 = vst [vmem:[#allocation2 + $0x3b0] sm:$0xff] %v6560_v32  ;;  %501 = vst [vmem:[#allocation2 + $0x3b8] sm:$0xff] %v6560_v32 }
  0x72   : > { %502 = vst [vmem:[#allocation2 + $0x3c0] sm:$0xff] %v6560_v32  ;;  %503 = vst [vmem:[#allocation2 + $0x3c8] sm:$0xff] %v6560_v32 }
  0x73   : > { %504 = vst [vmem:[#allocation2 + $0x3d0] sm:$0xff] %v6560_v32  ;;  %505 = vst [vmem:[#allocation2 + $0x3d8] sm:$0xff] %v6560_v32 }
  0x74   : > { %506 = vst [vmem:[#allocation2 + $0x3e0] sm:$0xff] %v6560_v32  ;;  %507 = vst [vmem:[#allocation2 + $0x3e8] sm:$0xff] %v6560_v32 }
  0x75   : > { %508 = vst [vmem:[#allocation2 + $0x3f0] sm:$0xff] %v6560_v32  ;;  %509 = vst [vmem:[#allocation2 + $0x3f8] sm:$0xff] %v6560_v32 }
  0x76   : > { %510 = vst [vmem:[#allocation2 + $0x400] sm:$0xff] %v6560_v32  ;;  %511 = vst [vmem:[#allocation2 + $0x408] sm:$0xff] %v6560_v32 }
  0x77   : > { %512 = vst [vmem:[#allocation2 + $0x410] sm:$0xff] %v6560_v32  ;;  %513 = vst [vmem:[#allocation2 + $0x418] sm:$0xff] %v6560_v32 }
  0x78   : > { %514 = vst [vmem:[#allocation2 + $0x420] sm:$0xff] %v6560_v32  ;;  %515 = vst [vmem:[#allocation2 + $0x428] sm:$0xff] %v6560_v32 }
  0x79   : > { %516 = vst [vmem:[#allocation2 + $0x430] sm:$0xff] %v6560_v32  ;;  %517 = vst [vmem:[#allocation2 + $0x438] sm:$0xff] %v6560_v32 }
  0x7a   : > { %518 = vst [vmem:[#allocation2 + $0x440] sm:$0xff] %v6560_v32  ;;  %519 = vst [vmem:[#allocation2 + $0x448] sm:$0xff] %v6560_v32 }
  0x7b   : > { %520 = vst [vmem:[#allocation2 + $0x450] sm:$0xff] %v6560_v32  ;;  %521 = vst [vmem:[#allocation2 + $0x458] sm:$0xff] %v6560_v32 }
  0x7c   : > { %522 = vst [vmem:[#allocation2 + $0x460] sm:$0xff] %v6560_v32  ;;  %523 = vst [vmem:[#allocation2 + $0x468] sm:$0xff] %v6560_v32 }
  0x7d   : > { %524 = vst [vmem:[#allocation2 + $0x470] sm:$0xff] %v6560_v32  ;;  %525 = vst [vmem:[#allocation2 + $0x478] sm:$0xff] %v6560_v32 }
  0x7e   : > { %526 = vst [vmem:[#allocation2 + $0x480] sm:$0xff] %v6560_v32  ;;  %527 = vst [vmem:[#allocation2 + $0x488] sm:$0xff] %v6560_v32 }
  0x7f   : > { %528 = vst [vmem:[#allocation2 + $0x490] sm:$0xff] %v6560_v32  ;;  %529 = vst [vmem:[#allocation2 + $0x498] sm:$0xff] %v6560_v32 }
  0x80   : > { %530 = vst [vmem:[#allocation2 + $0x4a0] sm:$0xff] %v6560_v32  ;;  %531 = vst [vmem:[#allocation2 + $0x4a8] sm:$0xff] %v6560_v32 }
  0x81   : > { %532 = vst [vmem:[#allocation2 + $0x4b0] sm:$0xff] %v6560_v32  ;;  %533 = vst [vmem:[#allocation2 + $0x4b8] sm:$0xff] %v6560_v32 }
  0x82   : > { %534 = vst [vmem:[#allocation2 + $0x4c0] sm:$0xff] %v6560_v32  ;;  %535 = vst [vmem:[#allocation2 + $0x4c8] sm:$0xff] %v6560_v32 }
  0x83   : > { %536 = vst [vmem:[#allocation2 + $0x4d0] sm:$0xff] %v6560_v32  ;;  %537 = vst [vmem:[#allocation2 + $0x4d8] sm:$0xff] %v6560_v32 }
  0x84   : > { %538 = vst [vmem:[#allocation2 + $0x4e0] sm:$0xff] %v6560_v32  ;;  %539 = vst [vmem:[#allocation2 + $0x4e8] sm:$0xff] %v6560_v32 }
  0x85   : > { %540 = vst [vmem:[#allocation2 + $0x4f0] sm:$0xff] %v6560_v32  ;;  %541 = vst [vmem:[#allocation2 + $0x4f8] sm:$0xff] %v6560_v32 }
  0x86   : > { %542 = vst [vmem:[#allocation2 + $0x500] sm:$0xff] %v6560_v32  ;;  %543 = vst [vmem:[#allocation2 + $0x508] sm:$0xff] %v6560_v32 }
  0x87   : > { %544 = vst [vmem:[#allocation2 + $0x510] sm:$0xff] %v6560_v32  ;;  %545 = vst [vmem:[#allocation2 + $0x518] sm:$0xff] %v6560_v32 }
  0x88   : > { %546 = vst [vmem:[#allocation2 + $0x520] sm:$0xff] %v6560_v32  ;;  %547 = vst [vmem:[#allocation2 + $0x528] sm:$0xff] %v6560_v32 }
  0x89   : > { %548 = vst [vmem:[#allocation2 + $0x530] sm:$0xff] %v6560_v32  ;;  %549 = vst [vmem:[#allocation2 + $0x538] sm:$0xff] %v6560_v32 }
  0x8a   : > { %550 = vst [vmem:[#allocation2 + $0x540] sm:$0xff] %v6560_v32  ;;  %551 = vst [vmem:[#allocation2 + $0x548] sm:$0xff] %v6560_v32 }
  0x8b   : > { %552 = vst [vmem:[#allocation2 + $0x550] sm:$0xff] %v6560_v32  ;;  %553 = vst [vmem:[#allocation2 + $0x558] sm:$0xff] %v6560_v32 }
  0x8c   : > { %554 = vst [vmem:[#allocation2 + $0x560] sm:$0xff] %v6560_v32  ;;  %555 = vst [vmem:[#allocation2 + $0x568] sm:$0xff] %v6560_v32 }
  0x8d   : > { %556 = vst [vmem:[#allocation2 + $0x570] sm:$0xff] %v6560_v32  ;;  %557 = vst [vmem:[#allocation2 + $0x578] sm:$0xff] %v6560_v32 }
  0x8e   : > { %558 = vst [vmem:[#allocation2 + $0x580] sm:$0xff] %v6560_v32  ;;  %559 = vst [vmem:[#allocation2 + $0x588] sm:$0xff] %v6560_v32 }
  0x8f   : > { %560 = vst [vmem:[#allocation2 + $0x590] sm:$0xff] %v6560_v32  ;;  %561 = vst [vmem:[#allocation2 + $0x598] sm:$0xff] %v6560_v32 }
  0x90   : > { %562 = vst [vmem:[#allocation2 + $0x5a0] sm:$0xff] %v6560_v32  ;;  %563 = vst [vmem:[#allocation2 + $0x5a8] sm:$0xff] %v6560_v32 }
  0x91   : > { %564 = vst [vmem:[#allocation2 + $0x5b0] sm:$0xff] %v6560_v32  ;;  %565 = vst [vmem:[#allocation2 + $0x5b8] sm:$0xff] %v6560_v32 }
  0x92   : > { %566 = vst [vmem:[#allocation2 + $0x5c0] sm:$0xff] %v6560_v32  ;;  %567 = vst [vmem:[#allocation2 + $0x5c8] sm:$0xff] %v6560_v32 }
  0x93   : > { %568 = vst [vmem:[#allocation2 + $0x5d0] sm:$0xff] %v6560_v32  ;;  %569 = vst [vmem:[#allocation2 + $0x5d8] sm:$0xff] %v6560_v32 }
  0x94   : > { %570 = vst [vmem:[#allocation2 + $0x5e0] sm:$0xff] %v6560_v32  ;;  %571 = vst [vmem:[#allocation2 + $0x5e8] sm:$0xff] %v6560_v32 }
  0x95   : > { %572 = vst [vmem:[#allocation2 + $0x5f0] sm:$0xff] %v6560_v32  ;;  %573 = vst [vmem:[#allocation2 + $0x5f8] sm:$0xff] %v6560_v32 }
  0x96   : > { %574 = vst [vmem:[#allocation2 + $0x600] sm:$0xff] %v6560_v32  ;;  %575 = vst [vmem:[#allocation2 + $0x608] sm:$0xff] %v6560_v32 }
  0x97   : > { %576 = vst [vmem:[#allocation2 + $0x610] sm:$0xff] %v6560_v32  ;;  %577 = vst [vmem:[#allocation2 + $0x618] sm:$0xff] %v6560_v32 }
  0x98   : > { %578 = vst [vmem:[#allocation2 + $0x620] sm:$0xff] %v6560_v32  ;;  %579 = vst [vmem:[#allocation2 + $0x628] sm:$0xff] %v6560_v32 }
  0x99   : > { %580 = vst [vmem:[#allocation2 + $0x630] sm:$0xff] %v6560_v32  ;;  %581 = vst [vmem:[#allocation2 + $0x638] sm:$0xff] %v6560_v32 }
  0x9a   : > { %582 = vst [vmem:[#allocation2 + $0x640] sm:$0xff] %v6560_v32  ;;  %583 = vst [vmem:[#allocation2 + $0x648] sm:$0xff] %v6560_v32 }
  0x9b   : > { %584 = vst [vmem:[#allocation2 + $0x650] sm:$0xff] %v6560_v32  ;;  %585 = vst [vmem:[#allocation2 + $0x658] sm:$0xff] %v6560_v32 }
  0x9c   : > { %586 = vst [vmem:[#allocation2 + $0x660] sm:$0xff] %v6560_v32  ;;  %587 = vst [vmem:[#allocation2 + $0x668] sm:$0xff] %v6560_v32 }
  0x9d   : > { %588 = vst [vmem:[#allocation2 + $0x670] sm:$0xff] %v6560_v32  ;;  %589 = vst [vmem:[#allocation2 + $0x678] sm:$0xff] %v6560_v32 }
  0x9e   : > { %590 = vst [vmem:[#allocation2 + $0x680] sm:$0xff] %v6560_v32  ;;  %591 = vst [vmem:[#allocation2 + $0x688] sm:$0xff] %v6560_v32 }
  0x9f   : > { %592 = vst [vmem:[#allocation2 + $0x690] sm:$0xff] %v6560_v32  ;;  %593 = vst [vmem:[#allocation2 + $0x698] sm:$0xff] %v6560_v32 }
  0xa0   : > { %594 = vst [vmem:[#allocation2 + $0x6a0] sm:$0xff] %v6560_v32  ;;  %595 = vst [vmem:[#allocation2 + $0x6a8] sm:$0xff] %v6560_v32 }
  0xa1   : > { %596 = vst [vmem:[#allocation2 + $0x6b0] sm:$0xff] %v6560_v32  ;;  %597 = vst [vmem:[#allocation2 + $0x6b8] sm:$0xff] %v6560_v32 }
  0xa2   : > { %598 = vst [vmem:[#allocation2 + $0x6c0] sm:$0xff] %v6560_v32  ;;  %599 = vst [vmem:[#allocation2 + $0x6c8] sm:$0xff] %v6560_v32 }
  0xa3   : > { %600 = vst [vmem:[#allocation2 + $0x6d0] sm:$0xff] %v6560_v32  ;;  %601 = vst [vmem:[#allocation2 + $0x6d8] sm:$0xff] %v6560_v32 }
  0xa4   : > { %602 = vst [vmem:[#allocation2 + $0x6e0] sm:$0xff] %v6560_v32  ;;  %603 = vst [vmem:[#allocation2 + $0x6e8] sm:$0xff] %v6560_v32 }
  0xa5   : > { %604 = vst [vmem:[#allocation2 + $0x6f0] sm:$0xff] %v6560_v32  ;;  %605 = vst [vmem:[#allocation2 + $0x6f8] sm:$0xff] %v6560_v32 }
  0xa6   : > { %606 = vst [vmem:[#allocation2 + $0x700] sm:$0xff] %v6560_v32  ;;  %607 = vst [vmem:[#allocation2 + $0x708] sm:$0xff] %v6560_v32 }
  0xa7   : > { %608 = vst [vmem:[#allocation2 + $0x710] sm:$0xff] %v6560_v32  ;;  %609 = vst [vmem:[#allocation2 + $0x718] sm:$0xff] %v6560_v32 }
  0xa8   : > { %610 = vst [vmem:[#allocation2 + $0x720] sm:$0xff] %v6560_v32  ;;  %611 = vst [vmem:[#allocation2 + $0x728] sm:$0xff] %v6560_v32 }
  0xa9   : > { %612 = vst [vmem:[#allocation2 + $0x730] sm:$0xff] %v6560_v32  ;;  %613 = vst [vmem:[#allocation2 + $0x738] sm:$0xff] %v6560_v32 }
  0xaa   : > { %614 = vst [vmem:[#allocation2 + $0x740] sm:$0xff] %v6560_v32  ;;  %615 = vst [vmem:[#allocation2 + $0x748] sm:$0xff] %v6560_v32 }
  0xab   : > { %616 = vst [vmem:[#allocation2 + $0x750] sm:$0xff] %v6560_v32  ;;  %617 = vst [vmem:[#allocation2 + $0x758] sm:$0xff] %v6560_v32 }
  0xac   : > { %618 = vst [vmem:[#allocation2 + $0x760] sm:$0xff] %v6560_v32  ;;  %619 = vst [vmem:[#allocation2 + $0x768] sm:$0xff] %v6560_v32 }
  0xad   : > { %620 = vst [vmem:[#allocation2 + $0x770] sm:$0xff] %v6560_v32  ;;  %621 = vst [vmem:[#allocation2 + $0x778] sm:$0xff] %v6560_v32 }
  0xae   : > { %622 = vst [vmem:[#allocation2 + $0x780] sm:$0xff] %v6560_v32  ;;  %623 = vst [vmem:[#allocation2 + $0x788] sm:$0xff] %v6560_v32 }
  0xaf   : > { %624 = vst [vmem:[#allocation2 + $0x790] sm:$0xff] %v6560_v32  ;;  %625 = vst [vmem:[#allocation2 + $0x798] sm:$0xff] %v6560_v32 }
  0xb0   : > { %626 = vst [vmem:[#allocation2 + $0x7a0] sm:$0xff] %v6560_v32  ;;  %627 = vst [vmem:[#allocation2 + $0x7a8] sm:$0xff] %v6560_v32 }
  0xb1   : > { %628 = vst [vmem:[#allocation2 + $0x7b0] sm:$0xff] %v6560_v32  ;;  %629 = vst [vmem:[#allocation2 + $0x7b8] sm:$0xff] %v6560_v32 }
  0xb2   : > { %630 = vst [vmem:[#allocation2 + $0x7c0] sm:$0xff] %v6560_v32  ;;  %631 = vst [vmem:[#allocation2 + $0x7c8] sm:$0xff] %v6560_v32 }
  0xb3   : > { %632 = vst [vmem:[#allocation2 + $0x7d0] sm:$0xff] %v6560_v32  ;;  %633 = vst [vmem:[#allocation2 + $0x7d8] sm:$0xff] %v6560_v32 }
  0xb4   : > { %634 = vst [vmem:[#allocation2 + $0x7e0] sm:$0xff] %v6560_v32  ;;  %635 = vst [vmem:[#allocation2 + $0x7e8] sm:$0xff] %v6560_v32 }
  0xb5   : > { %636 = vst [vmem:[#allocation2 + $0x7f0] sm:$0xff] %v6560_v32  ;;  %637 = vst [vmem:[#allocation2 + $0x7f8] sm:$0xff] %v6560_v32 }
  0xb6 PF: > { %s5495_s15 = sshll.u32 %s6542_s17, 8  ;;  %v6391_v33 = vld [vmem:[%s6723_s30 + $0x4] ss:$8 sps:$4 sm:$0xff]   ;;  %p5658_p12 = scmp.ne.s32.totalorder %s6542_s17, 1 }
  0xb7   : > { %s639_s18 = sshra.s32 %s5495_s15, 3  ;;  %1892 = vmatprep.mubr.bf16.mxu0 %v6391_v33  ;;  %2085 = vmatprep.mubr.bf16.mxu1 %v6391_v33 }
  0xb8   : > { %s5758_s5 = sshll.u32 %s639_s18, 5 }
  0xb9   : > { %s6987_s8 = scalar_lea.vmem %s7937_s1, %s5758_s5 }
  0xba   : > { %v644_v34 = vld [vmem:[%s6987_s8] sm:$0xff]  ;;  %v645_v36 = vld [vmem:[%s6987_s8 + $0x8] sm:$0xff] }
  0xbb   : > { %v648_v35 = vld [vmem:[%s6987_s8 + $0x20] sm:$0xff]  ;;  %v649_v38 = vld [vmem:[%s6987_s8 + $0x28] sm:$0xff] }
  0xbc   : > { %v5531_v37 = vcombine.high %v644_v34, %v648_v35  ;;  %v5530_v39 = vcombine.low %v644_v34, %v648_v35  ;;  %v652_v40 = vld [vmem:[%s6987_s8 + $0x40] sm:$0xff]  ;;  %v5533_v42 = vcombine.high %v645_v36, %v649_v38  ;;  %v5532_v43 = vcombine.low %v645_v36, %v649_v38  ;;  %v653_v45 = vld [vmem:[%s6987_s8 + $0x48] sm:$0xff] }
  0xbd   : > { %v656_v41 = vld [vmem:[%s6987_s8 + $0x60] sm:$0xff]  ;;  %v657_v46 = vld [vmem:[%s6987_s8 + $0x68] sm:$0xff] }
  0xbe   : > { %v5539_v44 = vcombine.high %v652_v40, %v656_v41  ;;  %v660_v47 = vld [vmem:[%s6987_s8 + $0x80] sm:$0xff]  ;;  %1860 = vmatprep.subr.bf16.mxu0 %v5531_v37  ;;  %v5541_v48 = vcombine.high %v653_v45, %v657_v46  ;;  %v661_v50 = vld [vmem:[%s6987_s8 + $0x88] sm:$0xff]  ;;  %2053 = vmatprep.subr.bf16.mxu1 %v5533_v42  ;;  %v5538_v52 = vcombine.low %v652_v40, %v656_v41 }
  0xbf   : > { %v664_v49 = vld [vmem:[%s6987_s8 + $0xa0] sm:$0xff]  ;;  %v665_v51 = vld [vmem:[%s6987_s8 + $0xa8] sm:$0xff]  ;;  %1861 = vmatpush1.bf16.msra.mxu0 %v5530_v39  ;;  %2054 = vmatpush1.bf16.msra.mxu1 %v5532_v43  ;;  %v5540_v53 = vcombine.low %v653_v45, %v657_v46 }
  0xc0   : > { %1862 = vmatprep.subr.bf16.mxu0 %v5539_v44  ;;  %v5547_v54 = vcombine.high %v660_v47, %v664_v49  ;;  %2055 = vmatprep.subr.bf16.mxu1 %v5541_v48  ;;  %v5549_v55 = vcombine.high %v661_v50, %v665_v51  ;;  %v668_v56 = vld [vmem:[%s6987_s8 + $0xc0] sm:$0xff]  ;;  %v669_v58 = vld [vmem:[%s6987_s8 + $0xc8] sm:$0xff]  ;;  %v5546_v60 = vcombine.low %v660_v47, %v664_v49 }
  0xc1   : > { %v672_v57 = vld [vmem:[%s6987_s8 + $0xe0] sm:$0xff]  ;;  %v673_v59 = vld [vmem:[%s6987_s8 + $0xe8] sm:$0xff]  ;;  %v5548_v61 = vcombine.low %v661_v50, %v665_v51 }
  0xc2   : > { %v5555_v62 = vcombine.high %v668_v56, %v672_v57  ;;  %v5557_v63 = vcombine.high %v669_v58, %v673_v59  ;;  %v676_v0 = vld [vmem:[%s6987_s8 + $0x100] sm:$0xff]  ;;  %v677_v2 = vld [vmem:[%s6987_s8 + $0x108] sm:$0xff]  ;;  %v5554_v4 = vcombine.low %v668_v56, %v672_v57  ;;  %v5556_v5 = vcombine.low %v669_v58, %v673_v59 }
  0xc3   : > { %1863 = vmatpush1.bf16.msra.mxu0 %v5538_v52  ;;  %2056 = vmatpush1.bf16.msra.mxu1 %v5540_v53  ;;  %v680_v1 = vld [vmem:[%s6987_s8 + $0x120] sm:$0xff]  ;;  %v681_v3 = vld [vmem:[%s6987_s8 + $0x128] sm:$0xff] }
  0xc4   : > { %1864 = vmatprep.subr.bf16.mxu0 %v5547_v54  ;;  %2057 = vmatprep.subr.bf16.mxu1 %v5549_v55  ;;  %v5563_v6 = vcombine.high %v676_v0, %v680_v1  ;;  %v5565_v7 = vcombine.high %v677_v2, %v681_v3  ;;  %v684_v8 = vld [vmem:[%s6987_s8 + $0x140] sm:$0xff]  ;;  %v685_v10 = vld [vmem:[%s6987_s8 + $0x148] sm:$0xff]  ;;  %v5562_v12 = vcombine.low %v676_v0, %v680_v1 }
  0xc5   : > { %v688_v9 = vld [vmem:[%s6987_s8 + $0x160] sm:$0xff]  ;;  %v689_v11 = vld [vmem:[%s6987_s8 + $0x168] sm:$0xff]  ;;  %v5564_v13 = vcombine.low %v677_v2, %v681_v3 }
  0xc6   : > { %v5571_v14 = vcombine.high %v684_v8, %v688_v9  ;;  %v5573_v15 = vcombine.high %v685_v10, %v689_v11  ;;  %v692_v16 = vld [vmem:[%s6987_s8 + $0x180] sm:$0xff]  ;;  %v693_v18 = vld [vmem:[%s6987_s8 + $0x188] sm:$0xff]  ;;  %v5570_v20 = vcombine.low %v684_v8, %v688_v9  ;;  %v5572_v21 = vcombine.low %v685_v10, %v689_v11 }
  0xc7   : > { %1865 = vmatpush1.bf16.msra.mxu0 %v5546_v60  ;;  %2058 = vmatpush1.bf16.msra.mxu1 %v5548_v61  ;;  %v696_v17 = vld [vmem:[%s6987_s8 + $0x1a0] sm:$0xff]  ;;  %v697_v19 = vld [vmem:[%s6987_s8 + $0x1a8] sm:$0xff] }
  0xc8   : > { %1866 = vmatprep.subr.bf16.mxu0 %v5555_v62  ;;  %2059 = vmatprep.subr.bf16.mxu1 %v5557_v63  ;;  %v5579_v22 = vcombine.high %v692_v16, %v696_v17  ;;  %v5581_v23 = vcombine.high %v693_v18, %v697_v19  ;;  %v700_v24 = vld [vmem:[%s6987_s8 + $0x1c0] sm:$0xff]  ;;  %v701_v26 = vld [vmem:[%s6987_s8 + $0x1c8] sm:$0xff]  ;;  %v5578_v28 = vcombine.low %v692_v16, %v696_v17 }
  0xc9   : > { %v704_v25 = vld [vmem:[%s6987_s8 + $0x1e0] sm:$0xff]  ;;  %v705_v27 = vld [vmem:[%s6987_s8 + $0x1e8] sm:$0xff]  ;;  %v5580_v29 = vcombine.low %v693_v18, %v697_v19 }
  0xca   : > { %v5587_v30 = vcombine.high %v700_v24, %v704_v25  ;;  %v5589_v31 = vcombine.high %v701_v26, %v705_v27  ;;  %v708_v32 = vld [vmem:[%s6987_s8 + $0x200] sm:$0xff]  ;;  %v709_v34 = vld [vmem:[%s6987_s8 + $0x208] sm:$0xff]  ;;  %v5586_v36 = vcombine.low %v700_v24, %v704_v25  ;;  %v5588_v37 = vcombine.low %v701_v26, %v705_v27 }
  0xcb   : > { %1867 = vmatpush1.bf16.msra.mxu0 %v5554_v4  ;;  %2060 = vmatpush1.bf16.msra.mxu1 %v5556_v5  ;;  %v712_v33 = vld [vmem:[%s6987_s8 + $0x220] sm:$0xff]  ;;  %v713_v35 = vld [vmem:[%s6987_s8 + $0x228] sm:$0xff] }
  0xcc   : > { %1868 = vmatprep.subr.bf16.mxu0 %v5563_v6  ;;  %2061 = vmatprep.subr.bf16.mxu1 %v5565_v7  ;;  %v5595_v38 = vcombine.high %v708_v32, %v712_v33  ;;  %v5597_v39 = vcombine.high %v709_v34, %v713_v35  ;;  %v716_v40 = vld [vmem:[%s6987_s8 + $0x240] sm:$0xff]  ;;  %v717_v42 = vld [vmem:[%s6987_s8 + $0x248] sm:$0xff]  ;;  %v5594_v44 = vcombine.low %v708_v32, %v712_v33  ;;  %v646_v32 = vld [vmem:[%s6987_s8 + $0x10] sm:$0xff] }
  0xcd   : > { %v720_v41 = vld [vmem:[%s6987_s8 + $0x260] sm:$0xff]  ;;  %v721_v43 = vld [vmem:[%s6987_s8 + $0x268] sm:$0xff]  ;;  %v5596_v45 = vcombine.low %v709_v34, %v713_v35  ;;  %v650_v33 = vld [vmem:[%s6987_s8 + $0x30] sm:$0xff] }
  0xce   : > { %v5603_v46 = vcombine.high %v716_v40, %v720_v41  ;;  %v5605_v47 = vcombine.high %v717_v42, %v721_v43  ;;  %v724_v48 = vld [vmem:[%s6987_s8 + $0x280] sm:$0xff]  ;;  %v725_v50 = vld [vmem:[%s6987_s8 + $0x288] sm:$0xff]  ;;  %v5602_v52 = vcombine.low %v716_v40, %v720_v41  ;;  %v5604_v53 = vcombine.low %v717_v42, %v721_v43  ;;  %v647_v34 = vld [vmem:[%s6987_s8 + $0x18] sm:$0xff] }
  0xcf   : > { %1869 = vmatpush1.bf16.msra.mxu0 %v5562_v12  ;;  %2062 = vmatpush1.bf16.msra.mxu1 %v5564_v13  ;;  %v728_v49 = vld [vmem:[%s6987_s8 + $0x2a0] sm:$0xff]  ;;  %v729_v51 = vld [vmem:[%s6987_s8 + $0x2a8] sm:$0xff]  ;;  %v651_v35 = vld [vmem:[%s6987_s8 + $0x38] sm:$0xff]  ;;  %v5534_v43 = vcombine.low %v646_v32, %v650_v33 }
  0xd0   : > { %1870 = vmatprep.subr.bf16.mxu0 %v5571_v14  ;;  %2063 = vmatprep.subr.bf16.mxu1 %v5573_v15  ;;  %v5611_v54 = vcombine.high %v724_v48, %v728_v49  ;;  %v5613_v55 = vcombine.high %v725_v50, %v729_v51  ;;  %v732_v56 = vld [vmem:[%s6987_s8 + $0x2c0] sm:$0xff]  ;;  %v733_v58 = vld [vmem:[%s6987_s8 + $0x2c8] sm:$0xff]  ;;  %v5610_v60 = vcombine.low %v724_v48, %v728_v49  ;;  %v654_v41 = vld [vmem:[%s6987_s8 + $0x50] sm:$0xff] }
  0xd1   : > { %v736_v57 = vld [vmem:[%s6987_s8 + $0x2e0] sm:$0xff]  ;;  %v737_v59 = vld [vmem:[%s6987_s8 + $0x2e8] sm:$0xff]  ;;  %v5612_v61 = vcombine.low %v725_v50, %v729_v51  ;;  %v658_v42 = vld [vmem:[%s6987_s8 + $0x70] sm:$0xff] }
  0xd2   : > { %v5619_v62 = vcombine.high %v732_v56, %v736_v57  ;;  %v5621_v63 = vcombine.high %v733_v58, %v737_v59  ;;  %v740_v0 = vld [vmem:[%s6987_s8 + $0x300] sm:$0xff]  ;;  %v741_v2 = vld [vmem:[%s6987_s8 + $0x308] sm:$0xff]  ;;  %v5618_v4 = vcombine.low %v732_v56, %v736_v57  ;;  %v5620_v5 = vcombine.low %v733_v58, %v737_v59  ;;  %v662_v49 = vld [vmem:[%s6987_s8 + $0x90] sm:$0xff] }
  0xd3   : > { %1871 = vmatpush1.bf16.msra.mxu0 %v5570_v20  ;;  %2064 = vmatpush1.bf16.msra.mxu1 %v5572_v21  ;;  %v744_v1 = vld [vmem:[%s6987_s8 + $0x320] sm:$0xff]  ;;  %v745_v3 = vld [vmem:[%s6987_s8 + $0x328] sm:$0xff]  ;;  %v5543_v48 = vcombine.high %v654_v41, %v658_v42  ;;  %v666_v50 = vld [vmem:[%s6987_s8 + $0xb0] sm:$0xff] }
  0xd4   : > { %1872 = vmatprep.subr.bf16.mxu0 %v5579_v22  ;;  %2065 = vmatprep.subr.bf16.mxu1 %v5581_v23  ;;  %v5627_v6 = vcombine.high %v740_v0, %v744_v1  ;;  %v5629_v7 = vcombine.high %v741_v2, %v745_v3  ;;  %v748_v8 = vld [vmem:[%s6987_s8 + $0x340] sm:$0xff]  ;;  %v749_v10 = vld [vmem:[%s6987_s8 + $0x348] sm:$0xff]  ;;  %v5626_v12 = vcombine.low %v740_v0, %v744_v1  ;;  %v7076_v58 = vld [vmem:[%s6723_s30 + $0x10] ss:$8 sps:$4 sm:$0xff]  }
  0xd5   : > { %v752_v9 = vld [vmem:[%s6987_s8 + $0x360] sm:$0xff]  ;;  %v753_v11 = vld [vmem:[%s6987_s8 + $0x368] sm:$0xff]  ;;  %v5628_v13 = vcombine.low %v741_v2, %v745_v3  ;;  %v5551_v56 = vcombine.high %v662_v49, %v666_v50  ;;  %v670_v59 = vld [vmem:[%s6987_s8 + $0xd0] sm:$0xff]  ;;  %v5550_v0 = vcombine.low %v662_v49, %v666_v50 }
  0xd6   : > { %v5635_v14 = vcombine.high %v748_v8, %v752_v9  ;;  %v5637_v15 = vcombine.high %v749_v10, %v753_v11  ;;  %v756_v16 = vld [vmem:[%s6987_s8 + $0x380] sm:$0xff]  ;;  %v757_v18 = vld [vmem:[%s6987_s8 + $0x388] sm:$0xff]  ;;  %v5634_v20 = vcombine.low %v748_v8, %v752_v9  ;;  %v5636_v21 = vcombine.low %v749_v10, %v753_v11 }
  0xd7   : > { %1873 = vmatpush1.bf16.msra.mxu0 %v5578_v28  ;;  %2066 = vmatpush1.bf16.msra.mxu1 %v5580_v29  ;;  %v760_v17 = vld [vmem:[%s6987_s8 + $0x3a0] sm:$0xff]  ;;  %v761_v19 = vld [vmem:[%s6987_s8 + $0x3a8] sm:$0xff] }
  0xd8   : > { %1874 = vmatprep.subr.bf16.mxu0 %v5587_v30  ;;  %2067 = vmatprep.subr.bf16.mxu1 %v5589_v31  ;;  %v5643_v22 = vcombine.high %v756_v16, %v760_v17  ;;  %v5645_v23 = vcombine.high %v757_v18, %v761_v19  ;;  %v764_v24 = vld [vmem:[%s6987_s8 + $0x3c0] sm:$0xff]  ;;  %v765_v26 = vld [vmem:[%s6987_s8 + $0x3c8] sm:$0xff]  ;;  %v5642_v28 = vcombine.low %v756_v16, %v760_v17  ;;  %v687_v16 = vld [vmem:[%s6987_s8 + $0x158] sm:$0xff] }
  0xd9   : > { %v768_v25 = vld [vmem:[%s6987_s8 + $0x3e0] sm:$0xff]  ;;  %v769_v27 = vld [vmem:[%s6987_s8 + $0x3e8] sm:$0xff]  ;;  %v5644_v29 = vcombine.low %v757_v18, %v761_v19  ;;  %v691_v17 = vld [vmem:[%s6987_s8 + $0x178] sm:$0xff] }
  0xda   : > { %v5651_v30 = vcombine.high %v764_v24, %v768_v25  ;;  %v5653_v31 = vcombine.high %v765_v26, %v769_v27  ;;  %v7058_v40 = vld [vmem:[%s6723_s30] ss:$8 sps:$4 sm:$0xff]  }
  0xdb   : > { %1875 = vmatpush1.bf16.msra.mxu0 %v5586_v36  ;;  %2068 = vmatpush1.bf16.msra.mxu1 %v5588_v37  ;;  %v5650_v36 = vcombine.low %v764_v24, %v768_v25  ;;  %v5652_v37 = vcombine.low %v765_v26, %v769_v27  ;;  %v7094_v11 = vld [vmem:[%s6723_s30 + $0x20] ss:$8 sps:$4 sm:$0xff]   ;;  %v695_v24 = vld [vmem:[%s6987_s8 + $0x198] sm:$0xff]  ;;  %v5576_v27 = vcombine.low %v687_v16, %v691_v17 }
  0xdc   : > { %1876 = vmatprep.subr.bf16.mxu0 %v5595_v38  ;;  %2069 = vmatprep.subr.bf16.mxu1 %v5597_v39  ;;  %v5535_v38 = vcombine.high %v646_v32, %v650_v33  ;;  %v5537_v39 = vcombine.high %v647_v34, %v651_v35  ;;  %v699_v25 = vld [vmem:[%s6987_s8 + $0x1b8] sm:$0xff]  ;;  %v706_v32 = vld [vmem:[%s6987_s8 + $0x1f0] sm:$0xff]  ;;  %v7117_v33 = vld [vmem:[%s6723_s30 + $0x44] ss:$8 sps:$4 sm:$0xff]  }
  0xdd   : > { %v7130_v49 = vld [vmem:[%s6723_s30 + $0x40] ss:$8 sps:$4 sm:$0xff]  }
  0xdf   : > { %1877 = vmatpush1.bf16.msra.mxu0 %v5594_v44  ;;  %2070 = vmatpush1.bf16.msra.mxu1 %v5596_v45  ;;  %v655_v44 = vld [vmem:[%s6987_s8 + $0x58] sm:$0xff] }
  0xe0   : > { %1878 = vmatprep.subr.bf16.mxu0 %v5603_v46  ;;  %2071 = vmatprep.subr.bf16.mxu1 %v5605_v47  ;;  %v659_v45 = vld [vmem:[%s6987_s8 + $0x78] sm:$0xff]  ;;  %v5536_v46 = vcombine.low %v647_v34, %v651_v35 }
  0xe1   : > { %v7065_v47 = vld [vmem:[%s6723_s30 + $0x14] ss:$8 sps:$4 sm:$0xff]   ;;  %v5545_v51 = vcombine.high %v655_v44, %v659_v45 }
  0xe2   : > { %v703_v34 = vld [vmem:[%s6987_s8 + $0x1d8] sm:$0xff] }
  0xe3   : > { %1879 = vmatpush1.bf16.msra.mxu0 %v5602_v52  ;;  %2072 = vmatpush1.bf16.msra.mxu1 %v5604_v53  ;;  %v663_v52 = vld [vmem:[%s6987_s8 + $0x98] sm:$0xff] }
  0xe4   : > { %1880 = vmatprep.subr.bf16.mxu0 %v5611_v54  ;;  %2073 = vmatprep.subr.bf16.mxu1 %v5613_v55  ;;  %v667_v53 = vld [vmem:[%s6987_s8 + $0xb8] sm:$0xff]  ;;  %v5542_v54 = vcombine.low %v654_v41, %v658_v42  ;;  %v5544_v55 = vcombine.low %v655_v44, %v659_v45  ;;  %v710_v41 = vld [vmem:[%s6987_s8 + $0x210] sm:$0xff] }
  0xe5   : > { %v5553_v57 = vcombine.high %v663_v52, %v667_v53  ;;  %v5552_v1 = vcombine.low %v663_v52, %v667_v53  ;;  %v707_v35 = vld [vmem:[%s6987_s8 + $0x1f8] sm:$0xff]  ;;  %v714_v42 = vld [vmem:[%s6987_s8 + $0x230] sm:$0xff] }
  0xe6   : > { %v715_v44 = vld [vmem:[%s6987_s8 + $0x238] sm:$0xff]  ;;  %v722_v52 = vld [vmem:[%s6987_s8 + $0x270] sm:$0xff] }
  0xe7   : > { %1881 = vmatpush1.bf16.msra.mxu0 %v5610_v60  ;;  %2074 = vmatpush1.bf16.msra.mxu1 %v5612_v61  ;;  %v674_v60 = vld [vmem:[%s6987_s8 + $0xf0] sm:$0xff]  ;;  %v7081_v61 = vld [vmem:[%s6723_s30 + $0x24] ss:$8 sps:$4 sm:$0xff]  }
  0xe8   : > { %1882 = vmatprep.subr.bf16.mxu0 %v5619_v62  ;;  %2075 = vmatprep.subr.bf16.mxu1 %v5621_v63  ;;  %v671_v62 = vld [vmem:[%s6987_s8 + $0xd8] sm:$0xff]  ;;  %v5559_v2 = vcombine.high %v670_v59, %v674_v60  ;;  %v5558_v8 = vcombine.low %v670_v59, %v674_v60 }
  0xe9   : > { %v675_v63 = vld [vmem:[%s6987_s8 + $0xf8] sm:$0xff] }
  0xea   : > { %v5561_v3 = vcombine.high %v671_v62, %v675_v63  ;;  %v5560_v9 = vcombine.low %v671_v62, %v675_v63  ;;  %v7135_v53 = vld [vmem:[%s6723_s30 + $0x54] ss:$8 sps:$4 sm:$0xff]  }
  0xeb   : > { %1883 = vmatpush1.bf16.msra.mxu0 %v5618_v4  ;;  %2076 = vmatpush1.bf16.msra.mxu1 %v5620_v5  ;;  %v678_v4 = vld [vmem:[%s6987_s8 + $0x110] sm:$0xff] }
  0xec   : > { %1884 = vmatprep.subr.bf16.mxu0 %v5627_v6  ;;  %2077 = vmatprep.subr.bf16.mxu1 %v5629_v7  ;;  %v682_v5 = vld [vmem:[%s6987_s8 + $0x130] sm:$0xff]  ;;  %v679_v6 = vld [vmem:[%s6987_s8 + $0x118] sm:$0xff] }
  0xed   : > { %v683_v7 = vld [vmem:[%s6987_s8 + $0x138] sm:$0xff]  ;;  %v5567_v10 = vcombine.high %v678_v4, %v682_v5  ;;  %v5566_v18 = vcombine.low %v678_v4, %v682_v5  ;;  %v726_v62 = vld [vmem:[%s6987_s8 + $0x290] sm:$0xff] }
  0xee   : > { %v5568_v19 = vcombine.low %v679_v6, %v683_v7  ;;  %v730_v63 = vld [vmem:[%s6987_s8 + $0x2b0] sm:$0xff] }
  0xef   : > { %1885 = vmatpush1.bf16.msra.mxu0 %v5626_v12  ;;  %2078 = vmatpush1.bf16.msra.mxu1 %v5628_v13  ;;  %v5569_v12 = vcombine.high %v679_v6, %v683_v7  ;;  %v686_v13 = vld [vmem:[%s6987_s8 + $0x150] sm:$0xff]  ;;  %v5615_v4 = vcombine.high %v726_v62, %v730_v63 }
  0xf0   : > { %1886 = vmatprep.subr.bf16.mxu0 %v5635_v14  ;;  %2079 = vmatprep.subr.bf16.mxu1 %v5637_v15  ;;  %v690_v14 = vld [vmem:[%s6987_s8 + $0x170] sm:$0xff] }
  0xf1   : > { %v7099_v15 = vld [vmem:[%s6723_s30 + $0x34] ss:$8 sps:$4 sm:$0xff]   ;;  %v5574_v26 = vcombine.low %v686_v13, %v690_v14  ;;  %v7148_v5 = vld [vmem:[%s6723_s30 + $0x50] ss:$8 sps:$4 sm:$0xff]  }
  0xf2   : > { %v734_v7 = vld [vmem:[%s6987_s8 + $0x2d0] sm:$0xff] }
  0xf3   : > { %1887 = vmatpush1.bf16.msra.mxu0 %v5634_v20  ;;  %2080 = vmatpush1.bf16.msra.mxu1 %v5636_v21  ;;  %v5575_v20 = vcombine.high %v686_v13, %v690_v14  ;;  %v5577_v21 = vcombine.high %v687_v16, %v691_v17  ;;  %v5614_v13 = vcombine.low %v726_v62, %v730_v63 }
  0xf4   : > { %1888 = vmatprep.subr.bf16.mxu0 %v5643_v22  ;;  %2081 = vmatprep.subr.bf16.mxu1 %v5645_v23  ;;  %v694_v22 = vld [vmem:[%s6987_s8 + $0x190] sm:$0xff] }
  0xf5   : > { %v698_v23 = vld [vmem:[%s6987_s8 + $0x1b0] sm:$0xff] }
  0xf7   : > { %1889 = vmatpush1.bf16.msra.mxu0 %v5642_v28  ;;  %2082 = vmatpush1.bf16.msra.mxu1 %v5644_v29  ;;  %v5583_v28 = vcombine.high %v694_v22, %v698_v23  ;;  %v7112_v29 = vld [vmem:[%s6723_s30 + $0x30] ss:$8 sps:$4 sm:$0xff]  }
  0xf8   : > { %1890 = vmatprep.subr.bf16.mxu0 %v5651_v30  ;;  %2083 = vmatprep.subr.bf16.mxu1 %v5653_v31  ;;  %v5585_v30 = vcombine.high %v695_v24, %v699_v25  ;;  %v702_v31 = vld [vmem:[%s6987_s8 + $0x1d0] sm:$0xff] }
  0xf9   : > { %v5590_v45 = vcombine.low %v702_v31, %v706_v32 }
  0xfb   : > { %1891 = vmatpush1.bf16.msra.mxu0 %v5650_v36  ;;  %2084 = vmatpush1.bf16.msra.mxu1 %v5652_v37  ;;  %v5582_v36 = vcombine.low %v694_v22, %v698_v23  ;;  %v5584_v37 = vcombine.low %v695_v24, %v699_v25  ;;  %v7166_v25 = vld [vmem:[%s6723_s30 + $0x60] ss:$8 sps:$4 sm:$0xff]  }
  0xfc   : > { %2246 = vmatprep.subr.bf16.mxu0 %v5535_v38  ;;  %2439 = vmatprep.subr.bf16.mxu1 %v5537_v39  ;;  %v5591_v38 = vcombine.high %v702_v31, %v706_v32  ;;  %v5593_v39 = vcombine.high %v703_v34, %v707_v35  ;;  %v751_v31 = vld [vmem:[%s6987_s8 + $0x358] sm:$0xff] }
  0xfd   : > { %v755_v32 = vld [vmem:[%s6987_s8 + $0x378] sm:$0xff] }
  0xfe   : > { %1893 = vmatmul.mubr.bf16.vlgmr.msra.gmra.mrb[0].mxu0 %v7058_v40  ;;  %2086 = vmatmul.mubr.bf16.vlgmr.msra.gmra.mrb[0].mxu1 %v7058_v40 }
  0xff   : > { %2247 = vmatpush1.bf16.msra.mxu0 %v5534_v43  ;;  %2440 = vmatpush1.bf16.msra.mxu1 %v5536_v46  ;;  %v711_v43 = vld [vmem:[%s6987_s8 + $0x218] sm:$0xff]  ;;  %v5592_v46 = vcombine.low %v703_v34, %v707_v35 }
 0x100   : > { %1902 = vmatprep.mubr.bf16.mxu0 %v7065_v47  ;;  %2095 = vmatprep.mubr.bf16.mxu1 %v7065_v47  ;;  %v5601_v50 = vcombine.high %v711_v43, %v715_v44 }
 0x101   : > { %2248 = vmatprep.subr.bf16.mxu0 %v5543_v48  ;;  %2441 = vmatprep.subr.bf16.mxu1 %v5545_v51  ;;  %v5599_v48 = vcombine.high %v710_v41, %v714_v42  ;;  %v718_v51 = vld [vmem:[%s6987_s8 + $0x250] sm:$0xff] }
 0x102   : > { %v5607_v59 = vcombine.high %v718_v51, %v722_v52 }
 0x103   : > { %2249 = vmatpush1.bf16.msra.mxu0 %v5542_v54  ;;  %2442 = vmatpush1.bf16.msra.mxu1 %v5544_v55  ;;  %v719_v54 = vld [vmem:[%s6987_s8 + $0x258] sm:$0xff] }
 0x104   : > { %2250 = vmatprep.subr.bf16.mxu0 %v5551_v56  ;;  %2443 = vmatprep.subr.bf16.mxu1 %v5553_v57  ;;  %v723_v55 = vld [vmem:[%s6987_s8 + $0x278] sm:$0xff]  ;;  %v5598_v56 = vcombine.low %v710_v41, %v714_v42  ;;  %v5600_v57 = vcombine.low %v711_v43, %v715_v44  ;;  %v5640_v44 = vcombine.low %v751_v31, %v755_v32 }
 0x105   : > { %v5609_v60 = vcombine.high %v719_v54, %v723_v55  ;;  %v759_v41 = vld [vmem:[%s6987_s8 + $0x398] sm:$0xff] }
 0x106   : > { %1903 = vmatmul.mubr.bf16.gmra.mrb[4].mxu0 %v7076_v58  ;;  %2096 = vmatmul.mubr.bf16.gmra.mrb[4].mxu1 %v7076_v58  ;;  %v763_v42 = vld [vmem:[%s6987_s8 + $0x3b8] sm:$0xff] }
 0x107   : > { %1912 = vmatprep.mubr.bf16.mxu0 %v7081_v61  ;;  %2105 = vmatprep.mubr.bf16.mxu1 %v7081_v61 }
 0x108   : > { %2251 = vmatpush1.bf16.msra.mxu0 %v5550_v0  ;;  %2444 = vmatpush1.bf16.msra.mxu1 %v5552_v1  ;;  %v727_v0 = vld [vmem:[%s6987_s8 + $0x298] sm:$0xff] }
 0x109   : > { %2252 = vmatprep.subr.bf16.mxu0 %v5559_v2  ;;  %2445 = vmatprep.subr.bf16.mxu1 %v5561_v3  ;;  %v731_v1 = vld [vmem:[%s6987_s8 + $0x2b8] sm:$0xff]  ;;  %v5606_v2 = vcombine.low %v718_v51, %v722_v52  ;;  %v5608_v3 = vcombine.low %v719_v54, %v723_v55  ;;  %v770_v51 = vld [vmem:[%s6987_s8 + $0x3f0] sm:$0xff]  ;;  %v7189_v52 = vld [vmem:[%s6723_s30 + $0x84] ss:$8 sps:$4 sm:$0xff]  }
 0x10a   : > { %v5617_v6 = vcombine.high %v727_v0, %v731_v1  ;;  %v5616_v14 = vcombine.low %v727_v0, %v731_v1  ;;  %v767_v54 = vld [vmem:[%s6987_s8 + $0x3d8] sm:$0xff]  ;;  %v7198_v0 = vld [vmem:[%s6723_s30 + $0x80] ss:$8 sps:$4 sm:$0xff]  }
 0x10b   : > { %v771_v55 = vld [vmem:[%s6987_s8 + $0x3f8] sm:$0xff] }
 0x10c   : > { %2253 = vmatpush1.bf16.msra.mxu0 %v5558_v8  ;;  %2446 = vmatpush1.bf16.msra.mxu1 %v5560_v9  ;;  %v738_v8 = vld [vmem:[%s6987_s8 + $0x2f0] sm:$0xff]  ;;  %v7153_v9 = vld [vmem:[%s6723_s30 + $0x64] ss:$8 sps:$4 sm:$0xff]   ;;  %v5656_v63 = vcombine.low %v767_v54, %v771_v55 }
 0x10d   : > { %2254 = vmatprep.subr.bf16.mxu0 %v5567_v10  ;;  %2447 = vmatprep.subr.bf16.mxu1 %v5569_v12  ;;  %v735_v10 = vld [vmem:[%s6987_s8 + $0x2d8] sm:$0xff]  ;;  %v5623_v16 = vcombine.high %v734_v7, %v738_v8  ;;  %v5622_v22 = vcombine.low %v734_v7, %v738_v8  ;;  %v7231_v8 = vld [vmem:[%s6723_s30 + $0xc4] ss:$8 sps:$4 sm:$0xff]  }
 0x10e   : > { %1913 = vmatmul.mubr.bf16.gmra.mrb[8].mxu0 %v7094_v11  ;;  %2106 = vmatmul.mubr.bf16.gmra.mrb[8].mxu1 %v7094_v11  ;;  %v739_v12 = vld [vmem:[%s6987_s8 + $0x2f8] sm:$0xff] }
 0x10f   : > { %1922 = vmatprep.mubr.bf16.mxu0 %v7099_v15  ;;  %2115 = vmatprep.mubr.bf16.mxu1 %v7099_v15  ;;  %v5625_v17 = vcombine.high %v735_v10, %v739_v12  ;;  %v5624_v23 = vcombine.low %v735_v10, %v739_v12  ;;  %v7201_v1 = vld [vmem:[%s6723_s30 + $0x94] ss:$8 sps:$4 sm:$0xff]   ;;  %v7228_v7 = vld [vmem:[%s6723_s30 + $0xb0] ss:$8 sps:$4 sm:$0xff]   ;;  %v7238_v10 = vld [vmem:[%s6723_s30 + $0xc0] ss:$8 sps:$4 sm:$0xff]  }
 0x110   : > { %2255 = vmatpush1.bf16.msra.mxu0 %v5566_v18  ;;  %2448 = vmatpush1.bf16.msra.mxu1 %v5568_v19  ;;  %v742_v18 = vld [vmem:[%s6987_s8 + $0x310] sm:$0xff] }
 0x111   : > { %2256 = vmatprep.subr.bf16.mxu0 %v5575_v20  ;;  %2449 = vmatprep.subr.bf16.mxu1 %v5577_v21  ;;  %v746_v19 = vld [vmem:[%s6987_s8 + $0x330] sm:$0xff]  ;;  %v743_v20 = vld [vmem:[%s6987_s8 + $0x318] sm:$0xff] }
 0x112   : > { %v747_v21 = vld [vmem:[%s6987_s8 + $0x338] sm:$0xff]  ;;  %v5631_v24 = vcombine.high %v742_v18, %v746_v19  ;;  %v5630_v34 = vcombine.low %v742_v18, %v746_v19  ;;  %v6439_v19 = vld [vmem:[%s6723_s30 + $0x4] ss:$8 sps:$4 sm:$0xff]  }
 0x113   : > { %v5632_v35 = vcombine.low %v743_v20, %v747_v21  ;;  %v7241_v12 = vld [vmem:[%s6723_s30 + $0xd4] ss:$8 sps:$4 sm:$0xff]   ;;  %v7268_v18 = vld [vmem:[%s6723_s30 + $0xf0] ss:$8 sps:$4 sm:$0xff]  }
 0x114   : > { %2257 = vmatpush1.bf16.msra.mxu0 %v5574_v26  ;;  %2450 = vmatpush1.bf16.msra.mxu1 %v5576_v27  ;;  %v5633_v26 = vcombine.high %v743_v20, %v747_v21  ;;  %v750_v27 = vld [vmem:[%s6987_s8 + $0x350] sm:$0xff] }
 0x115   : > { %2258 = vmatprep.subr.bf16.mxu0 %v5583_v28  ;;  %2451 = vmatprep.subr.bf16.mxu1 %v5585_v30  ;;  %v754_v28 = vld [vmem:[%s6987_s8 + $0x370] sm:$0xff] }
 0x116   : > { %1923 = vmatmul.mubr.bf16.gmra.mrb[12].mxu0 %v7112_v29  ;;  %2116 = vmatmul.mubr.bf16.gmra.mrb[12].mxu1 %v7112_v29  ;;  %v7171_v30 = vld [vmem:[%s6723_s30 + $0x74] ss:$8 sps:$4 sm:$0xff]   ;;  %v5638_v43 = vcombine.low %v750_v27, %v754_v28 }
 0x117   : > { %1932 = vmatprep.mubr.bf16.mxu0 %v7117_v33  ;;  %2125 = vmatprep.mubr.bf16.mxu1 %v7117_v33 }
 0x118   : > { %2259 = vmatpush1.bf16.msra.mxu0 %v5582_v36  ;;  %2452 = vmatpush1.bf16.msra.mxu1 %v5584_v37  ;;  %v5639_v36 = vcombine.high %v750_v27, %v754_v28  ;;  %v5641_v37 = vcombine.high %v751_v31, %v755_v32 }
 0x119   : > { %2260 = vmatprep.subr.bf16.mxu0 %v5591_v38  ;;  %2453 = vmatprep.subr.bf16.mxu1 %v5593_v39  ;;  %v758_v38 = vld [vmem:[%s6987_s8 + $0x390] sm:$0xff] }
 0x11a   : > { %v762_v39 = vld [vmem:[%s6987_s8 + $0x3b0] sm:$0xff] }
 0x11c   : > { %2261 = vmatpush1.bf16.msra.mxu0 %v5590_v45  ;;  %2454 = vmatpush1.bf16.msra.mxu1 %v5592_v46  ;;  %v5647_v45 = vcombine.high %v758_v38, %v762_v39  ;;  %v7184_v46 = vld [vmem:[%s6723_s30 + $0x70] ss:$8 sps:$4 sm:$0xff]  }
 0x11d   : > { %2262 = vmatprep.subr.bf16.mxu0 %v5599_v48  ;;  %2455 = vmatprep.subr.bf16.mxu1 %v5601_v50  ;;  %v5649_v48 = vcombine.high %v759_v41, %v763_v42  ;;  %v766_v50 = vld [vmem:[%s6987_s8 + $0x3d0] sm:$0xff] }
 0x11e   : > { %1933 = vmatmul.mubr.bf16.gmra.mrb[16].mxu0 %v7130_v49  ;;  %2126 = vmatmul.mubr.bf16.gmra.mrb[16].mxu1 %v7130_v49  ;;  %v5654_v62 = vcombine.low %v766_v50, %v770_v51 }
 0x11f   : > { %1942 = vmatprep.mubr.bf16.mxu0 %v7135_v53  ;;  %2135 = vmatprep.mubr.bf16.mxu1 %v7135_v53 }
 0x120   : > { %2263 = vmatpush1.bf16.msra.mxu0 %v5598_v56  ;;  %2456 = vmatpush1.bf16.msra.mxu1 %v5600_v57  ;;  %v5646_v56 = vcombine.low %v758_v38, %v762_v39  ;;  %v5648_v57 = vcombine.low %v759_v41, %v763_v42  ;;  %v791_v38 = vld [vmem:[#allocation2 + $0x98] sm:$0xff]  ;;  %v796_v39 = vld [vmem:[#allocation2 + $0xc0] sm:$0xff] }
 0x121   : > { %2264 = vmatprep.subr.bf16.mxu0 %v5607_v59  ;;  %2457 = vmatprep.subr.bf16.mxu1 %v5609_v60  ;;  %v5655_v59 = vcombine.high %v766_v50, %v770_v51  ;;  %v5657_v60 = vcombine.high %v767_v54, %v771_v55 }
 0x124   : > { %2265 = vmatpush1.bf16.msra.mxu0 %v5606_v2  ;;  %2458 = vmatpush1.bf16.msra.mxu1 %v5608_v3  ;;  %v7208_v2 = vld [vmem:[%s6723_s30 + $0x90] ss:$8 sps:$4 sm:$0xff]   ;;  %v7211_v3 = vld [vmem:[%s6723_s30 + $0xa4] ss:$8 sps:$4 sm:$0xff]  }
 0x125   : > { %2266 = vmatprep.subr.bf16.mxu0 %v5615_v4  ;;  %2459 = vmatprep.subr.bf16.mxu1 %v5617_v6  ;;  %v7218_v4 = vld [vmem:[%s6723_s30 + $0xa0] ss:$8 sps:$4 sm:$0xff]   ;;  %v7221_v6 = vld [vmem:[%s6723_s30 + $0xb4] ss:$8 sps:$4 sm:$0xff]  }
 0x126   : > { %1943 = vmatmul.mubr.bf16.gmra.mrb[20].mxu0 %v7148_v5  ;;  %2136 = vmatmul.mubr.bf16.gmra.mrb[20].mxu1 %v7148_v5 }
 0x127   : > { %1952 = vmatprep.mubr.bf16.mxu0 %v7153_v9  ;;  %2145 = vmatprep.mubr.bf16.mxu1 %v7153_v9 }
 0x128   : > { %2267 = vmatpush1.bf16.msra.mxu0 %v5614_v13  ;;  %2460 = vmatpush1.bf16.msra.mxu1 %v5616_v14  ;;  %v7248_v13 = vld [vmem:[%s6723_s30 + $0xd0] ss:$8 sps:$4 sm:$0xff]   ;;  %v7251_v14 = vld [vmem:[%s6723_s30 + $0xe4] ss:$8 sps:$4 sm:$0xff]  }
 0x129   : > { %2268 = vmatprep.subr.bf16.mxu0 %v5623_v16  ;;  %2461 = vmatprep.subr.bf16.mxu1 %v5625_v17  ;;  %v7258_v16 = vld [vmem:[%s6723_s30 + $0xe0] ss:$8 sps:$4 sm:$0xff]   ;;  %v7261_v17 = vld [vmem:[%s6723_s30 + $0xf4] ss:$8 sps:$4 sm:$0xff]  }
 0x12c   : > { %2269 = vmatpush1.bf16.msra.mxu0 %v5622_v22  ;;  %2462 = vmatpush1.bf16.msra.mxu1 %v5624_v23  ;;  %v783_v23 = vld [vmem:[#allocation2 + $0x58] sm:$0xff] }
 0x12d   : > { %2270 = vmatprep.subr.bf16.mxu0 %v5631_v24  ;;  %2463 = vmatprep.subr.bf16.mxu1 %v5633_v26 }
 0x12e   : > { %1953 = vmatmul.mubr.bf16.gmra.mrb[24].mxu0 %v7166_v25  ;;  %2146 = vmatmul.mubr.bf16.gmra.mrb[24].mxu1 %v7166_v25 }
 0x12f   : > { %1962 = vmatprep.mubr.bf16.mxu0 %v7171_v30  ;;  %2155 = vmatprep.mubr.bf16.mxu1 %v7171_v30 }
 0x130   : > { %2271 = vmatpush1.bf16.msra.mxu0 %v5630_v34  ;;  %2464 = vmatpush1.bf16.msra.mxu1 %v5632_v35  ;;  %v788_v34 = vld [vmem:[#allocation2 + $0x80] sm:$0xff]  ;;  %v790_v35 = vld [vmem:[#allocation2 + $0x90] sm:$0xff] }
 0x131   : > { %2272 = vmatprep.subr.bf16.mxu0 %v5639_v36  ;;  %2465 = vmatprep.subr.bf16.mxu1 %v5641_v37  ;;  %v789_v36 = vld [vmem:[#allocation2 + $0x88] sm:$0xff] }
 0x134   : > { %2273 = vmatpush1.bf16.msra.mxu0 %v5638_v43  ;;  %2466 = vmatpush1.bf16.msra.mxu1 %v5640_v44  ;;  %v798_v44 = vld [vmem:[#allocation2 + $0xd0] sm:$0xff] }
 0x135   : > { %2274 = vmatprep.subr.bf16.mxu0 %v5647_v45  ;;  %2467 = vmatprep.subr.bf16.mxu1 %v5649_v48  ;;  %v797_v45 = vld [vmem:[#allocation2 + $0xc8] sm:$0xff] }
 0x136   : > { %1963 = vmatmul.mubr.bf16.gmra.mrb[28].mxu0 %v7184_v46  ;;  %2156 = vmatmul.mubr.bf16.gmra.mrb[28].mxu1 %v7184_v46 }
 0x137   : > { %1972 = vmatprep.mubr.bf16.mxu0 %v7189_v52  ;;  %2165 = vmatprep.mubr.bf16.mxu1 %v7189_v52 }
 0x138   : > { %2275 = vmatpush1.bf16.msra.mxu0 %v5646_v56  ;;  %2468 = vmatpush1.bf16.msra.mxu1 %v5648_v57 }
 0x139   : > { %2276 = vmatprep.subr.bf16.mxu0 %v5655_v59  ;;  %2469 = vmatprep.subr.bf16.mxu1 %v5657_v60 }
 0x13c   : > { %2277 = vmatpush1.bf16.msra.mxu0 %v5654_v62  ;;  %2470 = vmatpush1.bf16.msra.mxu1 %v5656_v63 }
 0x13e   : > { %1973 = vmatmul.mubr.bf16.gmra.mrb[32].mxu0 %v7198_v0  ;;  %2166 = vmatmul.mubr.bf16.gmra.mrb[32].mxu1 %v7198_v0 }
 0x13f   : > { %1982 = vmatprep.mubr.bf16.mxu0 %v7201_v1  ;;  %2175 = vmatprep.mubr.bf16.mxu1 %v7201_v1 }
 0x146   : > { %1983 = vmatmul.mubr.bf16.gmra.mrb[36].mxu0 %v7208_v2  ;;  %2176 = vmatmul.mubr.bf16.gmra.mrb[36].mxu1 %v7208_v2 }
 0x147   : > { %1992 = vmatprep.mubr.bf16.mxu0 %v7211_v3  ;;  %2185 = vmatprep.mubr.bf16.mxu1 %v7211_v3 }
 0x14e   : > { %1993 = vmatmul.mubr.bf16.gmra.mrb[40].mxu0 %v7218_v4  ;;  %2186 = vmatmul.mubr.bf16.gmra.mrb[40].mxu1 %v7218_v4 }
 0x14f   : > { %2002 = vmatprep.mubr.bf16.mxu0 %v7221_v6  ;;  %2195 = vmatprep.mubr.bf16.mxu1 %v7221_v6 }
 0x156   : > { %2003 = vmatmul.mubr.bf16.gmra.mrb[44].mxu0 %v7228_v7  ;;  %2196 = vmatmul.mubr.bf16.gmra.mrb[44].mxu1 %v7228_v7 }
 0x157   : > { %2012 = vmatprep.mubr.bf16.mxu0 %v7231_v8  ;;  %2205 = vmatprep.mubr.bf16.mxu1 %v7231_v8 }
 0x15e   : > { %2013 = vmatmul.mubr.bf16.gmra.mrb[48].mxu0 %v7238_v10  ;;  %2206 = vmatmul.mubr.bf16.gmra.mrb[48].mxu1 %v7238_v10 }
 0x15f   : > { %2022 = vmatprep.mubr.bf16.mxu0 %v7241_v12  ;;  %2215 = vmatprep.mubr.bf16.mxu1 %v7241_v12 }
 0x166   : > { %2023 = vmatmul.mubr.bf16.gmra.mrb[52].mxu0 %v7248_v13  ;;  %2216 = vmatmul.mubr.bf16.gmra.mrb[52].mxu1 %v7248_v13 }
 0x167   : > { %2032 = vmatprep.mubr.bf16.mxu0 %v7251_v14  ;;  %2225 = vmatprep.mubr.bf16.mxu1 %v7251_v14 }
 0x16e   : > { %2033 = vmatmul.mubr.bf16.gmra.mrb[56].mxu0 %v7258_v16  ;;  %2226 = vmatmul.mubr.bf16.gmra.mrb[56].mxu1 %v7258_v16 }
 0x16f   : > { %2042 = vmatprep.mubr.bf16.mxu0 %v7261_v17  ;;  %2235 = vmatprep.mubr.bf16.mxu1 %v7261_v17 }
 0x176   : > { %2043 = vmatmul.mubr.bf16.gmra.mrb[60].mxu0 %v7268_v18  ;;  %2236 = vmatmul.mubr.bf16.gmra.mrb[60].mxu1 %v7268_v18 }
 0x177   : > { %2278 = vmatprep.mubr.bf16.mxu0 %v6439_v19  ;;  %2471 = vmatprep.mubr.bf16.mxu1 %v6439_v19 }
 0x17e   : > { %2279 = vmatmul.mubr.bf16.vlgmr.msra.gmra.mrb[64].mxu0 %v7058_v40  ;;  %2472 = vmatmul.mubr.bf16.vlgmr.msra.gmra.mrb[64].mxu1 %v7058_v40  ;;  %v772_v40 = vld [vmem:[#allocation2] sm:$0xff] }
 0x17f   : > { %2288 = vmatprep.mubr.bf16.mxu0 %v7065_v47  ;;  %2481 = vmatprep.mubr.bf16.mxu1 %v7065_v47  ;;  %v774_v47 = vld [vmem:[#allocation2 + $0x10] sm:$0xff] }
 0x186   : > { %2289 = vmatmul.mubr.bf16.gmra.mrb[68].mxu0 %v7076_v58  ;;  %2482 = vmatmul.mubr.bf16.gmra.mrb[68].mxu1 %v7076_v58  ;;  %v773_v58 = vld [vmem:[#allocation2 + $0x8] sm:$0xff] }
 0x187   : > { %2298 = vmatprep.mubr.bf16.mxu0 %v7081_v61  ;;  %2491 = vmatprep.mubr.bf16.mxu1 %v7081_v61 }
 0x18e   : > { %2299 = vmatmul.mubr.bf16.gmra.mrb[72].mxu0 %v7094_v11  ;;  %2492 = vmatmul.mubr.bf16.gmra.mrb[72].mxu1 %v7094_v11  ;;  %v775_v11 = vld [vmem:[#allocation2 + $0x18] sm:$0xff] }
 0x18f   : > { %2308 = vmatprep.mubr.bf16.mxu0 %v7099_v15  ;;  %2501 = vmatprep.mubr.bf16.mxu1 %v7099_v15  ;;  %v780_v15 = vld [vmem:[#allocation2 + $0x40] sm:$0xff] }
 0x196   : > { %2309 = vmatmul.mubr.bf16.gmra.mrb[76].mxu0 %v7112_v29  ;;  %2502 = vmatmul.mubr.bf16.gmra.mrb[76].mxu1 %v7112_v29 }
 0x197   : > { %2318 = vmatprep.mubr.bf16.mxu0 %v7117_v33  ;;  %2511 = vmatprep.mubr.bf16.mxu1 %v7117_v33 }
 0x19e   : > { %2319 = vmatmul.mubr.bf16.gmra.mrb[80].mxu0 %v7130_v49  ;;  %2512 = vmatmul.mubr.bf16.gmra.mrb[80].mxu1 %v7130_v49 }
 0x19f   : > { %2328 = vmatprep.mubr.bf16.mxu0 %v7135_v53  ;;  %2521 = vmatprep.mubr.bf16.mxu1 %v7135_v53  ;;  %v782_v53 = vld [vmem:[#allocation2 + $0x50] sm:$0xff] }
 0x1a6   : > { %2329 = vmatmul.mubr.bf16.gmra.mrb[84].mxu0 %v7148_v5  ;;  %2522 = vmatmul.mubr.bf16.gmra.mrb[84].mxu1 %v7148_v5  ;;  %v781_v5 = vld [vmem:[#allocation2 + $0x48] sm:$0xff] }
 0x1a7   : > { %2338 = vmatprep.mubr.bf16.mxu0 %v7153_v9  ;;  %2531 = vmatprep.mubr.bf16.mxu1 %v7153_v9 }
 0x1ae   : > { %2339 = vmatmul.mubr.bf16.gmra.mrb[88].mxu0 %v7166_v25  ;;  %2532 = vmatmul.mubr.bf16.gmra.mrb[88].mxu1 %v7166_v25 }
 0x1af   : > { %2348 = vmatprep.mubr.bf16.mxu0 %v7171_v30  ;;  %2541 = vmatprep.mubr.bf16.mxu1 %v7171_v30 }
 0x1b6   : > { %2349 = vmatmul.mubr.bf16.gmra.mrb[92].mxu0 %v7184_v46  ;;  %2542 = vmatmul.mubr.bf16.gmra.mrb[92].mxu1 %v7184_v46 }
 0x1b7   : > { %2358 = vmatprep.mubr.bf16.mxu0 %v7189_v52  ;;  %2551 = vmatprep.mubr.bf16.mxu1 %v7189_v52  ;;  %v799_v52 = vld [vmem:[#allocation2 + $0xd8] sm:$0xff] }
 0x1be   : > { %2359 = vmatmul.mubr.bf16.gmra.mrb[96].mxu0 %v7198_v0  ;;  %2552 = vmatmul.mubr.bf16.gmra.mrb[96].mxu1 %v7198_v0  ;;  %v804_v0 = vld [vmem:[#allocation2 + $0x100] sm:$0xff] }
 0x1bf   : > { %2368 = vmatprep.mubr.bf16.mxu0 %v7201_v1  ;;  %2561 = vmatprep.mubr.bf16.mxu1 %v7201_v1  ;;  %v806_v1 = vld [vmem:[#allocation2 + $0x110] sm:$0xff] }
 0x1c6   : > { %2369 = vmatmul.mubr.bf16.gmra.mrb[100].mxu0 %v7208_v2  ;;  %2562 = vmatmul.mubr.bf16.gmra.mrb[100].mxu1 %v7208_v2  ;;  %v805_v2 = vld [vmem:[#allocation2 + $0x108] sm:$0xff] }
 0x1c7   : > { %2378 = vmatprep.mubr.bf16.mxu0 %v7211_v3  ;;  %2571 = vmatprep.mubr.bf16.mxu1 %v7211_v3 }
 0x1ce   : > { %2379 = vmatmul.mubr.bf16.gmra.mrb[104].mxu0 %v7218_v4  ;;  %2572 = vmatmul.mubr.bf16.gmra.mrb[104].mxu1 %v7218_v4  ;;  %v807_v4 = vld [vmem:[#allocation2 + $0x118] sm:$0xff] }
 0x1cf   : > { %2388 = vmatprep.mubr.bf16.mxu0 %v7221_v6  ;;  %2581 = vmatprep.mubr.bf16.mxu1 %v7221_v6  ;;  %v812_v6 = vld [vmem:[#allocation2 + $0x140] sm:$0xff] }
 0x1d1   : > { %v1894_v61 = vpop.f32.mrb[0].mxu0  ;;  %v2087_v33 = vpop.f32.mrb[0].mxu1 }
 0x1d2   : > { %v2632_v29 = vadd.f32 %v1894_v61, %v772_v40  ;;  %v1896_v49 = vpop.f32.mrb[1].mxu0  ;;  %v2634_v9 = vadd.f32 %v2087_v33, %v774_v47  ;;  %v2089_v21 = vpop.f32.mrb[1].mxu1  ;;  %v814_v40 = vld [vmem:[#allocation2 + $0x150] sm:$0xff]  ;;  %v813_v47 = vld [vmem:[#allocation2 + $0x148] sm:$0xff] }
 0x1d3   : > { %v2633_v20 = vadd.f32 %v1896_v49, %v773_v58  ;;  %v1898_v22 = vpop.f32.mrb[2].mxu0  ;;  %v2635_v24 = vadd.f32 %v2089_v21, %v775_v11  ;;  %v2091_v26 = vpop.f32.mrb[2].mxu1  ;;  %v820_v21 = vld [vmem:[#allocation2 + $0x180] sm:$0xff] }
 0x1d4   : > { %2888 = vst [vmem:[#allocation2] sm:$0xff] %v2632_v29  ;;  %v2640_v25 = vadd.f32 %v1898_v22, %v780_v15  ;;  %v1900_v27 = vpop.f32.mrb[3].mxu0  ;;  %2890 = vst [vmem:[#allocation2 + $0x10] sm:$0xff] %v2634_v9  ;;  %v2642_v28 = vadd.f32 %v2091_v26, %v782_v53  ;;  %v2093_v31 = vpop.f32.mrb[3].mxu1  ;;  %v815_v15 = vld [vmem:[#allocation2 + $0x158] sm:$0xff]  ;;  %v822_v22 = vld [vmem:[#allocation2 + $0x190] sm:$0xff] }
 0x1d5   : > { %2889 = vst [vmem:[#allocation2 + $0x8] sm:$0xff] %v2633_v20  ;;  %v2641_v30 = vadd.f32 %v1900_v27, %v781_v5  ;;  %2891 = vst [vmem:[#allocation2 + $0x18] sm:$0xff] %v2635_v24  ;;  %v2643_v32 = vadd.f32 %v2093_v31, %v783_v23  ;;  %v821_v23 = vld [vmem:[#allocation2 + $0x188] sm:$0xff]  ;;  %v828_v26 = vld [vmem:[#allocation2 + $0x1c0] sm:$0xff] }
 0x1d6   : > { %2896 = vst [vmem:[#allocation2 + $0x40] sm:$0xff] %v2640_v25  ;;  %2389 = vmatmul.mubr.bf16.gmra.mrb[108].mxu0 %v7228_v7  ;;  %2898 = vst [vmem:[#allocation2 + $0x50] sm:$0xff] %v2642_v28  ;;  %2582 = vmatmul.mubr.bf16.gmra.mrb[108].mxu1 %v7228_v7  ;;  %v823_v25 = vld [vmem:[#allocation2 + $0x198] sm:$0xff]  ;;  %v830_v31 = vld [vmem:[#allocation2 + $0x1d0] sm:$0xff] }
 0x1d7   : > { %2897 = vst [vmem:[#allocation2 + $0x48] sm:$0xff] %v2641_v30  ;;  %2398 = vmatprep.mubr.bf16.mxu0 %v7231_v8  ;;  %2899 = vst [vmem:[#allocation2 + $0x58] sm:$0xff] %v2643_v32  ;;  %2591 = vmatprep.mubr.bf16.mxu1 %v7231_v8  ;;  %v829_v32 = vld [vmem:[#allocation2 + $0x1c8] sm:$0xff] }
 0x1d9   : > { %v1904_v37 = vpop.f32.mrb[4].mxu0  ;;  %v2097_v42 = vpop.f32.mrb[4].mxu1 }
 0x1da   : > { %v2648_v41 = vadd.f32 %v1904_v37, %v788_v34  ;;  %v1906_v43 = vpop.f32.mrb[5].mxu0  ;;  %v2650_v46 = vadd.f32 %v2097_v42, %v790_v35  ;;  %v2099_v50 = vpop.f32.mrb[5].mxu1  ;;  %v831_v37 = vld [vmem:[#allocation2 + $0x1d8] sm:$0xff] }
 0x1db   : > { %v2649_v48 = vadd.f32 %v1906_v43, %v789_v36  ;;  %v1908_v51 = vpop.f32.mrb[6].mxu0  ;;  %v2651_v54 = vadd.f32 %v2099_v50, %v791_v38  ;;  %v2101_v56 = vpop.f32.mrb[6].mxu1  ;;  %v837_v50 = vld [vmem:[#allocation2 + $0x208] sm:$0xff] }
 0x1dc   : > { %2904 = vst [vmem:[#allocation2 + $0x80] sm:$0xff] %v2648_v41  ;;  %v2656_v55 = vadd.f32 %v1908_v51, %v796_v39  ;;  %v1910_v57 = vpop.f32.mrb[7].mxu0  ;;  %2906 = vst [vmem:[#allocation2 + $0x90] sm:$0xff] %v2650_v46  ;;  %v2658_v59 = vadd.f32 %v2101_v56, %v798_v44  ;;  %v2103_v62 = vpop.f32.mrb[7].mxu1  ;;  %v836_v46 = vld [vmem:[#allocation2 + $0x200] sm:$0xff] }
 0x1dd   : > { %2905 = vst [vmem:[#allocation2 + $0x88] sm:$0xff] %v2649_v48  ;;  %v2657_v60 = vadd.f32 %v1910_v57, %v797_v45  ;;  %2907 = vst [vmem:[#allocation2 + $0x98] sm:$0xff] %v2651_v54  ;;  %v2659_v63 = vadd.f32 %v2103_v62, %v799_v52  ;;  %v838_v48 = vld [vmem:[#allocation2 + $0x210] sm:$0xff]  ;;  %v839_v52 = vld [vmem:[#allocation2 + $0x218] sm:$0xff] }
 0x1de   : > { %2912 = vst [vmem:[#allocation2 + $0xc0] sm:$0xff] %v2656_v55  ;;  %2399 = vmatmul.mubr.bf16.gmra.mrb[112].mxu0 %v7238_v10  ;;  %2914 = vst [vmem:[#allocation2 + $0xd0] sm:$0xff] %v2658_v59  ;;  %2592 = vmatmul.mubr.bf16.gmra.mrb[112].mxu1 %v7238_v10  ;;  %v844_v54 = vld [vmem:[#allocation2 + $0x240] sm:$0xff]  ;;  %v846_v59 = vld [vmem:[#allocation2 + $0x250] sm:$0xff] }
 0x1df   : > { %2913 = vst [vmem:[#allocation2 + $0xc8] sm:$0xff] %v2657_v60  ;;  %2408 = vmatprep.mubr.bf16.mxu0 %v7241_v12  ;;  %2915 = vst [vmem:[#allocation2 + $0xd8] sm:$0xff] %v2659_v63  ;;  %2601 = vmatprep.mubr.bf16.mxu1 %v7241_v12  ;;  %v845_v60 = vld [vmem:[#allocation2 + $0x248] sm:$0xff] }
 0x1e1   : > { %v1914_v3 = vpop.f32.mrb[8].mxu0  ;;  %v2107_v8 = vpop.f32.mrb[8].mxu1 }
 0x1e2   : > { %v2664_v7 = vadd.f32 %v1914_v3, %v804_v0  ;;  %v1916_v19 = vpop.f32.mrb[9].mxu0  ;;  %v2666_v58 = vadd.f32 %v2107_v8, %v806_v1  ;;  %v2109_v11 = vpop.f32.mrb[9].mxu1  ;;  %v847_v1 = vld [vmem:[#allocation2 + $0x258] sm:$0xff] }
 0x1e3   : > { %v2665_v61 = vadd.f32 %v1916_v19, %v805_v2  ;;  %v1918_v10 = vpop.f32.mrb[10].mxu0  ;;  %v2667_v29 = vadd.f32 %v2109_v11, %v807_v4  ;;  %v2111_v49 = vpop.f32.mrb[10].mxu1  ;;  %v855_v11 = vld [vmem:[#allocation2 + $0x298] sm:$0xff] }
 0x1e4   : > { %2920 = vst [vmem:[#allocation2 + $0x100] sm:$0xff] %v2664_v7  ;;  %v2672_v33 = vadd.f32 %v1918_v10, %v812_v6  ;;  %v1920_v53 = vpop.f32.mrb[11].mxu0  ;;  %2922 = vst [vmem:[#allocation2 + $0x110] sm:$0xff] %v2666_v58  ;;  %v2674_v12 = vadd.f32 %v2111_v49, %v814_v40  ;;  %v2113_v9 = vpop.f32.mrb[11].mxu1  ;;  %v852_v40 = vld [vmem:[#allocation2 + $0x280] sm:$0xff]  ;;  %v853_v58 = vld [vmem:[#allocation2 + $0x288] sm:$0xff] }
 0x1e5   : > { %2921 = vst [vmem:[#allocation2 + $0x108] sm:$0xff] %v2665_v61  ;;  %v2673_v5 = vadd.f32 %v1920_v53, %v813_v47  ;;  %2923 = vst [vmem:[#allocation2 + $0x118] sm:$0xff] %v2667_v29  ;;  %v2675_v20 = vadd.f32 %v2113_v9, %v815_v15  ;;  %v854_v47 = vld [vmem:[#allocation2 + $0x290] sm:$0xff]  ;;  %v860_v10 = vld [vmem:[#allocation2 + $0x2c0] sm:$0xff] }
 0x1e6   : > { %2928 = vst [vmem:[#allocation2 + $0x140] sm:$0xff] %v2672_v33  ;;  %2409 = vmatmul.mubr.bf16.gmra.mrb[116].mxu0 %v7248_v13  ;;  %2930 = vst [vmem:[#allocation2 + $0x150] sm:$0xff] %v2674_v12  ;;  %2602 = vmatmul.mubr.bf16.gmra.mrb[116].mxu1 %v7248_v13  ;;  %v862_v49 = vld [vmem:[#allocation2 + $0x2d0] sm:$0xff]  ;;  %v861_v53 = vld [vmem:[#allocation2 + $0x2c8] sm:$0xff] }
 0x1e7   : > { %2929 = vst [vmem:[#allocation2 + $0x148] sm:$0xff] %v2673_v5  ;;  %2418 = vmatprep.mubr.bf16.mxu0 %v7251_v14  ;;  %2931 = vst [vmem:[#allocation2 + $0x158] sm:$0xff] %v2675_v20  ;;  %2611 = vmatprep.mubr.bf16.mxu1 %v7251_v14 }
 0x1e9   : > { %v1924_v24 = vpop.f32.mrb[12].mxu0  ;;  %v2117_v28 = vpop.f32.mrb[12].mxu1 }
 0x1ea   : > { %v2680_v27 = vadd.f32 %v1924_v24, %v820_v21  ;;  %v1926_v30 = vpop.f32.mrb[13].mxu0  ;;  %v2682_v34 = vadd.f32 %v2117_v28, %v822_v22  ;;  %v2119_v36 = vpop.f32.mrb[13].mxu1  ;;  %v863_v21 = vld [vmem:[#allocation2 + $0x2d8] sm:$0xff] }
 0x1eb   : > { %v2681_v35 = vadd.f32 %v1926_v30, %v821_v23  ;;  %v1928_v13 = vpop.f32.mrb[14].mxu0  ;;  %v2683_v38 = vadd.f32 %v2119_v36, %v823_v25  ;;  %v2121_v41 = vpop.f32.mrb[14].mxu1  ;;  %v868_v30 = vld [vmem:[#allocation2 + $0x300] sm:$0xff] }
 0x1ec   : > { %2936 = vst [vmem:[#allocation2 + $0x180] sm:$0xff] %v2680_v27  ;;  %v2688_v39 = vadd.f32 %v1928_v13, %v828_v26  ;;  %v1930_v42 = vpop.f32.mrb[15].mxu0  ;;  %2938 = vst [vmem:[#allocation2 + $0x190] sm:$0xff] %v2682_v34  ;;  %v2690_v14 = vadd.f32 %v2121_v41, %v830_v31  ;;  %v2123_v44 = vpop.f32.mrb[15].mxu1  ;;  %v870_v31 = vld [vmem:[#allocation2 + $0x310] sm:$0xff]  ;;  %v876_v36 = vld [vmem:[#allocation2 + $0x340] sm:$0xff] }
 0x1ed   : > { %2937 = vst [vmem:[#allocation2 + $0x188] sm:$0xff] %v2681_v35  ;;  %v2689_v43 = vadd.f32 %v1930_v42, %v829_v32  ;;  %2939 = vst [vmem:[#allocation2 + $0x198] sm:$0xff] %v2683_v38  ;;  %v2691_v45 = vadd.f32 %v2123_v44, %v831_v37  ;;  %v869_v32 = vld [vmem:[#allocation2 + $0x308] sm:$0xff]  ;;  %v871_v35 = vld [vmem:[#allocation2 + $0x318] sm:$0xff] }
 0x1ee   : > { %2944 = vst [vmem:[#allocation2 + $0x1c0] sm:$0xff] %v2688_v39  ;;  %2419 = vmatmul.mubr.bf16.gmra.mrb[120].mxu0 %v7258_v16  ;;  %2946 = vst [vmem:[#allocation2 + $0x1d0] sm:$0xff] %v2690_v14  ;;  %2612 = vmatmul.mubr.bf16.gmra.mrb[120].mxu1 %v7258_v16  ;;  %v878_v39 = vld [vmem:[#allocation2 + $0x350] sm:$0xff]  ;;  %v877_v41 = vld [vmem:[#allocation2 + $0x348] sm:$0xff] }
 0x1ef   : > { %2945 = vst [vmem:[#allocation2 + $0x1c8] sm:$0xff] %v2689_v43  ;;  %2428 = vmatprep.mubr.bf16.mxu0 %v7261_v17  ;;  %2947 = vst [vmem:[#allocation2 + $0x1d8] sm:$0xff] %v2691_v45  ;;  %2621 = vmatprep.mubr.bf16.mxu1 %v7261_v17  ;;  %v879_v45 = vld [vmem:[#allocation2 + $0x358] sm:$0xff] }
 0x1f1   : > { %v1934_v51 = vpop.f32.mrb[16].mxu0  ;;  %v2127_v56 = vpop.f32.mrb[16].mxu1 }
 0x1f2   : > { %v2696_v55 = vadd.f32 %v1934_v51, %v836_v46  ;;  %v1936_v57 = vpop.f32.mrb[17].mxu0  ;;  %v2698_v62 = vadd.f32 %v2127_v56, %v838_v48  ;;  %v2129_v0 = vpop.f32.mrb[17].mxu1 }
 0x1f3   : > { %v2697_v63 = vadd.f32 %v1936_v57, %v837_v50  ;;  %v1938_v16 = vpop.f32.mrb[18].mxu0  ;;  %v2699_v2 = vadd.f32 %v2129_v0, %v839_v52  ;;  %v2131_v4 = vpop.f32.mrb[18].mxu1  ;;  %v884_v57 = vld [vmem:[#allocation2 + $0x380] sm:$0xff] }
 0x1f4   : > { %2952 = vst [vmem:[#allocation2 + $0x200] sm:$0xff] %v2696_v55  ;;  %v2704_v3 = vadd.f32 %v1938_v16, %v844_v54  ;;  %v1940_v6 = vpop.f32.mrb[19].mxu0  ;;  %2954 = vst [vmem:[#allocation2 + $0x210] sm:$0xff] %v2698_v62  ;;  %v2706_v17 = vadd.f32 %v2131_v4, %v846_v59  ;;  %v2133_v8 = vpop.f32.mrb[19].mxu1  ;;  %v886_v59 = vld [vmem:[#allocation2 + $0x390] sm:$0xff]  ;;  %v892_v0 = vld [vmem:[#allocation2 + $0x3c0] sm:$0xff] }
 0x1f5   : > { %2953 = vst [vmem:[#allocation2 + $0x208] sm:$0xff] %v2697_v63  ;;  %v2705_v7 = vadd.f32 %v1940_v6, %v845_v60  ;;  %2955 = vst [vmem:[#allocation2 + $0x218] sm:$0xff] %v2699_v2  ;;  %v2707_v19 = vadd.f32 %v2133_v8, %v847_v1  ;;  %v885_v60 = vld [vmem:[#allocation2 + $0x388] sm:$0xff]  ;;  %v887_v63 = vld [vmem:[#allocation2 + $0x398] sm:$0xff] }
 0x1f6   : > { %2960 = vst [vmem:[#allocation2 + $0x240] sm:$0xff] %v2704_v3  ;;  %2429 = vmatmul.mubr.bf16.gmra.mrb[124].mxu0 %v7268_v18  ;;  %2962 = vst [vmem:[#allocation2 + $0x250] sm:$0xff] %v2706_v17  ;;  %2622 = vmatmul.mubr.bf16.gmra.mrb[124].mxu1 %v7268_v18  ;;  %v894_v3 = vld [vmem:[#allocation2 + $0x3d0] sm:$0xff]  ;;  %v893_v4 = vld [vmem:[#allocation2 + $0x3c8] sm:$0xff] }
 0x1f7   : > { %2961 = vst [vmem:[#allocation2 + $0x248] sm:$0xff] %v2705_v7  ;;  %2963 = vst [vmem:[#allocation2 + $0x258] sm:$0xff] %v2707_v19  ;;  %v895_v19 = vld [vmem:[#allocation2 + $0x3d8] sm:$0xff] }
 0x1f9   : > { %v1944_v61 = vpop.f32.mrb[20].mxu0  ;;  %v2137_v29 = vpop.f32.mrb[20].mxu1 }
 0x1fa   : > { %v2712_v15 = vadd.f32 %v1944_v61, %v852_v40  ;;  %v1946_v33 = vpop.f32.mrb[21].mxu0  ;;  %v2714_v12 = vadd.f32 %v2137_v29, %v854_v47  ;;  %v2139_v9 = vpop.f32.mrb[21].mxu1 }
 0x1fb   : > { %v2713_v5 = vadd.f32 %v1946_v33, %v853_v58  ;;  %v1948_v20 = vpop.f32.mrb[22].mxu0  ;;  %v2715_v22 = vadd.f32 %v2139_v9, %v855_v11  ;;  %v2141_v23 = vpop.f32.mrb[22].mxu1  ;;  %v900_v33 = vld [vmem:[#allocation2 + $0x400] sm:$0xff] }
 0x1fc   : > { %2968 = vst [vmem:[#allocation2 + $0x280] sm:$0xff] %v2712_v15  ;;  %v2720_v18 = vadd.f32 %v1948_v20, %v860_v10  ;;  %v1950_v24 = vpop.f32.mrb[23].mxu0  ;;  %2970 = vst [vmem:[#allocation2 + $0x290] sm:$0xff] %v2714_v12  ;;  %v2722_v25 = vadd.f32 %v2141_v23, %v862_v49  ;;  %v2143_v27 = vpop.f32.mrb[23].mxu1  ;;  %v902_v49 = vld [vmem:[#allocation2 + $0x410] sm:$0xff]  ;;  %v908_v9 = vld [vmem:[#allocation2 + $0x440] sm:$0xff] }
 0x1fd   : > { %2969 = vst [vmem:[#allocation2 + $0x288] sm:$0xff] %v2713_v5  ;;  %v2721_v26 = vadd.f32 %v1950_v24, %v861_v53  ;;  %2971 = vst [vmem:[#allocation2 + $0x298] sm:$0xff] %v2715_v22  ;;  %v2723_v28 = vadd.f32 %v2143_v27, %v863_v21  ;;  %v901_v53 = vld [vmem:[#allocation2 + $0x408] sm:$0xff]  ;;  %v903_v5 = vld [vmem:[#allocation2 + $0x418] sm:$0xff] }
 0x1fe   : > { %2976 = vst [vmem:[#allocation2 + $0x2c0] sm:$0xff] %v2720_v18  ;;  %2978 = vst [vmem:[#allocation2 + $0x2d0] sm:$0xff] %v2722_v25  ;;  %v910_v18 = vld [vmem:[#allocation2 + $0x450] sm:$0xff]  ;;  %v909_v23 = vld [vmem:[#allocation2 + $0x448] sm:$0xff] }
 0x1ff   : > { %2977 = vst [vmem:[#allocation2 + $0x2c8] sm:$0xff] %v2721_v26  ;;  %2979 = vst [vmem:[#allocation2 + $0x2d8] sm:$0xff] %v2723_v28  ;;  %v911_v28 = vld [vmem:[#allocation2 + $0x458] sm:$0xff] }
 0x201   : > { %v1954_v34 = vpop.f32.mrb[24].mxu0  ;;  %v2147_v37 = vpop.f32.mrb[24].mxu1 }
 0x202   : > { %v2728_v13 = vadd.f32 %v1954_v34, %v868_v30  ;;  %v1956_v38 = vpop.f32.mrb[25].mxu0  ;;  %v2730_v42 = vadd.f32 %v2147_v37, %v870_v31  ;;  %v2149_v43 = vpop.f32.mrb[25].mxu1 }
 0x203   : > { %v2729_v14 = vadd.f32 %v1956_v38, %v869_v32  ;;  %v1958_v44 = vpop.f32.mrb[26].mxu0  ;;  %v2731_v46 = vadd.f32 %v2149_v43, %v871_v35  ;;  %v2151_v50 = vpop.f32.mrb[26].mxu1  ;;  %v916_v38 = vld [vmem:[#allocation2 + $0x480] sm:$0xff] }
 0x204   : > { %2984 = vst [vmem:[#allocation2 + $0x300] sm:$0xff] %v2728_v13  ;;  %v2736_v48 = vadd.f32 %v1958_v44, %v876_v36  ;;  %v1960_v51 = vpop.f32.mrb[27].mxu0  ;;  %2986 = vst [vmem:[#allocation2 + $0x310] sm:$0xff] %v2730_v42  ;;  %v2738_v52 = vadd.f32 %v2151_v50, %v878_v39  ;;  %v2153_v55 = vpop.f32.mrb[27].mxu1  ;;  %v918_v39 = vld [vmem:[#allocation2 + $0x490] sm:$0xff]  ;;  %v924_v43 = vld [vmem:[#allocation2 + $0x4c0] sm:$0xff] }
 0x205   : > { %2985 = vst [vmem:[#allocation2 + $0x308] sm:$0xff] %v2729_v14  ;;  %v2737_v54 = vadd.f32 %v1960_v51, %v877_v41  ;;  %2987 = vst [vmem:[#allocation2 + $0x318] sm:$0xff] %v2731_v46  ;;  %v2739_v56 = vadd.f32 %v2153_v55, %v879_v45  ;;  %v917_v41 = vld [vmem:[#allocation2 + $0x488] sm:$0xff]  ;;  %v919_v14 = vld [vmem:[#allocation2 + $0x498] sm:$0xff] }
 0x206   : > { %2992 = vst [vmem:[#allocation2 + $0x340] sm:$0xff] %v2736_v48  ;;  %2994 = vst [vmem:[#allocation2 + $0x350] sm:$0xff] %v2738_v52  ;;  %v926_v48 = vld [vmem:[#allocation2 + $0x4d0] sm:$0xff]  ;;  %v925_v50 = vld [vmem:[#allocation2 + $0x4c8] sm:$0xff] }
 0x207   : > { %2993 = vst [vmem:[#allocation2 + $0x348] sm:$0xff] %v2737_v54  ;;  %2995 = vst [vmem:[#allocation2 + $0x358] sm:$0xff] %v2739_v56  ;;  %v927_v56 = vld [vmem:[#allocation2 + $0x4d8] sm:$0xff] }
 0x209   : > { %v1964_v62 = vpop.f32.mrb[28].mxu0  ;;  %v2157_v1 = vpop.f32.mrb[28].mxu1 }
 0x20a   : > { %v2744_v16 = vadd.f32 %v1964_v62, %v884_v57  ;;  %v1966_v2 = vpop.f32.mrb[29].mxu0  ;;  %v2746_v6 = vadd.f32 %v2157_v1, %v886_v59  ;;  %v2159_v7 = vpop.f32.mrb[29].mxu1 }
 0x20b   : > { %v2745_v17 = vadd.f32 %v1966_v2, %v885_v60  ;;  %v1968_v8 = vpop.f32.mrb[30].mxu0  ;;  %v2747_v40 = vadd.f32 %v2159_v7, %v887_v63  ;;  %v2161_v58 = vpop.f32.mrb[30].mxu1  ;;  %v932_v2 = vld [vmem:[#allocation2 + $0x500] sm:$0xff] }
 0x20c   : > { %3000 = vst [vmem:[#allocation2 + $0x380] sm:$0xff] %v2744_v16  ;;  %v2752_v47 = vadd.f32 %v1968_v8, %v892_v0  ;;  %v1970_v61 = vpop.f32.mrb[31].mxu0  ;;  %3002 = vst [vmem:[#allocation2 + $0x390] sm:$0xff] %v2746_v6  ;;  %v2754_v11 = vadd.f32 %v2161_v58, %v894_v3  ;;  %v2163_v15 = vpop.f32.mrb[31].mxu1  ;;  %v934_v3 = vld [vmem:[#allocation2 + $0x510] sm:$0xff]  ;;  %v940_v7 = vld [vmem:[#allocation2 + $0x540] sm:$0xff] }
 0x20d   : > { %3001 = vst [vmem:[#allocation2 + $0x388] sm:$0xff] %v2745_v17  ;;  %v2753_v10 = vadd.f32 %v1970_v61, %v893_v4  ;;  %3003 = vst [vmem:[#allocation2 + $0x398] sm:$0xff] %v2747_v40  ;;  %v2755_v29 = vadd.f32 %v2163_v15, %v895_v19  ;;  %v933_v4 = vld [vmem:[#allocation2 + $0x508] sm:$0xff]  ;;  %v935_v17 = vld [vmem:[#allocation2 + $0x518] sm:$0xff] }
 0x20e   : > { %3008 = vst [vmem:[#allocation2 + $0x3c0] sm:$0xff] %v2752_v47  ;;  %3010 = vst [vmem:[#allocation2 + $0x3d0] sm:$0xff] %v2754_v11  ;;  %v942_v47 = vld [vmem:[#allocation2 + $0x550] sm:$0xff]  ;;  %v941_v58 = vld [vmem:[#allocation2 + $0x548] sm:$0xff] }
 0x20f   : > { %3009 = vst [vmem:[#allocation2 + $0x3c8] sm:$0xff] %v2753_v10  ;;  %3011 = vst [vmem:[#allocation2 + $0x3d8] sm:$0xff] %v2755_v29  ;;  %v943_v29 = vld [vmem:[#allocation2 + $0x558] sm:$0xff] }
 0x211   : > { %v1974_v12 = vpop.f32.mrb[32].mxu0  ;;  %v2167_v21 = vpop.f32.mrb[32].mxu1 }
 0x212   : > { %v2760_v20 = vadd.f32 %v1974_v12, %v900_v33  ;;  %v1976_v22 = vpop.f32.mrb[33].mxu0  ;;  %v2762_v24 = vadd.f32 %v2167_v21, %v902_v49  ;;  %v2169_v26 = vpop.f32.mrb[33].mxu1 }
 0x213   : > { %v2761_v25 = vadd.f32 %v1976_v22, %v901_v53  ;;  %v1978_v27 = vpop.f32.mrb[34].mxu0  ;;  %v2763_v30 = vadd.f32 %v2169_v26, %v903_v5  ;;  %v2171_v32 = vpop.f32.mrb[34].mxu1  ;;  %v948_v22 = vld [vmem:[#allocation2 + $0x580] sm:$0xff] }
 0x214   : > { %3016 = vst [vmem:[#allocation2 + $0x400] sm:$0xff] %v2760_v20  ;;  %v2768_v31 = vadd.f32 %v1978_v27, %v908_v9  ;;  %v1980_v34 = vpop.f32.mrb[35].mxu0  ;;  %3018 = vst [vmem:[#allocation2 + $0x410] sm:$0xff] %v2762_v24  ;;  %v2770_v35 = vadd.f32 %v2171_v32, %v910_v18  ;;  %v2173_v13 = vpop.f32.mrb[35].mxu1  ;;  %v950_v18 = vld [vmem:[#allocation2 + $0x590] sm:$0xff]  ;;  %v956_v26 = vld [vmem:[#allocation2 + $0x5c0] sm:$0xff] }
 0x215   : > { %3017 = vst [vmem:[#allocation2 + $0x408] sm:$0xff] %v2761_v25  ;;  %v2769_v36 = vadd.f32 %v1980_v34, %v909_v23  ;;  %3019 = vst [vmem:[#allocation2 + $0x418] sm:$0xff] %v2763_v30  ;;  %v2771_v37 = vadd.f32 %v2173_v13, %v911_v28  ;;  %v949_v23 = vld [vmem:[#allocation2 + $0x588] sm:$0xff]  ;;  %v951_v25 = vld [vmem:[#allocation2 + $0x598] sm:$0xff] }
 0x216   : > { %3024 = vst [vmem:[#allocation2 + $0x440] sm:$0xff] %v2768_v31  ;;  %3026 = vst [vmem:[#allocation2 + $0x450] sm:$0xff] %v2770_v35  ;;  %v958_v31 = vld [vmem:[#allocation2 + $0x5d0] sm:$0xff]  ;;  %v957_v32 = vld [vmem:[#allocation2 + $0x5c8] sm:$0xff] }
 0x217   : > { %3025 = vst [vmem:[#allocation2 + $0x448] sm:$0xff] %v2769_v36  ;;  %3027 = vst [vmem:[#allocation2 + $0x458] sm:$0xff] %v2771_v37  ;;  %v959_v37 = vld [vmem:[#allocation2 + $0x5d8] sm:$0xff] }
 0x219   : > { %v1984_v42 = vpop.f32.mrb[36].mxu0  ;;  %v2177_v45 = vpop.f32.mrb[36].mxu1 }
 0x21a   : > { %v2776_v44 = vadd.f32 %v1984_v42, %v916_v38  ;;  %v1986_v46 = vpop.f32.mrb[37].mxu0  ;;  %v2778_v51 = vadd.f32 %v2177_v45, %v918_v39  ;;  %v2179_v54 = vpop.f32.mrb[37].mxu1 }
 0x21b   : > { %v2777_v52 = vadd.f32 %v1986_v46, %v917_v41  ;;  %v1988_v55 = vpop.f32.mrb[38].mxu0  ;;  %v2779_v57 = vadd.f32 %v2179_v54, %v919_v14  ;;  %v2181_v60 = vpop.f32.mrb[38].mxu1  ;;  %v964_v46 = vld [vmem:[#allocation2 + $0x600] sm:$0xff] }
 0x21c   : > { %3032 = vst [vmem:[#allocation2 + $0x480] sm:$0xff] %v2776_v44  ;;  %v2784_v59 = vadd.f32 %v1988_v55, %v924_v43  ;;  %v1990_v62 = vpop.f32.mrb[39].mxu0  ;;  %3034 = vst [vmem:[#allocation2 + $0x490] sm:$0xff] %v2778_v51  ;;  %v2786_v63 = vadd.f32 %v2181_v60, %v926_v48  ;;  %v2183_v16 = vpop.f32.mrb[39].mxu1  ;;  %v966_v48 = vld [vmem:[#allocation2 + $0x610] sm:$0xff]  ;;  %v972_v54 = vld [vmem:[#allocation2 + $0x640] sm:$0xff] }
 0x21d   : > { %3033 = vst [vmem:[#allocation2 + $0x488] sm:$0xff] %v2777_v52  ;;  %v2785_v0 = vadd.f32 %v1990_v62, %v925_v50  ;;  %3035 = vst [vmem:[#allocation2 + $0x498] sm:$0xff] %v2779_v57  ;;  %v2787_v1 = vadd.f32 %v2183_v16, %v927_v56  ;;  %v965_v50 = vld [vmem:[#allocation2 + $0x608] sm:$0xff]  ;;  %v967_v52 = vld [vmem:[#allocation2 + $0x618] sm:$0xff] }
 0x21e   : > { %3040 = vst [vmem:[#allocation2 + $0x4c0] sm:$0xff] %v2784_v59  ;;  %3042 = vst [vmem:[#allocation2 + $0x4d0] sm:$0xff] %v2786_v63  ;;  %v974_v59 = vld [vmem:[#allocation2 + $0x650] sm:$0xff]  ;;  %v973_v60 = vld [vmem:[#allocation2 + $0x648] sm:$0xff] }
 0x21f   : > { %3041 = vst [vmem:[#allocation2 + $0x4c8] sm:$0xff] %v2785_v0  ;;  %3043 = vst [vmem:[#allocation2 + $0x4d8] sm:$0xff] %v2787_v1  ;;  %v975_v1 = vld [vmem:[#allocation2 + $0x658] sm:$0xff] }
 0x221   : > { %v1994_v6 = vpop.f32.mrb[40].mxu0  ;;  %v2187_v19 = vpop.f32.mrb[40].mxu1 }
 0x222   : > { %v2792_v8 = vadd.f32 %v1994_v6, %v932_v2  ;;  %v1996_v40 = vpop.f32.mrb[41].mxu0  ;;  %v2794_v61 = vadd.f32 %v2187_v19, %v934_v3  ;;  %v2189_v10 = vpop.f32.mrb[41].mxu1 }
 0x223   : > { %v2793_v11 = vadd.f32 %v1996_v40, %v933_v4  ;;  %v1998_v15 = vpop.f32.mrb[42].mxu0  ;;  %v2795_v33 = vadd.f32 %v2189_v10, %v935_v17  ;;  %v2191_v53 = vpop.f32.mrb[42].mxu1  ;;  %v980_v40 = vld [vmem:[#allocation2 + $0x680] sm:$0xff] }
 0x224   : > { %3048 = vst [vmem:[#allocation2 + $0x500] sm:$0xff] %v2792_v8  ;;  %v2800_v49 = vadd.f32 %v1998_v15, %v940_v7  ;;  %v2000_v12 = vpop.f32.mrb[43].mxu0  ;;  %3050 = vst [vmem:[#allocation2 + $0x510] sm:$0xff] %v2794_v61  ;;  %v2802_v5 = vadd.f32 %v2191_v53, %v942_v47  ;;  %v2193_v20 = vpop.f32.mrb[43].mxu1  ;;  %v982_v47 = vld [vmem:[#allocation2 + $0x690] sm:$0xff]  ;;  %v988_v10 = vld [vmem:[#allocation2 + $0x6c0] sm:$0xff] }
 0x225   : > { %3049 = vst [vmem:[#allocation2 + $0x508] sm:$0xff] %v2793_v11  ;;  %v2801_v9 = vadd.f32 %v2000_v12, %v941_v58  ;;  %3051 = vst [vmem:[#allocation2 + $0x518] sm:$0xff] %v2795_v33  ;;  %v2803_v21 = vadd.f32 %v2193_v20, %v943_v29  ;;  %v981_v58 = vld [vmem:[#allocation2 + $0x688] sm:$0xff]  ;;  %v983_v11 = vld [vmem:[#allocation2 + $0x698] sm:$0xff] }
 0x226   : > { %3056 = vst [vmem:[#allocation2 + $0x540] sm:$0xff] %v2800_v49  ;;  %3058 = vst [vmem:[#allocation2 + $0x550] sm:$0xff] %v2802_v5  ;;  %v990_v49 = vld [vmem:[#allocation2 + $0x6d0] sm:$0xff]  ;;  %v989_v53 = vld [vmem:[#allocation2 + $0x6c8] sm:$0xff] }
 0x227   : > { %3057 = vst [vmem:[#allocation2 + $0x548] sm:$0xff] %v2801_v9  ;;  %3059 = vst [vmem:[#allocation2 + $0x558] sm:$0xff] %v2803_v21  ;;  %v991_v21 = vld [vmem:[#allocation2 + $0x6d8] sm:$0xff] }
 0x229   : > { %v2004_v24 = vpop.f32.mrb[44].mxu0  ;;  %v2197_v28 = vpop.f32.mrb[44].mxu1 }
 0x22a   : > { %v2808_v27 = vadd.f32 %v2004_v24, %v948_v22  ;;  %v2006_v30 = vpop.f32.mrb[45].mxu0  ;;  %v2810_v34 = vadd.f32 %v2197_v28, %v950_v18  ;;  %v2199_v36 = vpop.f32.mrb[45].mxu1 }
 0x22b   : > { %v2809_v35 = vadd.f32 %v2006_v30, %v949_v23  ;;  %v2008_v13 = vpop.f32.mrb[46].mxu0  ;;  %v2811_v38 = vadd.f32 %v2199_v36, %v951_v25  ;;  %v2201_v41 = vpop.f32.mrb[46].mxu1  ;;  %v996_v30 = vld [vmem:[#allocation2 + $0x700] sm:$0xff] }
 0x22c   : > { %3064 = vst [vmem:[#allocation2 + $0x580] sm:$0xff] %v2808_v27  ;;  %v2816_v39 = vadd.f32 %v2008_v13, %v956_v26  ;;  %v2010_v42 = vpop.f32.mrb[47].mxu0  ;;  %3066 = vst [vmem:[#allocation2 + $0x590] sm:$0xff] %v2810_v34  ;;  %v2818_v14 = vadd.f32 %v2201_v41, %v958_v31  ;;  %v2203_v44 = vpop.f32.mrb[47].mxu1  ;;  %v998_v31 = vld [vmem:[#allocation2 + $0x710] sm:$0xff]  ;;  %v1004_v36 = vld [vmem:[#allocation2 + $0x740] sm:$0xff] }
 0x22d   : > { %3065 = vst [vmem:[#allocation2 + $0x588] sm:$0xff] %v2809_v35  ;;  %v2817_v43 = vadd.f32 %v2010_v42, %v957_v32  ;;  %3067 = vst [vmem:[#allocation2 + $0x598] sm:$0xff] %v2811_v38  ;;  %v2819_v45 = vadd.f32 %v2203_v44, %v959_v37  ;;  %v997_v32 = vld [vmem:[#allocation2 + $0x708] sm:$0xff]  ;;  %v999_v35 = vld [vmem:[#allocation2 + $0x718] sm:$0xff] }
 0x22e   : > { %3072 = vst [vmem:[#allocation2 + $0x5c0] sm:$0xff] %v2816_v39  ;;  %3074 = vst [vmem:[#allocation2 + $0x5d0] sm:$0xff] %v2818_v14  ;;  %v1006_v39 = vld [vmem:[#allocation2 + $0x750] sm:$0xff]  ;;  %v1005_v41 = vld [vmem:[#allocation2 + $0x748] sm:$0xff] }
 0x22f   : > { %3073 = vst [vmem:[#allocation2 + $0x5c8] sm:$0xff] %v2817_v43  ;;  %3075 = vst [vmem:[#allocation2 + $0x5d8] sm:$0xff] %v2819_v45  ;;  %v1007_v45 = vld [vmem:[#allocation2 + $0x758] sm:$0xff] }
 0x231   : > { %v2014_v51 = vpop.f32.mrb[48].mxu0  ;;  %v2207_v56 = vpop.f32.mrb[48].mxu1 }
 0x232   : > { %v2824_v55 = vadd.f32 %v2014_v51, %v964_v46  ;;  %v2016_v57 = vpop.f32.mrb[49].mxu0  ;;  %v2826_v62 = vadd.f32 %v2207_v56, %v966_v48  ;;  %v2209_v0 = vpop.f32.mrb[49].mxu1 }
 0x233   : > { %v2825_v63 = vadd.f32 %v2016_v57, %v965_v50  ;;  %v2018_v16 = vpop.f32.mrb[50].mxu0  ;;  %v2827_v2 = vadd.f32 %v2209_v0, %v967_v52  ;;  %v2211_v4 = vpop.f32.mrb[50].mxu1  ;;  %v1012_v57 = vld [vmem:[#allocation2 + $0x780] sm:$0xff] }
 0x234   : > { %3080 = vst [vmem:[#allocation2 + $0x600] sm:$0xff] %v2824_v55  ;;  %v2832_v3 = vadd.f32 %v2018_v16, %v972_v54  ;;  %v2020_v6 = vpop.f32.mrb[51].mxu0  ;;  %3082 = vst [vmem:[#allocation2 + $0x610] sm:$0xff] %v2826_v62  ;;  %v2834_v17 = vadd.f32 %v2211_v4, %v974_v59  ;;  %v2213_v8 = vpop.f32.mrb[51].mxu1  ;;  %v1014_v59 = vld [vmem:[#allocation2 + $0x790] sm:$0xff]  ;;  %v1020_v0 = vld [vmem:[#allocation2 + $0x7c0] sm:$0xff] }
 0x235   : > { %3081 = vst [vmem:[#allocation2 + $0x608] sm:$0xff] %v2825_v63  ;;  %v2833_v7 = vadd.f32 %v2020_v6, %v973_v60  ;;  %3083 = vst [vmem:[#allocation2 + $0x618] sm:$0xff] %v2827_v2  ;;  %v2835_v19 = vadd.f32 %v2213_v8, %v975_v1  ;;  %v1013_v60 = vld [vmem:[#allocation2 + $0x788] sm:$0xff]  ;;  %v1015_v63 = vld [vmem:[#allocation2 + $0x798] sm:$0xff] }
 0x236   : > { %3088 = vst [vmem:[#allocation2 + $0x640] sm:$0xff] %v2832_v3  ;;  %3090 = vst [vmem:[#allocation2 + $0x650] sm:$0xff] %v2834_v17  ;;  %v1022_v3 = vld [vmem:[#allocation2 + $0x7d0] sm:$0xff]  ;;  %v1021_v4 = vld [vmem:[#allocation2 + $0x7c8] sm:$0xff] }
 0x237   : > { %3089 = vst [vmem:[#allocation2 + $0x648] sm:$0xff] %v2833_v7  ;;  %3091 = vst [vmem:[#allocation2 + $0x658] sm:$0xff] %v2835_v19  ;;  %v1023_v19 = vld [vmem:[#allocation2 + $0x7d8] sm:$0xff] }
 0x239   : > { %v2024_v61 = vpop.f32.mrb[52].mxu0  ;;  %v2217_v29 = vpop.f32.mrb[52].mxu1 }
 0x23a   : > { %v2840_v15 = vadd.f32 %v2024_v61, %v980_v40  ;;  %v2026_v33 = vpop.f32.mrb[53].mxu0  ;;  %v2842_v12 = vadd.f32 %v2217_v29, %v982_v47  ;;  %v2219_v9 = vpop.f32.mrb[53].mxu1 }
 0x23b   : > { %v2841_v5 = vadd.f32 %v2026_v33, %v981_v58  ;;  %v2028_v20 = vpop.f32.mrb[54].mxu0  ;;  %v2843_v22 = vadd.f32 %v2219_v9, %v983_v11  ;;  %v2221_v23 = vpop.f32.mrb[54].mxu1  ;;  %v776_v33 = vld [vmem:[#allocation2 + $0x20] sm:$0xff] }
 0x23c   : > { %3096 = vst [vmem:[#allocation2 + $0x680] sm:$0xff] %v2840_v15  ;;  %v2848_v18 = vadd.f32 %v2028_v20, %v988_v10  ;;  %v2030_v24 = vpop.f32.mrb[55].mxu0  ;;  %3098 = vst [vmem:[#allocation2 + $0x690] sm:$0xff] %v2842_v12  ;;  %v2850_v25 = vadd.f32 %v2221_v23, %v990_v49  ;;  %v2223_v27 = vpop.f32.mrb[55].mxu1  ;;  %v778_v49 = vld [vmem:[#allocation2 + $0x30] sm:$0xff]  ;;  %v784_v9 = vld [vmem:[#allocation2 + $0x60] sm:$0xff] }
 0x23d   : > { %3097 = vst [vmem:[#allocation2 + $0x688] sm:$0xff] %v2841_v5  ;;  %v2849_v26 = vadd.f32 %v2030_v24, %v989_v53  ;;  %3099 = vst [vmem:[#allocation2 + $0x698] sm:$0xff] %v2843_v22  ;;  %v2851_v28 = vadd.f32 %v2223_v27, %v991_v21  ;;  %v777_v53 = vld [vmem:[#allocation2 + $0x28] sm:$0xff]  ;;  %v779_v5 = vld [vmem:[#allocation2 + $0x38] sm:$0xff] }
 0x23e   : > { %3104 = vst [vmem:[#allocation2 + $0x6c0] sm:$0xff] %v2848_v18  ;;  %3106 = vst [vmem:[#allocation2 + $0x6d0] sm:$0xff] %v2850_v25  ;;  %v786_v18 = vld [vmem:[#allocation2 + $0x70] sm:$0xff]  ;;  %v785_v23 = vld [vmem:[#allocation2 + $0x68] sm:$0xff] }
 0x23f   : > { %3105 = vst [vmem:[#allocation2 + $0x6c8] sm:$0xff] %v2849_v26  ;;  %3107 = vst [vmem:[#allocation2 + $0x6d8] sm:$0xff] %v2851_v28  ;;  %v787_v28 = vld [vmem:[#allocation2 + $0x78] sm:$0xff] }
 0x241   : > { %v2034_v34 = vpop.f32.mrb[56].mxu0  ;;  %v2227_v37 = vpop.f32.mrb[56].mxu1 }
 0x242   : > { %v2856_v13 = vadd.f32 %v2034_v34, %v996_v30  ;;  %v2036_v38 = vpop.f32.mrb[57].mxu0  ;;  %v2858_v42 = vadd.f32 %v2227_v37, %v998_v31  ;;  %v2229_v43 = vpop.f32.mrb[57].mxu1 }
 0x243   : > { %v2857_v14 = vadd.f32 %v2036_v38, %v997_v32  ;;  %v2038_v44 = vpop.f32.mrb[58].mxu0  ;;  %v2859_v46 = vadd.f32 %v2229_v43, %v999_v35  ;;  %v2231_v50 = vpop.f32.mrb[58].mxu1  ;;  %v792_v38 = vld [vmem:[#allocation2 + $0xa0] sm:$0xff] }
 0x244   : > { %3112 = vst [vmem:[#allocation2 + $0x700] sm:$0xff] %v2856_v13  ;;  %v2864_v48 = vadd.f32 %v2038_v44, %v1004_v36  ;;  %v2040_v51 = vpop.f32.mrb[59].mxu0  ;;  %3114 = vst [vmem:[#allocation2 + $0x710] sm:$0xff] %v2858_v42  ;;  %v2866_v52 = vadd.f32 %v2231_v50, %v1006_v39  ;;  %v2233_v55 = vpop.f32.mrb[59].mxu1  ;;  %v794_v39 = vld [vmem:[#allocation2 + $0xb0] sm:$0xff]  ;;  %v800_v43 = vld [vmem:[#allocation2 + $0xe0] sm:$0xff] }
 0x245   : > { %3113 = vst [vmem:[#allocation2 + $0x708] sm:$0xff] %v2857_v14  ;;  %v2865_v54 = vadd.f32 %v2040_v51, %v1005_v41  ;;  %3115 = vst [vmem:[#allocation2 + $0x718] sm:$0xff] %v2859_v46  ;;  %v2867_v56 = vadd.f32 %v2233_v55, %v1007_v45  ;;  %v793_v41 = vld [vmem:[#allocation2 + $0xa8] sm:$0xff]  ;;  %v795_v14 = vld [vmem:[#allocation2 + $0xb8] sm:$0xff] }
 0x246   : > { %3120 = vst [vmem:[#allocation2 + $0x740] sm:$0xff] %v2864_v48  ;;  %3122 = vst [vmem:[#allocation2 + $0x750] sm:$0xff] %v2866_v52  ;;  %v802_v48 = vld [vmem:[#allocation2 + $0xf0] sm:$0xff]  ;;  %v801_v50 = vld [vmem:[#allocation2 + $0xe8] sm:$0xff] }
 0x247   : > { %3121 = vst [vmem:[#allocation2 + $0x748] sm:$0xff] %v2865_v54  ;;  %3123 = vst [vmem:[#allocation2 + $0x758] sm:$0xff] %v2867_v56  ;;  %v803_v56 = vld [vmem:[#allocation2 + $0xf8] sm:$0xff] }
 0x249   : > { %v2044_v62 = vpop.f32.mrb[60].mxu0  ;;  %v2237_v1 = vpop.f32.mrb[60].mxu1 }
 0x24a   : > { %v2872_v16 = vadd.f32 %v2044_v62, %v1012_v57  ;;  %v2046_v2 = vpop.f32.mrb[61].mxu0  ;;  %v2874_v6 = vadd.f32 %v2237_v1, %v1014_v59  ;;  %v2239_v7 = vpop.f32.mrb[61].mxu1 }
 0x24b   : > { %v2873_v17 = vadd.f32 %v2046_v2, %v1013_v60  ;;  %v2048_v8 = vpop.f32.mrb[62].mxu0  ;;  %v2875_v40 = vadd.f32 %v2239_v7, %v1015_v63  ;;  %v2241_v58 = vpop.f32.mrb[62].mxu1  ;;  %v808_v2 = vld [vmem:[#allocation2 + $0x120] sm:$0xff] }
 0x24c   : > { %3128 = vst [vmem:[#allocation2 + $0x780] sm:$0xff] %v2872_v16  ;;  %v2880_v47 = vadd.f32 %v2048_v8, %v1020_v0  ;;  %v2050_v61 = vpop.f32.mrb[63].mxu0  ;;  %3130 = vst [vmem:[#allocation2 + $0x790] sm:$0xff] %v2874_v6  ;;  %v2882_v11 = vadd.f32 %v2241_v58, %v1022_v3  ;;  %v2243_v15 = vpop.f32.mrb[63].mxu1  ;;  %v810_v3 = vld [vmem:[#allocation2 + $0x130] sm:$0xff]  ;;  %v816_v7 = vld [vmem:[#allocation2 + $0x160] sm:$0xff] }
 0x24d   : > { %3129 = vst [vmem:[#allocation2 + $0x788] sm:$0xff] %v2873_v17  ;;  %v2881_v10 = vadd.f32 %v2050_v61, %v1021_v4  ;;  %3131 = vst [vmem:[#allocation2 + $0x798] sm:$0xff] %v2875_v40  ;;  %v2883_v29 = vadd.f32 %v2243_v15, %v1023_v19  ;;  %v809_v4 = vld [vmem:[#allocation2 + $0x128] sm:$0xff]  ;;  %v811_v17 = vld [vmem:[#allocation2 + $0x138] sm:$0xff] }
 0x24e   : > { %3136 = vst [vmem:[#allocation2 + $0x7c0] sm:$0xff] %v2880_v47  ;;  %3138 = vst [vmem:[#allocation2 + $0x7d0] sm:$0xff] %v2882_v11  ;;  %v818_v47 = vld [vmem:[#allocation2 + $0x170] sm:$0xff]  ;;  %v817_v58 = vld [vmem:[#allocation2 + $0x168] sm:$0xff] }
 0x24f   : > { %3137 = vst [vmem:[#allocation2 + $0x7c8] sm:$0xff] %v2881_v10  ;;  %3139 = vst [vmem:[#allocation2 + $0x7d8] sm:$0xff] %v2883_v29  ;;  %v819_v29 = vld [vmem:[#allocation2 + $0x178] sm:$0xff] }
 0x251   : > { %v2280_v12 = vpop.f32.mrb[64].mxu0  ;;  %v2473_v21 = vpop.f32.mrb[64].mxu1 }
 0x252   : > { %v2636_v20 = vadd.f32 %v2280_v12, %v776_v33  ;;  %v2282_v22 = vpop.f32.mrb[65].mxu0  ;;  %v2638_v24 = vadd.f32 %v2473_v21, %v778_v49  ;;  %v2475_v26 = vpop.f32.mrb[65].mxu1 }
 0x253   : > { %v2637_v25 = vadd.f32 %v2282_v22, %v777_v53  ;;  %v2284_v27 = vpop.f32.mrb[66].mxu0  ;;  %v2639_v30 = vadd.f32 %v2475_v26, %v779_v5  ;;  %v2477_v32 = vpop.f32.mrb[66].mxu1  ;;  %v824_v22 = vld [vmem:[#allocation2 + $0x1a0] sm:$0xff] }
 0x254   : > { %2892 = vst [vmem:[#allocation2 + $0x20] sm:$0xff] %v2636_v20  ;;  %v2644_v31 = vadd.f32 %v2284_v27, %v784_v9  ;;  %v2286_v34 = vpop.f32.mrb[67].mxu0  ;;  %2894 = vst [vmem:[#allocation2 + $0x30] sm:$0xff] %v2638_v24  ;;  %v2646_v35 = vadd.f32 %v2477_v32, %v786_v18  ;;  %v2479_v13 = vpop.f32.mrb[67].mxu1  ;;  %v826_v18 = vld [vmem:[#allocation2 + $0x1b0] sm:$0xff]  ;;  %v832_v26 = vld [vmem:[#allocation2 + $0x1e0] sm:$0xff] }
 0x255   : > { %2893 = vst [vmem:[#allocation2 + $0x28] sm:$0xff] %v2637_v25  ;;  %v2645_v36 = vadd.f32 %v2286_v34, %v785_v23  ;;  %2895 = vst [vmem:[#allocation2 + $0x38] sm:$0xff] %v2639_v30  ;;  %v2647_v37 = vadd.f32 %v2479_v13, %v787_v28  ;;  %v825_v23 = vld [vmem:[#allocation2 + $0x1a8] sm:$0xff]  ;;  %v827_v25 = vld [vmem:[#allocation2 + $0x1b8] sm:$0xff] }
 0x256   : > { %2900 = vst [vmem:[#allocation2 + $0x60] sm:$0xff] %v2644_v31  ;;  %2902 = vst [vmem:[#allocation2 + $0x70] sm:$0xff] %v2646_v35  ;;  %v834_v31 = vld [vmem:[#allocation2 + $0x1f0] sm:$0xff]  ;;  %v833_v32 = vld [vmem:[#allocation2 + $0x1e8] sm:$0xff] }
 0x257   : > { %2901 = vst [vmem:[#allocation2 + $0x68] sm:$0xff] %v2645_v36  ;;  %2903 = vst [vmem:[#allocation2 + $0x78] sm:$0xff] %v2647_v37  ;;  %v835_v37 = vld [vmem:[#allocation2 + $0x1f8] sm:$0xff] }
 0x259   : > { %v2290_v42 = vpop.f32.mrb[68].mxu0  ;;  %v2483_v45 = vpop.f32.mrb[68].mxu1 }
 0x25a   : > { %v2652_v44 = vadd.f32 %v2290_v42, %v792_v38  ;;  %v2292_v46 = vpop.f32.mrb[69].mxu0  ;;  %v2654_v51 = vadd.f32 %v2483_v45, %v794_v39  ;;  %v2485_v54 = vpop.f32.mrb[69].mxu1 }
 0x25b   : > { %v2653_v52 = vadd.f32 %v2292_v46, %v793_v41  ;;  %v2294_v55 = vpop.f32.mrb[70].mxu0  ;;  %v2655_v57 = vadd.f32 %v2485_v54, %v795_v14  ;;  %v2487_v60 = vpop.f32.mrb[70].mxu1  ;;  %v840_v46 = vld [vmem:[#allocation2 + $0x220] sm:$0xff] }
 0x25c   : > { %2908 = vst [vmem:[#allocation2 + $0xa0] sm:$0xff] %v2652_v44  ;;  %v2660_v59 = vadd.f32 %v2294_v55, %v800_v43  ;;  %v2296_v62 = vpop.f32.mrb[71].mxu0  ;;  %2910 = vst [vmem:[#allocation2 + $0xb0] sm:$0xff] %v2654_v51  ;;  %v2662_v63 = vadd.f32 %v2487_v60, %v802_v48  ;;  %v2489_v16 = vpop.f32.mrb[71].mxu1  ;;  %v842_v48 = vld [vmem:[#allocation2 + $0x230] sm:$0xff]  ;;  %v848_v54 = vld [vmem:[#allocation2 + $0x260] sm:$0xff] }
 0x25d   : > { %2909 = vst [vmem:[#allocation2 + $0xa8] sm:$0xff] %v2653_v52  ;;  %v2661_v0 = vadd.f32 %v2296_v62, %v801_v50  ;;  %2911 = vst [vmem:[#allocation2 + $0xb8] sm:$0xff] %v2655_v57  ;;  %v2663_v1 = vadd.f32 %v2489_v16, %v803_v56  ;;  %v841_v50 = vld [vmem:[#allocation2 + $0x228] sm:$0xff]  ;;  %v843_v52 = vld [vmem:[#allocation2 + $0x238] sm:$0xff] }
 0x25e   : > { %2916 = vst [vmem:[#allocation2 + $0xe0] sm:$0xff] %v2660_v59  ;;  %2918 = vst [vmem:[#allocation2 + $0xf0] sm:$0xff] %v2662_v63  ;;  %v850_v59 = vld [vmem:[#allocation2 + $0x270] sm:$0xff]  ;;  %v849_v60 = vld [vmem:[#allocation2 + $0x268] sm:$0xff] }
 0x25f   : > { %2917 = vst [vmem:[#allocation2 + $0xe8] sm:$0xff] %v2661_v0  ;;  %2919 = vst [vmem:[#allocation2 + $0xf8] sm:$0xff] %v2663_v1  ;;  %v851_v1 = vld [vmem:[#allocation2 + $0x278] sm:$0xff] }
 0x261   : > { %v2300_v6 = vpop.f32.mrb[72].mxu0  ;;  %v2493_v19 = vpop.f32.mrb[72].mxu1 }
 0x262   : > { %v2668_v8 = vadd.f32 %v2300_v6, %v808_v2  ;;  %v2302_v40 = vpop.f32.mrb[73].mxu0  ;;  %v2670_v61 = vadd.f32 %v2493_v19, %v810_v3  ;;  %v2495_v10 = vpop.f32.mrb[73].mxu1 }
 0x263   : > { %v2669_v11 = vadd.f32 %v2302_v40, %v809_v4  ;;  %v2304_v15 = vpop.f32.mrb[74].mxu0  ;;  %v2671_v33 = vadd.f32 %v2495_v10, %v811_v17  ;;  %v2497_v53 = vpop.f32.mrb[74].mxu1  ;;  %v856_v40 = vld [vmem:[#allocation2 + $0x2a0] sm:$0xff] }
 0x264   : > { %2924 = vst [vmem:[#allocation2 + $0x120] sm:$0xff] %v2668_v8  ;;  %v2676_v49 = vadd.f32 %v2304_v15, %v816_v7  ;;  %v2306_v12 = vpop.f32.mrb[75].mxu0  ;;  %2926 = vst [vmem:[#allocation2 + $0x130] sm:$0xff] %v2670_v61  ;;  %v2678_v5 = vadd.f32 %v2497_v53, %v818_v47  ;;  %v2499_v20 = vpop.f32.mrb[75].mxu1  ;;  %v858_v47 = vld [vmem:[#allocation2 + $0x2b0] sm:$0xff]  ;;  %v864_v10 = vld [vmem:[#allocation2 + $0x2e0] sm:$0xff] }
 0x265   : > { %2925 = vst [vmem:[#allocation2 + $0x128] sm:$0xff] %v2669_v11  ;;  %v2677_v9 = vadd.f32 %v2306_v12, %v817_v58  ;;  %2927 = vst [vmem:[#allocation2 + $0x138] sm:$0xff] %v2671_v33  ;;  %v2679_v21 = vadd.f32 %v2499_v20, %v819_v29  ;;  %v857_v58 = vld [vmem:[#allocation2 + $0x2a8] sm:$0xff]  ;;  %v859_v11 = vld [vmem:[#allocation2 + $0x2b8] sm:$0xff] }
 0x266   : > { %2932 = vst [vmem:[#allocation2 + $0x160] sm:$0xff] %v2676_v49  ;;  %2934 = vst [vmem:[#allocation2 + $0x170] sm:$0xff] %v2678_v5  ;;  %v866_v49 = vld [vmem:[#allocation2 + $0x2f0] sm:$0xff]  ;;  %v865_v53 = vld [vmem:[#allocation2 + $0x2e8] sm:$0xff] }
 0x267   : > { %2933 = vst [vmem:[#allocation2 + $0x168] sm:$0xff] %v2677_v9  ;;  %2935 = vst [vmem:[#allocation2 + $0x178] sm:$0xff] %v2679_v21  ;;  %v867_v21 = vld [vmem:[#allocation2 + $0x2f8] sm:$0xff] }
 0x269   : > { %v2310_v24 = vpop.f32.mrb[76].mxu0  ;;  %v2503_v28 = vpop.f32.mrb[76].mxu1 }
 0x26a   : > { %v2684_v27 = vadd.f32 %v2310_v24, %v824_v22  ;;  %v2312_v30 = vpop.f32.mrb[77].mxu0  ;;  %v2686_v34 = vadd.f32 %v2503_v28, %v826_v18  ;;  %v2505_v36 = vpop.f32.mrb[77].mxu1 }
 0x26b   : > { %v2685_v35 = vadd.f32 %v2312_v30, %v825_v23  ;;  %v2314_v13 = vpop.f32.mrb[78].mxu0  ;;  %v2687_v38 = vadd.f32 %v2505_v36, %v827_v25  ;;  %v2507_v41 = vpop.f32.mrb[78].mxu1  ;;  %v872_v30 = vld [vmem:[#allocation2 + $0x320] sm:$0xff] }
 0x26c   : > { %2940 = vst [vmem:[#allocation2 + $0x1a0] sm:$0xff] %v2684_v27  ;;  %v2692_v39 = vadd.f32 %v2314_v13, %v832_v26  ;;  %v2316_v42 = vpop.f32.mrb[79].mxu0  ;;  %2942 = vst [vmem:[#allocation2 + $0x1b0] sm:$0xff] %v2686_v34  ;;  %v2694_v14 = vadd.f32 %v2507_v41, %v834_v31  ;;  %v2509_v44 = vpop.f32.mrb[79].mxu1  ;;  %v874_v31 = vld [vmem:[#allocation2 + $0x330] sm:$0xff]  ;;  %v880_v36 = vld [vmem:[#allocation2 + $0x360] sm:$0xff] }
 0x26d   : > { %2941 = vst [vmem:[#allocation2 + $0x1a8] sm:$0xff] %v2685_v35  ;;  %v2693_v43 = vadd.f32 %v2316_v42, %v833_v32  ;;  %2943 = vst [vmem:[#allocation2 + $0x1b8] sm:$0xff] %v2687_v38  ;;  %v2695_v45 = vadd.f32 %v2509_v44, %v835_v37  ;;  %v873_v32 = vld [vmem:[#allocation2 + $0x328] sm:$0xff]  ;;  %v875_v35 = vld [vmem:[#allocation2 + $0x338] sm:$0xff] }
 0x26e   : > { %2948 = vst [vmem:[#allocation2 + $0x1e0] sm:$0xff] %v2692_v39  ;;  %2950 = vst [vmem:[#allocation2 + $0x1f0] sm:$0xff] %v2694_v14  ;;  %v882_v39 = vld [vmem:[#allocation2 + $0x370] sm:$0xff]  ;;  %v881_v41 = vld [vmem:[#allocation2 + $0x368] sm:$0xff] }
 0x26f   : > { %2949 = vst [vmem:[#allocation2 + $0x1e8] sm:$0xff] %v2693_v43  ;;  %2951 = vst [vmem:[#allocation2 + $0x1f8] sm:$0xff] %v2695_v45  ;;  %v883_v45 = vld [vmem:[#allocation2 + $0x378] sm:$0xff] }
 0x271   : > { %v2320_v51 = vpop.f32.mrb[80].mxu0  ;;  %v2513_v56 = vpop.f32.mrb[80].mxu1 }
 0x272   : > { %v2700_v55 = vadd.f32 %v2320_v51, %v840_v46  ;;  %v2322_v57 = vpop.f32.mrb[81].mxu0  ;;  %v2702_v62 = vadd.f32 %v2513_v56, %v842_v48  ;;  %v2515_v0 = vpop.f32.mrb[81].mxu1 }
 0x273   : > { %v2701_v63 = vadd.f32 %v2322_v57, %v841_v50  ;;  %v2324_v16 = vpop.f32.mrb[82].mxu0  ;;  %v2703_v2 = vadd.f32 %v2515_v0, %v843_v52  ;;  %v2517_v4 = vpop.f32.mrb[82].mxu1  ;;  %v888_v57 = vld [vmem:[#allocation2 + $0x3a0] sm:$0xff] }
 0x274   : > { %2956 = vst [vmem:[#allocation2 + $0x220] sm:$0xff] %v2700_v55  ;;  %v2708_v3 = vadd.f32 %v2324_v16, %v848_v54  ;;  %v2326_v6 = vpop.f32.mrb[83].mxu0  ;;  %2958 = vst [vmem:[#allocation2 + $0x230] sm:$0xff] %v2702_v62  ;;  %v2710_v17 = vadd.f32 %v2517_v4, %v850_v59  ;;  %v2519_v8 = vpop.f32.mrb[83].mxu1  ;;  %v890_v59 = vld [vmem:[#allocation2 + $0x3b0] sm:$0xff]  ;;  %v896_v0 = vld [vmem:[#allocation2 + $0x3e0] sm:$0xff] }
 0x275   : > { %2957 = vst [vmem:[#allocation2 + $0x228] sm:$0xff] %v2701_v63  ;;  %v2709_v7 = vadd.f32 %v2326_v6, %v849_v60  ;;  %2959 = vst [vmem:[#allocation2 + $0x238] sm:$0xff] %v2703_v2  ;;  %v2711_v19 = vadd.f32 %v2519_v8, %v851_v1  ;;  %v889_v60 = vld [vmem:[#allocation2 + $0x3a8] sm:$0xff]  ;;  %v891_v63 = vld [vmem:[#allocation2 + $0x3b8] sm:$0xff] }
 0x276   : > { %2964 = vst [vmem:[#allocation2 + $0x260] sm:$0xff] %v2708_v3  ;;  %2966 = vst [vmem:[#allocation2 + $0x270] sm:$0xff] %v2710_v17  ;;  %v898_v3 = vld [vmem:[#allocation2 + $0x3f0] sm:$0xff]  ;;  %v897_v4 = vld [vmem:[#allocation2 + $0x3e8] sm:$0xff] }
 0x277   : > { %2965 = vst [vmem:[#allocation2 + $0x268] sm:$0xff] %v2709_v7  ;;  %2967 = vst [vmem:[#allocation2 + $0x278] sm:$0xff] %v2711_v19  ;;  %v899_v19 = vld [vmem:[#allocation2 + $0x3f8] sm:$0xff] }
 0x279   : > { %v2330_v61 = vpop.f32.mrb[84].mxu0  ;;  %v2523_v29 = vpop.f32.mrb[84].mxu1 }
 0x27a   : > { %v2716_v15 = vadd.f32 %v2330_v61, %v856_v40  ;;  %v2332_v33 = vpop.f32.mrb[85].mxu0  ;;  %v2718_v12 = vadd.f32 %v2523_v29, %v858_v47  ;;  %v2525_v9 = vpop.f32.mrb[85].mxu1 }
 0x27b   : > { %v2717_v5 = vadd.f32 %v2332_v33, %v857_v58  ;;  %v2334_v20 = vpop.f32.mrb[86].mxu0  ;;  %v2719_v22 = vadd.f32 %v2525_v9, %v859_v11  ;;  %v2527_v23 = vpop.f32.mrb[86].mxu1  ;;  %v904_v33 = vld [vmem:[#allocation2 + $0x420] sm:$0xff] }
 0x27c   : > { %2972 = vst [vmem:[#allocation2 + $0x2a0] sm:$0xff] %v2716_v15  ;;  %v2724_v18 = vadd.f32 %v2334_v20, %v864_v10  ;;  %v2336_v24 = vpop.f32.mrb[87].mxu0  ;;  %2974 = vst [vmem:[#allocation2 + $0x2b0] sm:$0xff] %v2718_v12  ;;  %v2726_v25 = vadd.f32 %v2527_v23, %v866_v49  ;;  %v2529_v27 = vpop.f32.mrb[87].mxu1  ;;  %v906_v49 = vld [vmem:[#allocation2 + $0x430] sm:$0xff]  ;;  %v912_v9 = vld [vmem:[#allocation2 + $0x460] sm:$0xff] }
 0x27d   : > { %2973 = vst [vmem:[#allocation2 + $0x2a8] sm:$0xff] %v2717_v5  ;;  %v2725_v26 = vadd.f32 %v2336_v24, %v865_v53  ;;  %2975 = vst [vmem:[#allocation2 + $0x2b8] sm:$0xff] %v2719_v22  ;;  %v2727_v28 = vadd.f32 %v2529_v27, %v867_v21  ;;  %v905_v53 = vld [vmem:[#allocation2 + $0x428] sm:$0xff]  ;;  %v907_v5 = vld [vmem:[#allocation2 + $0x438] sm:$0xff] }
 0x27e   : > { %2980 = vst [vmem:[#allocation2 + $0x2e0] sm:$0xff] %v2724_v18  ;;  %2982 = vst [vmem:[#allocation2 + $0x2f0] sm:$0xff] %v2726_v25  ;;  %v914_v18 = vld [vmem:[#allocation2 + $0x470] sm:$0xff]  ;;  %v913_v23 = vld [vmem:[#allocation2 + $0x468] sm:$0xff] }
 0x27f   : > { %2981 = vst [vmem:[#allocation2 + $0x2e8] sm:$0xff] %v2725_v26  ;;  %2983 = vst [vmem:[#allocation2 + $0x2f8] sm:$0xff] %v2727_v28  ;;  %v915_v28 = vld [vmem:[#allocation2 + $0x478] sm:$0xff] }
 0x281   : > { %v2340_v34 = vpop.f32.mrb[88].mxu0  ;;  %v2533_v37 = vpop.f32.mrb[88].mxu1 }
 0x282   : > { %v2732_v13 = vadd.f32 %v2340_v34, %v872_v30  ;;  %v2342_v38 = vpop.f32.mrb[89].mxu0  ;;  %v2734_v42 = vadd.f32 %v2533_v37, %v874_v31  ;;  %v2535_v43 = vpop.f32.mrb[89].mxu1 }
 0x283   : > { %v2733_v14 = vadd.f32 %v2342_v38, %v873_v32  ;;  %v2344_v44 = vpop.f32.mrb[90].mxu0  ;;  %v2735_v46 = vadd.f32 %v2535_v43, %v875_v35  ;;  %v2537_v50 = vpop.f32.mrb[90].mxu1  ;;  %v920_v38 = vld [vmem:[#allocation2 + $0x4a0] sm:$0xff] }
 0x284   : > { %2988 = vst [vmem:[#allocation2 + $0x320] sm:$0xff] %v2732_v13  ;;  %v2740_v48 = vadd.f32 %v2344_v44, %v880_v36  ;;  %v2346_v51 = vpop.f32.mrb[91].mxu0  ;;  %2990 = vst [vmem:[#allocation2 + $0x330] sm:$0xff] %v2734_v42  ;;  %v2742_v52 = vadd.f32 %v2537_v50, %v882_v39  ;;  %v2539_v55 = vpop.f32.mrb[91].mxu1  ;;  %v922_v39 = vld [vmem:[#allocation2 + $0x4b0] sm:$0xff]  ;;  %v928_v43 = vld [vmem:[#allocation2 + $0x4e0] sm:$0xff] }
 0x285   : > { %2989 = vst [vmem:[#allocation2 + $0x328] sm:$0xff] %v2733_v14  ;;  %v2741_v54 = vadd.f32 %v2346_v51, %v881_v41  ;;  %2991 = vst [vmem:[#allocation2 + $0x338] sm:$0xff] %v2735_v46  ;;  %v2743_v56 = vadd.f32 %v2539_v55, %v883_v45  ;;  %v921_v41 = vld [vmem:[#allocation2 + $0x4a8] sm:$0xff]  ;;  %v923_v14 = vld [vmem:[#allocation2 + $0x4b8] sm:$0xff] }
 0x286   : > { %2996 = vst [vmem:[#allocation2 + $0x360] sm:$0xff] %v2740_v48  ;;  %2998 = vst [vmem:[#allocation2 + $0x370] sm:$0xff] %v2742_v52  ;;  %v930_v48 = vld [vmem:[#allocation2 + $0x4f0] sm:$0xff]  ;;  %v929_v50 = vld [vmem:[#allocation2 + $0x4e8] sm:$0xff] }
 0x287   : > { %2997 = vst [vmem:[#allocation2 + $0x368] sm:$0xff] %v2741_v54  ;;  %2999 = vst [vmem:[#allocation2 + $0x378] sm:$0xff] %v2743_v56  ;;  %v931_v56 = vld [vmem:[#allocation2 + $0x4f8] sm:$0xff] }
 0x289   : > { %v2350_v62 = vpop.f32.mrb[92].mxu0  ;;  %v2543_v1 = vpop.f32.mrb[92].mxu1 }
 0x28a   : > { %v2748_v16 = vadd.f32 %v2350_v62, %v888_v57  ;;  %v2352_v2 = vpop.f32.mrb[93].mxu0  ;;  %v2750_v6 = vadd.f32 %v2543_v1, %v890_v59  ;;  %v2545_v7 = vpop.f32.mrb[93].mxu1 }
 0x28b   : > { %v2749_v17 = vadd.f32 %v2352_v2, %v889_v60  ;;  %v2354_v8 = vpop.f32.mrb[94].mxu0  ;;  %v2751_v40 = vadd.f32 %v2545_v7, %v891_v63  ;;  %v2547_v58 = vpop.f32.mrb[94].mxu1  ;;  %v936_v2 = vld [vmem:[#allocation2 + $0x520] sm:$0xff] }
 0x28c   : > { %3004 = vst [vmem:[#allocation2 + $0x3a0] sm:$0xff] %v2748_v16  ;;  %v2756_v47 = vadd.f32 %v2354_v8, %v896_v0  ;;  %v2356_v61 = vpop.f32.mrb[95].mxu0  ;;  %3006 = vst [vmem:[#allocation2 + $0x3b0] sm:$0xff] %v2750_v6  ;;  %v2758_v11 = vadd.f32 %v2547_v58, %v898_v3  ;;  %v2549_v15 = vpop.f32.mrb[95].mxu1  ;;  %v938_v3 = vld [vmem:[#allocation2 + $0x530] sm:$0xff]  ;;  %v944_v7 = vld [vmem:[#allocation2 + $0x560] sm:$0xff] }
 0x28d   : > { %3005 = vst [vmem:[#allocation2 + $0x3a8] sm:$0xff] %v2749_v17  ;;  %v2757_v10 = vadd.f32 %v2356_v61, %v897_v4  ;;  %3007 = vst [vmem:[#allocation2 + $0x3b8] sm:$0xff] %v2751_v40  ;;  %v2759_v29 = vadd.f32 %v2549_v15, %v899_v19  ;;  %v937_v4 = vld [vmem:[#allocation2 + $0x528] sm:$0xff]  ;;  %v939_v17 = vld [vmem:[#allocation2 + $0x538] sm:$0xff] }
 0x28e   : > { %3012 = vst [vmem:[#allocation2 + $0x3e0] sm:$0xff] %v2756_v47  ;;  %3014 = vst [vmem:[#allocation2 + $0x3f0] sm:$0xff] %v2758_v11  ;;  %v946_v47 = vld [vmem:[#allocation2 + $0x570] sm:$0xff]  ;;  %v945_v58 = vld [vmem:[#allocation2 + $0x568] sm:$0xff] }
 0x28f   : > { %3013 = vst [vmem:[#allocation2 + $0x3e8] sm:$0xff] %v2757_v10  ;;  %3015 = vst [vmem:[#allocation2 + $0x3f8] sm:$0xff] %v2759_v29  ;;  %v947_v29 = vld [vmem:[#allocation2 + $0x578] sm:$0xff] }
 0x291   : > { %v2360_v12 = vpop.f32.mrb[96].mxu0  ;;  %v2553_v21 = vpop.f32.mrb[96].mxu1 }
 0x292   : > { %v2764_v20 = vadd.f32 %v2360_v12, %v904_v33  ;;  %v2362_v22 = vpop.f32.mrb[97].mxu0  ;;  %v2766_v24 = vadd.f32 %v2553_v21, %v906_v49  ;;  %v2555_v26 = vpop.f32.mrb[97].mxu1 }
 0x293   : > { %v2765_v25 = vadd.f32 %v2362_v22, %v905_v53  ;;  %v2364_v27 = vpop.f32.mrb[98].mxu0  ;;  %v2767_v30 = vadd.f32 %v2555_v26, %v907_v5  ;;  %v2557_v32 = vpop.f32.mrb[98].mxu1  ;;  %v952_v22 = vld [vmem:[#allocation2 + $0x5a0] sm:$0xff] }
 0x294   : > { %3020 = vst [vmem:[#allocation2 + $0x420] sm:$0xff] %v2764_v20  ;;  %v2772_v31 = vadd.f32 %v2364_v27, %v912_v9  ;;  %v2366_v34 = vpop.f32.mrb[99].mxu0  ;;  %3022 = vst [vmem:[#allocation2 + $0x430] sm:$0xff] %v2766_v24  ;;  %v2774_v35 = vadd.f32 %v2557_v32, %v914_v18  ;;  %v2559_v13 = vpop.f32.mrb[99].mxu1  ;;  %v954_v18 = vld [vmem:[#allocation2 + $0x5b0] sm:$0xff]  ;;  %v960_v26 = vld [vmem:[#allocation2 + $0x5e0] sm:$0xff] }
 0x295   : > { %3021 = vst [vmem:[#allocation2 + $0x428] sm:$0xff] %v2765_v25  ;;  %v2773_v36 = vadd.f32 %v2366_v34, %v913_v23  ;;  %3023 = vst [vmem:[#allocation2 + $0x438] sm:$0xff] %v2767_v30  ;;  %v2775_v37 = vadd.f32 %v2559_v13, %v915_v28  ;;  %v953_v23 = vld [vmem:[#allocation2 + $0x5a8] sm:$0xff]  ;;  %v955_v25 = vld [vmem:[#allocation2 + $0x5b8] sm:$0xff] }
 0x296   : > { %3028 = vst [vmem:[#allocation2 + $0x460] sm:$0xff] %v2772_v31  ;;  %3030 = vst [vmem:[#allocation2 + $0x470] sm:$0xff] %v2774_v35  ;;  %v962_v31 = vld [vmem:[#allocation2 + $0x5f0] sm:$0xff]  ;;  %v961_v32 = vld [vmem:[#allocation2 + $0x5e8] sm:$0xff] }
 0x297   : > { %3029 = vst [vmem:[#allocation2 + $0x468] sm:$0xff] %v2773_v36  ;;  %3031 = vst [vmem:[#allocation2 + $0x478] sm:$0xff] %v2775_v37  ;;  %v963_v37 = vld [vmem:[#allocation2 + $0x5f8] sm:$0xff] }
 0x299   : > { %v2370_v42 = vpop.f32.mrb[100].mxu0  ;;  %v2563_v45 = vpop.f32.mrb[100].mxu1 }
 0x29a   : > { %v2780_v44 = vadd.f32 %v2370_v42, %v920_v38  ;;  %v2372_v46 = vpop.f32.mrb[101].mxu0  ;;  %v2782_v51 = vadd.f32 %v2563_v45, %v922_v39  ;;  %v2565_v54 = vpop.f32.mrb[101].mxu1 }
 0x29b   : > { %v2781_v52 = vadd.f32 %v2372_v46, %v921_v41  ;;  %v2374_v55 = vpop.f32.mrb[102].mxu0  ;;  %v2783_v57 = vadd.f32 %v2565_v54, %v923_v14  ;;  %v2567_v60 = vpop.f32.mrb[102].mxu1  ;;  %v968_v46 = vld [vmem:[#allocation2 + $0x620] sm:$0xff] }
 0x29c   : > { %3036 = vst [vmem:[#allocation2 + $0x4a0] sm:$0xff] %v2780_v44  ;;  %v2788_v59 = vadd.f32 %v2374_v55, %v928_v43  ;;  %v2376_v62 = vpop.f32.mrb[103].mxu0  ;;  %3038 = vst [vmem:[#allocation2 + $0x4b0] sm:$0xff] %v2782_v51  ;;  %v2790_v63 = vadd.f32 %v2567_v60, %v930_v48  ;;  %v2569_v16 = vpop.f32.mrb[103].mxu1  ;;  %v970_v48 = vld [vmem:[#allocation2 + $0x630] sm:$0xff]  ;;  %v976_v54 = vld [vmem:[#allocation2 + $0x660] sm:$0xff] }
 0x29d   : > { %3037 = vst [vmem:[#allocation2 + $0x4a8] sm:$0xff] %v2781_v52  ;;  %v2789_v0 = vadd.f32 %v2376_v62, %v929_v50  ;;  %3039 = vst [vmem:[#allocation2 + $0x4b8] sm:$0xff] %v2783_v57  ;;  %v2791_v1 = vadd.f32 %v2569_v16, %v931_v56  ;;  %v969_v50 = vld [vmem:[#allocation2 + $0x628] sm:$0xff]  ;;  %v971_v52 = vld [vmem:[#allocation2 + $0x638] sm:$0xff] }
 0x29e   : > { %3044 = vst [vmem:[#allocation2 + $0x4e0] sm:$0xff] %v2788_v59  ;;  %3046 = vst [vmem:[#allocation2 + $0x4f0] sm:$0xff] %v2790_v63  ;;  %v978_v59 = vld [vmem:[#allocation2 + $0x670] sm:$0xff]  ;;  %v977_v60 = vld [vmem:[#allocation2 + $0x668] sm:$0xff] }
 0x29f   : > { %3045 = vst [vmem:[#allocation2 + $0x4e8] sm:$0xff] %v2789_v0  ;;  %3047 = vst [vmem:[#allocation2 + $0x4f8] sm:$0xff] %v2791_v1  ;;  %v979_v1 = vld [vmem:[#allocation2 + $0x678] sm:$0xff] }
 0x2a1   : > { %v2380_v6 = vpop.f32.mrb[104].mxu0  ;;  %v2573_v19 = vpop.f32.mrb[104].mxu1 }
 0x2a2   : > { %v2796_v8 = vadd.f32 %v2380_v6, %v936_v2  ;;  %v2382_v40 = vpop.f32.mrb[105].mxu0  ;;  %v2798_v61 = vadd.f32 %v2573_v19, %v938_v3  ;;  %v2575_v10 = vpop.f32.mrb[105].mxu1 }
 0x2a3   : > { %v2797_v11 = vadd.f32 %v2382_v40, %v937_v4  ;;  %v2384_v15 = vpop.f32.mrb[106].mxu0  ;;  %v2799_v33 = vadd.f32 %v2575_v10, %v939_v17  ;;  %v2577_v53 = vpop.f32.mrb[106].mxu1  ;;  %v984_v40 = vld [vmem:[#allocation2 + $0x6a0] sm:$0xff] }
 0x2a4   : > { %3052 = vst [vmem:[#allocation2 + $0x520] sm:$0xff] %v2796_v8  ;;  %v2804_v49 = vadd.f32 %v2384_v15, %v944_v7  ;;  %v2386_v12 = vpop.f32.mrb[107].mxu0  ;;  %3054 = vst [vmem:[#allocation2 + $0x530] sm:$0xff] %v2798_v61  ;;  %v2806_v5 = vadd.f32 %v2577_v53, %v946_v47  ;;  %v2579_v20 = vpop.f32.mrb[107].mxu1  ;;  %v986_v47 = vld [vmem:[#allocation2 + $0x6b0] sm:$0xff]  ;;  %v992_v10 = vld [vmem:[#allocation2 + $0x6e0] sm:$0xff] }
 0x2a5   : > { %3053 = vst [vmem:[#allocation2 + $0x528] sm:$0xff] %v2797_v11  ;;  %v2805_v9 = vadd.f32 %v2386_v12, %v945_v58  ;;  %3055 = vst [vmem:[#allocation2 + $0x538] sm:$0xff] %v2799_v33  ;;  %v2807_v21 = vadd.f32 %v2579_v20, %v947_v29  ;;  %v985_v58 = vld [vmem:[#allocation2 + $0x6a8] sm:$0xff]  ;;  %v987_v11 = vld [vmem:[#allocation2 + $0x6b8] sm:$0xff] }
 0x2a6   : > { %3060 = vst [vmem:[#allocation2 + $0x560] sm:$0xff] %v2804_v49  ;;  %3062 = vst [vmem:[#allocation2 + $0x570] sm:$0xff] %v2806_v5  ;;  %v994_v49 = vld [vmem:[#allocation2 + $0x6f0] sm:$0xff]  ;;  %v993_v53 = vld [vmem:[#allocation2 + $0x6e8] sm:$0xff] }
 0x2a7   : > { %3061 = vst [vmem:[#allocation2 + $0x568] sm:$0xff] %v2805_v9  ;;  %3063 = vst [vmem:[#allocation2 + $0x578] sm:$0xff] %v2807_v21  ;;  %v995_v21 = vld [vmem:[#allocation2 + $0x6f8] sm:$0xff] }
 0x2a9   : > { %v2390_v24 = vpop.f32.mrb[108].mxu0  ;;  %v2583_v28 = vpop.f32.mrb[108].mxu1 }
 0x2aa   : > { %v2812_v27 = vadd.f32 %v2390_v24, %v952_v22  ;;  %v2392_v30 = vpop.f32.mrb[109].mxu0  ;;  %v2814_v34 = vadd.f32 %v2583_v28, %v954_v18  ;;  %v2585_v36 = vpop.f32.mrb[109].mxu1 }
 0x2ab   : > { %v2813_v35 = vadd.f32 %v2392_v30, %v953_v23  ;;  %v2394_v13 = vpop.f32.mrb[110].mxu0  ;;  %v2815_v38 = vadd.f32 %v2585_v36, %v955_v25  ;;  %v2587_v41 = vpop.f32.mrb[110].mxu1  ;;  %v1000_v30 = vld [vmem:[#allocation2 + $0x720] sm:$0xff] }
 0x2ac   : > { %3068 = vst [vmem:[#allocation2 + $0x5a0] sm:$0xff] %v2812_v27  ;;  %v2820_v39 = vadd.f32 %v2394_v13, %v960_v26  ;;  %v2396_v42 = vpop.f32.mrb[111].mxu0  ;;  %3070 = vst [vmem:[#allocation2 + $0x5b0] sm:$0xff] %v2814_v34  ;;  %v2822_v14 = vadd.f32 %v2587_v41, %v962_v31  ;;  %v2589_v44 = vpop.f32.mrb[111].mxu1  ;;  %v1002_v31 = vld [vmem:[#allocation2 + $0x730] sm:$0xff]  ;;  %v1008_v36 = vld [vmem:[#allocation2 + $0x760] sm:$0xff] }
 0x2ad   : > { %3069 = vst [vmem:[#allocation2 + $0x5a8] sm:$0xff] %v2813_v35  ;;  %v2821_v43 = vadd.f32 %v2396_v42, %v961_v32  ;;  %3071 = vst [vmem:[#allocation2 + $0x5b8] sm:$0xff] %v2815_v38  ;;  %v2823_v45 = vadd.f32 %v2589_v44, %v963_v37  ;;  %v1001_v32 = vld [vmem:[#allocation2 + $0x728] sm:$0xff]  ;;  %v1003_v35 = vld [vmem:[#allocation2 + $0x738] sm:$0xff] }
 0x2ae   : > { %3076 = vst [vmem:[#allocation2 + $0x5e0] sm:$0xff] %v2820_v39  ;;  %3078 = vst [vmem:[#allocation2 + $0x5f0] sm:$0xff] %v2822_v14  ;;  %v1010_v39 = vld [vmem:[#allocation2 + $0x770] sm:$0xff]  ;;  %v1009_v41 = vld [vmem:[#allocation2 + $0x768] sm:$0xff] }
 0x2af   : > { %3077 = vst [vmem:[#allocation2 + $0x5e8] sm:$0xff] %v2821_v43  ;;  %3079 = vst [vmem:[#allocation2 + $0x5f8] sm:$0xff] %v2823_v45  ;;  %v1011_v45 = vld [vmem:[#allocation2 + $0x778] sm:$0xff] }
 0x2b1   : > { %v2400_v51 = vpop.f32.mrb[112].mxu0  ;;  %v2593_v56 = vpop.f32.mrb[112].mxu1 }
 0x2b2   : > { %v2828_v55 = vadd.f32 %v2400_v51, %v968_v46  ;;  %v2402_v57 = vpop.f32.mrb[113].mxu0  ;;  %v2830_v62 = vadd.f32 %v2593_v56, %v970_v48  ;;  %v2595_v0 = vpop.f32.mrb[113].mxu1 }
 0x2b3   : > { %v2829_v63 = vadd.f32 %v2402_v57, %v969_v50  ;;  %v2404_v16 = vpop.f32.mrb[114].mxu0  ;;  %v2831_v2 = vadd.f32 %v2595_v0, %v971_v52  ;;  %v2597_v4 = vpop.f32.mrb[114].mxu1  ;;  %v1016_v57 = vld [vmem:[#allocation2 + $0x7a0] sm:$0xff] }
 0x2b4   : > { %3084 = vst [vmem:[#allocation2 + $0x620] sm:$0xff] %v2828_v55  ;;  %v2836_v3 = vadd.f32 %v2404_v16, %v976_v54  ;;  %v2406_v6 = vpop.f32.mrb[115].mxu0  ;;  %3086 = vst [vmem:[#allocation2 + $0x630] sm:$0xff] %v2830_v62  ;;  %v2838_v17 = vadd.f32 %v2597_v4, %v978_v59  ;;  %v2599_v8 = vpop.f32.mrb[115].mxu1  ;;  %v1018_v59 = vld [vmem:[#allocation2 + $0x7b0] sm:$0xff]  ;;  %v1024_v0 = vld [vmem:[#allocation2 + $0x7e0] sm:$0xff] }
 0x2b5   : > { %3085 = vst [vmem:[#allocation2 + $0x628] sm:$0xff] %v2829_v63  ;;  %v2837_v7 = vadd.f32 %v2406_v6, %v977_v60  ;;  %3087 = vst [vmem:[#allocation2 + $0x638] sm:$0xff] %v2831_v2  ;;  %v2839_v19 = vadd.f32 %v2599_v8, %v979_v1  ;;  %v1017_v60 = vld [vmem:[#allocation2 + $0x7a8] sm:$0xff]  ;;  %v1019_v63 = vld [vmem:[#allocation2 + $0x7b8] sm:$0xff] }
 0x2b6   : > { %3092 = vst [vmem:[#allocation2 + $0x660] sm:$0xff] %v2836_v3  ;;  %3094 = vst [vmem:[#allocation2 + $0x670] sm:$0xff] %v2838_v17  ;;  %v1026_v3 = vld [vmem:[#allocation2 + $0x7f0] sm:$0xff]  ;;  %v1025_v4 = vld [vmem:[#allocation2 + $0x7e8] sm:$0xff] }
 0x2b7   : > { %3093 = vst [vmem:[#allocation2 + $0x668] sm:$0xff] %v2837_v7  ;;  %3095 = vst [vmem:[#allocation2 + $0x678] sm:$0xff] %v2839_v19  ;;  %v1027_v19 = vld [vmem:[#allocation2 + $0x7f8] sm:$0xff] }
 0x2b9   : > { %v2410_v61 = vpop.f32.mrb[116].mxu0  ;;  %v2603_v29 = vpop.f32.mrb[116].mxu1 }
 0x2ba   : > { %v2844_v15 = vadd.f32 %v2410_v61, %v984_v40  ;;  %v2412_v33 = vpop.f32.mrb[117].mxu0  ;;  %v2846_v12 = vadd.f32 %v2603_v29, %v986_v47  ;;  %v2605_v9 = vpop.f32.mrb[117].mxu1 }
 0x2bb   : > { %v2845_v5 = vadd.f32 %v2412_v33, %v985_v58  ;;  %v2414_v20 = vpop.f32.mrb[118].mxu0  ;;  %v2847_v22 = vadd.f32 %v2605_v9, %v987_v11  ;;  %v2607_v23 = vpop.f32.mrb[118].mxu1  ;;  %v6440_v33 = vld [vmem:[%s7938_s2 + $0x40] sm:$0xff] (!%p5658_p12)   ;;  %v6445_v9 = vld [vmem:[%s7938_s2 + $0xc8] sm:$0xff] (!%p5658_p12)  }
 0x2bc   : > { %3100 = vst [vmem:[#allocation2 + $0x6a0] sm:$0xff] %v2844_v15  ;;  %v2852_v18 = vadd.f32 %v2414_v20, %v992_v10  ;;  %v2416_v24 = vpop.f32.mrb[119].mxu0  ;;  %3102 = vst [vmem:[#allocation2 + $0x6b0] sm:$0xff] %v2846_v12  ;;  %v2854_v25 = vadd.f32 %v2607_v23, %v994_v49  ;;  %v2609_v27 = vpop.f32.mrb[119].mxu1  ;;  %v6441_v49 = vld [vmem:[%s7938_s2 + $0xc0] sm:$0xff] (!%p5658_p12)   ;;  %5886 = vmatprep.subr.bf16.mxu0 (!%p5658_p12), %v6440_v33  ;;  %v6446_v20 = vld [vmem:[%s7938_s2 + $0x8] sm:$0xff] (!%p5658_p12)  }
 0x2bd   : > { %3101 = vst [vmem:[#allocation2 + $0x6a8] sm:$0xff] %v2845_v5  ;;  %v2853_v26 = vadd.f32 %v2416_v24, %v993_v53  ;;  %3103 = vst [vmem:[#allocation2 + $0x6b8] sm:$0xff] %v2847_v22  ;;  %v2855_v28 = vadd.f32 %v2609_v27, %v995_v21  ;;  %v6442_v53 = vld [vmem:[%s7938_s2] sm:$0xff] (!%p5658_p12)   ;;  %5998 = vmatprep.subr.bf16.mxu1 (!%p5658_p12), %v6441_v49  ;;  %v6444_v5 = vld [vmem:[%s7938_s2 + $0x48] sm:$0xff] (!%p5658_p12)  }
 0x2be   : > { %3108 = vst [vmem:[#allocation2 + $0x6e0] sm:$0xff] %v2852_v18  ;;  %3110 = vst [vmem:[#allocation2 + $0x6f0] sm:$0xff] %v2854_v25  ;;  %v6443_v12 = vld [vmem:[%s7938_s2 + $0x80] sm:$0xff] (!%p5658_p12)   ;;  %5887 = vmatpush3.bf16.msra.mxu0 (!%p5658_p12), %v6442_v53  ;;  %v6447_v21 = vld [vmem:[%s7938_s2 + $0x88] sm:$0xff] (!%p5658_p12)  }
 0x2bf   : > { %3109 = vst [vmem:[#allocation2 + $0x6e8] sm:$0xff] %v2853_v26  ;;  %3111 = vst [vmem:[#allocation2 + $0x6f8] sm:$0xff] %v2855_v28  ;;  %5999 = vmatpush3.bf16.msra.mxu1 (!%p5658_p12), %v6443_v12  ;;  %5888 = vmatprep.subr.bf16.mxu0 (!%p5658_p12), %v6444_v5  ;;  %v6448_v22 = vld [vmem:[%s7938_s2 + $0x50] sm:$0xff] (!%p5658_p12)   ;;  %v6452_v25 = vld [vmem:[%s7938_s2 + $0x58] sm:$0xff] (!%p5658_p12)  }
 0x2c0   : > { %6000 = vmatprep.subr.bf16.mxu1 (!%p5658_p12), %v6445_v9  ;;  %v6449_v18 = vld [vmem:[%s7938_s2 + $0xd0] sm:$0xff] (!%p5658_p12)   ;;  %v6453_v26 = vld [vmem:[%s7938_s2 + $0xd8] sm:$0xff] (!%p5658_p12)  }
 0x2c1   : > { %v2420_v34 = vpop.f32.mrb[120].mxu0  ;;  %v2613_v37 = vpop.f32.mrb[120].mxu1  ;;  %v6450_v23 = vld [vmem:[%s7938_s2 + $0x10] sm:$0xff] (!%p5658_p12)   ;;  %v6454_v27 = vld [vmem:[%s7938_s2 + $0x18] sm:$0xff] (!%p5658_p12)  }
 0x2c2   : > { %v2860_v13 = vadd.f32 %v2420_v34, %v1000_v30  ;;  %v2422_v38 = vpop.f32.mrb[121].mxu0  ;;  %v2862_v42 = vadd.f32 %v2613_v37, %v1002_v31  ;;  %v2615_v43 = vpop.f32.mrb[121].mxu1  ;;  %5889 = vmatpush3.bf16.msra.mxu0 (!%p5658_p12), %v6446_v20  ;;  %v6451_v24 = vld [vmem:[%s7938_s2 + $0x90] sm:$0xff] (!%p5658_p12)   ;;  %v6455_v28 = vld [vmem:[%s7938_s2 + $0x98] sm:$0xff] (!%p5658_p12)   ;;  %v6456_v30 = vld [vmem:[%s7938_s2 + $0x60] sm:$0xff] (!%p5658_p12)   ;;  %v3406_v34 = vlaneseq (!%p5658_p12) }
 0x2c3   : > { %v2861_v14 = vadd.f32 %v2422_v38, %v1001_v32  ;;  %v2424_v44 = vpop.f32.mrb[122].mxu0  ;;  %v2863_v46 = vadd.f32 %v2615_v43, %v1003_v35  ;;  %v2617_v50 = vpop.f32.mrb[122].mxu1  ;;  %6001 = vmatpush3.bf16.msra.mxu1 (!%p5658_p12), %v6447_v21  ;;  %5890 = vmatprep.subr.bf16.mxu0 (!%p5658_p12), %v6448_v22  ;;  %v6457_v31 = vld [vmem:[%s7938_s2 + $0xe0] sm:$0xff] (!%p5658_p12)   ;;  %v6462_v37 = vld [vmem:[%s7938_s2 + $0x28] sm:$0xff] (!%p5658_p12)  }
 0x2c4   : > { %3116 = vst [vmem:[#allocation2 + $0x720] sm:$0xff] %v2860_v13  ;;  %v2868_v48 = vadd.f32 %v2424_v44, %v1008_v36  ;;  %v2426_v51 = vpop.f32.mrb[123].mxu0  ;;  %3118 = vst [vmem:[#allocation2 + $0x730] sm:$0xff] %v2862_v42  ;;  %v2870_v52 = vadd.f32 %v2617_v50, %v1010_v39  ;;  %v2619_v55 = vpop.f32.mrb[123].mxu1  ;;  %6002 = vmatprep.subr.bf16.mxu1 (!%p5658_p12), %v6449_v18  ;;  %v6458_v32 = vld [vmem:[%s7938_s2 + $0x20] sm:$0xff] (!%p5658_p12)   ;;  %v6460_v36 = vld [vmem:[%s7938_s2 + $0x68] sm:$0xff] (!%p5658_p12)  }
 0x2c5   : > { %3117 = vst [vmem:[#allocation2 + $0x728] sm:$0xff] %v2861_v14  ;;  %v2869_v54 = vadd.f32 %v2426_v51, %v1009_v41  ;;  %3119 = vst [vmem:[#allocation2 + $0x738] sm:$0xff] %v2863_v46  ;;  %v2871_v56 = vadd.f32 %v2619_v55, %v1011_v45  ;;  %v6459_v35 = vld [vmem:[%s7938_s2 + $0xa0] sm:$0xff] (!%p5658_p12)   ;;  %v6461_v13 = vld [vmem:[%s7938_s2 + $0xe8] sm:$0xff] (!%p5658_p12)   ;;  %v3407_v38 = vshrl.u32 (!%p5658_p12), %v3406_v34, 7 }
 0x2c6   : > { %3124 = vst [vmem:[#allocation2 + $0x760] sm:$0xff] %v2868_v48  ;;  %3126 = vst [vmem:[#allocation2 + $0x770] sm:$0xff] %v2870_v52  ;;  %5891 = vmatpush3.bf16.msra.mxu0 (!%p5658_p12), %v6450_v23  ;;  %v6463_v39 = vld [vmem:[%s7938_s2 + $0xa8] sm:$0xff] (!%p5658_p12)   ;;  %v6464_v41 = vld [vmem:[%s7938_s2 + $0x70] sm:$0xff] (!%p5658_p12)  }
 0x2c7   : > { %3125 = vst [vmem:[#allocation2 + $0x768] sm:$0xff] %v2869_v54  ;;  %3127 = vst [vmem:[#allocation2 + $0x778] sm:$0xff] %v2871_v56  ;;  %6003 = vmatpush3.bf16.msra.mxu1 (!%p5658_p12), %v6451_v24  ;;  %5892 = vmatprep.subr.bf16.mxu0 (!%p5658_p12), %v6452_v25  ;;  %v6465_v42 = vld [vmem:[%s7938_s2 + $0xf0] sm:$0xff] (!%p5658_p12)   ;;  %v3412_v43 = vsub.s32 (!%p5658_p12), 1, %v3407_v38  ;;  %v3420_v45 = vsub.s32 (!%p5658_p12), 3, %v3407_v38  ;;  %v6468_v46 = vld [vmem:[%s7938_s2 + $0x78] sm:$0xff] (!%p5658_p12)  }
 0x2c8   : > { %6004 = vmatprep.subr.bf16.mxu1 (!%p5658_p12), %v6453_v26  ;;  %v6466_v14 = vld [vmem:[%s7938_s2 + $0x30] sm:$0xff] (!%p5658_p12)   ;;  %v3408_v48 = vsub.s32 (!%p5658_p12), 0, %v3407_v38  ;;  %v6469_v50 = vld [vmem:[%s7938_s2 + $0xf8] sm:$0xff] (!%p5658_p12)   ;;  %v3416_v51 = vsub.s32 (!%p5658_p12), 2, %v3407_v38  ;;  %v3428_v55 = vsub.s32 (!%p5658_p12), 5, %v3407_v38  ;;  %v3149_v56 = vld [vmem:[#allocation2 + $0x8] sm:$0xff] (!%p5658_p12) }
 0x2c9   : > { %v2430_v62 = vpop.f32.mrb[124].mxu0  ;;  %v2623_v1 = vpop.f32.mrb[124].mxu1  ;;  %3147 = sbr.rel (%p5658_p12) target bundleno = 1205 (0x4b5), region = 82  ;;  %v6467_v44 = vld [vmem:[%s7938_s2 + $0xb0] sm:$0xff] (!%p5658_p12)   ;;  %v6470_v52 = vld [vmem:[%s7938_s2 + $0x38] sm:$0xff] (!%p5658_p12)   ;;  %v6473_v22 = vld [vmem:[%s7938_s2 + $0x100] sm:$0xff] (!%p5658_p12)  }
 0x2ca   : > { %v2876_v16 = vadd.f32 %v2430_v62, %v1016_v57  ;;  %v2432_v2 = vpop.f32.mrb[125].mxu0  ;;  %v2878_v6 = vadd.f32 %v2623_v1, %v1018_v59  ;;  %v2625_v7 = vpop.f32.mrb[125].mxu1  ;;  %5893 = vmatpush3.bf16.msra.mxu0 (!%p5658_p12), %v6454_v27  ;;  %v6471_v54 = vld [vmem:[%s7938_s2 + $0xb8] sm:$0xff] (!%p5658_p12)   ;;  %v3157_v57 = vld [vmem:[#allocation2 + $0x48] sm:$0xff] (!%p5658_p12)  ;;  %v3404_v59 = vld [vmem:[%s7939_s3] sm:$0xff] (!%p5658_p12)  ;;  %v3424_v62 = vsub.s32 (!%p5658_p12), 4, %v3407_v38 }
 0x2cb   : > { %v2877_v17 = vadd.f32 %v2432_v2, %v1017_v60  ;;  %v2434_v8 = vpop.f32.mrb[126].mxu0  ;;  %v2879_v40 = vadd.f32 %v2625_v7, %v1019_v63  ;;  %v2627_v58 = vpop.f32.mrb[126].mxu1  ;;  %6005 = vmatpush3.bf16.msra.mxu1 (!%p5658_p12), %v6455_v28  ;;  %5894 = vmatprep.subr.bf16.mxu0 (!%p5658_p12), %v6456_v30  ;;  %v3436_v60 = vsub.s32 (!%p5658_p12), 7, %v3407_v38  ;;  %v3432_v63 = vsub.s32 (!%p5658_p12), 6, %v3407_v38  ;;  %v3159_v1 = vld [vmem:[#allocation2 + $0x58] sm:$0xff] (!%p5658_p12)  ;;  %v3150_v7 = vld [vmem:[#allocation2 + $0x10] sm:$0xff] (!%p5658_p12) }
 0x2cc   : > { %3132 = vst [vmem:[#allocation2 + $0x7a0] sm:$0xff] %v2876_v16  ;;  %v2884_v47 = vadd.f32 %v2434_v8, %v1024_v0  ;;  %v2436_v61 = vpop.f32.mrb[127].mxu0  ;;  %3134 = vst [vmem:[#allocation2 + $0x7b0] sm:$0xff] %v2878_v6  ;;  %v2886_v11 = vadd.f32 %v2627_v58, %v1026_v3  ;;  %v2629_v15 = vpop.f32.mrb[127].mxu1  ;;  %6006 = vmatprep.subr.bf16.mxu1 (!%p5658_p12), %v6457_v31  ;;  %v7435_v0 = vrot.slane (!%p5658_p12), %v3404_v59, %v3412_v43  ;;  %v3151_v16 = vld [vmem:[#allocation2 + $0x18] sm:$0xff] (!%p5658_p12)  ;;  %v3148_v3 = vld [vmem:[#allocation2] sm:$0xff] (!%p5658_p12) }
 0x2cd   : > { %3133 = vst [vmem:[#allocation2 + $0x7a8] sm:$0xff] %v2877_v17  ;;  %v2885_v10 = vadd.f32 %v2436_v61, %v1025_v4  ;;  %3135 = vst [vmem:[#allocation2 + $0x7b8] sm:$0xff] %v2879_v40  ;;  %v2887_v29 = vadd.f32 %v2629_v15, %v1027_v19  ;;  %v7437_v2 = vrot.slane (!%p5658_p12), %v3404_v59, %v3420_v45  ;;  %v3156_v17 = vld [vmem:[#allocation2 + $0x40] sm:$0xff] (!%p5658_p12)  ;;  %v3158_v8 = vld [vmem:[#allocation2 + $0x50] sm:$0xff] (!%p5658_p12) }
 0x2ce   : > { %3140 = vst [vmem:[#allocation2 + $0x7e0] sm:$0xff] %v2884_v47  ;;  %3142 = vst [vmem:[#allocation2 + $0x7f0] sm:$0xff] %v2886_v11  ;;  %5895 = vmatpush3.bf16.msra.mxu0 (!%p5658_p12), %v6458_v32  ;;  %v7439_v4 = vrot.slane (!%p5658_p12), %v3404_v59, %v3408_v48  ;;  %v7441_v6 = vrot.slane (!%p5658_p12), %v3404_v59, %v3416_v51  ;;  %v7443_v19 = vrot.slane (!%p5658_p12), %v3404_v59, %v3428_v55  ;;  %v6474_v28 = vld [vmem:[%s7938_s2 + $0x1c0] sm:$0xff] (!%p5658_p12)   ;;  %v3165_v34 = vld [vmem:[#allocation2 + $0x88] sm:$0xff] (!%p5658_p12) }
 0x2cf   : > { %3141 = vst [vmem:[#allocation2 + $0x7e8] sm:$0xff] %v2885_v10  ;;  %3143 = vst [vmem:[#allocation2 + $0x7f8] sm:$0xff] %v2887_v29  ;;  %6007 = vmatpush3.bf16.msra.mxu1 (!%p5658_p12), %v6459_v35  ;;  %5896 = vmatprep.subr.bf16.mxu0 (!%p5658_p12), %v6460_v36  ;;  %v7445_v40 = vrot.slane (!%p5658_p12), %v3404_v59, %v3436_v60  ;;  %v7447_v47 = vrot.slane (!%p5658_p12), %v3404_v59, %v3424_v62  ;;  %v6472_v29 = vld [vmem:[%s7938_s2 + $0x140] sm:$0xff] (!%p5658_p12)   ;;  %v3173_v35 = vld [vmem:[#allocation2 + $0xc8] sm:$0xff] (!%p5658_p12) }
 0x2d0   : > { %6008 = vmatprep.subr.bf16.mxu1 %v6461_v13  ;;  %v7449_v58 = vrot.slane %v3404_v59, %v3432_v63  ;;  %v3447_v61 = vadd.f32 %v7435_v0, %v3149_v56  ;;  %v3455_v11 = vadd.f32 %v7435_v0, %v3157_v57  ;;  %v3449_v10 = vadd.f32 %v7437_v2, %v3151_v16  ;;  %v6475_v32 = vld [vmem:[%s7938_s2 + $0x180] sm:$0xff]   ;;  %v3175_v38 = vld [vmem:[#allocation2 + $0xd8] sm:$0xff]  ;;  %v3174_v45 = vld [vmem:[#allocation2 + $0xd0] sm:$0xff] }
 0x2d1   : > { %v3457_v15 = vadd.f32 %v7437_v2, %v3159_v1  ;;  %v3446_v33 = vadd.f32 %v7439_v4, %v3148_v3  ;;  %v3454_v49 = vadd.f32 %v7439_v4, %v3156_v17  ;;  %v3448_v53 = vadd.f32 %v7441_v6, %v3150_v7  ;;  %v3183_v55 = vld [vmem:[#allocation2 + $0x118] sm:$0xff]  ;;  %v3180_v63 = vld [vmem:[#allocation2 + $0x100] sm:$0xff] }
 0x2d2   : > { %5897 = vmatpush3.bf16.msra.mxu0 %v6462_v37  ;;  %v3456_v12 = vadd.f32 %v7441_v6, %v3158_v8  ;;  %v3703_v5 = vmax.f32 %v3447_v61, 0.0  ;;  %v3711_v9 = vmax.f32 %v3455_v11, 0.0  ;;  %v3705_v20 = vmax.f32 %v3449_v10, 0.0  ;;  %v3167_v37 = vld [vmem:[#allocation2 + $0x98] sm:$0xff]  ;;  %v3188_v16 = vld [vmem:[#allocation2 + $0x140] sm:$0xff]  ;;  %v3182_v8 = vld [vmem:[#allocation2 + $0x110] sm:$0xff] }
 0x2d3   : > { %6009 = vmatpush3.bf16.msra.mxu1 %v6463_v39  ;;  %5898 = vmatprep.subr.bf16.mxu0 %v6464_v41  ;;  %v3713_v21 = vmax.f32 %v3457_v15, 0.0  ;;  %v3702_v18 = vmax.f32 %v3446_v33, 0.0  ;;  %v3710_v23 = vmax.f32 %v3454_v49, 0.0  ;;  %v3704_v24 = vmax.f32 %v3448_v53, 0.0  ;;  %v3164_v39 = vld [vmem:[#allocation2 + $0x80] sm:$0xff]  ;;  %v3191_v62 = vld [vmem:[#allocation2 + $0x158] sm:$0xff] }
 0x2d4   : > { %6010 = vmatprep.subr.bf16.mxu1 %v6465_v42  ;;  %v3712_v25 = vmax.f32 %v3456_v12, 0.0  ;;  %v3959_v26 = vpack.c.bf16 %v3711_v9, %v3703_v5  ;;  %v3463_v36 = vadd.f32 %v7435_v0, %v3165_v34  ;;  %v3471_v13 = vadd.f32 %v7435_v0, %v3173_v35  ;;  %v3190_v61 = vld [vmem:[#allocation2 + $0x150] sm:$0xff]  ;;  %v6476_v33 = vld [vmem:[%s7938_s2 + $0x148] sm:$0xff]   ;;  %v3199_v35 = vld [vmem:[#allocation2 + $0x198] sm:$0xff] }
 0x2d5   : > { %v3961_v27 = vpack.c.bf16 %v3713_v21, %v3705_v20  ;;  %v3958_v30 = vpack.c.bf16 %v3710_v23, %v3702_v18  ;;  %v3465_v41 = vadd.f32 %v7437_v2, %v3167_v37  ;;  %v3473_v42 = vadd.f32 %v7437_v2, %v3175_v38  ;;  %v6477_v9 = vld [vmem:[%s7938_s2 + $0x108] sm:$0xff]  }
 0x2d6   : > { %5899 = vmatpush3.bf16.msra.mxu0 %v6466_v14  ;;  %v3960_v31 = vpack.c.bf16 %v3712_v25, %v3704_v24  ;;  %4630 = vmatprep.mubr.bf16.mxu0 %v3959_v26  ;;  %v3172_v14 = vld [vmem:[#allocation2 + $0xc0] sm:$0xff]  ;;  %v3462_v43 = vadd.f32 %v7439_v4, %v3164_v39  ;;  %v3727_v48 = vmax.f32 %v3471_v13, 0.0  ;;  %v3472_v60 = vadd.f32 %v7441_v6, %v3174_v45  ;;  %v6478_v23 = vld [vmem:[%s7938_s2 + $0x1c8] sm:$0xff]   ;;  %v3207_v39 = vld [vmem:[#allocation2 + $0x1d8] sm:$0xff] }
 0x2d7   : > { %6011 = vmatpush3.bf16.msra.mxu1 %v6467_v44  ;;  %5900 = vmatprep.subr.bf16.mxu0 %v6468_v46  ;;  %v3166_v44 = vld [vmem:[#allocation2 + $0x90] sm:$0xff]  ;;  %v3719_v46 = vmax.f32 %v3463_v36, 0.0  ;;  %v3721_v56 = vmax.f32 %v3465_v41, 0.0  ;;  %v3729_v57 = vmax.f32 %v3473_v42, 0.0  ;;  %v3489_v12 = vadd.f32 %v7437_v2, %v3191_v62  ;;  %v6479_v24 = vld [vmem:[%s7938_s2 + $0x188] sm:$0xff]   ;;  %v3196_v41 = vld [vmem:[#allocation2 + $0x180] sm:$0xff] }
 0x2d8   : > { %6012 = vmatprep.subr.bf16.mxu1 %v6469_v50  ;;  %4791 = vmatprep.mubr.bf16.mxu1 %v3961_v27  ;;  %v3470_v50 = vadd.f32 %v7439_v4, %v3172_v14  ;;  %v3464_v51 = vadd.f32 %v7441_v6, %v3166_v44  ;;  %v3718_v59 = vmax.f32 %v3462_v43, 0.0  ;;  %v3728_v10 = vmax.f32 %v3472_v60, 0.0  ;;  %v3205_v34 = vld [vmem:[#allocation2 + $0x1c8] sm:$0xff]  ;;  %v3204_v42 = vld [vmem:[#allocation2 + $0x1c0] sm:$0xff]  ;;  %v3198_v45 = vld [vmem:[#allocation2 + $0x190] sm:$0xff] }
 0x2d9   : > { %v3967_v1 = vpack.c.bf16 %v3727_v48, %v3719_v46  ;;  %v3969_v11 = vpack.c.bf16 %v3729_v57, %v3721_v56  ;;  %v3478_v5 = vadd.f32 %v7439_v4, %v3180_v63  ;;  %v3486_v18 = vadd.f32 %v7439_v4, %v3188_v16  ;;  %v3206_v46 = vld [vmem:[#allocation2 + $0x1d0] sm:$0xff]  ;;  %v3213_v48 = vld [vmem:[#allocation2 + $0x208] sm:$0xff]  ;;  %v3215_v62 = vld [vmem:[#allocation2 + $0x218] sm:$0xff] }
 0x2da   : > { %5901 = vmatpush3.bf16.msra.mxu0 %v6470_v52  ;;  %v3181_v52 = vld [vmem:[#allocation2 + $0x108] sm:$0xff]  ;;  %v3726_v3 = vmax.f32 %v3470_v50, 0.0  ;;  %v3720_v17 = vmax.f32 %v3464_v51, 0.0  ;;  %v3745_v25 = vmax.f32 %v3489_v12, 0.0  ;;  %v3480_v27 = vadd.f32 %v7441_v6, %v3182_v8  ;;  %v3223_v63 = vld [vmem:[#allocation2 + $0x258] sm:$0xff]  ;;  %v3212_v16 = vld [vmem:[#allocation2 + $0x200] sm:$0xff] }
 0x2db   : > { %6013 = vmatpush3.bf16.msra.mxu1 %v6471_v54  ;;  %6110 = vmatprep.subr.bf16.mxu0 %v6472_v29  ;;  %v3189_v54 = vld [vmem:[#allocation2 + $0x148] sm:$0xff]  ;;  %v3479_v7 = vadd.f32 %v7435_v0, %v3181_v52  ;;  %v3481_v29 = vadd.f32 %v7437_v2, %v3183_v55  ;;  %v3734_v26 = vmax.f32 %v3478_v5, 0.0  ;;  %v3503_v43 = vadd.f32 %v7435_v0, %v3205_v34  ;;  %v3220_v8 = vld [vmem:[#allocation2 + $0x240] sm:$0xff]  ;;  %v3231_v34 = vld [vmem:[#allocation2 + $0x298] sm:$0xff] }
 0x2dc   : > { %6222 = vmatprep.subr.bf16.mxu1 %v6474_v28  ;;  %v3487_v15 = vadd.f32 %v7435_v0, %v3189_v54  ;;  %v3966_v49 = vpack.c.bf16 %v3726_v3, %v3718_v59  ;;  %v3968_v20 = vpack.c.bf16 %v3728_v10, %v3720_v17  ;;  %v3488_v28 = vadd.f32 %v7441_v6, %v3190_v61  ;;  %v3221_v55 = vld [vmem:[#allocation2 + $0x248] sm:$0xff]  ;;  %v3214_v61 = vld [vmem:[#allocation2 + $0x210] sm:$0xff] }
 0x2dd   : > { %4631 = vmatmul.mubr.bf16.vlgmr.msra.gmra.mrb[0].mxu0 %v3958_v30  ;;  %v3735_v53 = vmax.f32 %v3479_v7, 0.0  ;;  %v3736_v13 = vmax.f32 %v3480_v27, 0.0  ;;  %v3497_v44 = vadd.f32 %v7437_v2, %v3199_v35  ;;  %v3505_v52 = vadd.f32 %v7437_v2, %v3207_v39  ;;  %v6480_v10 = vld [vmem:[%s7938_s2 + $0x150] sm:$0xff]   ;;  %v3239_v35 = vld [vmem:[#allocation2 + $0x2d8] sm:$0xff] }
 0x2de   : > { %4792 = vmatmul.mubr.bf16.vlgmr.msra.gmra.mrb[0].mxu1 %v3960_v31  ;;  %6111 = vmatpush3.bf16.msra.mxu0 %v6473_v22  ;;  %v3743_v21 = vmax.f32 %v3487_v15, 0.0  ;;  %v3737_v22 = vmax.f32 %v3481_v29, 0.0  ;;  %v3742_v31 = vmax.f32 %v3486_v18, 0.0  ;;  %v3744_v37 = vmax.f32 %v3488_v28, 0.0 }
 0x2df   : > { %6223 = vmatpush3.bf16.msra.mxu1 %v6475_v32  ;;  %4638 = vmatprep.mubr.bf16.mxu0 %v3967_v1  ;;  %v3197_v32 = vld [vmem:[#allocation2 + $0x188] sm:$0xff]  ;;  %v3494_v54 = vadd.f32 %v7439_v4, %v3196_v41  ;;  %v3759_v56 = vmax.f32 %v3503_v43, 0.0  ;;  %v3753_v57 = vmax.f32 %v3497_v44, 0.0  ;;  %v3502_v59 = vadd.f32 %v7439_v4, %v3204_v42  ;;  %v3228_v44 = vld [vmem:[#allocation2 + $0x280] sm:$0xff] }
 0x2e0   : > { %4799 = vmatprep.mubr.bf16.mxu1 %v3969_v11  ;;  %6112 = vmatprep.subr.bf16.mxu0 %v6476_v33  ;;  %v3975_v30 = vpack.c.bf16 %v3743_v21, %v3735_v53  ;;  %v3977_v36 = vpack.c.bf16 %v3745_v25, %v3737_v22  ;;  %v3495_v38 = vadd.f32 %v7435_v0, %v3197_v32  ;;  %v3761_v1 = vmax.f32 %v3505_v52, 0.0  ;;  %v3222_v11 = vld [vmem:[#allocation2 + $0x250] sm:$0xff]  ;;  %v3237_v32 = vld [vmem:[#allocation2 + $0x2c8] sm:$0xff] }
 0x2e1   : > { %6224 = vmatprep.subr.bf16.mxu1 %v6478_v23  ;;  %v3974_v14 = vpack.c.bf16 %v3742_v31, %v3734_v26  ;;  %v3976_v50 = vpack.c.bf16 %v3744_v37, %v3736_v13  ;;  %v3496_v60 = vadd.f32 %v7441_v6, %v3198_v45  ;;  %v3750_v3 = vmax.f32 %v3494_v54, 0.0  ;;  %v6482_v21 = vld [vmem:[%s7938_s2 + $0x1d0] sm:$0xff]   ;;  %v3229_v26 = vld [vmem:[#allocation2 + $0x288] sm:$0xff] }
 0x2e2   : > { %6113 = vmatpush3.bf16.msra.mxu0 %v6477_v9  ;;  %v3751_v51 = vmax.f32 %v3495_v38, 0.0  ;;  %v3504_v17 = vadd.f32 %v7441_v6, %v3206_v46  ;;  %v3511_v7 = vadd.f32 %v7435_v0, %v3213_v48  ;;  %v3758_v29 = vmax.f32 %v3502_v59, 0.0  ;;  %v6483_v23 = vld [vmem:[%s7938_s2 + $0x190] sm:$0xff]   ;;  %v3245_v54 = vld [vmem:[#allocation2 + $0x308] sm:$0xff]  ;;  %v6484_v59 = vld [vmem:[%s7938_s2 + $0x158] sm:$0xff]  }
 0x2e3   : > { %6225 = vmatpush3.bf16.msra.mxu1 %v6479_v24  ;;  %v3752_v33 = vmax.f32 %v3496_v60, 0.0  ;;  %v3985_v53 = vpack.c.bf16 %v3761_v1, %v3753_v57  ;;  %v3513_v9 = vadd.f32 %v7437_v2, %v3215_v62  ;;  %6114 = vmatprep.subr.bf16.mxu0 %v6480_v10  ;;  %v3521_v18 = vadd.f32 %v7437_v2, %v3223_v63  ;;  %v3238_v52 = vld [vmem:[#allocation2 + $0x2d0] sm:$0xff]  ;;  %v3247_v57 = vld [vmem:[#allocation2 + $0x318] sm:$0xff] }
 0x2e4   : > { %v3983_v15 = vpack.c.bf16 %v3759_v56, %v3751_v51  ;;  %v3760_v12 = vmax.f32 %v3504_v17, 0.0  ;;  %v3767_v5 = vmax.f32 %v3511_v7, 0.0  ;;  %v3510_v25 = vadd.f32 %v7439_v4, %v3212_v16  ;;  %6226 = vmatprep.subr.bf16.mxu1 %v6482_v21  ;;  %v3230_v51 = vld [vmem:[#allocation2 + $0x290] sm:$0xff]  ;;  %v3253_v56 = vld [vmem:[#allocation2 + $0x348] sm:$0xff]  ;;  %v3255_v62 = vld [vmem:[#allocation2 + $0x358] sm:$0xff] }
 0x2e5   : > { %4639 = vmatmul.mubr.bf16.gmra.mrb[4].mxu0 %v3966_v49  ;;  %v3519_v49 = vadd.f32 %v7435_v0, %v3221_v55  ;;  %v3769_v24 = vmax.f32 %v3513_v9, 0.0  ;;  %v3777_v27 = vmax.f32 %v3521_v18, 0.0  ;;  %v3518_v28 = vadd.f32 %v7439_v4, %v3220_v8  ;;  %v6485_v63 = vld [vmem:[%s7938_s2 + $0x118] sm:$0xff]   ;;  %v3252_v21 = vld [vmem:[#allocation2 + $0x340] sm:$0xff]  ;;  %v3254_v18 = vld [vmem:[#allocation2 + $0x350] sm:$0xff] }
 0x2e6   : > { %4800 = vmatmul.mubr.bf16.gmra.mrb[4].mxu1 %v3968_v20  ;;  %4646 = vmatprep.mubr.bf16.mxu0 %v3975_v30  ;;  %v6481_v20 = vld [vmem:[%s7938_s2 + $0x110] sm:$0xff]   ;;  %v3512_v30 = vadd.f32 %v7441_v6, %v3214_v61  ;;  %v3520_v31 = vadd.f32 %v7441_v6, %v3222_v11  ;;  %v3982_v13 = vpack.c.bf16 %v3758_v29, %v3750_v3  ;;  %v3766_v42 = vmax.f32 %v3510_v25, 0.0  ;;  %v6486_v17 = vld [vmem:[%s7938_s2 + $0x1d8] sm:$0xff]  }
 0x2e7   : > { %4807 = vmatprep.mubr.bf16.mxu1 %v3977_v36  ;;  %v3775_v22 = vmax.f32 %v3519_v49, 0.0  ;;  %6115 = vmatpush3.bf16.msra.mxu0 %v6481_v20  ;;  %v3527_v36 = vadd.f32 %v7435_v0, %v3229_v26  ;;  %v3984_v37 = vpack.c.bf16 %v3760_v12, %v3752_v33  ;;  %v3535_v39 = vadd.f32 %v7435_v0, %v3237_v32  ;;  %v6487_v7 = vld [vmem:[%s7938_s2 + $0x198] sm:$0xff]   ;;  %v3244_v20 = vld [vmem:[#allocation2 + $0x300] sm:$0xff] }
 0x2e8   : > { %6227 = vmatpush3.bf16.msra.mxu1 %v6483_v23  ;;  %v3993_v41 = vpack.c.bf16 %v3777_v27, %v3769_v24  ;;  %v3537_v43 = vadd.f32 %v7437_v2, %v3239_v35  ;;  %v3774_v45 = vmax.f32 %v3518_v28, 0.0  ;;  %v3768_v46 = vmax.f32 %v3512_v30, 0.0  ;;  %6116 = vmatprep.subr.bf16.mxu0 %v6484_v59  ;;  %v3261_v27 = vld [vmem:[#allocation2 + $0x388] sm:$0xff]  ;;  %v3263_v32 = vld [vmem:[#allocation2 + $0x398] sm:$0xff]  ;;  %v3260_v59 = vld [vmem:[#allocation2 + $0x380] sm:$0xff] }
 0x2e9   : > { %v3991_v38 = vpack.c.bf16 %v3775_v22, %v3767_v5  ;;  %v3776_v48 = vmax.f32 %v3520_v31, 0.0  ;;  %v3783_v55 = vmax.f32 %v3527_v36, 0.0  ;;  %v3791_v60 = vmax.f32 %v3535_v39, 0.0  ;;  %6228 = vmatprep.subr.bf16.mxu1 %v6486_v17  ;;  %v3246_v22 = vld [vmem:[#allocation2 + $0x310] sm:$0xff]  ;;  %v3269_v28 = vld [vmem:[#allocation2 + $0x3c8] sm:$0xff]  ;;  %v6488_v36 = vld [vmem:[%s7938_s2 + $0x160] sm:$0xff]  }
 0x2ea   : > { %v3793_v1 = vmax.f32 %v3537_v43, 0.0  ;;  %v3526_v3 = vadd.f32 %v7439_v4, %v3228_v44  ;;  %v3528_v61 = vadd.f32 %v7441_v6, %v3230_v51  ;;  %v3536_v11 = vadd.f32 %v7441_v6, %v3238_v52 }
 0x2eb   : > { %v3543_v10 = vadd.f32 %v7435_v0, %v3245_v54  ;;  %6117 = vmatpush3.bf16.msra.mxu0 %v6485_v63  ;;  %v3992_v29 = vpack.c.bf16 %v3776_v48, %v3768_v46  ;;  %v3551_v33 = vadd.f32 %v7435_v0, %v3253_v56  ;;  %v3545_v49 = vadd.f32 %v7437_v2, %v3247_v57  ;;  %v3268_v63 = vld [vmem:[#allocation2 + $0x3c0] sm:$0xff] }
 0x2ec   : > { %v3553_v5 = vadd.f32 %v7437_v2, %v3255_v62  ;;  %6229 = vmatpush3.bf16.msra.mxu1 %v6487_v7  ;;  %v3782_v9 = vmax.f32 %v3526_v3, 0.0  ;;  %v3784_v24 = vmax.f32 %v3528_v61, 0.0  ;;  %v3792_v25 = vmax.f32 %v3536_v11, 0.0  ;;  %6118 = vmatprep.subr.bf16.mxu0 %v6488_v36  ;;  %v3277_v7 = vld [vmem:[#allocation2 + $0x408] sm:$0xff]  ;;  %v3279_v61 = vld [vmem:[#allocation2 + $0x418] sm:$0xff]  ;;  %v3286_v36 = vld [vmem:[#allocation2 + $0x450] sm:$0xff] }
 0x2ed   : > { %4647 = vmatmul.mubr.bf16.gmra.mrb[8].mxu0 %v3974_v14  ;;  %v3529_v14 = vadd.f32 %v7437_v2, %v3231_v34  ;;  %v3799_v26 = vmax.f32 %v3543_v10, 0.0  ;;  %v3807_v30 = vmax.f32 %v3551_v33, 0.0  ;;  %v3801_v31 = vmax.f32 %v3545_v49, 0.0  ;;  %v3271_v34 = vld [vmem:[#allocation2 + $0x3d8] sm:$0xff]  ;;  %v6492_v10 = vld [vmem:[%s7938_s2 + $0x168] sm:$0xff]  }
 0x2ee   : > { %4808 = vmatmul.mubr.bf16.gmra.mrb[8].mxu1 %v3976_v50  ;;  %4654 = vmatprep.mubr.bf16.mxu0 %v3983_v15  ;;  %v3236_v50 = vld [vmem:[#allocation2 + $0x2c0] sm:$0xff]  ;;  %v3990_v15 = vpack.c.bf16 %v3774_v45, %v3766_v42  ;;  %v3809_v35 = vmax.f32 %v3553_v5, 0.0  ;;  %v3544_v39 = vadd.f32 %v7441_v6, %v3246_v22  ;;  %v4000_v44 = vpack.c.bf16 %v3792_v25, %v3784_v24  ;;  %v3287_v11 = vld [vmem:[#allocation2 + $0x458] sm:$0xff] }
 0x2ef   : > { %4815 = vmatprep.mubr.bf16.mxu1 %v3985_v53  ;;  %v3785_v16 = vmax.f32 %v3529_v14, 0.0  ;;  %v3534_v8 = vadd.f32 %v7439_v4, %v3236_v50  ;;  %v3999_v53 = vpack.c.bf16 %v3791_v60, %v3783_v55  ;;  %v6490_v42 = vld [vmem:[%s7938_s2 + $0x1e0] sm:$0xff]   ;;  %v3559_v45 = vadd.f32 %v7435_v0, %v3261_v27 }
 0x2f0   : > { %v6491_v14 = vld [vmem:[%s7938_s2 + $0x1a0] sm:$0xff]   ;;  %v3567_v46 = vadd.f32 %v7435_v0, %v3269_v28  ;;  %v4007_v48 = vpack.c.bf16 %v3807_v30, %v3799_v26  ;;  %v4009_v50 = vpack.c.bf16 %v3809_v35, %v3801_v31  ;;  %v3561_v51 = vadd.f32 %v7437_v2, %v3263_v32  ;;  %6230 = vmatprep.subr.bf16.mxu1 %v6490_v42  ;;  %v6495_v26 = vld [vmem:[%s7938_s2 + $0x1a8] sm:$0xff]   ;;  %v3278_v35 = vld [vmem:[#allocation2 + $0x410] sm:$0xff] }
 0x2f1   : > { %v4001_v12 = vpack.c.bf16 %v3793_v1, %v3785_v16  ;;  %v3790_v23 = vmax.f32 %v3534_v8, 0.0  ;;  %v3569_v52 = vadd.f32 %v7437_v2, %v3271_v34  ;;  %6231 = vmatpush3.bf16.msra.mxu1 %v6491_v14  ;;  %v3800_v56 = vmax.f32 %v3544_v39, 0.0  ;;  %v3262_v16 = vld [vmem:[#allocation2 + $0x390] sm:$0xff]  ;;  %v3285_v8 = vld [vmem:[#allocation2 + $0x448] sm:$0xff]  ;;  %v3276_v25 = vld [vmem:[#allocation2 + $0x400] sm:$0xff] }
 0x2f2   : > { %v3815_v60 = vmax.f32 %v3559_v45, 0.0  ;;  %v3823_v62 = vmax.f32 %v3567_v46, 0.0  ;;  %v3270_v1 = vld [vmem:[#allocation2 + $0x3d0] sm:$0xff]  ;;  %v3817_v3 = vmax.f32 %v3561_v51, 0.0  ;;  %v3558_v33 = vadd.f32 %v7439_v4, %v3260_v59  ;;  %v3284_v30 = vld [vmem:[#allocation2 + $0x440] sm:$0xff]  ;;  %v3301_v42 = vld [vmem:[#allocation2 + $0x4c8] sm:$0xff] }
 0x2f3   : > { %v3998_v43 = vpack.c.bf16 %v3790_v23, %v3782_v9  ;;  %v3825_v17 = vmax.f32 %v3569_v52, 0.0  ;;  %v3566_v49 = vadd.f32 %v7439_v4, %v3268_v63  ;;  %v3560_v5 = vadd.f32 %v7441_v6, %v3262_v16  ;;  %v3295_v14 = vld [vmem:[#allocation2 + $0x498] sm:$0xff]  ;;  %v3302_v59 = vld [vmem:[#allocation2 + $0x4d0] sm:$0xff] }
 0x2f4   : > { %v3568_v9 = vadd.f32 %v7441_v6, %v3270_v1  ;;  %v3577_v23 = vadd.f32 %v7437_v2, %v3279_v61  ;;  %v3585_v24 = vadd.f32 %v7437_v2, %v3287_v11  ;;  %v3814_v27 = vmax.f32 %v3558_v33, 0.0  ;;  %v3309_v1 = vld [vmem:[#allocation2 + $0x508] sm:$0xff] }
 0x2f5   : > { %4655 = vmatmul.mubr.bf16.gmra.mrb[12].mxu0 %v3982_v13  ;;  %v6489_v13 = vld [vmem:[%s7938_s2 + $0x120] sm:$0xff]   ;;  %v4017_v22 = vpack.c.bf16 %v3825_v17, %v3817_v3  ;;  %v3822_v28 = vmax.f32 %v3566_v49, 0.0  ;;  %v3816_v31 = vmax.f32 %v3560_v5, 0.0  ;;  %v3574_v39 = vadd.f32 %v7439_v4, %v3276_v25  ;;  %v3317_v3 = vld [vmem:[#allocation2 + $0x548] sm:$0xff]  ;;  %v6496_v17 = vld [vmem:[%s7938_s2 + $0x170] sm:$0xff]  }
 0x2f6   : > { %4816 = vmatmul.mubr.bf16.gmra.mrb[12].mxu1 %v3984_v37  ;;  %4662 = vmatprep.mubr.bf16.mxu0 %v3991_v38  ;;  %v3542_v37 = vadd.f32 %v7439_v4, %v3244_v20  ;;  %v3550_v38 = vadd.f32 %v7439_v4, %v3252_v21  ;;  %v3575_v20 = vadd.f32 %v7435_v0, %v3277_v7  ;;  %v6494_v21 = vld [vmem:[%s7938_s2 + $0x1e8] sm:$0xff]   ;;  %v3824_v32 = vmax.f32 %v3568_v9, 0.0 }
 0x2f7   : > { %4823 = vmatprep.mubr.bf16.mxu1 %v3993_v41  ;;  %v3552_v41 = vadd.f32 %v7441_v6, %v3254_v18  ;;  %6119 = vmatpush3.bf16.msra.mxu0 %v6489_v13  ;;  %v3583_v18 = vadd.f32 %v7435_v0, %v3285_v8  ;;  %v4014_v45 = vpack.c.bf16 %v3822_v28, %v3814_v27  ;;  %v3830_v63 = vmax.f32 %v3574_v39, 0.0  ;;  %v6497_v8 = vld [vmem:[%s7938_s2 + $0x130] sm:$0xff]  }
 0x2f8   : > { %v3798_v54 = vmax.f32 %v3542_v37, 0.0  ;;  %v3806_v55 = vmax.f32 %v3550_v38, 0.0  ;;  %6120 = vmatprep.subr.bf16.mxu0 %v6492_v10  ;;  %6232 = vmatprep.subr.bf16.mxu1 %v6494_v21  ;;  %v3831_v34 = vmax.f32 %v3575_v20, 0.0  ;;  %v3833_v37 = vmax.f32 %v3577_v23, 0.0  ;;  %v6498_v10 = vld [vmem:[%s7938_s2 + $0x1f0] sm:$0xff]  }
 0x2f9   : > { %v3808_v57 = vmax.f32 %v3552_v41, 0.0  ;;  %v3839_v13 = vmax.f32 %v3583_v18, 0.0  ;;  %v3841_v38 = vmax.f32 %v3585_v24, 0.0  ;;  %v3293_v41 = vld [vmem:[#allocation2 + $0x488] sm:$0xff]  ;;  %6233 = vmatpush3.bf16.msra.mxu1 %v6495_v26  ;;  %v3576_v46 = vadd.f32 %v7441_v6, %v3278_v35  ;;  %v3310_v39 = vld [vmem:[#allocation2 + $0x510] sm:$0xff] }
 0x2fa   : > { %v4016_v51 = vpack.c.bf16 %v3824_v32, %v3816_v31  ;;  %v3591_v52 = vadd.f32 %v7435_v0, %v3293_v41  ;;  %v3600_v21 = vadd.f32 %v7441_v6, %v3302_v59  ;;  %v3607_v18 = vadd.f32 %v7435_v0, %v3309_v1  ;;  %6234 = vmatprep.subr.bf16.mxu1 %v6498_v10  ;;  %v3318_v41 = vld [vmem:[#allocation2 + $0x550] sm:$0xff]  ;;  %v3324_v10 = vld [vmem:[#allocation2 + $0x580] sm:$0xff] }
 0x2fb   : > { %v3832_v61 = vmax.f32 %v3576_v46, 0.0  ;;  %v3615_v23 = vadd.f32 %v7435_v0, %v3317_v3  ;;  %v6503_v46 = vld [vmem:[%s7938_s2 + $0x1b8] sm:$0xff]  }
 0x2fc   : > { %v3856_v35 = vmax.f32 %v3600_v21, 0.0  ;;  %v3343_v21 = vld [vmem:[#allocation2 + $0x618] sm:$0xff] }
 0x2fd   : > { %4663 = vmatmul.mubr.bf16.gmra.mrb[16].mxu0 %v3990_v15  ;;  %v4006_v15 = vpack.c.bf16 %v3806_v55, %v3798_v54  ;;  %v3599_v54 = vadd.f32 %v7435_v0, %v3301_v42  ;;  %v3593_v55 = vadd.f32 %v7437_v2, %v3295_v14  ;;  %v6500_v42 = vld [vmem:[%s7938_s2 + $0x178] sm:$0xff]  }
 0x2fe   : > { %4824 = vmatmul.mubr.bf16.gmra.mrb[16].mxu1 %v3992_v29  ;;  %4670 = vmatprep.mubr.bf16.mxu0 %v3999_v53  ;;  %v4008_v29 = vpack.c.bf16 %v3808_v57, %v3800_v56  ;;  %v6493_v53 = vld [vmem:[%s7938_s2 + $0x128] sm:$0xff]   ;;  %v3300_v56 = vld [vmem:[#allocation2 + $0x4c0] sm:$0xff]  ;;  %v3294_v57 = vld [vmem:[#allocation2 + $0x490] sm:$0xff] }
 0x2ff   : > { %4831 = vmatprep.mubr.bf16.mxu1 %v4001_v12  ;;  %v4015_v12 = vpack.c.bf16 %v3823_v62, %v3815_v60  ;;  %6121 = vmatpush3.bf16.msra.mxu0 %v6493_v53  ;;  %v4023_v60 = vpack.c.bf16 %v3839_v13, %v3831_v34  ;;  %v4025_v62 = vpack.c.bf16 %v3841_v38, %v3833_v37  ;;  %v3855_v33 = vmax.f32 %v3599_v54, 0.0  ;;  %v3316_v13 = vld [vmem:[#allocation2 + $0x540] sm:$0xff]  ;;  %v6501_v14 = vld [vmem:[%s7938_s2 + $0x138] sm:$0xff]  }
 0x300   : > { %6122 = vmatprep.subr.bf16.mxu0 %v6496_v17  ;;  %v3849_v49 = vmax.f32 %v3593_v55, 0.0  ;;  %v3598_v9 = vadd.f32 %v7439_v4, %v3300_v56  ;;  %v3592_v20 = vadd.f32 %v7441_v6, %v3294_v57  ;;  %v3863_v37 = vmax.f32 %v3607_v18, 0.0  ;;  %v3327_v54 = vld [vmem:[#allocation2 + $0x598] sm:$0xff] }
 0x301   : > { %v3871_v38 = vmax.f32 %v3615_v23, 0.0  ;;  %v3335_v55 = vld [vmem:[#allocation2 + $0x5d8] sm:$0xff]  ;;  %v3608_v56 = vadd.f32 %v7441_v6, %v3310_v39  ;;  %v3616_v57 = vadd.f32 %v7441_v6, %v3318_v41  ;;  %v3625_v3 = vadd.f32 %v7437_v2, %v3327_v54  ;;  %v3340_v39 = vld [vmem:[#allocation2 + $0x600] sm:$0xff] }
 0x302   : > { %v3854_v32 = vmax.f32 %v3598_v9, 0.0  ;;  %v3848_v34 = vmax.f32 %v3592_v20, 0.0  ;;  %v3633_v17 = vadd.f32 %v7437_v2, %v3335_v55  ;;  %v3622_v23 = vadd.f32 %v7439_v4, %v3324_v10  ;;  %v3348_v41 = vld [vmem:[#allocation2 + $0x640] sm:$0xff]  ;;  %v3359_v54 = vld [vmem:[#allocation2 + $0x698] sm:$0xff] }
 0x303   : > { %6123 = vmatpush3.bf16.msra.mxu0 %v6497_v8  ;;  %v3881_v9 = vmax.f32 %v3625_v3, 0.0  ;;  %v3367_v55 = vld [vmem:[#allocation2 + $0x6d8] sm:$0xff]  ;;  %v3657_v3 = vadd.f32 %v7437_v2, %v3359_v54  ;;  %v3356_v10 = vld [vmem:[#allocation2 + $0x680] sm:$0xff] }
 0x304   : > { %6124 = vmatprep.subr.bf16.mxu0 %v6500_v42  ;;  %v3889_v20 = vmax.f32 %v3633_v17, 0.0  ;;  %v3665_v17 = vadd.f32 %v7437_v2, %v3367_v55  ;;  %v3391_v54 = vld [vmem:[#allocation2 + $0x798] sm:$0xff] }
 0x305   : > { %4671 = vmatmul.mubr.bf16.gmra.mrb[20].mxu0 %v3998_v43  ;;  %v3582_v43 = vadd.f32 %v7439_v4, %v3284_v30  ;;  %v3399_v55 = vld [vmem:[#allocation2 + $0x7d8] sm:$0xff] }
 0x306   : > { %4832 = vmatmul.mubr.bf16.gmra.mrb[20].mxu1 %v4000_v44  ;;  %4678 = vmatprep.mubr.bf16.mxu0 %v4007_v48  ;;  %v3303_v44 = vld [vmem:[#allocation2 + $0x4d8] sm:$0xff]  ;;  %v3584_v48 = vadd.f32 %v7441_v6, %v3286_v36  ;;  %v3308_v36 = vld [vmem:[#allocation2 + $0x500] sm:$0xff] }
 0x307   : > { %4839 = vmatprep.mubr.bf16.mxu1 %v4009_v50  ;;  %v3292_v50 = vld [vmem:[#allocation2 + $0x480] sm:$0xff]  ;;  %v3601_v16 = vadd.f32 %v7437_v2, %v3303_v44  ;;  %v3838_v7 = vmax.f32 %v3582_v43, 0.0  ;;  %v6502_v44 = vld [vmem:[%s7938_s2 + $0x1f8] sm:$0xff]   ;;  %6125 = vmatpush3.bf16.msra.mxu0 %v6501_v14 }
 0x308   : > { %v3840_v11 = vmax.f32 %v3584_v48, 0.0  ;;  %v3590_v53 = vadd.f32 %v7439_v4, %v3292_v50  ;;  %v3325_v48 = vld [vmem:[#allocation2 + $0x588] sm:$0xff]  ;;  %v3606_v50 = vadd.f32 %v7439_v4, %v3308_v36  ;;  %v3878_v36 = vmax.f32 %v3622_v23, 0.0 }
 0x309   : > { %v3857_v5 = vmax.f32 %v3601_v16, 0.0  ;;  %v4022_v24 = vpack.c.bf16 %v3838_v7, %v3830_v63  ;;  %v3623_v16 = vadd.f32 %v7435_v0, %v3325_v48  ;;  %v3357_v48 = vld [vmem:[#allocation2 + $0x688] sm:$0xff]  ;;  %v3654_v23 = vadd.f32 %v7439_v4, %v3356_v10  ;;  %v3388_v10 = vld [vmem:[#allocation2 + $0x780] sm:$0xff] }
 0x30a   : > { %v4024_v26 = vpack.c.bf16 %v3840_v11, %v3832_v61  ;;  %v3846_v28 = vmax.f32 %v3590_v53, 0.0  ;;  %v3862_v7 = vmax.f32 %v3606_v50, 0.0  ;;  %v3864_v61 = vmax.f32 %v3608_v56, 0.0  ;;  %v3349_v53 = vld [vmem:[#allocation2 + $0x648] sm:$0xff] }
 0x30b   : > { %v4033_v31 = vpack.c.bf16 %v3857_v5, %v3849_v49  ;;  %v3872_v11 = vmax.f32 %v3616_v57, 0.0  ;;  %v3341_v49 = vld [vmem:[#allocation2 + $0x608] sm:$0xff]  ;;  %v3638_v50 = vadd.f32 %v7439_v4, %v3340_v39  ;;  %v3372_v39 = vld [vmem:[#allocation2 + $0x700] sm:$0xff] }
 0x30c   : > { %v4030_v59 = vpack.c.bf16 %v3854_v32, %v3846_v28  ;;  %v3639_v28 = vadd.f32 %v7435_v0, %v3341_v49  ;;  %v3373_v49 = vld [vmem:[#allocation2 + $0x708] sm:$0xff] }
 0x30d   : > { %4679 = vmatmul.mubr.bf16.gmra.mrb[24].mxu0 %v4006_v15  ;;  %v6499_v15 = vld [vmem:[%s7938_s2 + $0x1b0] sm:$0xff]  }
 0x30e   : > { %4840 = vmatmul.mubr.bf16.gmra.mrb[24].mxu1 %v4008_v29  ;;  %4686 = vmatprep.mubr.bf16.mxu0 %v4015_v12  ;;  %v3847_v29 = vmax.f32 %v3591_v52, 0.0  ;;  %v3311_v12 = vld [vmem:[#allocation2 + $0x518] sm:$0xff]  ;;  %v3333_v52 = vld [vmem:[#allocation2 + $0x5c8] sm:$0xff]  ;;  %v3895_v42 = vmax.f32 %v3639_v28, 0.0  ;;  %v3671_v28 = vadd.f32 %v7435_v0, %v3373_v49 }
 0x30f   : > { %4847 = vmatprep.mubr.bf16.mxu1 %v4017_v22  ;;  %v3319_v22 = vld [vmem:[#allocation2 + $0x558] sm:$0xff]  ;;  %v3609_v25 = vadd.f32 %v7437_v2, %v3311_v12  ;;  %6235 = vmatpush3.bf16.msra.mxu1 %v6499_v15  ;;  %v3631_v1 = vadd.f32 %v7435_v0, %v3333_v52  ;;  %v3332_v15 = vld [vmem:[#allocation2 + $0x5c0] sm:$0xff]  ;;  %v3879_v12 = vmax.f32 %v3623_v16, 0.0  ;;  %v3365_v52 = vld [vmem:[#allocation2 + $0x6c8] sm:$0xff]  ;;  %v3655_v16 = vadd.f32 %v7435_v0, %v3357_v48 }
 0x310   : > { %v4031_v27 = vpack.c.bf16 %v3855_v33, %v3847_v29  ;;  %v3617_v30 = vadd.f32 %v7437_v2, %v3319_v22  ;;  %6236 = vmatprep.subr.bf16.mxu1 %v6502_v44  ;;  %v3326_v29 = vld [vmem:[#allocation2 + $0x590] sm:$0xff]  ;;  %v3351_v22 = vld [vmem:[#allocation2 + $0x658] sm:$0xff]  ;;  %v3389_v48 = vld [vmem:[#allocation2 + $0x788] sm:$0xff] }
 0x311   : > { %v3865_v43 = vmax.f32 %v3609_v25, 0.0  ;;  %v3334_v33 = vld [vmem:[#allocation2 + $0x5d0] sm:$0xff]  ;;  %v3887_v5 = vmax.f32 %v3631_v1, 0.0  ;;  %v3630_v25 = vadd.f32 %v7439_v4, %v3332_v15  ;;  %v3649_v32 = vadd.f32 %v7437_v2, %v3351_v22  ;;  %v3364_v15 = vld [vmem:[#allocation2 + $0x6c0] sm:$0xff]  ;;  %v3383_v22 = vld [vmem:[#allocation2 + $0x758] sm:$0xff] }
 0x312   : > { %v3663_v1 = vadd.f32 %v7435_v0, %v3365_v52  ;;  %v3397_v52 = vld [vmem:[#allocation2 + $0x7c8] sm:$0xff] }
 0x313   : > { %6237 = vmatpush3.bf16.msra.mxu1 %v6503_v46  ;;  %v3905_v44 = vmax.f32 %v3649_v32, 0.0  ;;  %v3350_v46 = vld [vmem:[#allocation2 + $0x650] sm:$0xff]  ;;  %v3681_v32 = vadd.f32 %v7437_v2, %v3383_v22  ;;  %v3153_v49 = vld [vmem:[#allocation2 + $0x28] sm:$0xff]  ;;  %v3686_v22 = vadd.f32 %v7439_v4, %v3388_v10 }
 0x314   : > { %v3648_v57 = vadd.f32 %v7441_v6, %v3350_v46  ;;  %v3382_v46 = vld [vmem:[#allocation2 + $0x750] sm:$0xff]  ;;  %v3185_v10 = vld [vmem:[#allocation2 + $0x128] sm:$0xff] }
 0x315   : > { %4687 = vmatmul.mubr.bf16.gmra.mrb[28].mxu0 %v4014_v45  ;;  %v3873_v45 = vmax.f32 %v3617_v30, 0.0  ;;  %v3647_v30 = vadd.f32 %v7435_v0, %v3349_v53  ;;  %v3381_v53 = vld [vmem:[#allocation2 + $0x748] sm:$0xff] }
 0x316   : > { %4848 = vmatmul.mubr.bf16.gmra.mrb[28].mxu1 %v4016_v51  ;;  %4694 = vmatprep.mubr.bf16.mxu0 %v4023_v60  ;;  %v3614_v51 = vadd.f32 %v7439_v4, %v3316_v13  ;;  %v4032_v60 = vpack.c.bf16 %v3856_v35, %v3848_v34  ;;  %v4047_v34 = vpack.c.bf16 %v3887_v5, %v3879_v12  ;;  %v3886_v13 = vmax.f32 %v3630_v25, 0.0 }
 0x317   : > { %4855 = vmatprep.mubr.bf16.mxu1 %v4025_v62  ;;  %v4039_v62 = vpack.c.bf16 %v3871_v38, %v3863_v37  ;;  %v4041_v63 = vpack.c.bf16 %v3873_v45, %v3865_v43  ;;  %v4049_v35 = vpack.c.bf16 %v3889_v20, %v3881_v9  ;;  %v3903_v14 = vmax.f32 %v3647_v30, 0.0  ;;  %v3342_v45 = vld [vmem:[#allocation2 + $0x610] sm:$0xff] }
 0x318   : > { %v3870_v8 = vmax.f32 %v3614_v51, 0.0  ;;  %v3646_v51 = vadd.f32 %v7439_v4, %v3348_v41  ;;  %v3640_v56 = vadd.f32 %v7441_v6, %v3342_v45  ;;  %v3911_v12 = vmax.f32 %v3655_v16, 0.0  ;;  %v3380_v41 = vld [vmem:[#allocation2 + $0x740] sm:$0xff]  ;;  %v3374_v45 = vld [vmem:[#allocation2 + $0x710] sm:$0xff] }
 0x319   : > { %v3919_v5 = vmax.f32 %v3663_v1, 0.0  ;;  %v3913_v9 = vmax.f32 %v3657_v3, 0.0  ;;  %v3921_v20 = vmax.f32 %v3665_v17, 0.0  ;;  %v3662_v25 = vadd.f32 %v7439_v4, %v3364_v15  ;;  %v3396_v15 = vld [vmem:[#allocation2 + $0x7c0] sm:$0xff] }
 0x31a   : > { %v4038_v18 = vpack.c.bf16 %v3870_v8, %v3862_v7  ;;  %v3894_v7 = vmax.f32 %v3638_v50, 0.0  ;;  %v3902_v8 = vmax.f32 %v3646_v51, 0.0  ;;  %v3679_v30 = vadd.f32 %v7435_v0, %v3381_v53  ;;  %v3161_v53 = vld [vmem:[#allocation2 + $0x68] sm:$0xff] }
 0x31b   : > { %v3670_v50 = vadd.f32 %v7439_v4, %v3372_v39  ;;  %v3678_v51 = vadd.f32 %v7439_v4, %v3380_v41  ;;  %v3687_v16 = vadd.f32 %v7435_v0, %v3389_v48  ;;  %v3695_v1 = vadd.f32 %v7435_v0, %v3397_v52  ;;  %v3171_v48 = vld [vmem:[#allocation2 + $0xb8] sm:$0xff] }
 0x31c   : > { %v3689_v3 = vadd.f32 %v7437_v2, %v3391_v54  ;;  %v3697_v17 = vadd.f32 %v7437_v2, %v3399_v55 }
 0x31d   : > { %4695 = vmatmul.mubr.bf16.gmra.mrb[32].mxu0 %v4022_v24  ;;  %v4040_v24 = vpack.c.bf16 %v3872_v11, %v3864_v61  ;;  %v3896_v61 = vmax.f32 %v3640_v56, 0.0  ;;  %v3904_v11 = vmax.f32 %v3648_v57, 0.0  ;;  %v3672_v56 = vadd.f32 %v7441_v6, %v3374_v45 }
 0x31e   : > { %4856 = vmatmul.mubr.bf16.gmra.mrb[32].mxu1 %v4024_v26  ;;  %4702 = vmatprep.mubr.bf16.mxu0 %v4031_v27  ;;  %v3624_v26 = vadd.f32 %v7441_v6, %v3326_v29  ;;  %v3632_v27 = vadd.f32 %v7441_v6, %v3334_v33  ;;  %v3358_v29 = vld [vmem:[#allocation2 + $0x690] sm:$0xff]  ;;  %v3680_v57 = vadd.f32 %v7441_v6, %v3382_v46  ;;  %v3951_v0 = vmax.f32 %v3695_v1, 0.0  ;;  %v3177_v46 = vld [vmem:[#allocation2 + $0xe8] sm:$0xff] }
 0x31f   : > { %4863 = vmatprep.mubr.bf16.mxu1 %v4033_v31  ;;  %v3641_v31 = vadd.f32 %v7437_v2, %v3343_v21  ;;  %v3366_v33 = vld [vmem:[#allocation2 + $0x6d0] sm:$0xff]  ;;  %v3375_v21 = vld [vmem:[#allocation2 + $0x718] sm:$0xff] }
 0x320   : > { %v3880_v37 = vmax.f32 %v3624_v26, 0.0  ;;  %v3888_v38 = vmax.f32 %v3632_v27, 0.0  ;;  %v3656_v26 = vadd.f32 %v7441_v6, %v3358_v29  ;;  %v3664_v27 = vadd.f32 %v7441_v6, %v3366_v33  ;;  %v3390_v29 = vld [vmem:[#allocation2 + $0x790] sm:$0xff] }
 0x321   : > { %v3897_v43 = vmax.f32 %v3641_v31, 0.0  ;;  %v3673_v31 = vadd.f32 %v7437_v2, %v3375_v21  ;;  %v3398_v33 = vld [vmem:[#allocation2 + $0x7d0] sm:$0xff]  ;;  %v3163_v2 = vld [vmem:[#allocation2 + $0x78] sm:$0xff] }
 0x325   : > { %4703 = vmatmul.mubr.bf16.gmra.mrb[36].mxu0 %v4030_v59  ;;  %v4046_v59 = vpack.c.bf16 %v3886_v13, %v3878_v36  ;;  %v3910_v36 = vmax.f32 %v3654_v23, 0.0  ;;  %v3918_v13 = vmax.f32 %v3662_v25, 0.0  ;;  %v3694_v23 = vadd.f32 %v7439_v4, %v3396_v15  ;;  %v3160_v4 = vld [vmem:[#allocation2 + $0x60] sm:$0xff]  ;;  %v3193_v15 = vld [vmem:[#allocation2 + $0x168] sm:$0xff] }
 0x326   : > { %4864 = vmatmul.mubr.bf16.gmra.mrb[36].mxu1 %v4032_v60  ;;  %4710 = vmatprep.mubr.bf16.mxu0 %v4039_v62  ;;  %v4048_v60 = vpack.c.bf16 %v3888_v38, %v3880_v37  ;;  %v4055_v62 = vpack.c.bf16 %v3903_v14, %v3895_v42  ;;  %v3912_v37 = vmax.f32 %v3656_v26, 0.0  ;;  %v3920_v38 = vmax.f32 %v3664_v27, 0.0 }
 0x327   : > { %4871 = vmatprep.mubr.bf16.mxu1 %v4041_v63  ;;  %v4057_v63 = vpack.c.bf16 %v3905_v44, %v3897_v43  ;;  %v3927_v42 = vmax.f32 %v3671_v28, 0.0  ;;  %v3935_v14 = vmax.f32 %v3679_v30, 0.0  ;;  %v3929_v43 = vmax.f32 %v3673_v31, 0.0 }
 0x328   : > { %v3937_v44 = vmax.f32 %v3681_v32, 0.0  ;;  %v3696_v25 = vadd.f32 %v7441_v6, %v3398_v33  ;;  %v3451_v26 = vadd.f32 %v7443_v19, %v3153_v49  ;;  %v3459_v27 = vadd.f32 %v7443_v19, %v3161_v53 }
 0x329   : > { %v3461_v30 = vadd.f32 %v7445_v40, %v3163_v2  ;;  %v3458_v45 = vadd.f32 %v7447_v47, %v3160_v4 }
 0x32b   : > { %v3717_v41 = vmax.f32 %v3461_v30, 0.0  ;;  %v3714_v1 = vmax.f32 %v3458_v45, 0.0 }
 0x32d   : > { %4711 = vmatmul.mubr.bf16.gmra.mrb[40].mxu0 %v4038_v18  ;;  %v4054_v18 = vpack.c.bf16 %v3902_v8, %v3894_v7  ;;  %v3926_v7 = vmax.f32 %v3670_v50, 0.0  ;;  %v3934_v8 = vmax.f32 %v3678_v51, 0.0  ;;  %v3179_v50 = vld [vmem:[#allocation2 + $0xf8] sm:$0xff] }
 0x32e   : > { %4872 = vmatmul.mubr.bf16.gmra.mrb[40].mxu1 %v4040_v24  ;;  %4718 = vmatprep.mubr.bf16.mxu0 %v4047_v34  ;;  %v4056_v24 = vpack.c.bf16 %v3904_v11, %v3896_v61  ;;  %v4063_v34 = vpack.c.bf16 %v3919_v5, %v3911_v12  ;;  %v3928_v61 = vmax.f32 %v3672_v56, 0.0  ;;  %v3936_v11 = vmax.f32 %v3680_v57, 0.0 }
 0x32f   : > { %4879 = vmatprep.mubr.bf16.mxu1 %v4049_v35  ;;  %v4065_v35 = vpack.c.bf16 %v3921_v20, %v3913_v9  ;;  %v3943_v12 = vmax.f32 %v3687_v16, 0.0  ;;  %v3945_v5 = vmax.f32 %v3689_v3, 0.0  ;;  %v3953_v9 = vmax.f32 %v3697_v17, 0.0  ;;  %v3155_v20 = vld [vmem:[#allocation2 + $0x38] sm:$0xff] }
 0x330   : > { %v4070_v21 = vpack.c.bf16 %v3934_v8, %v3926_v7  ;;  %v3453_v28 = vadd.f32 %v7445_v40, %v3155_v20  ;;  %v3168_v7 = vld [vmem:[#allocation2 + $0xa0] sm:$0xff] }
 0x331   : > { %v4079_v31 = vpack.c.bf16 %v3951_v0, %v3943_v12  ;;  %v4081_v32 = vpack.c.bf16 %v3953_v9, %v3945_v5  ;;  %v3176_v8 = vld [vmem:[#allocation2 + $0xe0] sm:$0xff]  ;;  %v3187_v12 = vld [vmem:[#allocation2 + $0x138] sm:$0xff]  ;;  %v3466_v9 = vadd.f32 %v7447_v47, %v3168_v7  ;;  %v3217_v7 = vld [vmem:[#allocation2 + $0x228] sm:$0xff] }
 0x332   : > { %v3709_v39 = vmax.f32 %v3453_v28, 0.0  ;;  %v3195_v0 = vld [vmem:[#allocation2 + $0x178] sm:$0xff]  ;;  %v3474_v2 = vadd.f32 %v7447_v47, %v3176_v8  ;;  %v3225_v8 = vld [vmem:[#allocation2 + $0x268] sm:$0xff] }
 0x333   : > { %v3722_v28 = vmax.f32 %v3466_v9, 0.0 }
 0x334   : > { %v3965_v57 = vpack.c.bf16 %v3717_v41, %v3709_v39  ;;  %v3730_v30 = vmax.f32 %v3474_v2, 0.0  ;;  %v3201_v39 = vld [vmem:[#allocation2 + $0x1a8] sm:$0xff]  ;;  %v3523_v2 = vadd.f32 %v7443_v19, %v3225_v8 }
 0x335   : > { %4719 = vmatmul.mubr.bf16.gmra.mrb[44].mxu0 %v4046_v59  ;;  %v4062_v59 = vpack.c.bf16 %v3918_v13, %v3910_v36  ;;  %v3952_v13 = vmax.f32 %v3696_v25, 0.0  ;;  %v3493_v25 = vadd.f32 %v7445_v40, %v3195_v0 }
 0x336   : > { %4880 = vmatmul.mubr.bf16.gmra.mrb[44].mxu1 %v4048_v60  ;;  %4726 = vmatprep.mubr.bf16.mxu0 %v4055_v62  ;;  %v4064_v60 = vpack.c.bf16 %v3920_v38, %v3912_v37  ;;  %v4071_v62 = vpack.c.bf16 %v3935_v14, %v3927_v42  ;;  %v3152_v37 = vld [vmem:[#allocation2 + $0x20] sm:$0xff]  ;;  %v3707_v38 = vmax.f32 %v3451_v26, 0.0  ;;  %v3154_v42 = vld [vmem:[#allocation2 + $0x30] sm:$0xff] }
 0x337   : > { %4887 = vmatprep.mubr.bf16.mxu1 %v4057_v63  ;;  %v4073_v63 = vpack.c.bf16 %v3937_v44, %v3929_v43  ;;  %v3162_v14 = vld [vmem:[#allocation2 + $0x70] sm:$0xff]  ;;  %v3169_v43 = vld [vmem:[#allocation2 + $0xa8] sm:$0xff]  ;;  %v3450_v44 = vadd.f32 %v7447_v47, %v3152_v37  ;;  %v3452_v51 = vadd.f32 %v7449_v58, %v3154_v42  ;;  %v3749_v4 = vmax.f32 %v3493_v25, 0.0 }
 0x338   : > { %v3460_v52 = vadd.f32 %v7449_v58, %v3162_v14  ;;  %v3209_v14 = vld [vmem:[#allocation2 + $0x1e8] sm:$0xff] }
 0x339   : > { %v3706_v16 = vmax.f32 %v3450_v44, 0.0  ;;  %v3708_v3 = vmax.f32 %v3452_v51, 0.0  ;;  %v3211_v44 = vld [vmem:[#allocation2 + $0x1f8] sm:$0xff] }
 0x33a   : > { %v3716_v17 = vmax.f32 %v3460_v52, 0.0 }
 0x33b   : > { %v3962_v5 = vpack.c.bf16 %v3714_v1, %v3706_v16  ;;  %v3200_v16 = vld [vmem:[#allocation2 + $0x1a0] sm:$0xff] }
 0x33c   : > { %v3964_v20 = vpack.c.bf16 %v3716_v17, %v3708_v3  ;;  %v3208_v1 = vld [vmem:[#allocation2 + $0x1e0] sm:$0xff]  ;;  %v3202_v3 = vld [vmem:[#allocation2 + $0x1b0] sm:$0xff] }
 0x33d   : > { %4727 = vmatmul.mubr.bf16.gmra.mrb[48].mxu0 %v4054_v18  ;;  %v4072_v18 = vpack.c.bf16 %v3936_v11, %v3928_v61  ;;  %v3170_v61 = vld [vmem:[#allocation2 + $0xb0] sm:$0xff]  ;;  %v3506_v0 = vadd.f32 %v7447_v47, %v3208_v1  ;;  %v3257_v1 = vld [vmem:[#allocation2 + $0x368] sm:$0xff] }
 0x33e   : > { %4888 = vmatmul.mubr.bf16.gmra.mrb[48].mxu1 %v4056_v24  ;;  %4734 = vmatprep.mubr.bf16.mxu0 %v4063_v34  ;;  %v3688_v24 = vadd.f32 %v7441_v6, %v3390_v29  ;;  %v3942_v34 = vmax.f32 %v3686_v22, 0.0  ;;  %v3715_v6 = vmax.f32 %v3459_v27, 0.0  ;;  %v3178_v11 = vld [vmem:[#allocation2 + $0xf0] sm:$0xff] }
 0x33f   : > { %4895 = vmatprep.mubr.bf16.mxu1 %v4065_v35  ;;  %v3950_v35 = vmax.f32 %v3694_v23, 0.0  ;;  %v3476_v22 = vadd.f32 %v7449_v58, %v3178_v11  ;;  %v3491_v23 = vadd.f32 %v7443_v19, %v3193_v15  ;;  %v3210_v17 = vld [vmem:[#allocation2 + $0x1f0] sm:$0xff]  ;;  %v3762_v25 = vmax.f32 %v3506_v0, 0.0 }
 0x340   : > { %v3944_v36 = vmax.f32 %v3688_v24, 0.0  ;;  %v3963_v56 = vpack.c.bf16 %v3715_v6, %v3707_v38  ;;  %v3485_v24 = vadd.f32 %v7445_v40, %v3187_v12  ;;  %v3186_v38 = vld [vmem:[#allocation2 + $0x130] sm:$0xff]  ;;  %v3508_v9 = vadd.f32 %v7449_v58, %v3210_v17 }
 0x341   : > { %v4078_v54 = vpack.c.bf16 %v3950_v35, %v3942_v34  ;;  %v3184_v34 = vld [vmem:[#allocation2 + $0x120] sm:$0xff]  ;;  %v3194_v6 = vld [vmem:[#allocation2 + $0x170] sm:$0xff]  ;;  %v3484_v45 = vadd.f32 %v7449_v58, %v3186_v38  ;;  %v3555_v0 = vadd.f32 %v7443_v19, %v3257_v1 }
 0x342   : > { %v4080_v55 = vpack.c.bf16 %v3952_v13, %v3944_v36  ;;  %v3192_v35 = vld [vmem:[#allocation2 + $0x160] sm:$0xff]  ;;  %v3747_v13 = vmax.f32 %v3491_v23, 0.0  ;;  %v3741_v37 = vmax.f32 %v3485_v24, 0.0  ;;  %v3482_v41 = vadd.f32 %v7447_v47, %v3184_v34 }
 0x343   : > { %v3490_v42 = vadd.f32 %v7447_v47, %v3192_v35 }
 0x344   : > { %v3981_v52 = vpack.c.bf16 %v3749_v4, %v3741_v37  ;;  %v3233_v37 = vld [vmem:[#allocation2 + $0x2a8] sm:$0xff] }
 0x345   : > { %4735 = vmatmul.mubr.bf16.gmra.mrb[52].mxu0 %v4062_v59  ;;  %v3467_v59 = vadd.f32 %v7443_v19, %v3169_v43  ;;  %v3203_v43 = vld [vmem:[#allocation2 + $0x1b8] sm:$0xff] }
 0x346   : > { %4896 = vmatmul.mubr.bf16.gmra.mrb[52].mxu1 %v4064_v60  ;;  %4742 = vmatprep.mubr.bf16.mxu0 %v4071_v62  ;;  %v3475_v60 = vadd.f32 %v7443_v19, %v3177_v46  ;;  %v3469_v62 = vadd.f32 %v7445_v40, %v3171_v48  ;;  %v3492_v46 = vadd.f32 %v7449_v58, %v3194_v6  ;;  %v3241_v6 = vld [vmem:[#allocation2 + $0x2e8] sm:$0xff] }
 0x347   : > { %4903 = vmatprep.mubr.bf16.mxu1 %v4073_v63  ;;  %v3477_v63 = vadd.f32 %v7445_v40, %v3179_v50  ;;  %v3723_v29 = vmax.f32 %v3467_v59, 0.0  ;;  %v3970_v48 = vpack.c.bf16 %v3730_v30, %v3722_v28  ;;  %v3738_v59 = vmax.f32 %v3482_v41, 0.0  ;;  %v3216_v28 = vld [vmem:[#allocation2 + $0x220] sm:$0xff]  ;;  %v3243_v41 = vld [vmem:[#allocation2 + $0x2f8] sm:$0xff] }
 0x348   : > { %v3731_v33 = vmax.f32 %v3475_v60, 0.0  ;;  %v3725_v49 = vmax.f32 %v3469_v62, 0.0  ;;  %v3746_v60 = vmax.f32 %v3490_v42, 0.0  ;;  %v3740_v62 = vmax.f32 %v3484_v45, 0.0  ;;  %v3224_v30 = vld [vmem:[#allocation2 + $0x260] sm:$0xff] }
 0x349   : > { %v3733_v53 = vmax.f32 %v3477_v63, 0.0  ;;  %v3748_v63 = vmax.f32 %v3492_v46, 0.0  ;;  %v3514_v4 = vadd.f32 %v7447_v47, %v3216_v28  ;;  %v3522_v38 = vadd.f32 %v7447_v47, %v3224_v30 }
 0x34a   : > { %v3971_v26 = vpack.c.bf16 %v3731_v33, %v3723_v29  ;;  %v3219_v29 = vld [vmem:[#allocation2 + $0x238] sm:$0xff] }
 0x34b   : > { %v3973_v27 = vpack.c.bf16 %v3733_v53, %v3725_v49  ;;  %v3227_v33 = vld [vmem:[#allocation2 + $0x278] sm:$0xff]  ;;  %v3978_v49 = vpack.c.bf16 %v3746_v60, %v3738_v59  ;;  %v3498_v53 = vadd.f32 %v7447_v47, %v3200_v16  ;;  %v3980_v12 = vpack.c.bf16 %v3748_v63, %v3740_v62  ;;  %v3232_v59 = vld [vmem:[#allocation2 + $0x2a0] sm:$0xff]  ;;  %v3234_v62 = vld [vmem:[#allocation2 + $0x2b0] sm:$0xff] }
 0x34c   : > { %v3240_v60 = vld [vmem:[#allocation2 + $0x2e0] sm:$0xff]  ;;  %v3242_v63 = vld [vmem:[#allocation2 + $0x2f0] sm:$0xff]  ;;  %v3249_v16 = vld [vmem:[#allocation2 + $0x328] sm:$0xff] }
 0x34d   : > { %4743 = vmatmul.mubr.bf16.gmra.mrb[56].mxu0 %v4070_v21  ;;  %v3468_v21 = vadd.f32 %v7449_v58, %v3170_v61  ;;  %v3754_v24 = vmax.f32 %v3498_v53, 0.0  ;;  %v3540_v53 = vadd.f32 %v7449_v58, %v3242_v63 }
 0x34e   : > { %4904 = vmatmul.mubr.bf16.gmra.mrb[56].mxu1 %v4072_v18  ;;  %4750 = vmatprep.mubr.bf16.mxu0 %v4079_v31  ;;  %v3483_v18 = vadd.f32 %v7443_v19, %v3185_v10 }
 0x34f   : > { %4911 = vmatprep.mubr.bf16.mxu1 %v4081_v32  ;;  %v3724_v31 = vmax.f32 %v3468_v21, 0.0  ;;  %v3732_v32 = vmax.f32 %v3476_v22, 0.0  ;;  %v3517_v21 = vadd.f32 %v7445_v40, %v3219_v29  ;;  %v3525_v22 = vadd.f32 %v7445_v40, %v3227_v33 }
 0x350   : > { %v3739_v36 = vmax.f32 %v3483_v18, 0.0  ;;  %v3538_v33 = vadd.f32 %v7447_v47, %v3240_v60  ;;  %v3289_v60 = vld [vmem:[#allocation2 + $0x468] sm:$0xff] }
 0x351   : > { %v3972_v50 = vpack.c.bf16 %v3732_v32, %v3724_v31  ;;  %v3779_v32 = vmax.f32 %v3523_v2, 0.0  ;;  %v3773_v34 = vmax.f32 %v3517_v21, 0.0  ;;  %v3781_v35 = vmax.f32 %v3525_v22, 0.0 }
 0x352   : > { %v3979_v51 = vpack.c.bf16 %v3747_v13, %v3739_v36  ;;  %v3218_v36 = vld [vmem:[#allocation2 + $0x230] sm:$0xff]  ;;  %v3794_v22 = vmax.f32 %v3538_v33, 0.0  ;;  %v3587_v33 = vadd.f32 %v7443_v19, %v3289_v60 }
 0x353   : > { %v3226_v13 = vld [vmem:[#allocation2 + $0x270] sm:$0xff]  ;;  %v3516_v42 = vadd.f32 %v7449_v58, %v3218_v36  ;;  %v3997_v46 = vpack.c.bf16 %v3781_v35, %v3773_v34  ;;  %v3265_v34 = vld [vmem:[#allocation2 + $0x3a8] sm:$0xff] }
 0x355   : > { %4751 = vmatmul.mubr.bf16.gmra.mrb[60].mxu0 %v4078_v54  ;;  %v3499_v54 = vadd.f32 %v7443_v19, %v3201_v39  ;;  %v3235_v39 = vld [vmem:[#allocation2 + $0x2b8] sm:$0xff] }
 0x356   : > { %4912 = vmatmul.mubr.bf16.gmra.mrb[60].mxu1 %v4080_v55  ;;  %4952 = vmatprep.mubr.bf16.mxu0 %v3963_v56  ;;  %v3507_v55 = vadd.f32 %v7443_v19, %v3209_v14  ;;  %v3501_v56 = vadd.f32 %v7445_v40, %v3203_v43  ;;  %v3524_v14 = vadd.f32 %v7449_v58, %v3226_v13  ;;  %v3273_v13 = vld [vmem:[#allocation2 + $0x3e8] sm:$0xff] }
 0x357   : > { %5113 = vmatprep.mubr.bf16.mxu1 %v3965_v57  ;;  %v3509_v57 = vadd.f32 %v7445_v40, %v3211_v44  ;;  %v3755_v61 = vmax.f32 %v3499_v54, 0.0  ;;  %v3986_v43 = vpack.c.bf16 %v3762_v25, %v3754_v24  ;;  %v3770_v54 = vmax.f32 %v3514_v4, 0.0  ;;  %v3248_v24 = vld [vmem:[#allocation2 + $0x320] sm:$0xff]  ;;  %v3275_v4 = vld [vmem:[#allocation2 + $0x3f8] sm:$0xff] }
 0x358   : > { %v3763_v11 = vmax.f32 %v3507_v55, 0.0  ;;  %v3757_v10 = vmax.f32 %v3501_v56, 0.0  ;;  %v3778_v55 = vmax.f32 %v3522_v38, 0.0  ;;  %v3772_v56 = vmax.f32 %v3516_v42, 0.0  ;;  %v3256_v25 = vld [vmem:[#allocation2 + $0x360] sm:$0xff] }
 0x359   : > { %v3765_v15 = vmax.f32 %v3509_v57, 0.0  ;;  %v3780_v57 = vmax.f32 %v3524_v14, 0.0  ;;  %v3546_v35 = vadd.f32 %v7447_v47, %v3248_v24  ;;  %v3554_v36 = vadd.f32 %v7447_v47, %v3256_v25 }
 0x35a   : > { %v3987_v18 = vpack.c.bf16 %v3763_v11, %v3755_v61  ;;  %v3251_v61 = vld [vmem:[#allocation2 + $0x338] sm:$0xff] }
 0x35b   : > { %v3989_v23 = vpack.c.bf16 %v3765_v15, %v3757_v10  ;;  %v3259_v11 = vld [vmem:[#allocation2 + $0x378] sm:$0xff]  ;;  %v3994_v10 = vpack.c.bf16 %v3778_v55, %v3770_v54  ;;  %v3530_v15 = vadd.f32 %v7447_v47, %v3232_v59  ;;  %v3996_v29 = vpack.c.bf16 %v3780_v57, %v3772_v56  ;;  %v3264_v54 = vld [vmem:[#allocation2 + $0x3a0] sm:$0xff]  ;;  %v3266_v56 = vld [vmem:[#allocation2 + $0x3b0] sm:$0xff] }
 0x35c   : > { %v3272_v55 = vld [vmem:[#allocation2 + $0x3e0] sm:$0xff]  ;;  %v3274_v57 = vld [vmem:[#allocation2 + $0x3f0] sm:$0xff]  ;;  %v3281_v59 = vld [vmem:[#allocation2 + $0x428] sm:$0xff] }
 0x35d   : > { %4953 = vmatmul.mubr.bf16.vlgmr.msra.gmra.mrb[64].mxu0 %v3962_v5  ;;  %v3500_v5 = vadd.f32 %v7449_v58, %v3202_v3  ;;  %v3786_v21 = vmax.f32 %v3530_v15, 0.0  ;;  %v3572_v15 = vadd.f32 %v7449_v58, %v3274_v57 }
 0x35e   : > { %5114 = vmatmul.mubr.bf16.vlgmr.msra.gmra.mrb[64].mxu1 %v3964_v20  ;;  %4960 = vmatprep.mubr.bf16.mxu0 %v3971_v26  ;;  %v3515_v20 = vadd.f32 %v7443_v19, %v3217_v7 }
 0x35f   : > { %5121 = vmatprep.mubr.bf16.mxu1 %v3973_v27  ;;  %v3756_v26 = vmax.f32 %v3500_v5, 0.0  ;;  %v3764_v27 = vmax.f32 %v3508_v9, 0.0  ;;  %v3549_v5 = vadd.f32 %v7445_v40, %v3251_v61  ;;  %v3557_v9 = vadd.f32 %v7445_v40, %v3259_v11 }
 0x360   : > { %v3771_v31 = vmax.f32 %v3515_v20, 0.0  ;;  %v3570_v11 = vadd.f32 %v7447_v47, %v3272_v55  ;;  %v3321_v55 = vld [vmem:[#allocation2 + $0x568] sm:$0xff] }
 0x361   : > { %v3988_v44 = vpack.c.bf16 %v3764_v27, %v3756_v26  ;;  %v3811_v27 = vmax.f32 %v3555_v0, 0.0  ;;  %v3805_v28 = vmax.f32 %v3549_v5, 0.0  ;;  %v3813_v30 = vmax.f32 %v3557_v9, 0.0 }
 0x362   : > { %v3995_v45 = vpack.c.bf16 %v3779_v32, %v3771_v31  ;;  %v3250_v31 = vld [vmem:[#allocation2 + $0x330] sm:$0xff]  ;;  %v3826_v9 = vmax.f32 %v3570_v11, 0.0  ;;  %v3619_v11 = vadd.f32 %v7443_v19, %v3321_v55 }
 0x363   : > { %v3258_v32 = vld [vmem:[#allocation2 + $0x370] sm:$0xff]  ;;  %v3548_v38 = vadd.f32 %v7449_v58, %v3250_v31  ;;  %v4013_v14 = vpack.c.bf16 %v3813_v30, %v3805_v28  ;;  %v3297_v28 = vld [vmem:[#allocation2 + $0x4a8] sm:$0xff] }
 0x365   : > { %4961 = vmatmul.mubr.bf16.gmra.mrb[68].mxu0 %v3970_v48  ;;  %v3531_v48 = vadd.f32 %v7443_v19, %v3233_v37  ;;  %v3267_v37 = vld [vmem:[#allocation2 + $0x3b8] sm:$0xff] }
 0x366   : > { %5122 = vmatmul.mubr.bf16.gmra.mrb[68].mxu1 %v3972_v50  ;;  %4968 = vmatprep.mubr.bf16.mxu0 %v3979_v51  ;;  %v3539_v50 = vadd.f32 %v7443_v19, %v3241_v6  ;;  %v3533_v51 = vadd.f32 %v7445_v40, %v3235_v39  ;;  %v3556_v6 = vadd.f32 %v7449_v58, %v3258_v32  ;;  %v3305_v32 = vld [vmem:[#allocation2 + $0x4e8] sm:$0xff] }
 0x367   : > { %5129 = vmatprep.mubr.bf16.mxu1 %v3981_v52  ;;  %v3541_v52 = vadd.f32 %v7445_v40, %v3243_v41  ;;  %v3787_v3 = vmax.f32 %v3531_v48, 0.0  ;;  %v4002_v39 = vpack.c.bf16 %v3794_v22, %v3786_v21  ;;  %v3802_v48 = vmax.f32 %v3546_v35, 0.0  ;;  %v3280_v21 = vld [vmem:[#allocation2 + $0x420] sm:$0xff]  ;;  %v3307_v35 = vld [vmem:[#allocation2 + $0x4f8] sm:$0xff] }
 0x368   : > { %v3795_v17 = vmax.f32 %v3539_v50, 0.0  ;;  %v3789_v7 = vmax.f32 %v3533_v51, 0.0  ;;  %v3810_v50 = vmax.f32 %v3554_v36, 0.0  ;;  %v3804_v51 = vmax.f32 %v3548_v38, 0.0  ;;  %v3288_v22 = vld [vmem:[#allocation2 + $0x460] sm:$0xff] }
 0x369   : > { %v3797_v8 = vmax.f32 %v3541_v52, 0.0  ;;  %v3812_v52 = vmax.f32 %v3556_v6, 0.0  ;;  %v3578_v30 = vadd.f32 %v7447_v47, %v3280_v21  ;;  %v3586_v31 = vadd.f32 %v7447_v47, %v3288_v22  ;;  %v3312_v21 = vld [vmem:[#allocation2 + $0x520] sm:$0xff] }
 0x36a   : > { %v4003_v20 = vpack.c.bf16 %v3795_v17, %v3787_v3  ;;  %v3283_v3 = vld [vmem:[#allocation2 + $0x438] sm:$0xff]  ;;  %v3320_v22 = vld [vmem:[#allocation2 + $0x560] sm:$0xff] }
 0x36b   : > { %v4005_v2 = vpack.c.bf16 %v3797_v8, %v3789_v7  ;;  %v3291_v17 = vld [vmem:[#allocation2 + $0x478] sm:$0xff]  ;;  %v4010_v7 = vpack.c.bf16 %v3810_v50, %v3802_v48  ;;  %v3562_v8 = vadd.f32 %v7447_v47, %v3264_v54  ;;  %v4012_v61 = vpack.c.bf16 %v3812_v52, %v3804_v51  ;;  %v3296_v48 = vld [vmem:[#allocation2 + $0x4a0] sm:$0xff]  ;;  %v3298_v51 = vld [vmem:[#allocation2 + $0x4b0] sm:$0xff] }
 0x36c   : > { %v3304_v50 = vld [vmem:[#allocation2 + $0x4e0] sm:$0xff]  ;;  %v3306_v52 = vld [vmem:[#allocation2 + $0x4f0] sm:$0xff]  ;;  %v3313_v54 = vld [vmem:[#allocation2 + $0x528] sm:$0xff] }
 0x36d   : > { %4969 = vmatmul.mubr.bf16.gmra.mrb[72].mxu0 %v3978_v49  ;;  %v3532_v49 = vadd.f32 %v7449_v58, %v3234_v62  ;;  %v3818_v5 = vmax.f32 %v3562_v8, 0.0  ;;  %v3604_v8 = vadd.f32 %v7449_v58, %v3306_v52 }
 0x36e   : > { %5130 = vmatmul.mubr.bf16.gmra.mrb[72].mxu1 %v3980_v12  ;;  %4976 = vmatprep.mubr.bf16.mxu0 %v3987_v18  ;;  %v3547_v12 = vadd.f32 %v7443_v19, %v3249_v16 }
 0x36f   : > { %5137 = vmatprep.mubr.bf16.mxu1 %v3989_v23  ;;  %v3788_v18 = vmax.f32 %v3532_v49, 0.0  ;;  %v3796_v23 = vmax.f32 %v3540_v53, 0.0  ;;  %v3581_v49 = vadd.f32 %v7445_v40, %v3283_v3  ;;  %v3589_v53 = vadd.f32 %v7445_v40, %v3291_v17 }
 0x370   : > { %v3803_v26 = vmax.f32 %v3547_v12, 0.0  ;;  %v3602_v17 = vadd.f32 %v7447_v47, %v3304_v50  ;;  %v3353_v50 = vld [vmem:[#allocation2 + $0x668] sm:$0xff] }
 0x371   : > { %v4004_v41 = vpack.c.bf16 %v3796_v23, %v3788_v18  ;;  %v3843_v23 = vmax.f32 %v3587_v33, 0.0  ;;  %v3837_v24 = vmax.f32 %v3581_v49, 0.0  ;;  %v3845_v25 = vmax.f32 %v3589_v53, 0.0 }
 0x372   : > { %v4011_v42 = vpack.c.bf16 %v3811_v27, %v3803_v26  ;;  %v3282_v26 = vld [vmem:[#allocation2 + $0x430] sm:$0xff]  ;;  %v3858_v53 = vmax.f32 %v3602_v17, 0.0 }
 0x373   : > { %v3290_v27 = vld [vmem:[#allocation2 + $0x470] sm:$0xff]  ;;  %v3580_v36 = vadd.f32 %v7449_v58, %v3282_v26  ;;  %v4029_v6 = vpack.c.bf16 %v3845_v25, %v3837_v24  ;;  %v3329_v24 = vld [vmem:[#allocation2 + $0x5a8] sm:$0xff]  ;;  %v3331_v26 = vld [vmem:[#allocation2 + $0x5b8] sm:$0xff] }
 0x374   : > { %v3337_v25 = vld [vmem:[#allocation2 + $0x5e8] sm:$0xff] }
 0x375   : > { %4977 = vmatmul.mubr.bf16.gmra.mrb[76].mxu0 %v3986_v43  ;;  %v3563_v43 = vadd.f32 %v7443_v19, %v3265_v34  ;;  %v3299_v34 = vld [vmem:[#allocation2 + $0x4b8] sm:$0xff] }
 0x376   : > { %5138 = vmatmul.mubr.bf16.gmra.mrb[76].mxu1 %v3988_v44  ;;  %4984 = vmatprep.mubr.bf16.mxu0 %v3995_v45  ;;  %v3571_v44 = vadd.f32 %v7443_v19, %v3273_v13  ;;  %v3565_v45 = vadd.f32 %v7445_v40, %v3267_v37  ;;  %v3588_v13 = vadd.f32 %v7449_v58, %v3290_v27  ;;  %v3339_v27 = vld [vmem:[#allocation2 + $0x5f8] sm:$0xff] }
 0x377   : > { %5145 = vmatprep.mubr.bf16.mxu1 %v3997_v46  ;;  %v3573_v46 = vadd.f32 %v7445_v40, %v3275_v4  ;;  %v3819_v62 = vmax.f32 %v3563_v43, 0.0  ;;  %v4018_v37 = vpack.c.bf16 %v3826_v9, %v3818_v5  ;;  %v3834_v43 = vmax.f32 %v3578_v30, 0.0 }
 0x378   : > { %v3827_v63 = vmax.f32 %v3571_v44, 0.0  ;;  %v3821_v16 = vmax.f32 %v3565_v45, 0.0  ;;  %v3842_v44 = vmax.f32 %v3586_v31, 0.0  ;;  %v3836_v45 = vmax.f32 %v3580_v36, 0.0 }
 0x379   : > { %v3829_v1 = vmax.f32 %v3573_v46, 0.0  ;;  %v3844_v46 = vmax.f32 %v3588_v13, 0.0  ;;  %v3875_v9 = vmax.f32 %v3619_v11, 0.0  ;;  %v3610_v31 = vadd.f32 %v7447_v47, %v3312_v21  ;;  %v3361_v21 = vld [vmem:[#allocation2 + $0x6a8] sm:$0xff] }
 0x37a   : > { %v4019_v12 = vpack.c.bf16 %v3827_v63, %v3819_v62  ;;  %v3315_v62 = vld [vmem:[#allocation2 + $0x538] sm:$0xff] }
 0x37b   : > { %v4021_v0 = vpack.c.bf16 %v3829_v1, %v3821_v16  ;;  %v3323_v63 = vld [vmem:[#allocation2 + $0x578] sm:$0xff]  ;;  %v4026_v16 = vpack.c.bf16 %v3842_v44, %v3834_v43  ;;  %v3594_v1 = vadd.f32 %v7447_v47, %v3296_v48  ;;  %v4028_v3 = vpack.c.bf16 %v3844_v46, %v3836_v45  ;;  %v3345_v48 = vld [vmem:[#allocation2 + $0x628] sm:$0xff] }
 0x37c   : > { %v3866_v43 = vmax.f32 %v3610_v31, 0.0 }
 0x37d   : > { %4985 = vmatmul.mubr.bf16.gmra.mrb[80].mxu0 %v3994_v10  ;;  %v3564_v10 = vadd.f32 %v7449_v58, %v3266_v56  ;;  %v3850_v49 = vmax.f32 %v3594_v1, 0.0  ;;  %v3651_v1 = vadd.f32 %v7443_v19, %v3353_v50 }
 0x37e   : > { %5146 = vmatmul.mubr.bf16.gmra.mrb[80].mxu1 %v3996_v29  ;;  %4992 = vmatprep.mubr.bf16.mxu0 %v4003_v20  ;;  %v3579_v29 = vadd.f32 %v7443_v19, %v3281_v59 }
 0x37f   : > { %5153 = vmatprep.mubr.bf16.mxu1 %v4005_v2  ;;  %v3820_v20 = vmax.f32 %v3564_v10, 0.0  ;;  %v3828_v2 = vmax.f32 %v3572_v15, 0.0  ;;  %v3613_v10 = vadd.f32 %v7445_v40, %v3315_v62  ;;  %v3621_v15 = vadd.f32 %v7445_v40, %v3323_v63 }
 0x380   : > { %v3835_v18 = vmax.f32 %v3579_v29, 0.0 }
 0x381   : > { %v4020_v4 = vpack.c.bf16 %v3828_v2, %v3820_v20  ;;  %v3869_v20 = vmax.f32 %v3613_v10, 0.0  ;;  %v3877_v2 = vmax.f32 %v3621_v15, 0.0 }
 0x382   : > { %v4027_v38 = vpack.c.bf16 %v3843_v23, %v3835_v18  ;;  %v3314_v18 = vld [vmem:[#allocation2 + $0x530] sm:$0xff] }
 0x383   : > { %v3322_v23 = vld [vmem:[#allocation2 + $0x570] sm:$0xff]  ;;  %v3612_v36 = vadd.f32 %v7449_v58, %v3314_v18 }
 0x384   : > { %v3620_v13 = vadd.f32 %v7449_v58, %v3322_v23 }
 0x385   : > { %4993 = vmatmul.mubr.bf16.gmra.mrb[84].mxu0 %v4002_v39  ;;  %v3595_v39 = vadd.f32 %v7443_v19, %v3297_v28  ;;  %v4034_v28 = vpack.c.bf16 %v3858_v53, %v3850_v49  ;;  %v3868_v45 = vmax.f32 %v3612_v36, 0.0  ;;  %v3907_v53 = vmax.f32 %v3651_v1, 0.0 }
 0x386   : > { %5154 = vmatmul.mubr.bf16.gmra.mrb[84].mxu1 %v4004_v41  ;;  %5000 = vmatprep.mubr.bf16.mxu0 %v4011_v42  ;;  %v3603_v41 = vadd.f32 %v7443_v19, %v3305_v32  ;;  %v3597_v42 = vadd.f32 %v7445_v40, %v3299_v34  ;;  %v3618_v32 = vadd.f32 %v7447_v47, %v3320_v22  ;;  %v3876_v46 = vmax.f32 %v3620_v13, 0.0  ;;  %v3369_v22 = vld [vmem:[#allocation2 + $0x6e8] sm:$0xff] }
 0x387   : > { %5161 = vmatprep.mubr.bf16.mxu1 %v4013_v14  ;;  %v3605_v14 = vadd.f32 %v7445_v40, %v3307_v35  ;;  %v3851_v56 = vmax.f32 %v3595_v39, 0.0  ;;  %v4045_v35 = vpack.c.bf16 %v3877_v2, %v3869_v20  ;;  %v3328_v39 = vld [vmem:[#allocation2 + $0x5a0] sm:$0xff]  ;;  %v3346_v20 = vld [vmem:[#allocation2 + $0x630] sm:$0xff] }
 0x388   : > { %v3859_v57 = vmax.f32 %v3603_v41, 0.0  ;;  %v3853_v59 = vmax.f32 %v3597_v42, 0.0  ;;  %v3336_v41 = vld [vmem:[#allocation2 + $0x5e0] sm:$0xff]  ;;  %v3330_v42 = vld [vmem:[#allocation2 + $0x5b0] sm:$0xff]  ;;  %v3874_v44 = vmax.f32 %v3618_v32, 0.0  ;;  %v4044_v17 = vpack.c.bf16 %v3876_v46, %v3868_v45 }
 0x389   : > { %v3861_v60 = vmax.f32 %v3605_v14, 0.0  ;;  %v3338_v14 = vld [vmem:[#allocation2 + $0x5f0] sm:$0xff]  ;;  %v3628_v62 = vadd.f32 %v7449_v58, %v3330_v42  ;;  %v3644_v32 = vadd.f32 %v7449_v58, %v3346_v20  ;;  %v3360_v46 = vld [vmem:[#allocation2 + $0x6a0] sm:$0xff] }
 0x38a   : > { %v4035_v29 = vpack.c.bf16 %v3859_v57, %v3851_v56  ;;  %v3347_v56 = vld [vmem:[#allocation2 + $0x638] sm:$0xff]  ;;  %v3636_v63 = vadd.f32 %v7449_v58, %v3338_v14  ;;  %v3354_v2 = vld [vmem:[#allocation2 + $0x670] sm:$0xff] }
 0x38b   : > { %v4037_v33 = vpack.c.bf16 %v3861_v60, %v3853_v59  ;;  %v3355_v57 = vld [vmem:[#allocation2 + $0x678] sm:$0xff]  ;;  %v3626_v59 = vadd.f32 %v7447_v47, %v3328_v39  ;;  %v3634_v60 = vadd.f32 %v7447_v47, %v3336_v41  ;;  %v3652_v13 = vadd.f32 %v7449_v58, %v3354_v2 }
 0x38d   : > { %5001 = vmatmul.mubr.bf16.gmra.mrb[88].mxu0 %v4010_v7  ;;  %v3596_v7 = vadd.f32 %v7449_v58, %v3298_v51  ;;  %v3882_v10 = vmax.f32 %v3626_v59, 0.0  ;;  %v3890_v15 = vmax.f32 %v3634_v60, 0.0  ;;  %v3900_v59 = vmax.f32 %v3644_v32, 0.0 }
 0x38e   : > { %5162 = vmatmul.mubr.bf16.gmra.mrb[88].mxu1 %v4012_v61  ;;  %5008 = vmatprep.mubr.bf16.mxu0 %v4019_v12  ;;  %v3611_v61 = vadd.f32 %v7443_v19, %v3313_v54  ;;  %v3908_v60 = vmax.f32 %v3652_v13, 0.0 }
 0x38f   : > { %5169 = vmatprep.mubr.bf16.mxu1 %v4021_v0  ;;  %v3852_v12 = vmax.f32 %v3596_v7, 0.0  ;;  %v3860_v0 = vmax.f32 %v3604_v8, 0.0  ;;  %v3645_v7 = vadd.f32 %v7445_v40, %v3347_v56  ;;  %v3653_v8 = vadd.f32 %v7445_v40, %v3355_v57  ;;  %v3370_v56 = vld [vmem:[#allocation2 + $0x6f0] sm:$0xff]  ;;  %v3377_v57 = vld [vmem:[#allocation2 + $0x728] sm:$0xff] }
 0x390   : > { %v3867_v5 = vmax.f32 %v3611_v61, 0.0  ;;  %v4050_v18 = vpack.c.bf16 %v3890_v15, %v3882_v10  ;;  %v3668_v15 = vadd.f32 %v7449_v58, %v3370_v56 }
 0x391   : > { %v4036_v30 = vpack.c.bf16 %v3860_v0, %v3852_v12  ;;  %v3344_v12 = vld [vmem:[#allocation2 + $0x620] sm:$0xff]  ;;  %v3901_v0 = vmax.f32 %v3645_v7, 0.0  ;;  %v3658_v7 = vadd.f32 %v7447_v47, %v3360_v46 }
 0x392   : > { %v4043_v34 = vpack.c.bf16 %v3875_v9, %v3867_v5  ;;  %v3909_v5 = vmax.f32 %v3653_v8, 0.0  ;;  %v3352_v9 = vld [vmem:[#allocation2 + $0x660] sm:$0xff]  ;;  %v3642_v23 = vadd.f32 %v7447_v47, %v3344_v12  ;;  %v3379_v8 = vld [vmem:[#allocation2 + $0x738] sm:$0xff]  ;;  %v3924_v32 = vmax.f32 %v3668_v15, 0.0 }
 0x393   : > { %v3650_v31 = vadd.f32 %v7447_v47, %v3352_v9  ;;  %v4060_v9 = vpack.c.bf16 %v3908_v60, %v3900_v59  ;;  %v3677_v2 = vadd.f32 %v7445_v40, %v3379_v8 }
 0x394   : > { %v4061_v36 = vpack.c.bf16 %v3909_v5, %v3901_v0  ;;  %v3898_v45 = vmax.f32 %v3642_v23, 0.0 }
 0x395   : > { %5009 = vmatmul.mubr.bf16.gmra.mrb[92].mxu0 %v4018_v37  ;;  %v3627_v37 = vadd.f32 %v7443_v19, %v3329_v24  ;;  %v3363_v24 = vld [vmem:[#allocation2 + $0x6b8] sm:$0xff] }
 0x396   : > { %5170 = vmatmul.mubr.bf16.gmra.mrb[92].mxu1 %v4020_v4  ;;  %5016 = vmatprep.mubr.bf16.mxu0 %v4027_v38  ;;  %v3635_v4 = vadd.f32 %v7443_v19, %v3337_v25  ;;  %v3629_v38 = vadd.f32 %v7445_v40, %v3331_v26  ;;  %v3371_v25 = vld [vmem:[#allocation2 + $0x6f8] sm:$0xff]  ;;  %v3661_v42 = vadd.f32 %v7445_v40, %v3363_v24 }
 0x397   : > { %5177 = vmatprep.mubr.bf16.mxu1 %v4029_v6  ;;  %v3637_v6 = vadd.f32 %v7445_v40, %v3339_v27  ;;  %v3883_v51 = vmax.f32 %v3627_v37, 0.0  ;;  %v3659_v37 = vadd.f32 %v7443_v19, %v3361_v21  ;;  %v3669_v14 = vadd.f32 %v7445_v40, %v3371_v25 }
 0x398   : > { %v3891_v52 = vmax.f32 %v3635_v4, 0.0  ;;  %v3885_v54 = vmax.f32 %v3629_v38, 0.0  ;;  %v3667_v4 = vadd.f32 %v7443_v19, %v3369_v22 }
 0x399   : > { %v3893_v55 = vmax.f32 %v3637_v6, 0.0 }
 0x39a   : > { %v4051_v61 = vpack.c.bf16 %v3891_v52, %v3883_v51 }
 0x39b   : > { %v4053_v11 = vpack.c.bf16 %v3893_v55, %v3885_v54  ;;  %v3906_v54 = vmax.f32 %v3650_v31, 0.0  ;;  %v3362_v55 = vld [vmem:[#allocation2 + $0x6b0] sm:$0xff] }
 0x39c   : > { %v3660_v10 = vadd.f32 %v7449_v58, %v3362_v55 }
 0x39d   : > { %5017 = vmatmul.mubr.bf16.gmra.mrb[96].mxu0 %v4026_v16  ;;  %v3643_v16 = vadd.f32 %v7443_v19, %v3345_v48  ;;  %v3368_v48 = vld [vmem:[#allocation2 + $0x6e0] sm:$0xff] }
 0x39e   : > { %5178 = vmatmul.mubr.bf16.gmra.mrb[96].mxu1 %v4028_v3  ;;  %5024 = vmatprep.mubr.bf16.mxu0 %v4035_v29  ;;  %v4042_v3 = vpack.c.bf16 %v3874_v44, %v3866_v43  ;;  %v3884_v29 = vmax.f32 %v3628_v62, 0.0  ;;  %v3915_v62 = vmax.f32 %v3659_v37, 0.0  ;;  %v3916_v31 = vmax.f32 %v3660_v10, 0.0 }
 0x39f   : > { %5185 = vmatprep.mubr.bf16.mxu1 %v4037_v33  ;;  %v3892_v33 = vmax.f32 %v3636_v63, 0.0  ;;  %v3899_v49 = vmax.f32 %v3643_v16, 0.0  ;;  %v3923_v63 = vmax.f32 %v3667_v4, 0.0  ;;  %v3385_v16 = vld [vmem:[#allocation2 + $0x768] sm:$0xff]  ;;  %v3376_v4 = vld [vmem:[#allocation2 + $0x720] sm:$0xff] }
 0x3a0   : > { %v3683_v12 = vadd.f32 %v7443_v19, %v3385_v16  ;;  %v3674_v46 = vadd.f32 %v7447_v47, %v3376_v4  ;;  %v4068_v55 = vpack.c.bf16 %v3924_v32, %v3916_v31 }
 0x3a1   : > { %v4067_v20 = vpack.c.bf16 %v3923_v63, %v3915_v62 }
 0x3a2   : > { %v3939_v37 = vmax.f32 %v3683_v12, 0.0 }
 0x3a5   : > { %5025 = vmatmul.mubr.bf16.gmra.mrb[100].mxu0 %v4034_v28  ;;  %v4052_v28 = vpack.c.bf16 %v3892_v33, %v3884_v29  ;;  %v3675_v29 = vadd.f32 %v7443_v19, %v3377_v57 }
 0x3a6   : > { %5186 = vmatmul.mubr.bf16.gmra.mrb[100].mxu1 %v4036_v30  ;;  %5032 = vmatprep.mubr.bf16.mxu0 %v4043_v34  ;;  %v4059_v30 = vpack.c.bf16 %v3907_v53, %v3899_v49  ;;  %v4058_v53 = vpack.c.bf16 %v3906_v54, %v3898_v45 }
 0x3a7   : > { %5193 = vmatprep.mubr.bf16.mxu1 %v4045_v35 }
 0x3ad   : > { %5033 = vmatmul.mubr.bf16.gmra.mrb[104].mxu0 %v4042_v3  ;;  %v3917_v3 = vmax.f32 %v3661_v42, 0.0 }
 0x3ae   : > { %5194 = vmatmul.mubr.bf16.gmra.mrb[104].mxu1 %v4044_v17  ;;  %5040 = vmatprep.mubr.bf16.mxu0 %v4051_v61  ;;  %v3925_v17 = vmax.f32 %v3669_v14, 0.0  ;;  %v3387_v61 = vld [vmem:[#allocation2 + $0x778] sm:$0xff]  ;;  %v3386_v14 = vld [vmem:[#allocation2 + $0x770] sm:$0xff] }
 0x3af   : > { %5201 = vmatprep.mubr.bf16.mxu1 %v4053_v11  ;;  %v3666_v11 = vadd.f32 %v7447_v47, %v3368_v48  ;;  %v3685_v21 = vadd.f32 %v7445_v40, %v3387_v61  ;;  %v3395_v48 = vld [vmem:[#allocation2 + $0x7b8] sm:$0xff]  ;;  %v3684_v16 = vadd.f32 %v7449_v58, %v3386_v14 }
 0x3b0   : > { %v5902_v26 = vpop.f32.mrb[0].mxu0  ;;  %v4069_v25 = vpack.c.bf16 %v3925_v17, %v3917_v3  ;;  %v3693_v10 = vadd.f32 %v7445_v40, %v3395_v48 }
 0x3b1   : > { %v6014_v27 = vpop.f32.mrb[0].mxu1  ;;  %v5903_v34 = vpop.f32.mrb[1].mxu0 }
 0x3b2   : > { %v6015_v35 = vpop.f32.mrb[1].mxu1  ;;  %v5904_v38 = vadd.f32 %v5903_v34, %v5902_v26  ;;  %v5905_v39 = vpop.f32.mrb[2].mxu0  ;;  %v3914_v26 = vmax.f32 %v3658_v7, 0.0  ;;  %v3931_v34 = vmax.f32 %v3675_v29, 0.0 }
 0x3b3   : > { %v6016_v6 = vadd.f32 %v6015_v35, %v6014_v27  ;;  %v6017_v41 = vpop.f32.mrb[2].mxu1  ;;  %v5906_v43 = vpop.f32.mrb[3].mxu0 }
 0x3b4   : > { %v6018_v44 = vpop.f32.mrb[3].mxu1  ;;  %v5907_v51 = vadd.f32 %v5906_v43, %v5905_v39  ;;  %v3384_v39 = vld [vmem:[#allocation2 + $0x760] sm:$0xff]  ;;  %v3393_v43 = vld [vmem:[#allocation2 + $0x7a8] sm:$0xff]  ;;  %v4075_v56 = vpack.c.bf16 %v3939_v37, %v3931_v34 }
 0x3b5   : > { %v7783_v50 = vadd.f32 %v6016_v6, %v5904_v38  ;;  %v6019_v52 = vadd.f32 %v6018_v44, %v6017_v41  ;;  %5041 = vmatmul.mubr.bf16.gmra.mrb[108].mxu0 %v4050_v18  ;;  %v3933_v38 = vmax.f32 %v3677_v2, 0.0  ;;  %v3941_v6 = vmax.f32 %v3685_v21, 0.0  ;;  %v3378_v41 = vld [vmem:[#allocation2 + $0x730] sm:$0xff]  ;;  %v3401_v44 = vld [vmem:[#allocation2 + $0x7e8] sm:$0xff]  ;;  %v3392_v2 = vld [vmem:[#allocation2 + $0x7a0] sm:$0xff] }
 0x3b6   : > { %5202 = vmatmul.mubr.bf16.gmra.mrb[108].mxu1 %v4052_v28  ;;  %5048 = vmatprep.mubr.bf16.mxu0 %v4059_v30  ;;  %v3922_v30 = vmax.f32 %v3666_v11, 0.0  ;;  %v3682_v57 = vadd.f32 %v7447_v47, %v3384_v39  ;;  %v3676_v59 = vadd.f32 %v7449_v58, %v3378_v41  ;;  %v3691_v3 = vadd.f32 %v7443_v19, %v3393_v43 }
 0x3b7   : > { %v7785_v1 = vadd.f32 %v6019_v52, %v5907_v51  ;;  %5209 = vmatprep.mubr.bf16.mxu1 %v4061_v36  ;;  %v3403_v51 = vld [vmem:[#allocation2 + $0x7f8] sm:$0xff]  ;;  %v4077_v63 = vpack.c.bf16 %v3941_v6, %v3933_v38  ;;  %v3699_v17 = vadd.f32 %v7443_v19, %v3401_v44  ;;  %v3940_v19 = vmax.f32 %v3684_v16, 0.0 }
 0x3b8   : > { %v5908_v33 = vpop.f32.mrb[4].mxu0  ;;  %v4066_v45 = vpack.c.bf16 %v3922_v30, %v3914_v26  ;;  %v3701_v15 = vadd.f32 %v7445_v40, %v3403_v51  ;;  %v3949_v40 = vmax.f32 %v3693_v10, 0.0  ;;  %v3690_v30 = vadd.f32 %v7447_v47, %v3392_v2 }
 0x3b9   : > { %v6020_v49 = vpop.f32.mrb[4].mxu1  ;;  %v5909_v0 = vpop.f32.mrb[5].mxu0 }
 0x3ba   : > { %v6021_v5 = vpop.f32.mrb[5].mxu1  ;;  %v5910_v22 = vadd.f32 %v5909_v0, %v5908_v33  ;;  %v5911_v23 = vpop.f32.mrb[6].mxu0  ;;  %v3946_v51 = vmax.f32 %v3690_v30, 0.0 }
 0x3bb   : > { %v6022_v18 = vadd.f32 %v6021_v5, %v6020_v49  ;;  %v6023_v24 = vpop.f32.mrb[6].mxu1  ;;  %v5912_v27 = vpop.f32.mrb[7].mxu0  ;;  %v3930_v49 = vmax.f32 %v3674_v46, 0.0  ;;  %v3938_v5 = vmax.f32 %v3682_v57, 0.0 }
 0x3bc   : > { %v6024_v28 = vpop.f32.mrb[7].mxu1  ;;  %v5913_v36 = vadd.f32 %v5912_v27, %v5911_v23  ;;  %v3400_v23 = vld [vmem:[#allocation2 + $0x7e0] sm:$0xff] }
 0x3bd   : > { %v7795_v35 = vadd.f32 %v6022_v18, %v5910_v22  ;;  %v6025_v13 = vadd.f32 %v6024_v28, %v6023_v24  ;;  %5049 = vmatmul.mubr.bf16.gmra.mrb[112].mxu0 %v4058_v53  ;;  %v3955_v22 = vmax.f32 %v3699_v17, 0.0  ;;  %v3957_v18 = vmax.f32 %v3701_v15, 0.0  ;;  %v3394_v24 = vld [vmem:[#allocation2 + $0x7b0] sm:$0xff] }
 0x3be   : > { %5210 = vmatmul.mubr.bf16.gmra.mrb[112].mxu1 %v4060_v9  ;;  %5056 = vmatprep.mubr.bf16.mxu0 %v4067_v20  ;;  %v3932_v9 = vmax.f32 %v3676_v59, 0.0  ;;  %v3947_v20 = vmax.f32 %v3691_v3, 0.0  ;;  %v4074_v28 = vpack.c.bf16 %v3938_v5, %v3930_v49 }
 0x3bf   : > { %v7797_v42 = vadd.f32 %v6025_v13, %v5913_v36  ;;  %5217 = vmatprep.mubr.bf16.mxu1 %v4069_v25  ;;  %v3402_v25 = vld [vmem:[#allocation2 + $0x7f0] sm:$0xff]  ;;  %v3698_v36 = vadd.f32 %v7447_v47, %v3400_v23  ;;  %v3692_v13 = vadd.f32 %v7449_v58, %v3394_v24  ;;  %v4085_v14 = vpack.c.bf16 %v3957_v18, %v3949_v40 }
 0x3c0   : > { %v5914_v52 = vpop.f32.mrb[8].mxu0  ;;  %v4076_v34 = vpack.c.bf16 %v3940_v19, %v3932_v9  ;;  %v3700_v37 = vadd.f32 %v7449_v58, %v3402_v25  ;;  %v4083_v41 = vpack.c.bf16 %v3955_v22, %v3947_v20 }
 0x3c1   : > { %v6026_v54 = vpop.f32.mrb[8].mxu1  ;;  %v5915_v60 = vpop.f32.mrb[9].mxu0  ;;  %v3954_v47 = vmax.f32 %v3698_v36, 0.0 }
 0x3c2   : > { %v6027_v62 = vpop.f32.mrb[9].mxu1  ;;  %v5916_v7 = vadd.f32 %v5915_v60, %v5914_v52  ;;  %v5917_v61 = vpop.f32.mrb[10].mxu0  ;;  %v3948_v52 = vmax.f32 %v3692_v13, 0.0 }
 0x3c3   : > { %v6028_v8 = vadd.f32 %v6027_v62, %v6026_v54  ;;  %v6029_v11 = vpop.f32.mrb[10].mxu1  ;;  %v5918_v29 = vpop.f32.mrb[11].mxu0  ;;  %v3956_v54 = vmax.f32 %v3700_v37, 0.0  ;;  %v4082_v60 = vpack.c.bf16 %v3954_v47, %v3946_v51 }
 0x3c4   : > { %v6030_v33 = vpop.f32.mrb[11].mxu1  ;;  %v5919_v12 = vadd.f32 %v5918_v29, %v5917_v61 }
 0x3c5   : > { %v7807_v53 = vadd.f32 %v6028_v8, %v5916_v7  ;;  %v6031_v0 = vadd.f32 %v6030_v33, %v6029_v11  ;;  %5057 = vmatmul.mubr.bf16.gmra.mrb[116].mxu0 %v4066_v45  ;;  %v4084_v62 = vpack.c.bf16 %v3956_v54, %v3948_v52 }
 0x3c6   : > { %5218 = vmatmul.mubr.bf16.gmra.mrb[116].mxu1 %v4068_v55  ;;  %5064 = vmatprep.mubr.bf16.mxu0 %v4075_v56 }
 0x3c7   : > { %v7809_v21 = vadd.f32 %v6031_v0, %v5919_v12  ;;  %5225 = vmatprep.mubr.bf16.mxu1 %v4077_v63 }
 0x3c8   : > { %v5920_v26 = vpop.f32.mrb[12].mxu0 }
 0x3c9   : > { %v6032_v27 = vpop.f32.mrb[12].mxu1  ;;  %v5921_v31 = vpop.f32.mrb[13].mxu0 }
 0x3ca   : > { %v6033_v32 = vpop.f32.mrb[13].mxu1  ;;  %v5922_v4 = vadd.f32 %v5921_v31, %v5920_v26  ;;  %v5923_v6 = vpop.f32.mrb[14].mxu0 }
 0x3cb   : > { %v6034_v38 = vadd.f32 %v6033_v32, %v6032_v27  ;;  %v6035_v39 = vpop.f32.mrb[14].mxu1  ;;  %v5924_v43 = vpop.f32.mrb[15].mxu0 }
 0x3cc   : > { %v6036_v44 = vpop.f32.mrb[15].mxu1  ;;  %v5925_v46 = vadd.f32 %v5924_v43, %v5923_v6 }
 0x3cd   : > { %v7815_v45 = vadd.f32 %v6034_v38, %v5922_v4  ;;  %v6037_v48 = vadd.f32 %v6036_v44, %v6035_v39  ;;  %5065 = vmatmul.mubr.bf16.gmra.mrb[120].mxu0 %v4074_v28 }
 0x3ce   : > { %5226 = vmatmul.mubr.bf16.gmra.mrb[120].mxu1 %v4076_v34  ;;  %5072 = vmatprep.mubr.bf16.mxu0 %v4083_v41 }
 0x3cf   : > { %v7817_v55 = vadd.f32 %v6037_v48, %v5925_v46  ;;  %5233 = vmatprep.mubr.bf16.mxu1 %v4085_v14 }
 0x3d0   : > { %v5926_v58 = vpop.f32.mrb[16].mxu0 }
 0x3d1   : > { %v6038_v56 = vpop.f32.mrb[16].mxu1  ;;  %v5927_v57 = vpop.f32.mrb[17].mxu0 }
 0x3d2   : > { %v6039_v59 = vpop.f32.mrb[17].mxu1  ;;  %v5928_v63 = vadd.f32 %v5927_v57, %v5926_v58  ;;  %v5929_v3 = vpop.f32.mrb[18].mxu0 }
 0x3d3   : > { %v6040_v16 = vadd.f32 %v6039_v59, %v6038_v56  ;;  %v6041_v17 = vpop.f32.mrb[18].mxu1  ;;  %v5930_v7 = vpop.f32.mrb[19].mxu0 }
 0x3d4   : > { %v6042_v8 = vpop.f32.mrb[19].mxu1  ;;  %v5931_v11 = vadd.f32 %v5930_v7, %v5929_v3 }
 0x3d5   : > { %v7819_v61 = vadd.f32 %v6040_v16, %v5928_v63  ;;  %v6043_v10 = vadd.f32 %v6042_v8, %v6041_v17  ;;  %5073 = vmatmul.mubr.bf16.gmra.mrb[124].mxu0 %v4082_v60 }
 0x3d6   : > { %5234 = vmatmul.mubr.bf16.gmra.mrb[124].mxu1 %v4084_v62 }
 0x3d7   : > { %v7821_v15 = vadd.f32 %v6043_v10, %v5931_v11 }
 0x3d8   : > { %v5932_v29 = vpop.f32.mrb[20].mxu0 }
 0x3d9   : > { %v6044_v33 = vpop.f32.mrb[20].mxu1  ;;  %v5933_v49 = vpop.f32.mrb[21].mxu0 }
 0x3da   : > { %v6045_v12 = vpop.f32.mrb[21].mxu1  ;;  %v5934_v0 = vadd.f32 %v5933_v49, %v5932_v29  ;;  %v5935_v9 = vpop.f32.mrb[22].mxu0 }
 0x3db   : > { %v6046_v5 = vadd.f32 %v6045_v12, %v6044_v33  ;;  %v6047_v19 = vpop.f32.mrb[22].mxu1  ;;  %v5936_v20 = vpop.f32.mrb[23].mxu0 }
 0x3dc   : > { %v6048_v2 = vpop.f32.mrb[23].mxu1  ;;  %v5937_v40 = vadd.f32 %v5936_v20, %v5935_v9 }
 0x3dd   : > { %v7823_v22 = vadd.f32 %v6046_v5, %v5934_v0  ;;  %v6049_v18 = vadd.f32 %v6048_v2, %v6047_v19 }
 0x3df   : > { %v7825_v23 = vadd.f32 %v6049_v18, %v5937_v40 }
 0x3e0   : > { %v5938_v24 = vpop.f32.mrb[24].mxu0 }
 0x3e1   : > { %v6050_v25 = vpop.f32.mrb[24].mxu1  ;;  %v5939_v26 = vpop.f32.mrb[25].mxu0 }
 0x3e2   : > { %v6051_v27 = vpop.f32.mrb[25].mxu1  ;;  %v5940_v28 = vadd.f32 %v5939_v26, %v5938_v24  ;;  %v5941_v31 = vpop.f32.mrb[26].mxu0 }
 0x3e3   : > { %v6052_v30 = vadd.f32 %v6051_v27, %v6050_v25  ;;  %v6053_v32 = vpop.f32.mrb[26].mxu1  ;;  %v5942_v34 = vpop.f32.mrb[27].mxu0 }
 0x3e4   : > { %v6054_v36 = vpop.f32.mrb[27].mxu1  ;;  %v5943_v37 = vadd.f32 %v5942_v34, %v5941_v31 }
 0x3e5   : > { %v7827_v13 = vadd.f32 %v6052_v30, %v5940_v28  ;;  %v6055_v4 = vadd.f32 %v6054_v36, %v6053_v32 }
 0x3e7   : > { %v7829_v38 = vadd.f32 %v6055_v4, %v5943_v37 }
 0x3e8   : > { %v5944_v6 = vpop.f32.mrb[28].mxu0 }
 0x3e9   : > { %v6056_v39 = vpop.f32.mrb[28].mxu1  ;;  %v5945_v41 = vpop.f32.mrb[29].mxu0 }
 0x3ea   : > { %v6057_v14 = vpop.f32.mrb[29].mxu1  ;;  %v5946_v43 = vadd.f32 %v5945_v41, %v5944_v6  ;;  %v5947_v46 = vpop.f32.mrb[30].mxu0 }
 0x3eb   : > { %v6058_v44 = vadd.f32 %v6057_v14, %v6056_v39  ;;  %v6059_v48 = vpop.f32.mrb[30].mxu1  ;;  %v5948_v51 = vpop.f32.mrb[31].mxu0 }
 0x3ec   : > { %v6060_v47 = vpop.f32.mrb[31].mxu1  ;;  %v5949_v54 = vadd.f32 %v5948_v51, %v5947_v46 }
 0x3ed   : > { %v7831_v52 = vadd.f32 %v6058_v44, %v5946_v43  ;;  %v6061_v58 = vadd.f32 %v6060_v47, %v6059_v48 }
 0x3ef   : > { %v7833_v56 = vadd.f32 %v6061_v58, %v5949_v54 }
 0x3f0   : > { %v5950_v57 = vpop.f32.mrb[32].mxu0 }
 0x3f1   : > { %v6062_v59 = vpop.f32.mrb[32].mxu1  ;;  %v5951_v60 = vpop.f32.mrb[33].mxu0 }
 0x3f2   : > { %v6063_v62 = vpop.f32.mrb[33].mxu1  ;;  %v5952_v63 = vadd.f32 %v5951_v60, %v5950_v57  ;;  %v5953_v3 = vpop.f32.mrb[34].mxu0 }
 0x3f3   : > { %v6064_v16 = vadd.f32 %v6063_v62, %v6062_v59  ;;  %v6065_v17 = vpop.f32.mrb[34].mxu1  ;;  %v5954_v7 = vpop.f32.mrb[35].mxu0 }
 0x3f4   : > { %v6066_v8 = vpop.f32.mrb[35].mxu1  ;;  %v5955_v10 = vadd.f32 %v5954_v7, %v5953_v3 }
 0x3f5   : > { %v7835_v11 = vadd.f32 %v6064_v16, %v5952_v63  ;;  %v6067_v29 = vadd.f32 %v6066_v8, %v6065_v17 }
 0x3f7   : > { %v7837_v33 = vadd.f32 %v6067_v29, %v5955_v10 }
 0x3f8   : > { %v5956_v49 = vpop.f32.mrb[36].mxu0 }
 0x3f9   : > { %v6068_v12 = vpop.f32.mrb[36].mxu1  ;;  %v5957_v0 = vpop.f32.mrb[37].mxu0 }
 0x3fa   : > { %v6069_v5 = vpop.f32.mrb[37].mxu1  ;;  %v5958_v9 = vadd.f32 %v5957_v0, %v5956_v49  ;;  %v5959_v20 = vpop.f32.mrb[38].mxu0 }
 0x3fb   : > { %v6070_v19 = vadd.f32 %v6069_v5, %v6068_v12  ;;  %v6071_v2 = vpop.f32.mrb[38].mxu1  ;;  %v5960_v40 = vpop.f32.mrb[39].mxu0 }
 0x3fc   : > { %v6072_v18 = vpop.f32.mrb[39].mxu1  ;;  %v5961_v25 = vadd.f32 %v5960_v40, %v5959_v20 }
 0x3fd   : > { %v7839_v24 = vadd.f32 %v6070_v19, %v5958_v9  ;;  %v6073_v26 = vadd.f32 %v6072_v18, %v6071_v2 }
 0x3ff   : > { %v7841_v27 = vadd.f32 %v6073_v26, %v5961_v25 }
 0x400   : > { %v5962_v28 = vpop.f32.mrb[40].mxu0 }
 0x401   : > { %v6074_v30 = vpop.f32.mrb[40].mxu1  ;;  %v5963_v31 = vpop.f32.mrb[41].mxu0 }
 0x402   : > { %v6075_v32 = vpop.f32.mrb[41].mxu1  ;;  %v5964_v34 = vadd.f32 %v5963_v31, %v5962_v28  ;;  %v5965_v37 = vpop.f32.mrb[42].mxu0 }
 0x403   : > { %v6076_v36 = vadd.f32 %v6075_v32, %v6074_v30  ;;  %v6077_v4 = vpop.f32.mrb[42].mxu1  ;;  %v5966_v6 = vpop.f32.mrb[43].mxu0 }
 0x404   : > { %v6078_v39 = vpop.f32.mrb[43].mxu1  ;;  %v5967_v14 = vadd.f32 %v5966_v6, %v5965_v37 }
 0x405   : > { %v7843_v41 = vadd.f32 %v6076_v36, %v5964_v34  ;;  %v6079_v43 = vadd.f32 %v6078_v39, %v6077_v4 }
 0x407   : > { %v7845_v44 = vadd.f32 %v6079_v43, %v5967_v14 }
 0x408   : > { %v5968_v46 = vpop.f32.mrb[44].mxu0 }
 0x409   : > { %v6080_v48 = vpop.f32.mrb[44].mxu1  ;;  %v5969_v51 = vpop.f32.mrb[45].mxu0 }
 0x40a   : > { %v6081_v47 = vpop.f32.mrb[45].mxu1  ;;  %v5970_v54 = vadd.f32 %v5969_v51, %v5968_v46  ;;  %v5971_v57 = vpop.f32.mrb[46].mxu0 }
 0x40b   : > { %v6082_v58 = vadd.f32 %v6081_v47, %v6080_v48  ;;  %v6083_v59 = vpop.f32.mrb[46].mxu1  ;;  %v5972_v60 = vpop.f32.mrb[47].mxu0 }
 0x40c   : > { %v6084_v62 = vpop.f32.mrb[47].mxu1  ;;  %v5973_v16 = vadd.f32 %v5972_v60, %v5971_v57 }
 0x40d   : > { %v7847_v63 = vadd.f32 %v6082_v58, %v5970_v54  ;;  %v6085_v3 = vadd.f32 %v6084_v62, %v6083_v59 }
 0x40f   : > { %v7849_v17 = vadd.f32 %v6085_v3, %v5973_v16 }
 0x410   : > { %v5974_v7 = vpop.f32.mrb[48].mxu0 }
 0x411   : > { %v6086_v8 = vpop.f32.mrb[48].mxu1  ;;  %v5975_v10 = vpop.f32.mrb[49].mxu0 }
 0x412   : > { %v6087_v29 = vpop.f32.mrb[49].mxu1  ;;  %v5976_v49 = vadd.f32 %v5975_v10, %v5974_v7  ;;  %v5977_v0 = vpop.f32.mrb[50].mxu0 }
 0x413   : > { %v6088_v12 = vadd.f32 %v6087_v29, %v6086_v8  ;;  %v6089_v5 = vpop.f32.mrb[50].mxu1  ;;  %v5978_v9 = vpop.f32.mrb[51].mxu0 }
 0x414   : > { %v6090_v19 = vpop.f32.mrb[51].mxu1  ;;  %v5979_v2 = vadd.f32 %v5978_v9, %v5977_v0 }
 0x415   : > { %v7851_v20 = vadd.f32 %v6088_v12, %v5976_v49  ;;  %v6091_v40 = vadd.f32 %v6090_v19, %v6089_v5 }
 0x417   : > { %v7853_v18 = vadd.f32 %v6091_v40, %v5979_v2 }
 0x418   : > { %v5980_v25 = vpop.f32.mrb[52].mxu0 }
 0x419   : > { %v6092_v26 = vpop.f32.mrb[52].mxu1  ;;  %v5981_v28 = vpop.f32.mrb[53].mxu0 }
 0x41a   : > { %v6093_v30 = vpop.f32.mrb[53].mxu1  ;;  %v5982_v31 = vadd.f32 %v5981_v28, %v5980_v25  ;;  %v5983_v34 = vpop.f32.mrb[54].mxu0 }
 0x41b   : > { %v6094_v32 = vadd.f32 %v6093_v30, %v6092_v26  ;;  %v6095_v36 = vpop.f32.mrb[54].mxu1  ;;  %v5984_v37 = vpop.f32.mrb[55].mxu0 }
 0x41c   : > { %v6096_v4 = vpop.f32.mrb[55].mxu1  ;;  %v5985_v39 = vadd.f32 %v5984_v37, %v5983_v34 }
 0x41d   : > { %v7855_v6 = vadd.f32 %v6094_v32, %v5982_v31  ;;  %v6097_v14 = vadd.f32 %v6096_v4, %v6095_v36 }
 0x41f   : > { %v7857_v43 = vadd.f32 %v6097_v14, %v5985_v39 }
 0x420   : > { %v5986_v46 = vpop.f32.mrb[56].mxu0 }
 0x421   : > { %v6098_v48 = vpop.f32.mrb[56].mxu1  ;;  %v5987_v51 = vpop.f32.mrb[57].mxu0 }
 0x422   : > { %v6099_v47 = vpop.f32.mrb[57].mxu1  ;;  %v5988_v54 = vadd.f32 %v5987_v51, %v5986_v46  ;;  %v5989_v57 = vpop.f32.mrb[58].mxu0 }
 0x423   : > { %v6100_v58 = vadd.f32 %v6099_v47, %v6098_v48  ;;  %v6101_v59 = vpop.f32.mrb[58].mxu1  ;;  %v5990_v60 = vpop.f32.mrb[59].mxu0 }
 0x424   : > { %v6102_v62 = vpop.f32.mrb[59].mxu1  ;;  %v5991_v3 = vadd.f32 %v5990_v60, %v5989_v57 }
 0x425   : > { %v7859_v16 = vadd.f32 %v6100_v58, %v5988_v54  ;;  %v6103_v7 = vadd.f32 %v6102_v62, %v6101_v59 }
 0x427   : > { %v7861_v8 = vadd.f32 %v6103_v7, %v5991_v3 }
 0x428   : > { %v5992_v10 = vpop.f32.mrb[60].mxu0 }
 0x429   : > { %v6104_v29 = vpop.f32.mrb[60].mxu1  ;;  %v5993_v49 = vpop.f32.mrb[61].mxu0 }
 0x42a   : > { %v6105_v12 = vpop.f32.mrb[61].mxu1  ;;  %v5994_v0 = vadd.f32 %v5993_v49, %v5992_v10  ;;  %v5995_v9 = vpop.f32.mrb[62].mxu0 }
 0x42b   : > { %v6106_v5 = vadd.f32 %v6105_v12, %v6104_v29  ;;  %v6107_v19 = vpop.f32.mrb[62].mxu1  ;;  %v5996_v2 = vpop.f32.mrb[63].mxu0 }
 0x42c   : > { %v6108_v40 = vpop.f32.mrb[63].mxu1  ;;  %v5997_v26 = vadd.f32 %v5996_v2, %v5995_v9 }
 0x42d   : > { %v7863_v25 = vadd.f32 %v6106_v5, %v5994_v0  ;;  %v6109_v28 = vadd.f32 %v6108_v40, %v6107_v19 }
 0x42f   : > { %v7865_v30 = vadd.f32 %v6109_v28, %v5997_v26 }
 0x430   : > { %v6126_v31 = vpop.f32.mrb[64].mxu0 }
 0x431   : > { %v6238_v32 = vpop.f32.mrb[64].mxu1  ;;  %v6127_v34 = vpop.f32.mrb[65].mxu0 }
 0x432   : > { %v6239_v36 = vpop.f32.mrb[65].mxu1  ;;  %v6128_v37 = vadd.f32 %v6127_v34, %v6126_v31  ;;  %v6129_v39 = vpop.f32.mrb[66].mxu0 }
 0x433   : > { %v6240_v4 = vadd.f32 %v6239_v36, %v6238_v32  ;;  %v6241_v14 = vpop.f32.mrb[66].mxu1  ;;  %v6130_v46 = vpop.f32.mrb[67].mxu0 }
 0x434   : > { %v6242_v48 = vpop.f32.mrb[67].mxu1  ;;  %v4955_v51 = vadd.f32 %v6128_v37, %v7783_v50  ;;  %v6131_v47 = vadd.f32 %v6130_v46, %v6129_v39 }
 0x435   : > { %v6243_v54 = vadd.f32 %v6242_v48, %v6241_v14 }
 0x436   : > { %v5116_v58 = vadd.f32 %v6240_v4, %v4955_v51  ;;  %v4958_v57 = vadd.f32 %v6131_v47, %v7785_v1 }
 0x438   : > { %v5119_v59 = vadd.f32 %v6243_v54, %v4958_v57  ;;  %v6132_v60 = vpop.f32.mrb[68].mxu0 }
 0x439   : > { %v6244_v62 = vpop.f32.mrb[68].mxu1  ;;  %v6133_v3 = vpop.f32.mrb[69].mxu0 }
 0x43a   : > { %v6245_v7 = vpop.f32.mrb[69].mxu1  ;;  %v5794_v10 = vpack.c.bf16 %v5119_v59, %v5116_v58  ;;  %v6134_v29 = vadd.f32 %v6133_v3, %v6132_v60  ;;  %v6135_v12 = vpop.f32.mrb[70].mxu0 }
 0x43b   : > { %v6246_v49 = vadd.f32 %v6245_v7, %v6244_v62  ;;  %v6247_v0 = vpop.f32.mrb[70].mxu1  ;;  %v6136_v5 = vpop.f32.mrb[71].mxu0 }
 0x43c   : > { %v6248_v9 = vpop.f32.mrb[71].mxu1  ;;  %5795 = vst [vmem:[%s6721_s29] sm:$0xff] %v5794_v10   ;;  %v4963_v50 = vadd.f32 %v6134_v29, %v7795_v35  ;;  %v6137_v19 = vadd.f32 %v6136_v5, %v6135_v12 }
 0x43d   : > { %v6249_v2 = vadd.f32 %v6248_v9, %v6247_v0 }
 0x43e   : > { %v5124_v40 = vadd.f32 %v6246_v49, %v4963_v50  ;;  %v4966_v1 = vadd.f32 %v6137_v19, %v7797_v42 }
 0x440   : > { %v5127_v26 = vadd.f32 %v6249_v2, %v4966_v1  ;;  %v6138_v28 = vpop.f32.mrb[72].mxu0 }
 0x441   : > { %v6250_v31 = vpop.f32.mrb[72].mxu1  ;;  %v6139_v32 = vpop.f32.mrb[73].mxu0 }
 0x442   : > { %v6251_v34 = vpop.f32.mrb[73].mxu1  ;;  %v5799_v36 = vpack.c.bf16 %v5127_v26, %v5124_v40  ;;  %v6140_v37 = vadd.f32 %v6139_v32, %v6138_v28  ;;  %v6141_v39 = vpop.f32.mrb[74].mxu0 }
 0x443   : > { %v6252_v4 = vadd.f32 %v6251_v34, %v6250_v31  ;;  %v6253_v14 = vpop.f32.mrb[74].mxu1  ;;  %v6142_v46 = vpop.f32.mrb[75].mxu0 }
 0x444   : > { %v6254_v48 = vpop.f32.mrb[75].mxu1  ;;  %5871 = vst [vmem:[%s6721_s29 + $0x8] sm:$0xff] %v5799_v36   ;;  %v4971_v35 = vadd.f32 %v6140_v37, %v7807_v53  ;;  %v6143_v51 = vadd.f32 %v6142_v46, %v6141_v39 }
 0x445   : > { %v6255_v47 = vadd.f32 %v6254_v48, %v6253_v14 }
 0x446   : > { %v5132_v54 = vadd.f32 %v6252_v4, %v4971_v35  ;;  %v4974_v42 = vadd.f32 %v6143_v51, %v7809_v21 }
 0x448   : > { %v5135_v58 = vadd.f32 %v6255_v47, %v4974_v42  ;;  %v6144_v57 = vpop.f32.mrb[76].mxu0 }
 0x449   : > { %v6256_v59 = vpop.f32.mrb[76].mxu1  ;;  %v6145_v60 = vpop.f32.mrb[77].mxu0 }
 0x44a   : > { %v6257_v62 = vpop.f32.mrb[77].mxu1  ;;  %v5804_v3 = vpack.c.bf16 %v5135_v58, %v5132_v54  ;;  %v6146_v7 = vadd.f32 %v6145_v60, %v6144_v57  ;;  %v6147_v29 = vpop.f32.mrb[78].mxu0 }
 0x44b   : > { %v6258_v10 = vadd.f32 %v6257_v62, %v6256_v59  ;;  %v6259_v49 = vpop.f32.mrb[78].mxu1  ;;  %v6148_v12 = vpop.f32.mrb[79].mxu0 }
 0x44c   : > { %v6260_v0 = vpop.f32.mrb[79].mxu1  ;;  %5872 = vst [vmem:[%s6721_s29 + $0x10] sm:$0xff] %v5804_v3   ;;  %v4979_v53 = vadd.f32 %v6146_v7, %v7815_v45  ;;  %v6149_v5 = vadd.f32 %v6148_v12, %v6147_v29 }
 0x44d   : > { %v6261_v9 = vadd.f32 %v6260_v0, %v6259_v49 }
 0x44e   : > { %v5140_v50 = vadd.f32 %v6258_v10, %v4979_v53  ;;  %v4982_v21 = vadd.f32 %v6149_v5, %v7817_v55 }
 0x450   : > { %v5143_v19 = vadd.f32 %v6261_v9, %v4982_v21  ;;  %v6150_v2 = vpop.f32.mrb[80].mxu0 }
 0x451   : > { %v6262_v40 = vpop.f32.mrb[80].mxu1  ;;  %v6151_v1 = vpop.f32.mrb[81].mxu0 }
 0x452   : > { %v6263_v26 = vpop.f32.mrb[81].mxu1  ;;  %v5809_v28 = vpack.c.bf16 %v5143_v19, %v5140_v50  ;;  %v6152_v31 = vadd.f32 %v6151_v1, %v6150_v2  ;;  %v6153_v34 = vpop.f32.mrb[82].mxu0 }
 0x453   : > { %v6264_v32 = vadd.f32 %v6263_v26, %v6262_v40  ;;  %v6265_v36 = vpop.f32.mrb[82].mxu1  ;;  %v6154_v37 = vpop.f32.mrb[83].mxu0 }
 0x454   : > { %v6266_v4 = vpop.f32.mrb[83].mxu1  ;;  %5873 = vst [vmem:[%s6721_s29 + $0x18] sm:$0xff] %v5809_v28   ;;  %v4987_v45 = vadd.f32 %v6152_v31, %v7819_v61  ;;  %v6155_v39 = vadd.f32 %v6154_v37, %v6153_v34 }
 0x455   : > { %v6267_v14 = vadd.f32 %v6266_v4, %v6265_v36 }
 0x456   : > { %v5148_v46 = vadd.f32 %v6264_v32, %v4987_v45  ;;  %v4990_v55 = vadd.f32 %v6155_v39, %v7821_v15 }
 0x458   : > { %v5151_v48 = vadd.f32 %v6267_v14, %v4990_v55  ;;  %v6156_v35 = vpop.f32.mrb[84].mxu0 }
 0x459   : > { %v6268_v51 = vpop.f32.mrb[84].mxu1  ;;  %v6157_v47 = vpop.f32.mrb[85].mxu0 }
 0x45a   : > { %v6269_v54 = vpop.f32.mrb[85].mxu1  ;;  %v5814_v42 = vpack.c.bf16 %v5151_v48, %v5148_v46  ;;  %v6158_v58 = vadd.f32 %v6157_v47, %v6156_v35  ;;  %v6159_v59 = vpop.f32.mrb[86].mxu0 }
 0x45b   : > { %v6270_v57 = vadd.f32 %v6269_v54, %v6268_v51  ;;  %v6271_v60 = vpop.f32.mrb[86].mxu1  ;;  %v6160_v62 = vpop.f32.mrb[87].mxu0 }
 0x45c   : > { %v6272_v3 = vpop.f32.mrb[87].mxu1  ;;  %5874 = vst [vmem:[%s6721_s29 + $0x20] sm:$0xff] %v5814_v42   ;;  %v4995_v61 = vadd.f32 %v6158_v58, %v7823_v22  ;;  %v6161_v7 = vadd.f32 %v6160_v62, %v6159_v59 }
 0x45d   : > { %v6273_v10 = vadd.f32 %v6272_v3, %v6271_v60 }
 0x45e   : > { %v5156_v29 = vadd.f32 %v6270_v57, %v4995_v61  ;;  %v4998_v15 = vadd.f32 %v6161_v7, %v7825_v23 }
 0x460   : > { %v5159_v49 = vadd.f32 %v6273_v10, %v4998_v15  ;;  %v6162_v12 = vpop.f32.mrb[88].mxu0 }
 0x461   : > { %v6274_v0 = vpop.f32.mrb[88].mxu1  ;;  %v6163_v53 = vpop.f32.mrb[89].mxu0 }
 0x462   : > { %v6275_v5 = vpop.f32.mrb[89].mxu1  ;;  %v5819_v9 = vpack.c.bf16 %v5159_v49, %v5156_v29  ;;  %v6164_v50 = vadd.f32 %v6163_v53, %v6162_v12  ;;  %v6165_v19 = vpop.f32.mrb[90].mxu0 }
 0x463   : > { %v6276_v21 = vadd.f32 %v6275_v5, %v6274_v0  ;;  %v6277_v2 = vpop.f32.mrb[90].mxu1  ;;  %v6166_v40 = vpop.f32.mrb[91].mxu0 }
 0x464   : > { %v6278_v1 = vpop.f32.mrb[91].mxu1  ;;  %5875 = vst [vmem:[%s6721_s29 + $0x28] sm:$0xff] %v5819_v9   ;;  %v5003_v22 = vadd.f32 %v6164_v50, %v7827_v13  ;;  %v6167_v26 = vadd.f32 %v6166_v40, %v6165_v19 }
 0x465   : > { %v6279_v28 = vadd.f32 %v6278_v1, %v6277_v2 }
 0x466   : > { %v5164_v31 = vadd.f32 %v6276_v21, %v5003_v22  ;;  %v5006_v23 = vadd.f32 %v6167_v26, %v7829_v38 }
 0x468   : > { %v5167_v32 = vadd.f32 %v6279_v28, %v5006_v23  ;;  %v6168_v34 = vpop.f32.mrb[92].mxu0 }
 0x469   : > { %v6280_v36 = vpop.f32.mrb[92].mxu1  ;;  %v6169_v37 = vpop.f32.mrb[93].mxu0 }
 0x46a   : > { %v6281_v4 = vpop.f32.mrb[93].mxu1  ;;  %v5824_v45 = vpack.c.bf16 %v5167_v32, %v5164_v31  ;;  %v6170_v39 = vadd.f32 %v6169_v37, %v6168_v34  ;;  %v6171_v46 = vpop.f32.mrb[94].mxu0 }
 0x46b   : > { %v6282_v14 = vadd.f32 %v6281_v4, %v6280_v36  ;;  %v6283_v55 = vpop.f32.mrb[94].mxu1  ;;  %v6172_v48 = vpop.f32.mrb[95].mxu0 }
 0x46c   : > { %v6284_v35 = vpop.f32.mrb[95].mxu1  ;;  %5876 = vst [vmem:[%s6721_s29 + $0x30] sm:$0xff] %v5824_v45   ;;  %v5011_v13 = vadd.f32 %v6170_v39, %v7831_v52  ;;  %v6173_v51 = vadd.f32 %v6172_v48, %v6171_v46 }
 0x46d   : > { %v6285_v47 = vadd.f32 %v6284_v35, %v6283_v55 }
 0x46e   : > { %v5172_v54 = vadd.f32 %v6282_v14, %v5011_v13  ;;  %v5014_v38 = vadd.f32 %v6173_v51, %v7833_v56 }
 0x470   : > { %v5175_v42 = vadd.f32 %v6285_v47, %v5014_v38  ;;  %v6174_v58 = vpop.f32.mrb[96].mxu0 }
 0x471   : > { %v6286_v57 = vpop.f32.mrb[96].mxu1  ;;  %v6175_v59 = vpop.f32.mrb[97].mxu0 }
 0x472   : > { %v6287_v60 = vpop.f32.mrb[97].mxu1  ;;  %v5829_v62 = vpack.c.bf16 %v5175_v42, %v5172_v54  ;;  %v6176_v3 = vadd.f32 %v6175_v59, %v6174_v58  ;;  %v6177_v7 = vpop.f32.mrb[98].mxu0 }
 0x473   : > { %v6288_v61 = vadd.f32 %v6287_v60, %v6286_v57  ;;  %v6289_v10 = vpop.f32.mrb[98].mxu1  ;;  %v6178_v29 = vpop.f32.mrb[99].mxu0 }
 0x474   : > { %v6290_v15 = vpop.f32.mrb[99].mxu1  ;;  %5877 = vst [vmem:[%s6721_s29 + $0x38] sm:$0xff] %v5829_v62   ;;  %v5019_v52 = vadd.f32 %v6176_v3, %v7835_v11  ;;  %v6179_v49 = vadd.f32 %v6178_v29, %v6177_v7 }
 0x475   : > { %v6291_v12 = vadd.f32 %v6290_v15, %v6289_v10 }
 0x476   : > { %v5180_v0 = vadd.f32 %v6288_v61, %v5019_v52  ;;  %v5022_v56 = vadd.f32 %v6179_v49, %v7837_v33 }
 0x478   : > { %v5183_v53 = vadd.f32 %v6291_v12, %v5022_v56  ;;  %v6180_v5 = vpop.f32.mrb[100].mxu0 }
 0x479   : > { %v6292_v9 = vpop.f32.mrb[100].mxu1  ;;  %v6181_v50 = vpop.f32.mrb[101].mxu0 }
 0x47a   : > { %v6293_v21 = vpop.f32.mrb[101].mxu1  ;;  %v5834_v19 = vpack.c.bf16 %v5183_v53, %v5180_v0  ;;  %v6182_v2 = vadd.f32 %v6181_v50, %v6180_v5  ;;  %v6183_v1 = vpop.f32.mrb[102].mxu0 }
 0x47b   : > { %v6294_v40 = vadd.f32 %v6293_v21, %v6292_v9  ;;  %v6295_v22 = vpop.f32.mrb[102].mxu1  ;;  %v6184_v26 = vpop.f32.mrb[103].mxu0 }
 0x47c   : > { %v6296_v28 = vpop.f32.mrb[103].mxu1  ;;  %5878 = vst [vmem:[%s6721_s29 + $0x40] sm:$0xff] %v5834_v19   ;;  %v5027_v11 = vadd.f32 %v6182_v2, %v7839_v24  ;;  %v6185_v31 = vadd.f32 %v6184_v26, %v6183_v1 }
 0x47d   : > { %v6297_v23 = vadd.f32 %v6296_v28, %v6295_v22 }
 0x47e   : > { %v5188_v32 = vadd.f32 %v6294_v40, %v5027_v11  ;;  %v5030_v33 = vadd.f32 %v6185_v31, %v7841_v27 }
 0x480   : > { %v5191_v34 = vadd.f32 %v6297_v23, %v5030_v33  ;;  %v6186_v36 = vpop.f32.mrb[104].mxu0 }
 0x481   : > { %v6298_v37 = vpop.f32.mrb[104].mxu1  ;;  %v6187_v4 = vpop.f32.mrb[105].mxu0 }
 0x482   : > { %v6299_v45 = vpop.f32.mrb[105].mxu1  ;;  %v5839_v39 = vpack.c.bf16 %v5191_v34, %v5188_v32  ;;  %v6188_v14 = vadd.f32 %v6187_v4, %v6186_v36  ;;  %v6189_v55 = vpop.f32.mrb[106].mxu0 }
 0x483   : > { %v6300_v46 = vadd.f32 %v6299_v45, %v6298_v37  ;;  %v6301_v48 = vpop.f32.mrb[106].mxu1  ;;  %v6190_v35 = vpop.f32.mrb[107].mxu0 }
 0x484   : > { %v6302_v13 = vpop.f32.mrb[107].mxu1  ;;  %5879 = vst [vmem:[%s6721_s29 + $0x48] sm:$0xff] %v5839_v39   ;;  %v5035_v24 = vadd.f32 %v6188_v14, %v7843_v41  ;;  %v6191_v51 = vadd.f32 %v6190_v35, %v6189_v55 }
 0x485   : > { %v6303_v47 = vadd.f32 %v6302_v13, %v6301_v48 }
 0x486   : > { %v5196_v54 = vadd.f32 %v6300_v46, %v5035_v24  ;;  %v5038_v27 = vadd.f32 %v6191_v51, %v7845_v44 }
 0x488   : > { %v5199_v38 = vadd.f32 %v6303_v47, %v5038_v27  ;;  %v6192_v42 = vpop.f32.mrb[108].mxu0 }
 0x489   : > { %v6304_v58 = vpop.f32.mrb[108].mxu1  ;;  %v6193_v57 = vpop.f32.mrb[109].mxu0 }
 0x48a   : > { %v6305_v59 = vpop.f32.mrb[109].mxu1  ;;  %v5844_v60 = vpack.c.bf16 %v5199_v38, %v5196_v54  ;;  %v6194_v62 = vadd.f32 %v6193_v57, %v6192_v42  ;;  %v6195_v61 = vpop.f32.mrb[110].mxu0 }
 0x48b   : > { %v6306_v3 = vadd.f32 %v6305_v59, %v6304_v58  ;;  %v6307_v7 = vpop.f32.mrb[110].mxu1  ;;  %v6196_v10 = vpop.f32.mrb[111].mxu0 }
 0x48c   : > { %v6308_v29 = vpop.f32.mrb[111].mxu1  ;;  %5880 = vst [vmem:[%s6721_s29 + $0x50] sm:$0xff] %v5844_v60   ;;  %v5043_v41 = vadd.f32 %v6194_v62, %v7847_v63  ;;  %v6197_v15 = vadd.f32 %v6196_v10, %v6195_v61 }
 0x48d   : > { %v6309_v52 = vadd.f32 %v6308_v29, %v6307_v7 }
 0x48e   : > { %v5204_v49 = vadd.f32 %v6306_v3, %v5043_v41  ;;  %v5046_v44 = vadd.f32 %v6197_v15, %v7849_v17 }
 0x490   : > { %v5207_v12 = vadd.f32 %v6309_v52, %v5046_v44  ;;  %v6198_v0 = vpop.f32.mrb[112].mxu0 }
 0x491   : > { %v6310_v56 = vpop.f32.mrb[112].mxu1  ;;  %v6199_v53 = vpop.f32.mrb[113].mxu0 }
 0x492   : > { %v6311_v5 = vpop.f32.mrb[113].mxu1  ;;  %v5849_v9 = vpack.c.bf16 %v5207_v12, %v5204_v49  ;;  %v6200_v50 = vadd.f32 %v6199_v53, %v6198_v0  ;;  %v6201_v19 = vpop.f32.mrb[114].mxu0 }
 0x493   : > { %v6312_v21 = vadd.f32 %v6311_v5, %v6310_v56  ;;  %v6313_v2 = vpop.f32.mrb[114].mxu1  ;;  %v6202_v40 = vpop.f32.mrb[115].mxu0 }
 0x494   : > { %v6314_v1 = vpop.f32.mrb[115].mxu1  ;;  %5881 = vst [vmem:[%s6721_s29 + $0x58] sm:$0xff] %v5849_v9   ;;  %v5051_v63 = vadd.f32 %v6200_v50, %v7851_v20  ;;  %v6203_v22 = vadd.f32 %v6202_v40, %v6201_v19 }
 0x495   : > { %v6315_v26 = vadd.f32 %v6314_v1, %v6313_v2 }
 0x496   : > { %v5212_v28 = vadd.f32 %v6312_v21, %v5051_v63  ;;  %v5054_v17 = vadd.f32 %v6203_v22, %v7853_v18 }
 0x498   : > { %v5215_v11 = vadd.f32 %v6315_v26, %v5054_v17  ;;  %v6204_v31 = vpop.f32.mrb[116].mxu0 }
 0x499   : > { %v6316_v23 = vpop.f32.mrb[116].mxu1  ;;  %v6205_v32 = vpop.f32.mrb[117].mxu0 }
 0x49a   : > { %v6317_v33 = vpop.f32.mrb[117].mxu1  ;;  %v5854_v34 = vpack.c.bf16 %v5215_v11, %v5212_v28  ;;  %v6206_v36 = vadd.f32 %v6205_v32, %v6204_v31  ;;  %v6207_v4 = vpop.f32.mrb[118].mxu0 }
 0x49b   : > { %v6318_v37 = vadd.f32 %v6317_v33, %v6316_v23  ;;  %v6319_v45 = vpop.f32.mrb[118].mxu1  ;;  %v6208_v39 = vpop.f32.mrb[119].mxu0 }
 0x49c   : > { %v6320_v14 = vpop.f32.mrb[119].mxu1  ;;  %5882 = vst [vmem:[%s6721_s29 + $0x60] sm:$0xff] %v5854_v34   ;;  %v5059_v20 = vadd.f32 %v6206_v36, %v7855_v6  ;;  %v6209_v46 = vadd.f32 %v6208_v39, %v6207_v4 }
 0x49d   : > { %v6321_v55 = vadd.f32 %v6320_v14, %v6319_v45 }
 0x49e   : > { %v5220_v48 = vadd.f32 %v6318_v37, %v5059_v20  ;;  %v5062_v18 = vadd.f32 %v6209_v46, %v7857_v43 }
 0x4a0   : > { %v5223_v35 = vadd.f32 %v6321_v55, %v5062_v18  ;;  %v6210_v13 = vpop.f32.mrb[120].mxu0 }
 0x4a1   : > { %v6322_v24 = vpop.f32.mrb[120].mxu1  ;;  %v6211_v51 = vpop.f32.mrb[121].mxu0 }
 0x4a2   : > { %v6323_v47 = vpop.f32.mrb[121].mxu1  ;;  %v5859_v54 = vpack.c.bf16 %v5223_v35, %v5220_v48  ;;  %v6212_v27 = vadd.f32 %v6211_v51, %v6210_v13  ;;  %v6213_v42 = vpop.f32.mrb[122].mxu0 }
 0x4a3   : > { %v6324_v38 = vadd.f32 %v6323_v47, %v6322_v24  ;;  %v6325_v58 = vpop.f32.mrb[122].mxu1  ;;  %v6214_v57 = vpop.f32.mrb[123].mxu0 }
 0x4a4   : > { %v6326_v59 = vpop.f32.mrb[123].mxu1  ;;  %5883 = vst [vmem:[%s6721_s29 + $0x68] sm:$0xff] %v5859_v54   ;;  %v5067_v6 = vadd.f32 %v6212_v27, %v7859_v16  ;;  %v6215_v60 = vadd.f32 %v6214_v57, %v6213_v42 }
 0x4a5   : > { %v6327_v62 = vadd.f32 %v6326_v59, %v6325_v58 }
 0x4a6   : > { %v5228_v3 = vadd.f32 %v6324_v38, %v5067_v6  ;;  %v5070_v43 = vadd.f32 %v6215_v60, %v7861_v8 }
 0x4a8   : > { %v5231_v61 = vadd.f32 %v6327_v62, %v5070_v43  ;;  %v6216_v7 = vpop.f32.mrb[124].mxu0 }
 0x4a9   : > { %v6328_v10 = vpop.f32.mrb[124].mxu1  ;;  %v6217_v29 = vpop.f32.mrb[125].mxu0 }
 0x4aa   : > { %v6329_v41 = vpop.f32.mrb[125].mxu1  ;;  %v5864_v15 = vpack.c.bf16 %v5231_v61, %v5228_v3  ;;  %v6218_v52 = vadd.f32 %v6217_v29, %v6216_v7  ;;  %v6219_v44 = vpop.f32.mrb[126].mxu0 }
 0x4ab   : > { %v6330_v49 = vadd.f32 %v6329_v41, %v6328_v10  ;;  %v6331_v12 = vpop.f32.mrb[126].mxu1  ;;  %v6220_v0 = vpop.f32.mrb[127].mxu0 }
 0x4ac   : > { %v6332_v56 = vpop.f32.mrb[127].mxu1  ;;  %5884 = vst [vmem:[%s6721_s29 + $0x70] sm:$0xff] %v5864_v15   ;;  %v5075_v16 = vadd.f32 %v6218_v52, %v7863_v25  ;;  %v6221_v53 = vadd.f32 %v6220_v0, %v6219_v44 }
 0x4ad   : > { %v6333_v5 = vadd.f32 %v6332_v56, %v6331_v12 }
 0x4ae   : > { %v5236_v9 = vadd.f32 %v6330_v49, %v5075_v16  ;;  %v5078_v8 = vadd.f32 %v6221_v53, %v7865_v30 }
 0x4b0   : > { %v5239_v50 = vadd.f32 %v6333_v5, %v5078_v8 }
 0x4b2   : > { %v5869_v21 = vpack.c.bf16 %v5239_v50, %v5236_v9 }
 0x4b4   : > { %5885 = vst [vmem:[%s6721_s29 + $0x78] sm:$0xff] %v5869_v21  }
 0x4b5 PF: > { %s14_s21 = sadd.s32 1, %s6558_s21   ;;  %s7941_s15 = smov %s6538_s16 }
 0x4b6   : > { %p11_p13 = scmp.ge.s32.totalorder %s14_s21, 6   ;;  %s7942_s16 = smov %s6637_s28 }
 0x4b7   : > { %s7943_s17 = smov %s6550_s19  ;;  %s7944_s18 = smov %s6554_s20 }
 0x4b8   : > { %s7945_s19 = smov %s7948_s22  ;;  %s7946_s20 = smov %s7952_s23 }
 0x4b9   :  { %13 = sbr.rel (!%p11_p13) target bundleno = 4 (0x4), region = 118 }

</bundles_post_ra>
